<compile_context>
chip_gen: v5e
topology: v5e:2x2
jax: 0.10.0
libtpu: 0.0.40
codegen_flags: <defaults>
</compile_context>

<pallas_src>
import functools

import jax
import jax.numpy as jnp
from jax import lax
from jax.experimental import pallas as pl
from jax.experimental.pallas import tpu as pltpu


# ----------------------------------------------------------------------------
# VMEM accounting / tile selection
# ----------------------------------------------------------------------------
def _pad_to(v, m):
    return ((v + m - 1) // m) * m


def _vmem_limit_bytes():
    """Generation-aware scoped-VMEM limit (~81% of physical; None -> default)."""
    try:
        cap = getattr(pltpu.get_tpu_info(), "vmem_capacity_bytes", None)
        if cap:
            return (int(cap) * 13) // 16      # 128 MiB -> 104 MiB ; 64 MiB -> 52 MiB
    except Exception:
        pass
    return None


def _pass1_fixed_bytes(Hp, Wp, Cin, Cout, KH, KW):
    """Band-independent VMEM: double-buffered padded-image block (lane-padded
    to 128, sublane-padded to 16 for bf16) + double-buffered weights."""
    img = Hp * _pad_to(Wp, 16) * _pad_to(Cin, 128) * 2
    wgt = _pad_to(KH * KW * Cin, 16) * _pad_to(Cout, 128) * 2
    return 2 * (img + wgt)


def _pass1_band_bytes(TH, OW, Cout, Cin, KH, KW, fuse_taps):
    """Band-dependent VMEM (f32 accumulator, bf16 output tile, LHS temporaries)."""
    m = TH * OW
    b = _pad_to(m, 8) * _pad_to(Cout, 128) * 4                     # f32 accumulator
    b += 2 * _pad_to(Cout, 16) * _pad_to(m, 128) * 2               # bf16 out tile x2
    if fuse_taps:
        b += 2 * _pad_to(m, 16) * _pad_to(KH * KW * Cin, 128) * 2  # fused LHS + temps
    else:
        b += 2 * _pad_to(m, 16) * _pad_to(Cin, 128) * 2            # per-tap slice temps
    return b + (1 << 20)                                           # compiler slack


def _pick_band_rows(OH, OW, Cout, Cin, KH, KW, Hp, Wp, fuse_taps, budget_bytes):
    """Largest divisor of OH whose band fits the VMEM budget, preferring
    lane-dense bands (TH*OW % 128 == 0) so conv stores stay unmasked."""
    budget = max(budget_bytes - _pass1_fixed_bytes(Hp, Wp, Cin, Cout, KH, KW),
                 1 << 20)
    divisors = [d for d in range(OH, 0, -1) if OH % d == 0]
    for th in divisors:
        if (th * OW) % 128 == 0 and \
                _pass1_band_bytes(th, OW, Cout, Cin, KH, KW, fuse_taps) <= budget:
            return th
    for th in divisors:
        if _pass1_band_bytes(th, OW, Cout, Cin, KH, KW, fuse_taps) <= budget:
            return th
    return 1


def _pick_spatial_tile(S, Cout, out_itemsize, budget_bytes):
    """Largest divisor of S fitting the pass-2 VMEM budget (lane-dense first)."""
    def tile_bytes(ts):
        lanes = _pad_to(ts, 128)
        return (2 * _pad_to(Cout, 16) * lanes * 2                  # bf16 in x2
                + 2 * _pad_to(Cout, 8) * lanes * out_itemsize      # out x2
                + (1 << 20))
    divisors = [d for d in range(S, 0, -1) if S % d == 0]
    for ts in divisors:
        if ts % 128 == 0 and tile_bytes(ts) <= budget_bytes:
            return ts
    for ts in divisors:
        if tile_bytes(ts) <= budget_bytes:
            return ts
    return S


# ----------------------------------------------------------------------------
# Pass 1: direct conv on a row band (fused single dot, or per-tap fallback)
# ----------------------------------------------------------------------------
def _conv_band_acc(x_ref, w_ref, *, KH, KW, TH, OW, stride, dilation, fuse_taps):
    """Return the (TH*OW, Cout) f32 conv accumulator for band pl.program_id(1)."""
    Cin = x_ref.shape[-1]
    b = pl.program_id(1)
    row0 = b * (TH * stride)
    if (TH * stride) % 8 == 0:
        row0 = pl.multiple_of(row0, 8)

    def tap(kh, kw):
        h0 = row0 + kh * dilation
        w0 = kw * dilation
        if stride == 1:
            sl = x_ref[pl.ds(h0, TH), pl.ds(w0, OW), :]
        else:
            # TODO(synk): space-to-batch the stride phases in the wrapper so this
            # becomes a contiguous load (strided sublane access is slower).
            sl = x_ref[pl.ds(h0, TH, stride), pl.ds(w0, OW, stride), :]
        # (TH, OW, Cin) -> (TH*OW, Cin): collapse of leading dims only.
        return sl.reshape(TH * OW, Cin)

    if fuse_taps:
        # One MXU dot per band with K = KH*KW*Cin instead of KH*KW dots with
        # K = Cin: ~KH*KW x MXU contraction occupancy, and the KH*KW-1 full-band
        # f32 VPU accumulate passes (plus MRF pops on v5e/v6e) disappear.
        # The LHS is assembled purely in VMEM -- no HBM im2col blow-up.
        lhs = jnp.concatenate(
            [tap(kh, kw) for kh in range(KH) for kw in range(KW)], axis=-1)
        return jnp.dot(lhs, w_ref[...], preferred_element_type=jnp.float32)

    # Per-tap fallback (w_ref is (KH*KW, Cin, Cout)).
    acc = jnp.dot(tap(0, 0), w_ref[0], preferred_element_type=jnp.float32)
    for k in range(1, KH * KW):
        acc += jnp.dot(tap(k // KW, k % KW), w_ref[k],
                       preferred_element_type=jnp.float32)
    return acc


def _conv_stats_kernel(x_ref, w_ref, conv_ref, sum_ref, sq_ref, **conv_kw):
    # x_ref:    (Hp, Wp, Cin) bf16       whole padded image (constant across bands)
    # w_ref:    fused (KH*KW*Cin, Cout) or per-tap (KH*KW, Cin, Cout), bf16
    # conv_ref: (Cout, TH*OW) bf16       lane-dense, NCHW-flat conv band
    # sum_ref/sq_ref: (1, Cout) f32      per-(image, band) partial statistics
    acc = _conv_band_acc(x_ref, w_ref, **conv_kw)
    # Lane-dense, already-NCHW-flat store (transpose rides the XLU slot).
    # TODO(synk): cast to bf16 *before* the transpose once the packed 16-bit XLU
    # transpose is confirmed clean in the Mosaic dump (halves XLU/store traffic).
    conv_ref[...] = acc.T.astype(conv_ref.dtype)
    # Per-(image, band) partials -> both grid axes stay "parallel" (v7x megacore).
    sum_ref[...] = jnp.sum(acc, axis=0, keepdims=True)
    sq_ref[...] = jnp.sum(acc * acc, axis=0, keepdims=True)


def _conv_affine_act_kernel(x_ref, w_ref, shift_ref, out_ref, *, negative_slope,
                            **conv_kw):
    # with_bn=False fast path: bias + (Leaky)ReLU fused into pass 1, so the
    # (N, Cout, S) intermediate never round-trips through HBM.
    acc = _conv_band_acc(x_ref, w_ref, **conv_kw) + shift_ref[...]
    if negative_slope == 0.0:
        y = jnp.maximum(acc, 0.0)
    else:
        y = jnp.where(acc > 0, acc, negative_slope * acc)
    out_ref[...] = y.T.astype(out_ref.dtype)


# ----------------------------------------------------------------------------
# Pass 2 (BN path): folded BN affine + (Leaky)ReLU, lane-dense (Cout, spatial)
# ----------------------------------------------------------------------------
def _bn_relu_kernel(conv_ref, scale_ref, shift_ref, out_ref, *, negative_slope):
    y = conv_ref[...].astype(jnp.float32) * scale_ref[...] + shift_ref[...]
    if negative_slope == 0.0:
        out_ref[...] = jnp.maximum(y, 0.0).astype(out_ref.dtype)
    else:
        out_ref[...] = jnp.where(y > 0, y, negative_slope * y).astype(out_ref.dtype)


# ----------------------------------------------------------------------------
# wrapper (PyTorch-facing NCHW API)
# ----------------------------------------------------------------------------
def _with_tap_fallback(run, fuse_taps):
    """Try the fused single-dot path; if Mosaic rejects the unaligned in-VMEM
    lane concat on this generation, fall back (eagerly) to per-tap dots."""
    if not fuse_taps:
        return run(False)
    try:
        return run(True)
    except Exception:      # pragma: no cover - lowering fallback only
        return run(False)


def conv2d_batchnorm_relu(x_nchw, weight, bias, gamma, beta, *, stride, padding,
                          dilation=1, with_bn=True, leaky_relu=False, eps=1e-5,
                          out_dtype=jnp.float32):
    N, Cin, H, W = x_nchw.shape
    Cout, _, KH, KW = weight.shape
    OH = (H + 2 * padding - dilation * (KH - 1) - 1) // stride + 1
    OW = (W + 2 * padding - dilation * (KW - 1) - 1) // stride + 1
    S = OH * OW
    M = N * S

    # NCHW -> padded NHWC, bf16 (halves input DMA bytes; MXU-native operand).
    x = jnp.transpose(x_nchw, (0, 2, 3, 1))
    if padding > 0:
        x = jnp.pad(x, ((0, 0), (padding, padding), (padding, padding), (0, 0)))
    x = x.astype(jnp.bfloat16)
    Hp, Wp = x.shape[1], x.shape[2]

    # PyTorch (Cout, Cin, KH, KW) -> per-tap (KH*KW, Cin, Cout) and fused
    # (KH*KW*Cin, Cout) weights, bf16 (host-side reshapes, free).
    w_taps = (jnp.transpose(weight, (2, 3, 1, 0))
              .reshape(KH * KW, Cin, Cout).astype(jnp.bfloat16))
    w_fused = w_taps.reshape(KH * KW * Cin, Cout)

    # Consolidate the KH*KW taps into one MXU dot when the contraction is small.
    fuse_taps = (KH * KW > 1) and (Cin < 128)

    vmem_limit = _vmem_limit_bytes()
    budget = int(0.85 * (vmem_limit if vmem_limit else 32 * 1024 * 1024))

    TH = _pick_band_rows(OH, OW, Cout, Cin, KH, KW, Hp, Wp, fuse_taps, budget)
    n_bands = OH // TH

    conv_kw = dict(KH=KH, KW=KW, TH=TH, OW=OW, stride=stride, dilation=dilation)
    flops1 = 2 * N * S * KH * KW * Cin * Cout
    cparams1 = pltpu.CompilerParams(
        dimension_semantics=("parallel", "parallel"),
        vmem_limit_bytes=vmem_limit)
    out_itemsize = jnp.dtype(out_dtype).itemsize

    def img_spec():
        # Whole padded image per batch element; index constant across bands, so
        # the pipeline fetches it once per image.
        return pl.BlockSpec((None, Hp, Wp, Cin), lambda n, b: (n, 0, 0, 0))

    def w_spec(fuse):
        if fuse:
            return pl.BlockSpec((KH * KW * Cin, Cout), lambda n, b: (0, 0))
        return pl.BlockSpec((KH * KW, Cin, Cout), lambda n, b: (0, 0, 0))

    def conv_out_spec():
        return pl.BlockSpec((None, Cout, TH * OW), lambda n, b: (n, 0, b))

    if with_bn:
        # ---- Pass 1: conv + per-(image, band) channel sums (no bias: it cancels
        #      exactly under train-mode BN) ----------------------------------
        def run_pass1(fuse):
            kern = functools.partial(_conv_stats_kernel, fuse_taps=fuse, **conv_kw)
            return pl.pallas_call(
                kern,
                out_shape=(jax.ShapeDtypeStruct((N, Cout, S), jnp.bfloat16),
                           jax.ShapeDtypeStruct((N, n_bands, Cout), jnp.float32),
                           jax.ShapeDtypeStruct((N, n_bands, Cout), jnp.float32)),
                grid_spec=pltpu.PrefetchScalarGridSpec(
                    num_scalar_prefetch=0,
                    grid=(N, n_bands),
                    in_specs=[img_spec(), w_spec(fuse)],
                    out_specs=[conv_out_spec(),
                               pl.BlockSpec((None, 1, Cout), lambda n, b: (n, b, 0)),
                               pl.BlockSpec((None, 1, Cout), lambda n, b: (n, b, 0))]),
                compiler_params=cparams1,
                cost_estimate=pl.CostEstimate(
                    flops=flops1, transcendentals=0,
                    bytes_accessed=int(x.size) * 2 + KH * KW * Cin * Cout * 2
                                   + N * Cout * S * 2 + 2 * N * n_bands * Cout * 4),
            )(x, w_fused if fuse else w_taps)

        conv_nc, ch_sum, ch_sq = _with_tap_fallback(run_pass1, fuse_taps)

        # ---- Fold BN (training-mode batch stats) into a per-channel affine ----
        # Chan's parallel-variance combine of per-(image, band) partials avoids
        # the global E[x^2] - E[x]^2 cancellation.
        cnt = float(TH * OW)
        sums = ch_sum.reshape(-1, Cout)
        sqs = ch_sq.reshape(-1, Cout)
        mean_p = sums / cnt
        m2_p = jnp.maximum(sqs - cnt * mean_p * mean_p, 0.0)
        mean = jnp.sum(sums, axis=0) / M
        m2 = jnp.sum(m2_p, axis=0) + cnt * jnp.sum((mean_p - mean[None, :]) ** 2,
                                                   axis=0)
        var = m2 / M                                      # biased, as in BN training
        inv = gamma.astype(jnp.float32) / jnp.sqrt(var + eps)
        scale = inv
        shift = beta.astype(jnp.float32) - mean * inv
        # NOTE: stats come from the f32 accumulator while normalization is applied
        # to the bf16-rounded conv intermediate (tiny, documented skew).

        # ---- Pass 2: elementwise BN affine + (Leaky)ReLU, lane-dense ----
        ts = _pick_spatial_tile(S, Cout, out_itemsize, budget)
        n_sp = S // ts
        neg = 0.1 if leaky_relu else 0.0                  # module uses LeakyReLU(0.1)
        out_nc = pl.pallas_call(
            functools.partial(_bn_relu_kernel, negative_slope=neg),
            out_shape=jax.ShapeDtypeStruct((N, Cout, S), out_dtype),
            grid_spec=pltpu.PrefetchScalarGridSpec(
                num_scalar_prefetch=0,
                grid=(N, n_sp),
                in_specs=[pl.BlockSpec((None, Cout, ts), lambda n, j: (n, 0, j)),
                          pl.BlockSpec((None, Cout, 1), lambda n, j: (0, 0, 0)),
                          pl.BlockSpec((None, Cout, 1), lambda n, j: (0, 0, 0))],
                out_specs=pl.BlockSpec((None, Cout, ts), lambda n, j: (n, 0, j))),
            compiler_params=pltpu.CompilerParams(
                dimension_semantics=("parallel", "parallel"),
                vmem_limit_bytes=vmem_limit),
            cost_estimate=pl.CostEstimate(
                flops=3 * N * Cout * S, transcendentals=0,
                bytes_accessed=N * Cout * S * (2 + out_itemsize) + 2 * Cout * 4),
        )(conv_nc, scale.reshape(1, Cout, 1), shift.reshape(1, Cout, 1))

        # (N, Cout, OH*OW) -> (N, Cout, OH, OW): contiguous reshape, no transpose.
        return out_nc.reshape(N, Cout, OH, OW)

    # ---- with_bn=False: fuse bias + (Leaky)ReLU into pass 1, skip pass 2 ----
    shift = (bias if bias is not None
             else jnp.zeros((Cout,), jnp.float32)).astype(jnp.float32).reshape(1, Cout)
    neg = 0.1 if leaky_relu else 0.0

    def run_pass1_nobn(fuse):
        kern = functools.partial(_conv_affine_act_kernel, fuse_taps=fuse,
                                 negative_slope=neg, **conv_kw)
        return pl.pallas_call(
            kern,
            out_shape=jax.ShapeDtypeStruct((N, Cout, S), out_dtype),
            grid_spec=pltpu.PrefetchScalarGridSpec(
                num_scalar_prefetch=0,
                grid=(N, n_bands),
                in_specs=[img_spec(), w_spec(fuse),
                          pl.BlockSpec((1, Cout), lambda n, b: (0, 0))],
                out_specs=conv_out_spec()),
            compiler_params=cparams1,
            cost_estimate=pl.CostEstimate(
                flops=flops1 + 3 * N * Cout * S, transcendentals=0,
                bytes_accessed=int(x.size) * 2 + KH * KW * Cin * Cout * 2
                               + N * Cout * S * out_itemsize),
        )(x, w_fused if fuse else w_taps, shift)

    out_nc = _with_tap_fallback(run_pass1_nobn, fuse_taps)
    return out_nc.reshape(N, Cout, OH, OW)


# ----------------------------------------------------------------------------
# demo / self-check
# ----------------------------------------------------------------------------
if __name__ == "__main__":
    # conv2DBatchNormRelu(in_channels=4, n_filters=8, k_size=3, stride=1,
    #                     padding=1, bias=True, dilation=1, with_bn=True,
    #                     leaky_relu=False)
    N, Cin, H, W = 2, 4, 16, 16
    Cout, Ksz, stride, padding = 8, 3, 1, 1

    key = jax.random.PRNGKey(0)
    k1, k2, k3, k4, k5 = jax.random.split(key, 5)
    fan_in = Cin * Ksz * Ksz
    bound = 1.0 / (fan_in ** 0.5)
    weight = jax.random.uniform(k1, (Cout, Cin, Ksz, Ksz), jnp.float32, -bound, bound)
    bias = jax.random.uniform(k2, (Cout,), jnp.float32, -bound, bound)
    gamma = jax.random.uniform(k3, (Cout,), jnp.float32, 0.5, 1.5)
    beta = 0.1 * jax.random.normal(k4, (Cout,), jnp.float32)
    x = jax.random.normal(k5, (N, Cin, H, W), jnp.float32)

    y = conv2d_batchnorm_relu(x, weight, bias, gamma, beta,
                              stride=stride, padding=padding, dilation=1,
                              with_bn=True, leaky_relu=False)
    y = jax.block_until_ready(y)

    # ---- pure-JAX reference (f32 math on bf16-cast inputs, to match the MXU
    #      operand precision; tolerance covers the bf16 conv intermediate) ----
    xb = x.astype(jnp.bfloat16).astype(jnp.float32)
    wb = weight.astype(jnp.bfloat16).astype(jnp.float32)
    ref_conv = lax.conv_general_dilated(
        xb, wb, (stride, stride), [(padding, padding)] * 2,
        rhs_dilation=(1, 1), dimension_numbers=("NCHW", "OIHW", "NCHW"))
    ref_conv = ref_conv + bias.reshape(1, Cout, 1, 1)
    m = ref_conv.mean(axis=(0, 2, 3), keepdims=True)
    v = ref_conv.var(axis=(0, 2, 3), keepdims=True)      # biased, as in BN training
    ref = (ref_conv - m) / jnp.sqrt(v + 1e-5) * gamma.reshape(1, Cout, 1, 1) \
          + beta.reshape(1, Cout, 1, 1)
    ref = jnp.maximum(ref, 0.0)

    assert y.shape == (N, Cout, H, W)
    err = float(jnp.max(jnp.abs(y - ref)))
    assert err < 5e-2, err

    print("KERNEL_OK")
</pallas_src>

<mosaic_0001>
module attributes {stable_mosaic.version = 11 : i64} {
  func.func @_conv_stats_kernel(%arg0: i32, %arg1: i32, %arg2: memref<1x18x18x4xbf16, #tpu.memory_space<vmem>>, %arg3: memref<36x8xbf16, #tpu.memory_space<vmem>>, %arg4: memref<1x8x256xbf16, #tpu.memory_space<vmem>>, %arg5: memref<1x1x8xf32, #tpu.memory_space<vmem>>, %arg6: memref<1x1x8xf32, #tpu.memory_space<vmem>>) attributes {dimension_semantics = [#tpu.dimension_semantics<parallel>, #tpu.dimension_semantics<parallel>], iteration_bounds = array<i64: 2, 1>, scalar_prefetch = 0 : i64, scratch_operands = 0 : i64, tpu.core_type = #tpu.core_type<tc>, window_params = [{transform_indices = @transform_0, window_bounds = array<i64: 1, 18, 18, 4>}, {pipeline_mode = #tpu.pipeline_mode<synchronous>, transform_indices = @transform_1, window_bounds = array<i64: 36, 8>}, {transform_indices = @transform_2, window_bounds = array<i64: 1, 8, 256>}, {transform_indices = @transform_3, window_bounds = array<i64: 1, 1, 8>}, {transform_indices = @transform_4, window_bounds = array<i64: 1, 1, 8>}]} {
    %c16_i32 = arith.constant 16 : i32
    %0 = arith.muli %arg1, %c16_i32 : i32
    %1 = tpu.assume_multiple %0, 8 : i32
    %c0_i32 = arith.constant 0 : i32
    %2 = arith.addi %1, %c0_i32 : i32
    %c0 = arith.constant 0 : index
    %3 = arith.index_cast %2 : i32 to index
    %c0_0 = arith.constant 0 : index
    %c0_1 = arith.constant 0 : index
    %4 = vector.load %arg2[%c0, %3, %c0_0, %c0_1] : memref<1x18x18x4xbf16, #tpu.memory_space<vmem>>, vector<1x16x16x4xbf16>
    %5 = vector.shape_cast %4 : vector<1x16x16x4xbf16> to vector<16x16x4xbf16>
    %6 = vector.shape_cast %5 : vector<16x16x4xbf16> to vector<256x4xbf16>
    %c0_i32_2 = arith.constant 0 : i32
    %7 = arith.addi %1, %c0_i32_2 : i32
    %c0_3 = arith.constant 0 : index
    %8 = arith.index_cast %7 : i32 to index
    %c1 = arith.constant 1 : index
    %c0_4 = arith.constant 0 : index
    %9 = vector.load %arg2[%c0_3, %8, %c1, %c0_4] : memref<1x18x18x4xbf16, #tpu.memory_space<vmem>>, vector<1x16x16x4xbf16>
    %10 = vector.shape_cast %9 : vector<1x16x16x4xbf16> to vector<16x16x4xbf16>
    %11 = vector.shape_cast %10 : vector<16x16x4xbf16> to vector<256x4xbf16>
    %c0_i32_5 = arith.constant 0 : i32
    %12 = arith.addi %1, %c0_i32_5 : i32
    %c0_6 = arith.constant 0 : index
    %13 = arith.index_cast %12 : i32 to index
    %c2 = arith.constant 2 : index
    %c0_7 = arith.constant 0 : index
    %14 = vector.load %arg2[%c0_6, %13, %c2, %c0_7] : memref<1x18x18x4xbf16, #tpu.memory_space<vmem>>, vector<1x16x16x4xbf16>
    %15 = vector.shape_cast %14 : vector<1x16x16x4xbf16> to vector<16x16x4xbf16>
    %16 = vector.shape_cast %15 : vector<16x16x4xbf16> to vector<256x4xbf16>
    %c1_i32 = arith.constant 1 : i32
    %17 = arith.addi %1, %c1_i32 : i32
    %c0_8 = arith.constant 0 : index
    %18 = arith.index_cast %17 : i32 to index
    %c0_9 = arith.constant 0 : index
    %c0_10 = arith.constant 0 : index
    %19 = vector.load %arg2[%c0_8, %18, %c0_9, %c0_10] : memref<1x18x18x4xbf16, #tpu.memory_space<vmem>>, vector<1x16x16x4xbf16>
    %20 = vector.shape_cast %19 : vector<1x16x16x4xbf16> to vector<16x16x4xbf16>
    %21 = vector.shape_cast %20 : vector<16x16x4xbf16> to vector<256x4xbf16>
    %c1_i32_11 = arith.constant 1 : i32
    %22 = arith.addi %1, %c1_i32_11 : i32
    %c0_12 = arith.constant 0 : index
    %23 = arith.index_cast %22 : i32 to index
    %c1_13 = arith.constant 1 : index
    %c0_14 = arith.constant 0 : index
    %24 = vector.load %arg2[%c0_12, %23, %c1_13, %c0_14] : memref<1x18x18x4xbf16, #tpu.memory_space<vmem>>, vector<1x16x16x4xbf16>
    %25 = vector.shape_cast %24 : vector<1x16x16x4xbf16> to vector<16x16x4xbf16>
    %26 = vector.shape_cast %25 : vector<16x16x4xbf16> to vector<256x4xbf16>
    %c1_i32_15 = arith.constant 1 : i32
    %27 = arith.addi %1, %c1_i32_15 : i32
    %c0_16 = arith.constant 0 : index
    %28 = arith.index_cast %27 : i32 to index
    %c2_17 = arith.constant 2 : index
    %c0_18 = arith.constant 0 : index
    %29 = vector.load %arg2[%c0_16, %28, %c2_17, %c0_18] : memref<1x18x18x4xbf16, #tpu.memory_space<vmem>>, vector<1x16x16x4xbf16>
    %30 = vector.shape_cast %29 : vector<1x16x16x4xbf16> to vector<16x16x4xbf16>
    %31 = vector.shape_cast %30 : vector<16x16x4xbf16> to vector<256x4xbf16>
    %c2_i32 = arith.constant 2 : i32
    %32 = arith.addi %1, %c2_i32 : i32
    %c0_19 = arith.constant 0 : index
    %33 = arith.index_cast %32 : i32 to index
    %c0_20 = arith.constant 0 : index
    %c0_21 = arith.constant 0 : index
    %34 = vector.load %arg2[%c0_19, %33, %c0_20, %c0_21] : memref<1x18x18x4xbf16, #tpu.memory_space<vmem>>, vector<1x16x16x4xbf16>
    %35 = vector.shape_cast %34 : vector<1x16x16x4xbf16> to vector<16x16x4xbf16>
    %36 = vector.shape_cast %35 : vector<16x16x4xbf16> to vector<256x4xbf16>
    %c2_i32_22 = arith.constant 2 : i32
    %37 = arith.addi %1, %c2_i32_22 : i32
    %c0_23 = arith.constant 0 : index
    %38 = arith.index_cast %37 : i32 to index
    %c1_24 = arith.constant 1 : index
    %c0_25 = arith.constant 0 : index
    %39 = vector.load %arg2[%c0_23, %38, %c1_24, %c0_25] : memref<1x18x18x4xbf16, #tpu.memory_space<vmem>>, vector<1x16x16x4xbf16>
    %40 = vector.shape_cast %39 : vector<1x16x16x4xbf16> to vector<16x16x4xbf16>
    %41 = vector.shape_cast %40 : vector<16x16x4xbf16> to vector<256x4xbf16>
    %c2_i32_26 = arith.constant 2 : i32
    %42 = arith.addi %1, %c2_i32_26 : i32
    %c0_27 = arith.constant 0 : index
    %43 = arith.index_cast %42 : i32 to index
    %c2_28 = arith.constant 2 : index
    %c0_29 = arith.constant 0 : index
    %44 = vector.load %arg2[%c0_27, %43, %c2_28, %c0_29] : memref<1x18x18x4xbf16, #tpu.memory_space<vmem>>, vector<1x16x16x4xbf16>
    %45 = vector.shape_cast %44 : vector<1x16x16x4xbf16> to vector<16x16x4xbf16>
    %46 = vector.shape_cast %45 : vector<16x16x4xbf16> to vector<256x4xbf16>
    %47 = tpu.concatenate %6, %11, %16, %21, %26, %31, %36, %41, %46 in 1 : vector<256x4xbf16>, vector<256x4xbf16>, vector<256x4xbf16>, vector<256x4xbf16>, vector<256x4xbf16>, vector<256x4xbf16>, vector<256x4xbf16>, vector<256x4xbf16>, vector<256x4xbf16> -> vector<256x36xbf16>
    %c0_30 = arith.constant 0 : index
    %c0_31 = arith.constant 0 : index
    %48 = vector.load %arg3[%c0_30, %c0_31] : memref<36x8xbf16, #tpu.memory_space<vmem>>, vector<36x8xbf16>
    %cst = arith.constant dense<0.000000e+00> : vector<256x8xf32>
    %49 = tpu.matmul %47, %48, %cst {dimension_numbers = #tpu.dot_dimension_numbers<[1], [0], [0], [1], [0, 0, 1, 1], [], []>} : vector<256x36xbf16>, vector<36x8xbf16>, vector<256x8xf32> -> vector<256x8xf32>
    %50 = tpu.transpose %49, [1, 0] : vector<256x8xf32> -> vector<8x256xf32>
    %51 = arith.truncf %50 : vector<8x256xf32> to vector<8x256xbf16>
    %c0_32 = arith.constant 0 : index
    %c0_33 = arith.constant 0 : index
    %c0_34 = arith.constant 0 : index
    %52 = vector.load %arg4[%c0_32, %c0_33, %c0_34] : memref<1x8x256xbf16, #tpu.memory_space<vmem>>, vector<1x8x256xbf16>
    %53 = vector.shape_cast %52 : vector<1x8x256xbf16> to vector<8x256xbf16>
    %54 = vector.shape_cast %51 : vector<8x256xbf16> to vector<1x8x256xbf16>
    tpu.vector_store %arg4[%c0_32, %c0_33, %c0_34], %54 {strides = array<i32>} : memref<1x8x256xbf16, #tpu.memory_space<vmem>>, vector<1x8x256xbf16>,
    %cst_35 = arith.constant dense<0.000000e+00> : vector<8xf32>
    %55 = vector.multi_reduction <add>, %49, %cst_35 [0] : vector<256x8xf32> to vector<8xf32>
    %56 = vector.shape_cast %55 : vector<8xf32> to vector<1x8xf32>
    %c0_36 = arith.constant 0 : index
    %c0_37 = arith.constant 0 : index
    %c0_38 = arith.constant 0 : index
    %57 = vector.load %arg5[%c0_36, %c0_37, %c0_38] : memref<1x1x8xf32, #tpu.memory_space<vmem>>, vector<1x1x8xf32>
    %58 = vector.shape_cast %57 : vector<1x1x8xf32> to vector<1x8xf32>
    %59 = vector.shape_cast %56 : vector<1x8xf32> to vector<1x1x8xf32>
    tpu.vector_store %arg5[%c0_36, %c0_37, %c0_38], %59 {strides = array<i32>} : memref<1x1x8xf32, #tpu.memory_space<vmem>>, vector<1x1x8xf32>,
    %60 = arith.mulf %49, %49 : vector<256x8xf32>
    %cst_39 = arith.constant dense<0.000000e+00> : vector<8xf32>
    %61 = vector.multi_reduction <add>, %60, %cst_39 [0] : vector<256x8xf32> to vector<8xf32>
    %62 = vector.shape_cast %61 : vector<8xf32> to vector<1x8xf32>
    %c0_40 = arith.constant 0 : index
    %c0_41 = arith.constant 0 : index
    %c0_42 = arith.constant 0 : index
    %63 = vector.load %arg6[%c0_40, %c0_41, %c0_42] : memref<1x1x8xf32, #tpu.memory_space<vmem>>, vector<1x1x8xf32>
    %64 = vector.shape_cast %63 : vector<1x1x8xf32> to vector<1x8xf32>
    %65 = vector.shape_cast %62 : vector<1x8xf32> to vector<1x1x8xf32>
    tpu.vector_store %arg6[%c0_40, %c0_41, %c0_42], %65 {strides = array<i32>} : memref<1x1x8xf32, #tpu.memory_space<vmem>>, vector<1x1x8xf32>,
    return
  }
  func.func @transform_0(%arg0: i32, %arg1: i32) -> (i32, i32, i32, i32) {
    %c0_i32 = arith.constant 0 : i32
    %c0_i32_0 = arith.constant 0 : i32
    %c0_i32_1 = arith.constant 0 : i32
    %c0_i32_2 = arith.constant 0 : i32
    return %arg0, %c0_i32, %c0_i32_0, %c0_i32_1 : i32, i32, i32, i32
  }
  func.func @transform_1(%arg0: i32, %arg1: i32) -> (i32, i32) {
    %c0_i32 = arith.constant 0 : i32
    %c0_i32_0 = arith.constant 0 : i32
    %c0_i32_1 = arith.constant 0 : i32
    return %c0_i32, %c0_i32_0 : i32, i32
  }
  func.func @transform_2(%arg0: i32, %arg1: i32) -> (i32, i32, i32) {
    %c0_i32 = arith.constant 0 : i32
    %c0_i32_0 = arith.constant 0 : i32
    return %arg0, %c0_i32, %arg1 : i32, i32, i32
  }
  func.func @transform_3(%arg0: i32, %arg1: i32) -> (i32, i32, i32) {
    %c0_i32 = arith.constant 0 : i32
    %c0_i32_0 = arith.constant 0 : i32
    return %arg0, %arg1, %c0_i32 : i32, i32, i32
  }
  func.func @transform_4(%arg0: i32, %arg1: i32) -> (i32, i32, i32) {
    %c0_i32 = arith.constant 0 : i32
    %c0_i32_0 = arith.constant 0 : i32
    return %arg0, %arg1, %c0_i32 : i32, i32, i32
  }
}

module attributes {stable_mosaic.version = 11 : i64} {
  func.func @_conv_stats_kernel(%arg0: i32, %arg1: i32, %arg2: memref<1x18x18x4xbf16, #tpu.memory_space<vmem>>, %arg3: memref<9x4x8xbf16, #tpu.memory_space<vmem>>, %arg4: memref<1x8x256xbf16, #tpu.memory_space<vmem>>, %arg5: memref<1x1x8xf32, #tpu.memory_space<vmem>>, %arg6: memref<1x1x8xf32, #tpu.memory_space<vmem>>) attributes {dimension_semantics = [#tpu.dimension_semantics<parallel>, #tpu.dimension_semantics<parallel>], iteration_bounds = array<i64: 2, 1>, scalar_prefetch = 0 : i64, scratch_operands = 0 : i64, tpu.core_type = #tpu.core_type<tc>, window_params = [{transform_indices = @transform_0, window_bounds = array<i64: 1, 18, 18, 4>}, {pipeline_mode = #tpu.pipeline_mode<synchronous>, transform_indices = @transform_1, window_bounds = array<i64: 9, 4, 8>}, {transform_indices = @transform_2, window_bounds = array<i64: 1, 8, 256>}, {transform_indices = @transform_3, window_bounds = array<i64: 1, 1, 8>}, {transform_indices = @transform_4, window_bounds = array<i64: 1, 1, 8>}]} {
    %c16_i32 = arith.constant 16 : i32
    %0 = arith.muli %arg1, %c16_i32 : i32
    %1 = tpu.assume_multiple %0, 8 : i32
    %c0_i32 = arith.constant 0 : i32
    %2 = arith.addi %1, %c0_i32 : i32
    %c0 = arith.constant 0 : index
    %3 = arith.index_cast %2 : i32 to index
    %c0_0 = arith.constant 0 : index
    %c0_1 = arith.constant 0 : index
    %4 = vector.load %arg2[%c0, %3, %c0_0, %c0_1] : memref<1x18x18x4xbf16, #tpu.memory_space<vmem>>, vector<1x16x16x4xbf16>
    %5 = vector.shape_cast %4 : vector<1x16x16x4xbf16> to vector<16x16x4xbf16>
    %6 = vector.shape_cast %5 : vector<16x16x4xbf16> to vector<256x4xbf16>
    %c0_2 = arith.constant 0 : index
    %c0_3 = arith.constant 0 : index
    %c0_4 = arith.constant 0 : index
    %7 = vector.load %arg3[%c0_2, %c0_3, %c0_4] : memref<9x4x8xbf16, #tpu.memory_space<vmem>>, vector<1x4x8xbf16>
    %8 = vector.shape_cast %7 : vector<1x4x8xbf16> to vector<4x8xbf16>
    %cst = arith.constant dense<0.000000e+00> : vector<256x8xf32>
    %9 = tpu.matmul %6, %8, %cst {dimension_numbers = #tpu.dot_dimension_numbers<[1], [0], [0], [1], [0, 0, 1, 1], [], []>} : vector<256x4xbf16>, vector<4x8xbf16>, vector<256x8xf32> -> vector<256x8xf32>
    %c0_i32_5 = arith.constant 0 : i32
    %10 = arith.addi %1, %c0_i32_5 : i32
    %c0_6 = arith.constant 0 : index
    %11 = arith.index_cast %10 : i32 to index
    %c1 = arith.constant 1 : index
    %c0_7 = arith.constant 0 : index
    %12 = vector.load %arg2[%c0_6, %11, %c1, %c0_7] : memref<1x18x18x4xbf16, #tpu.memory_space<vmem>>, vector<1x16x16x4xbf16>
    %13 = vector.shape_cast %12 : vector<1x16x16x4xbf16> to vector<16x16x4xbf16>
    %14 = vector.shape_cast %13 : vector<16x16x4xbf16> to vector<256x4xbf16>
    %c1_8 = arith.constant 1 : index
    %c0_9 = arith.constant 0 : index
    %c0_10 = arith.constant 0 : index
    %15 = vector.load %arg3[%c1_8, %c0_9, %c0_10] : memref<9x4x8xbf16, #tpu.memory_space<vmem>>, vector<1x4x8xbf16>
    %16 = vector.shape_cast %15 : vector<1x4x8xbf16> to vector<4x8xbf16>
    %cst_11 = arith.constant dense<0.000000e+00> : vector<256x8xf32>
    %17 = tpu.matmul %14, %16, %cst_11 {dimension_numbers = #tpu.dot_dimension_numbers<[1], [0], [0], [1], [0, 0, 1, 1], [], []>} : vector<256x4xbf16>, vector<4x8xbf16>, vector<256x8xf32> -> vector<256x8xf32>
    %18 = arith.addf %9, %17 : vector<256x8xf32>
    %c0_i32_12 = arith.constant 0 : i32
    %19 = arith.addi %1, %c0_i32_12 : i32
    %c0_13 = arith.constant 0 : index
    %20 = arith.index_cast %19 : i32 to index
    %c2 = arith.constant 2 : index
    %c0_14 = arith.constant 0 : index
    %21 = vector.load %arg2[%c0_13, %20, %c2, %c0_14] : memref<1x18x18x4xbf16, #tpu.memory_space<vmem>>, vector<1x16x16x4xbf16>
    %22 = vector.shape_cast %21 : vector<1x16x16x4xbf16> to vector<16x16x4xbf16>
    %23 = vector.shape_cast %22 : vector<16x16x4xbf16> to vector<256x4xbf16>
    %c2_15 = arith.constant 2 : index
    %c0_16 = arith.constant 0 : index
    %c0_17 = arith.constant 0 : index
    %24 = vector.load %arg3[%c2_15, %c0_16, %c0_17] : memref<9x4x8xbf16, #tpu.memory_space<vmem>>, vector<1x4x8xbf16>
    %25 = vector.shape_cast %24 : vector<1x4x8xbf16> to vector<4x8xbf16>
    %cst_18 = arith.constant dense<0.000000e+00> : vector<256x8xf32>
    %26 = tpu.matmul %23, %25, %cst_18 {dimension_numbers = #tpu.dot_dimension_numbers<[1], [0], [0], [1], [0, 0, 1, 1], [], []>} : vector<256x4xbf16>, vector<4x8xbf16>, vector<256x8xf32> -> vector<256x8xf32>
    %27 = arith.addf %18, %26 : vector<256x8xf32>
    %c1_i32 = arith.constant 1 : i32
    %28 = arith.addi %1, %c1_i32 : i32
    %c0_19 = arith.constant 0 : index
    %29 = arith.index_cast %28 : i32 to index
    %c0_20 = arith.constant 0 : index
    %c0_21 = arith.constant 0 : index
    %30 = vector.load %arg2[%c0_19, %29, %c0_20, %c0_21] : memref<1x18x18x4xbf16, #tpu.memory_space<vmem>>, vector<1x16x16x4xbf16>
    %31 = vector.shape_cast %30 : vector<1x16x16x4xbf16> to vector<16x16x4xbf16>
    %32 = vector.shape_cast %31 : vector<16x16x4xbf16> to vector<256x4xbf16>
    %c3 = arith.constant 3 : index
    %c0_22 = arith.constant 0 : index
    %c0_23 = arith.constant 0 : index
    %33 = vector.load %arg3[%c3, %c0_22, %c0_23] : memref<9x4x8xbf16, #tpu.memory_space<vmem>>, vector<1x4x8xbf16>
    %34 = vector.shape_cast %33 : vector<1x4x8xbf16> to vector<4x8xbf16>
    %cst_24 = arith.constant dense<0.000000e+00> : vector<256x8xf32>
    %35 = tpu.matmul %32, %34, %cst_24 {dimension_numbers = #tpu.dot_dimension_numbers<[1], [0], [0], [1], [0, 0, 1, 1], [], []>} : vector<256x4xbf16>, vector<4x8xbf16>, vector<256x8xf32> -> vector<256x8xf32>
    %36 = arith.addf %27, %35 : vector<256x8xf32>
    %c1_i32_25 = arith.constant 1 : i32
    %37 = arith.addi %1, %c1_i32_25 : i32
    %c0_26 = arith.constant 0 : index
    %38 = arith.index_cast %37 : i32 to index
    %c1_27 = arith.constant 1 : index
    %c0_28 = arith.constant 0 : index
    %39 = vector.load %arg2[%c0_26, %38, %c1_27, %c0_28] : memref<1x18x18x4xbf16, #tpu.memory_space<vmem>>, vector<1x16x16x4xbf16>
    %40 = vector.shape_cast %39 : vector<1x16x16x4xbf16> to vector<16x16x4xbf16>
    %41 = vector.shape_cast %40 : vector<16x16x4xbf16> to vector<256x4xbf16>
    %c4 = arith.constant 4 : index
    %c0_29 = arith.constant 0 : index
    %c0_30 = arith.constant 0 : index
    %42 = vector.load %arg3[%c4, %c0_29, %c0_30] : memref<9x4x8xbf16, #tpu.memory_space<vmem>>, vector<1x4x8xbf16>
    %43 = vector.shape_cast %42 : vector<1x4x8xbf16> to vector<4x8xbf16>
    %cst_31 = arith.constant dense<0.000000e+00> : vector<256x8xf32>
    %44 = tpu.matmul %41, %43, %cst_31 {dimension_numbers = #tpu.dot_dimension_numbers<[1], [0], [0], [1], [0, 0, 1, 1], [], []>} : vector<256x4xbf16>, vector<4x8xbf16>, vector<256x8xf32> -> vector<256x8xf32>
    %45 = arith.addf %36, %44 : vector<256x8xf32>
    %c1_i32_32 = arith.constant 1 : i32
    %46 = arith.addi %1, %c1_i32_32 : i32
    %c0_33 = arith.constant 0 : index
    %47 = arith.index_cast %46 : i32 to index
    %c2_34 = arith.constant 2 : index
    %c0_35 = arith.constant 0 : index
    %48 = vector.load %arg2[%c0_33, %47, %c2_34, %c0_35] : memref<1x18x18x4xbf16, #tpu.memory_space<vmem>>, vector<1x16x16x4xbf16>
    %49 = vector.shape_cast %48 : vector<1x16x16x4xbf16> to vector<16x16x4xbf16>
    %50 = vector.shape_cast %49 : vector<16x16x4xbf16> to vector<256x4xbf16>
    %c5 = arith.constant 5 : index
    %c0_36 = arith.constant 0 : index
    %c0_37 = arith.constant 0 : index
    %51 = vector.load %arg3[%c5, %c0_36, %c0_37] : memref<9x4x8xbf16, #tpu.memory_space<vmem>>, vector<1x4x8xbf16>
    %52 = vector.shape_cast %51 : vector<1x4x8xbf16> to vector<4x8xbf16>
    %cst_38 = arith.constant dense<0.000000e+00> : vector<256x8xf32>
    %53 = tpu.matmul %50, %52, %cst_38 {dimension_numbers = #tpu.dot_dimension_numbers<[1], [0], [0], [1], [0, 0, 1, 1], [], []>} : vector<256x4xbf16>, vector<4x8xbf16>, vector<256x8xf32> -> vector<256x8xf32>
    %54 = arith.addf %45, %53 : vector<256x8xf32>
    %c2_i32 = arith.constant 2 : i32
    %55 = arith.addi %1, %c2_i32 : i32
    %c0_39 = arith.constant 0 : index
    %56 = arith.index_cast %55 : i32 to index
    %c0_40 = arith.constant 0 : index
    %c0_41 = arith.constant 0 : index
    %57 = vector.load %arg2[%c0_39, %56, %c0_40, %c0_41] : memref<1x18x18x4xbf16, #tpu.memory_space<vmem>>, vector<1x16x16x4xbf16>
    %58 = vector.shape_cast %57 : vector<1x16x16x4xbf16> to vector<16x16x4xbf16>
    %59 = vector.shape_cast %58 : vector<16x16x4xbf16> to vector<256x4xbf16>
    %c6 = arith.constant 6 : index
    %c0_42 = arith.constant 0 : index
    %c0_43 = arith.constant 0 : index
    %60 = vector.load %arg3[%c6, %c0_42, %c0_43] : memref<9x4x8xbf16, #tpu.memory_space<vmem>>, vector<1x4x8xbf16>
    %61 = vector.shape_cast %60 : vector<1x4x8xbf16> to vector<4x8xbf16>
    %cst_44 = arith.constant dense<0.000000e+00> : vector<256x8xf32>
    %62 = tpu.matmul %59, %61, %cst_44 {dimension_numbers = #tpu.dot_dimension_numbers<[1], [0], [0], [1], [0, 0, 1, 1], [], []>} : vector<256x4xbf16>, vector<4x8xbf16>, vector<256x8xf32> -> vector<256x8xf32>
    %63 = arith.addf %54, %62 : vector<256x8xf32>
    %c2_i32_45 = arith.constant 2 : i32
    %64 = arith.addi %1, %c2_i32_45 : i32
    %c0_46 = arith.constant 0 : index
    %65 = arith.index_cast %64 : i32 to index
    %c1_47 = arith.constant 1 : index
    %c0_48 = arith.constant 0 : index
    %66 = vector.load %arg2[%c0_46, %65, %c1_47, %c0_48] : memref<1x18x18x4xbf16, #tpu.memory_space<vmem>>, vector<1x16x16x4xbf16>
    %67 = vector.shape_cast %66 : vector<1x16x16x4xbf16> to vector<16x16x4xbf16>
    %68 = vector.shape_cast %67 : vector<16x16x4xbf16> to vector<256x4xbf16>
    %c7 = arith.constant 7 : index
    %c0_49 = arith.constant 0 : index
    %c0_50 = arith.constant 0 : index
    %69 = vector.load %arg3[%c7, %c0_49, %c0_50] : memref<9x4x8xbf16, #tpu.memory_space<vmem>>, vector<1x4x8xbf16>
    %70 = vector.shape_cast %69 : vector<1x4x8xbf16> to vector<4x8xbf16>
    %cst_51 = arith.constant dense<0.000000e+00> : vector<256x8xf32>
    %71 = tpu.matmul %68, %70, %cst_51 {dimension_numbers = #tpu.dot_dimension_numbers<[1], [0], [0], [1], [0, 0, 1, 1], [], []>} : vector<256x4xbf16>, vector<4x8xbf16>, vector<256x8xf32> -> vector<256x8xf32>
    %72 = arith.addf %63, %71 : vector<256x8xf32>
    %c2_i32_52 = arith.constant 2 : i32
    %73 = arith.addi %1, %c2_i32_52 : i32
    %c0_53 = arith.constant 0 : index
    %74 = arith.index_cast %73 : i32 to index
    %c2_54 = arith.constant 2 : index
    %c0_55 = arith.constant 0 : index
    %75 = vector.load %arg2[%c0_53, %74, %c2_54, %c0_55] : memref<1x18x18x4xbf16, #tpu.memory_space<vmem>>, vector<1x16x16x4xbf16>
    %76 = vector.shape_cast %75 : vector<1x16x16x4xbf16> to vector<16x16x4xbf16>
    %77 = vector.shape_cast %76 : vector<16x16x4xbf16> to vector<256x4xbf16>
    %c8 = arith.constant 8 : index
    %c0_56 = arith.constant 0 : index
    %c0_57 = arith.constant 0 : index
    %78 = vector.load %arg3[%c8, %c0_56, %c0_57] : memref<9x4x8xbf16, #tpu.memory_space<vmem>>, vector<1x4x8xbf16>
    %79 = vector.shape_cast %78 : vector<1x4x8xbf16> to vector<4x8xbf16>
    %cst_58 = arith.constant dense<0.000000e+00> : vector<256x8xf32>
    %80 = tpu.matmul %77, %79, %cst_58 {dimension_numbers = #tpu.dot_dimension_numbers<[1], [0], [0], [1], [0, 0, 1, 1], [], []>} : vector<256x4xbf16>, vector<4x8xbf16>, vector<256x8xf32> -> vector<256x8xf32>
    %81 = arith.addf %72, %80 : vector<256x8xf32>
    %82 = tpu.transpose %81, [1, 0] : vector<256x8xf32> -> vector<8x256xf32>
    %83 = arith.truncf %82 : vector<8x256xf32> to vector<8x256xbf16>
    %c0_59 = arith.constant 0 : index
    %c0_60 = arith.constant 0 : index
    %c0_61 = arith.constant 0 : index
    %84 = vector.load %arg4[%c0_59, %c0_60, %c0_61] : memref<1x8x256xbf16, #tpu.memory_space<vmem>>, vector<1x8x256xbf16>
    %85 = vector.shape_cast %84 : vector<1x8x256xbf16> to vector<8x256xbf16>
    %86 = vector.shape_cast %83 : vector<8x256xbf16> to vector<1x8x256xbf16>
    tpu.vector_store %arg4[%c0_59, %c0_60, %c0_61], %86 {strides = array<i32>} : memref<1x8x256xbf16, #tpu.memory_space<vmem>>, vector<1x8x256xbf16>,
    %cst_62 = arith.constant dense<0.000000e+00> : vector<8xf32>
    %87 = vector.multi_reduction <add>, %81, %cst_62 [0] : vector<256x8xf32> to vector<8xf32>
    %88 = vector.shape_cast %87 : vector<8xf32> to vector<1x8xf32>
    %c0_63 = arith.constant 0 : index
    %c0_64 = arith.constant 0 : index
    %c0_65 = arith.constant 0 : index
    %89 = vector.load %arg5[%c0_63, %c0_64, %c0_65] : memref<1x1x8xf32, #tpu.memory_space<vmem>>, vector<1x1x8xf32>
    %90 = vector.shape_cast %89 : vector<1x1x8xf32> to vector<1x8xf32>
    %91 = vector.shape_cast %88 : vector<1x8xf32> to vector<1x1x8xf32>
    tpu.vector_store %arg5[%c0_63, %c0_64, %c0_65], %91 {strides = array<i32>} : memref<1x1x8xf32, #tpu.memory_space<vmem>>, vector<1x1x8xf32>,
    %92 = arith.mulf %81, %81 : vector<256x8xf32>
    %cst_66 = arith.constant dense<0.000000e+00> : vector<8xf32>
    %93 = vector.multi_reduction <add>, %92, %cst_66 [0] : vector<256x8xf32> to vector<8xf32>
    %94 = vector.shape_cast %93 : vector<8xf32> to vector<1x8xf32>
    %c0_67 = arith.constant 0 : index
    %c0_68 = arith.constant 0 : index
    %c0_69 = arith.constant 0 : index
    %95 = vector.load %arg6[%c0_67, %c0_68, %c0_69] : memref<1x1x8xf32, #tpu.memory_space<vmem>>, vector<1x1x8xf32>
    %96 = vector.shape_cast %95 : vector<1x1x8xf32> to vector<1x8xf32>
    %97 = vector.shape_cast %94 : vector<1x8xf32> to vector<1x1x8xf32>
    tpu.vector_store %arg6[%c0_67, %c0_68, %c0_69], %97 {strides = array<i32>} : memref<1x1x8xf32, #tpu.memory_space<vmem>>, vector<1x1x8xf32>,
    return
  }
  func.func @transform_0(%arg0: i32, %arg1: i32) -> (i32, i32, i32, i32) {
    %c0_i32 = arith.constant 0 : i32
    %c0_i32_0 = arith.constant 0 : i32
    %c0_i32_1 = arith.constant 0 : i32
    %c0_i32_2 = arith.constant 0 : i32
    return %arg0, %c0_i32, %c0_i32_0, %c0_i32_1 : i32, i32, i32, i32
  }
  func.func @transform_1(%arg0: i32, %arg1: i32) -> (i32, i32, i32) {
    %c0_i32 = arith.constant 0 : i32
    %c0_i32_0 = arith.constant 0 : i32
    %c0_i32_1 = arith.constant 0 : i32
    %c0_i32_2 = arith.constant 0 : i32
    return %c0_i32, %c0_i32_0, %c0_i32_1 : i32, i32, i32
  }
  func.func @transform_2(%arg0: i32, %arg1: i32) -> (i32, i32, i32) {
    %c0_i32 = arith.constant 0 : i32
    %c0_i32_0 = arith.constant 0 : i32
    return %arg0, %c0_i32, %arg1 : i32, i32, i32
  }
  func.func @transform_3(%arg0: i32, %arg1: i32) -> (i32, i32, i32) {
    %c0_i32 = arith.constant 0 : i32
    %c0_i32_0 = arith.constant 0 : i32
    return %arg0, %arg1, %c0_i32 : i32, i32, i32
  }
  func.func @transform_4(%arg0: i32, %arg1: i32) -> (i32, i32, i32) {
    %c0_i32 = arith.constant 0 : i32
    %c0_i32_0 = arith.constant 0 : i32
    return %arg0, %arg1, %c0_i32 : i32, i32, i32
  }
}

</mosaic_0001>

<bundles_post_ra>
// kernel: tpu_custom_call.1
= control target key start
LH: loop header
LB: loop body
LE: loop exit
PB: predicated region body
PF: predicated region fallthrough
CT: control target
= control target key end

     0   :  { %10 = vsyncpa [#allocation3], 0  ;;  %s6408_s0 = inlined_call_operand.vmem [shape: bf16[2,18,18,4], index: 0, kind: input, shape index: {}]   ;;  %s6409_s1 = inlined_call_operand.vmem [shape: bf16[36,8], index: 1, kind: input, shape index: {}]   ;;  %s6410_s2 = inlined_call_operand.hbm [shape: bf16[2,8,256], index: 2, kind: output, shape index: {0}]   ;;  %s6411_s3 = inlined_call_operand.hbm [shape: f32[2,1,8], index: 3, kind: output, shape index: {1}]   ;;  %s6412_s4 = inlined_call_operand.hbm [shape: f32[2,1,8], index: 4, kind: output, shape index: {2}]  }
   0x1   :  { %12 = vsyncpa [#allocation3 + $0x1], 0 }
   0x2   :  { %13 = vsyncpa [#allocation5], 0 }
   0x3   :  { %15 = vsyncpa [#allocation5 + $0x1], 0  ;;  %s4429_s15 = smov 0   ;;  %s4431_s16 = smov 0  }
   0x4   :  { %s4433_s17 = smov 0   ;;  %s4435_s18 = smov 0  }
   0x5   :  { %s4437_s19 = smov 0   ;;  %s4439_s20 = smov 0  }
   0x6 LB: > { %s3665_s21 = sadd.s32 4294967295, %s4394_s20   ;;  %s6413_s22 = sadd.s32 4294967294, %s4394_s20   ;;  %s4394_s20 = sphi %s4439_s20, %s21_s20   ;;  %s4390_s19 = sphi %s4437_s19, %s6427_s19   ;;  %s4386_s18 = sphi %s4435_s18, %s6426_s18   ;;  %s4382_s17 = sphi %s4433_s17, %s6425_s17   ;;  %s4378_s16 = sphi %s4431_s16, %s6424_s16   ;;  %s4374_s15 = sphi %s4429_s15, %s6423_s15  }
   0x7   : > { %s33_s23 = sadd.s32 1, %s4390_s19  ;;  %s89_s24 = sadd.s32 1, %s4382_s17 }
   0x8   : > { %p35_p0 = scmp.ge.s32.totalorder %s33_s23, 2  ;;  %p99_p1 = scmp.ne.s32.totalorder %s4382_s17, %s4378_s16 }
   0x9   : > { %p100_p2 = scmp.eq.s32.totalorder %s3665_s21, 1  ;;  %p105_p3 = scmp.ne.s32.totalorder %s4378_s16, %s4374_s15 }
   0xa   : > { %s6429_s23 = smov (%p35_p0, %s33_s23), 0  ;;  %p106_p5 = scmp.eq.s32.totalorder %s6413_s22, 1 }
   0xb   : > { %p4471_p4 = por %p100_p2, %p99_p1  ;;  %s84_s26 = ssub.s32 %s4390_s19, %s6429_s23 }
   0xc   : > { %p3669_p6 = scmp.ge.s32.totalorder %s4394_s20, 1  ;;  %p87_p7 = scmp.eq.s32.totalorder %s84_s26, 0 }
   0xd   : > { %p4480_p8 = por %p106_p5, %p105_p3  ;;  %p191_p9 = scmp.lt.s32.totalorder %s4394_s20, 3 }
   0xe   : > { %s4486_s28 = scalar_select %p87_p7, %s4382_s17, %s89_s24  }
   0xf   : > { %p192_p10 = pnand %p3669_p6, %p191_p9 }
  0x10   : > { %p225_p11 = scmp.lt.s32.totalorder (!%p192_p10), %s4386_s18, 1  ;;  %s4396_s8 = smov (!%p192_p10), 4  }
  0x11   : > { %195 = sbr.rel (%p192_p10) target bundleno = 769 (0x301), region = 28  ;;  %s4397_s9 = smov (!%p192_p10), 8  }
  0x12   : > { %s4398_s10 = smov (!%p192_p10), 12   ;;  %s4399_s11 = smov (!%p192_p10), 16  }
  0x13   : > { %s4400_s12 = smov (!%p192_p10), 20   ;;  %s4401_s13 = smov (!%p192_p10), 24  }
  0x14   : > { %s4402_s14 = smov (!%p192_p10), 28   ;;  %s4403_s24 = smov (!%p192_p10), 32  }
  0x16   : > { %s226_s29 = scalar_select %p225_p11, %s4386_s18, 1  ;;  %vm284_vm0 = vsmask.f32 3328  ;;  %vm285_vm1 = vsmask.f32 7440  ;;  %vm735_vm3 = vcmask 1042432  }
  0x17   : > { %vm4521_vm2 = vmor %vm284_vm0, %vm285_vm1  ;;  %vm736_vm4 = vcmask 1046532   ;;  %vm2810_vm6 = vcmask 31744   ;;  %vm2859_vm7 = vcmask 64512   ;;  %vm2892_vm8 = vcmask 97280  }
  0x18   : > { %s4129_s30 = smul.u32 216, %s226_s29  ;;  %vm4723_vm5 = vmor %vm735_vm3, %vm736_vm4  ;;  %vm2925_vm9 = vcmask 130048   ;;  %vm3143_vm10 = vcmask 1041408   ;;  %vm2958_vm11 = vcmask 162816   ;;  %vm2991_vm12 = vcmask 195584  }
  0x19   : > { %vm3024_vm13 = vcmask 228352   ;;  %vm3057_vm14 = vcmask 261120   ;;  %vm3110_vm15 = vcmask 293888   ;;  %vm3371_vm0 = vcmask 57344  }
  0x1a   : > { %s4493_s7 = scalar_lea.vmem %s6408_s0, %s4129_s30 }
  0x1b   : > { %v244_v0 = vld [vmem:[%s4493_s7 + $0x30] sm:$0xf]  ;;  %v4497_v1 = vld [vmem:[%s4493_s7 + $0x34] sm:$0xf]  ;;  %v4500_v2 = vld [vmem:[%s4493_s7 + $0x38] sm:$0x1] }
  0x1c   : > { %v384_v3 = vshrl.u32 %v244_v0, 16  ;;  %v387_v4 = vshll.u32 %v244_v0, 16  ;;  %v393_v5 = vshll.u32 %v4497_v1, 16  ;;  %v397_v6 = vshrl.u32 %v4497_v1, 16  ;;  %v240_v7 = vld [vmem:[%s4493_s7 + $0x18] sm:$0xf] }
  0x1d   : > { %v403_v8 = vshll.u32 %v4500_v2, 16  ;;  %v4507_v9 = vld [vmem:[%s4493_s7 + $0x1c] sm:$0xf]  ;;  %v4510_v10 = vld [vmem:[%s4493_s7 + $0x20] sm:$0x1]  ;;  %v336_v11 = vshrl.u32 %v240_v7, 16 }
  0x1e   : > { %v386_v12 = vrot.slane %v384_v3, 4  ;;  %v389_v13 = vrot.slane %v387_v4, 5  ;;  %v395_v14 = vrot.slane %v393_v5, 5  ;;  %v399_v15 = vrot.slane %v397_v6, 4  ;;  %v236_v16 = vld [vmem:[%s4493_s7] sm:$0xf] }
  0x1f   : > { %v405_v17 = vrot.slane %v403_v8, 5  ;;  %v338_v18 = vrot.slane %v336_v11, 4  ;;  %v339_v19 = vshll.u32 %v240_v7, 16  ;;  %v345_v20 = vshll.u32 %v4507_v9, 16  ;;  %v4517_v25 = vld [vmem:[%s4493_s7 + $0x4] sm:$0xf] }
  0x20   : > { %v390_v21 = vor.u32 %v389_v13, %v386_v12  ;;  %v400_v22 = vor.u32 %v399_v15, %v395_v14  ;;  %v349_v23 = vshrl.u32 %v4507_v9, 16  ;;  %v355_v24 = vshll.u32 %v4510_v10, 16  ;;  %v4526_v36 = vld [vmem:[%s4493_s7 + $0x8] sm:$0x1]  ;;  %v246_v44 = vld [vmem:[%s4493_s7 + $0x3c] sm:$0xf] }
  0x21   : > { %v341_v27 = vrot.slane %v339_v19, 5  ;;  %v347_v28 = vrot.slane %v345_v20, 5  ;;  %v288_v29 = vshrl.u32 %v236_v16, 16  ;;  %v291_v30 = vshll.u32 %v236_v16, 16  ;;  %v4539_v56 = vld [vmem:[%s4493_s7 + $0x40] sm:$0xf] }
  0x22   : > { %v391_v31 = vrot.slane %v390_v21, 4  ;;  %v401_v32 = vrot.slane %v400_v22, 4  ;;  %v351_v33 = vrot.slane %v349_v23, 4  ;;  %v357_v34 = vrot.slane %v355_v24, 5  ;;  %v4544_v62 = vld [vmem:[%s4493_s7 + $0x44] sm:$0x1] }
  0x23   : > { %v342_v35 = vor.u32 %v341_v27, %v338_v18  ;;  %v290_v37 = vrot.slane %v288_v29, 4  ;;  %v293_v38 = vrot.slane %v291_v30, 5  ;;  %v297_v39 = vshll.u32 %v4517_v25, 16  ;;  %v242_v63 = vld [vmem:[%s4493_s7 + $0x24] sm:$0xf] }
  0x24   : > { %v396_v40 = vsel %vm4521_vm2, %v391_v31, %v395_v14  ;;  %v406_v41 = vsel %vm4521_vm2, %v401_v32, %v405_v17  ;;  %v352_v42 = vor.u32 %v351_v33, %v347_v28  ;;  %v301_v43 = vshrl.u32 %v4517_v25, 16  ;;  %v4553_v12 = vld [vmem:[%s4493_s7 + $0x28] sm:$0xf]  ;;  %v4557_v16 = vld [vmem:[%s4493_s7 + $0x2c] sm:$0x1] }
  0x25   : > { %v2146_v45 = vunpack.c.l.b16 %v396_v40  ;;  %v2147_v46 = vunpack.c.l.b16 %v406_v41  ;;  %v343_v47 = vrot.slane %v342_v35, 4  ;;  %v294_v48 = vor.u32 %v293_v38, %v290_v37  ;;  %v238_v22 = vld [vmem:[%s4493_s7 + $0xc] sm:$0xf]  ;;  %v4567_v37 = vld [vmem:[%s4493_s7 + $0x10] sm:$0xf] }
  0x26   : > { %v353_v49 = vrot.slane %v352_v42, 4  ;;  %v299_v50 = vrot.slane %v297_v39, 5  ;;  %v303_v51 = vrot.slane %v301_v43, 4  ;;  %v307_v52 = vshll.u32 %v4526_v36, 16  ;;  %v4570_v43 = vld [vmem:[%s4493_s7 + $0x14] sm:$0x1] }
  0x27   : > { %v2174_v53 = vpack.c.b16 %v2147_v46, %v2146_v45  ;;  %v348_v54 = vsel %vm4521_vm2, %v343_v47, %v347_v28  ;;  %v295_v55 = vrot.slane %v294_v48, 4  ;;  %v408_v57 = vshrl.u32 %v246_v44, 16  ;;  %v252_v48 = vld [vmem:[%s4493_s7 + $0x60] sm:$0xf] }
  0x28   : > { %v358_v58 = vsel %vm4521_vm2, %v353_v49, %v357_v34  ;;  %v2142_v59 = vunpack.c.l.b16 %v348_v54  ;;  %v304_v60 = vor.u32 %v303_v51, %v299_v50  ;;  %v309_v61 = vrot.slane %v307_v52, 5 }
  0x29   : > { %2194 = vrot.lane.b32.xlu2 %v2174_v53, %s4396_s8  ;;  %v2143_v0 = vunpack.c.l.b16 %v358_v58  ;;  %v300_v3 = vsel %vm4521_vm2, %v295_v55, %v299_v50  ;;  %v410_v4 = vrot.slane %v408_v57, 4  ;;  %v411_v5 = vshll.u32 %v246_v44, 16 }
  0x2a   : > { %v305_v6 = vrot.slane %v304_v60, 4  ;;  %v2138_v7 = vunpack.c.l.b16 %v300_v3  ;;  %v417_v8 = vshll.u32 %v4539_v56, 16  ;;  %v421_v11 = vshrl.u32 %v4539_v56, 16 }
  0x2b   : > { %v2172_v13 = vpack.c.b16 %v2143_v0, %v2142_v59  ;;  %v413_v14 = vrot.slane %v411_v5, 5  ;;  %v427_v15 = vshll.u32 %v4544_v62, 16  ;;  %v360_v17 = vshrl.u32 %v242_v63, 16 }
  0x2c   : > { %v310_v18 = vsel %vm4521_vm2, %v305_v6, %v309_v61  ;;  %v419_v19 = vrot.slane %v417_v8, 5  ;;  %v423_v20 = vrot.slane %v421_v11, 4  ;;  %v363_v21 = vshll.u32 %v242_v63, 16  ;;  %v4584_v61 = vld [vmem:[%s4493_s7 + $0x64] sm:$0xf] }
  0x2d   : > { %2190 = vrot.lane.b32.xlu1 %v2172_v13, %s4396_s8  ;;  %v2139_v23 = vunpack.c.l.b16 %v310_v18  ;;  %v414_v24 = vor.u32 %v413_v14, %v410_v4  ;;  %v429_v27 = vrot.slane %v427_v15, 5  ;;  %v362_v28 = vrot.slane %v360_v17, 4  ;;  %v4587_v6 = vld [vmem:[%s4493_s7 + $0x68] sm:$0x1] }
  0x2e   : > { %v424_v29 = vor.u32 %v423_v20, %v419_v19  ;;  %v365_v30 = vrot.slane %v363_v21, 5  ;;  %v369_v31 = vshll.u32 %v4553_v12, 16  ;;  %v373_v32 = vshrl.u32 %v4553_v12, 16 }
  0x2f   : > { %v2170_v33 = vpack.c.b16 %v2139_v23, %v2138_v7  ;;  %v415_v34 = vrot.slane %v414_v24, 4  ;;  %v379_v35 = vshll.u32 %v4557_v16, 16  ;;  %v312_v38 = vshrl.u32 %v238_v22, 16  ;;  %v250_v7 = vld [vmem:[%s4493_s7 + $0x54] sm:$0xf] }
  0x30   : > { %v425_v39 = vrot.slane %v424_v29, 4  ;;  %v366_v40 = vor.u32 %v365_v30, %v362_v28  ;;  %v371_v41 = vrot.slane %v369_v31, 5  ;;  %v375_v42 = vrot.slane %v373_v32, 4  ;;  %v4597_v23 = vld [vmem:[%s4493_s7 + $0x58] sm:$0xf] }
  0x31   : > { %2186 = vrot.lane.b32.xlu0 %v2170_v33, %s4396_s8  ;;  %v420_v44 = vsel %vm4521_vm2, %v415_v34, %v419_v19  ;;  %v381_v45 = vrot.slane %v379_v35, 5  ;;  %v314_v46 = vrot.slane %v312_v38, 4  ;;  %v315_v47 = vshll.u32 %v238_v22, 16  ;;  %v4602_v31 = vld [vmem:[%s4493_s7 + $0x5c] sm:$0x1] }
  0x32   : > { %v430_v49 = vsel %vm4521_vm2, %v425_v39, %v429_v27  ;;  %v2148_v50 = vunpack.c.l.b16 %v420_v44  ;;  %v367_v51 = vrot.slane %v366_v40, 4  ;;  %v376_v52 = vor.u32 %v375_v42, %v371_v41  ;;  %v248_v42 = vld [vmem:[%s4493_s7 + $0x48] sm:$0xf] }
  0x33   : > { %v2149_v53 = vunpack.c.l.b16 %v430_v49  ;;  %v317_v54 = vrot.slane %v315_v47, 5  ;;  %v321_v55 = vshll.u32 %v4567_v37, 16  ;;  %v325_v57 = vshrl.u32 %v4567_v37, 16 }
  0x34   : > { %v372_v58 = vsel %vm4521_vm2, %v367_v51, %v371_v41  ;;  %v377_v59 = vrot.slane %v376_v52, 4  ;;  %v331_v60 = vshll.u32 %v4570_v43, 16  ;;  %v480_v63 = vshrl.u32 %v252_v48, 16 }
  0x35   : > { %v2175_v0 = vpack.c.b16 %v2149_v53, %v2148_v50  ;;  %v2144_v3 = vunpack.c.l.b16 %v372_v58  ;;  %v318_v4 = vor.u32 %v317_v54, %v314_v46  ;;  %v323_v5 = vrot.slane %v321_v55, 5  ;;  %v4612_v55 = vld [vmem:[%s4493_s7 + $0x4c] sm:$0xf] }
  0x36   : > { %v382_v8 = vsel %vm4521_vm2, %v377_v59, %v381_v45  ;;  %v327_v11 = vrot.slane %v325_v57, 4  ;;  %v333_v13 = vrot.slane %v331_v60, 5  ;;  %v482_v14 = vrot.slane %v480_v63, 4  ;;  %v4617_v63 = vld [vmem:[%s4493_s7 + $0x50] sm:$0x1] }
  0x37   : > { %2196 = vrot.lane.b32.xlu2 %v2175_v0, %s4396_s8  ;;  %v2145_v15 = vunpack.c.l.b16 %v382_v8  ;;  %v319_v17 = vrot.slane %v318_v4, 4  ;;  %v483_v18 = vshll.u32 %v252_v48, 16  ;;  %v489_v19 = vshll.u32 %v4584_v61, 16 }
  0x38   : > { %v328_v20 = vor.u32 %v327_v11, %v323_v5  ;;  %v493_v21 = vshrl.u32 %v4584_v61, 16  ;;  %v499_v22 = vshll.u32 %v4587_v6, 16  ;;  %v456_v24 = vshrl.u32 %v250_v7, 16 }
  0x39   : > { %v2173_v27 = vpack.c.b16 %v2145_v15, %v2144_v3  ;;  %v324_v28 = vsel %vm4521_vm2, %v319_v17, %v323_v5  ;;  %v485_v29 = vrot.slane %v483_v18, 5  ;;  %v491_v30 = vrot.slane %v489_v19, 5  ;;  %v258_v3 = vld [vmem:[%s4493_s7 + $0x84] sm:$0xf] }
  0x3a   : > { %v329_v32 = vrot.slane %v328_v20, 4  ;;  %v2140_v33 = vunpack.c.l.b16 %v324_v28  ;;  %v495_v34 = vrot.slane %v493_v21, 4  ;;  %v501_v35 = vrot.slane %v499_v22, 5  ;;  %v4629_v28 = vld [vmem:[%s4493_s7 + $0x88] sm:$0xf] }
  0x3b   : > { %2192 = vrot.lane.b32.xlu1 %v2173_v27, %s4396_s8  ;;  %v486_v38 = vor.u32 %v485_v29, %v482_v14  ;;  %v458_v39 = vrot.slane %v456_v24, 4  ;;  %v459_v40 = vshll.u32 %v250_v7, 16  ;;  %v465_v41 = vshll.u32 %v4597_v23, 16  ;;  %v4632_v29 = vld [vmem:[%s4493_s7 + $0x8c] sm:$0x1] }
  0x3c   : > { %v334_v44 = vsel %vm4521_vm2, %v329_v32, %v333_v13  ;;  %v496_v45 = vor.u32 %v495_v34, %v491_v30  ;;  %v469_v46 = vshrl.u32 %v4597_v23, 16  ;;  %v475_v47 = vshll.u32 %v4602_v31, 16 }
  0x3d   : > { %v2141_v48 = vunpack.c.l.b16 %v334_v44  ;;  %v487_v49 = vrot.slane %v486_v38, 4  ;;  %v461_v50 = vrot.slane %v459_v40, 5  ;;  %v467_v51 = vrot.slane %v465_v41, 5 }
  0x3e   : > { %v497_v52 = vrot.slane %v496_v45, 4  ;;  %v471_v53 = vrot.slane %v469_v46, 4  ;;  %v477_v54 = vrot.slane %v475_v47, 5  ;;  %v432_v57 = vshrl.u32 %v248_v42, 16 }
  0x3f   : > { %v2171_v58 = vpack.c.b16 %v2141_v48, %v2140_v33  ;;  %v492_v59 = vsel %vm4521_vm2, %v487_v49, %v491_v30  ;;  %v462_v60 = vor.u32 %v461_v50, %v458_v39  ;;  %v435_v0 = vshll.u32 %v248_v42, 16  ;;  %v4644_v50 = vld [vmem:[%s4493_s7 + $0x7c] sm:$0xf] }
  0x40   : > { %v502_v4 = vsel %vm4521_vm2, %v497_v52, %v501_v35  ;;  %v2154_v5 = vunpack.c.l.b16 %v492_v59  ;;  %v472_v7 = vor.u32 %v471_v53, %v467_v51  ;;  %v434_v8 = vrot.slane %v432_v57, 4  ;;  %v256_v35 = vld [vmem:[%s4493_s7 + $0x78] sm:$0xf] }
  0x41   : > { %2188 = vrot.lane.b32.xlu0 %v2171_v58, %s4396_s8  ;;  %v2155_v11 = vunpack.c.l.b16 %v502_v4  ;;  %v463_v13 = vrot.slane %v462_v60, 4  ;;  %v437_v14 = vrot.slane %v435_v0, 5  ;;  %v441_v15 = vshll.u32 %v4612_v55, 16  ;;  %v4647_v58 = vld [vmem:[%s4493_s7 + $0x80] sm:$0x1] }
  0x42   : > { %v473_v17 = vrot.slane %v472_v7, 4  ;;  %v445_v18 = vshrl.u32 %v4612_v55, 16  ;;  %v451_v19 = vshll.u32 %v4617_v63, 16  ;;  %v552_v20 = vshrl.u32 %v258_v3, 16  ;;  %v254_v4 = vld [vmem:[%s4493_s7 + $0x6c] sm:$0xf] }
  0x43   : > { %v2178_v21 = vpack.c.b16 %v2155_v11, %v2154_v5  ;;  %v468_v22 = vsel %vm4521_vm2, %v463_v13, %v467_v51  ;;  %v438_v24 = vor.u32 %v437_v14, %v434_v8  ;;  %v443_v27 = vrot.slane %v441_v15, 5 }
  0x44   : > { %v478_v30 = vsel %vm4521_vm2, %v473_v17, %v477_v54  ;;  %v2152_v32 = vunpack.c.l.b16 %v468_v22  ;;  %v447_v33 = vrot.slane %v445_v18, 4  ;;  %v453_v34 = vrot.slane %v451_v19, 5 }
  0x45   : > { %2202 = vrot.lane.b32.xlu2 %v2178_v21, %s4396_s8  ;;  %v2153_v38 = vunpack.c.l.b16 %v478_v30  ;;  %v439_v39 = vrot.slane %v438_v24, 4  ;;  %v554_v40 = vrot.slane %v552_v20, 4  ;;  %v555_v41 = vshll.u32 %v258_v3, 16  ;;  %v4657_v21 = vld [vmem:[%s4493_s7 + $0x70] sm:$0xf] }
  0x46   : > { %v448_v42 = vor.u32 %v447_v33, %v443_v27  ;;  %v561_v44 = vshll.u32 %v4629_v28, 16  ;;  %v565_v45 = vshrl.u32 %v4629_v28, 16  ;;  %v571_v46 = vshll.u32 %v4632_v29, 16  ;;  %v4662_v33 = vld [vmem:[%s4493_s7 + $0x74] sm:$0x1] }
  0x47   : > { %v2177_v47 = vpack.c.b16 %v2153_v38, %v2152_v32  ;;  %v444_v48 = vsel %vm4521_vm2, %v439_v39, %v443_v27  ;;  %v557_v49 = vrot.slane %v555_v41, 5  ;;  %v528_v51 = vshrl.u32 %v256_v35, 16 }
  0x48   : > { %v449_v52 = vrot.slane %v448_v42, 4  ;;  %v2150_v53 = vunpack.c.l.b16 %v444_v48  ;;  %v563_v54 = vrot.slane %v561_v44, 5  ;;  %v567_v57 = vrot.slane %v565_v45, 4 }
  0x49   : > { %2200 = vrot.lane.b32.xlu1 %v2177_v47, %s4396_s8  ;;  %v558_v59 = vor.u32 %v557_v49, %v554_v40  ;;  %v573_v60 = vrot.slane %v571_v46, 5  ;;  %v530_v0 = vrot.slane %v528_v51, 4  ;;  %v531_v3 = vshll.u32 %v256_v35, 16 }
  0x4a   : > { %v454_v5 = vsel %vm4521_vm2, %v449_v52, %v453_v34  ;;  %v568_v7 = vor.u32 %v567_v57, %v563_v54  ;;  %v537_v8 = vshll.u32 %v4644_v50, 16  ;;  %v541_v11 = vshrl.u32 %v4644_v50, 16  ;;  %v264_v34 = vld [vmem:[%s4493_s7 + $0xa8] sm:$0xf]  ;;  %v4674_v57 = vld [vmem:[%s4493_s7 + $0xac] sm:$0xf] }
  0x4b   : > { %v2151_v13 = vunpack.c.l.b16 %v454_v5  ;;  %v559_v14 = vrot.slane %v558_v59, 4  ;;  %v533_v15 = vrot.slane %v531_v3, 5  ;;  %v547_v17 = vshll.u32 %v4647_v58, 16  ;;  %v4677_v59 = vld [vmem:[%s4493_s7 + $0xb0] sm:$0x1] }
  0x4c   : > { %v569_v18 = vrot.slane %v568_v7, 4  ;;  %v539_v19 = vrot.slane %v537_v8, 5  ;;  %v543_v20 = vrot.slane %v541_v11, 4  ;;  %v504_v22 = vshrl.u32 %v254_v4, 16  ;;  %v262_v5 = vld [vmem:[%s4493_s7 + $0x9c] sm:$0xf] }
  0x4d   : > { %v2176_v24 = vpack.c.b16 %v2151_v13, %v2150_v53  ;;  %v564_v27 = vsel %vm4521_vm2, %v559_v14, %v563_v54  ;;  %v534_v30 = vor.u32 %v533_v15, %v530_v0  ;;  %v549_v32 = vrot.slane %v547_v17, 5 }
  0x4e   : > { %v574_v35 = vsel %vm4521_vm2, %v569_v18, %v573_v60  ;;  %v2160_v38 = vunpack.c.l.b16 %v564_v27  ;;  %v544_v39 = vor.u32 %v543_v20, %v539_v19  ;;  %v506_v40 = vrot.slane %v504_v22, 4 }
  0x4f   : > { %2198 = vrot.lane.b32.xlu0 %v2176_v24, %s4396_s8  ;;  %v2161_v41 = vunpack.c.l.b16 %v574_v35  ;;  %v535_v42 = vrot.slane %v534_v30, 4  ;;  %v507_v44 = vshll.u32 %v254_v4, 16  ;;  %v513_v45 = vshll.u32 %v4657_v21, 16  ;;  %v4687_v24 = vld [vmem:[%s4493_s7 + $0xa0] sm:$0xf] }
  0x50   : > { %v545_v46 = vrot.slane %v544_v39, 4  ;;  %v517_v47 = vshrl.u32 %v4657_v21, 16  ;;  %v523_v48 = vshll.u32 %v4662_v33, 16  ;;  %v624_v49 = vshrl.u32 %v264_v34, 16 }
  0x51   : > { %v2181_v51 = vpack.c.b16 %v2161_v41, %v2160_v38  ;;  %v540_v52 = vsel %vm4521_vm2, %v535_v42, %v539_v19  ;;  %v509_v53 = vrot.slane %v507_v44, 5  ;;  %v515_v54 = vrot.slane %v513_v45, 5  ;;  %v260_v44 = vld [vmem:[%s4493_s7 + $0x90] sm:$0xf] }
  0x52   : > { %v550_v60 = vsel %vm4521_vm2, %v545_v46, %v549_v32  ;;  %v2158_v0 = vunpack.c.l.b16 %v540_v52  ;;  %v519_v3 = vrot.slane %v517_v47, 4  ;;  %v525_v4 = vrot.slane %v523_v48, 5 }
  0x53   : > { %2208 = vrot.lane.b32.xlu2 %v2181_v51, %s4396_s8  ;;  %v2159_v7 = vunpack.c.l.b16 %v550_v60  ;;  %v510_v8 = vor.u32 %v509_v53, %v506_v40  ;;  %v626_v11 = vrot.slane %v624_v49, 4  ;;  %v627_v13 = vshll.u32 %v264_v34, 16  ;;  %v4693_v40 = vld [vmem:[%s4493_s7 + $0xa4] sm:$0x1] }
  0x54   : > { %v520_v14 = vor.u32 %v519_v3, %v515_v54  ;;  %v633_v15 = vshll.u32 %v4674_v57, 16  ;;  %v637_v17 = vshrl.u32 %v4674_v57, 16  ;;  %v643_v18 = vshll.u32 %v4677_v59, 16 }
  0x55   : > { %v2180_v19 = vpack.c.b16 %v2159_v7, %v2158_v0  ;;  %v511_v20 = vrot.slane %v510_v8, 4  ;;  %v629_v22 = vrot.slane %v627_v13, 5  ;;  %v600_v27 = vshrl.u32 %v262_v5, 16  ;;  %v4707_v13 = vld [vmem:[%s4493_s7 + $0x98] sm:$0x1] }
  0x56   : > { %v521_v30 = vrot.slane %v520_v14, 4  ;;  %v635_v32 = vrot.slane %v633_v15, 5  ;;  %v639_v35 = vrot.slane %v637_v17, 4  ;;  %v645_v38 = vrot.slane %v643_v18, 5 }
  0x57   : > { %2206 = vrot.lane.b32.xlu1 %v2180_v19, %s4396_s8  ;;  %v516_v34 = vsel %vm4521_vm2, %v511_v20, %v515_v54  ;;  %v630_v39 = vor.u32 %v629_v22, %v626_v11  ;;  %v602_v41 = vrot.slane %v600_v27, 4  ;;  %v603_v42 = vshll.u32 %v262_v5, 16  ;;  %v4704_v11 = vld [vmem:[%s4493_s7 + $0x94] sm:$0xf] }
  0x58   : > { %v526_v45 = vsel %vm4521_vm2, %v521_v30, %v525_v4  ;;  %v2156_v46 = vunpack.c.l.b16 %v516_v34  ;;  %v640_v47 = vor.u32 %v639_v35, %v635_v32  ;;  %v609_v48 = vshll.u32 %v4687_v24, 16  ;;  %v672_v34 = vld [vmem:[%s4493_s7 + $0xc] sm:$0xe] }
  0x59   : > { %v2157_v49 = vunpack.c.l.b16 %v526_v45  ;;  %v631_v51 = vrot.slane %v630_v39, 4  ;;  %v605_v52 = vrot.slane %v603_v42, 5  ;;  %v613_v53 = vshrl.u32 %v4687_v24, 16 }
  0x5a   : > { %v641_v54 = vrot.slane %v640_v47, 4  ;;  %v611_v60 = vrot.slane %v609_v48, 5  ;;  %v619_v0 = vshll.u32 %v4693_v40, 16  ;;  %v576_v3 = vshrl.u32 %v260_v44, 16 }
  0x5b   : > { %v2179_v5 = vpack.c.b16 %v2157_v49, %v2156_v46  ;;  %v636_v4 = vsel %vm4521_vm2, %v631_v51, %v635_v32  ;;  %v606_v7 = vor.u32 %v605_v52, %v602_v41  ;;  %v615_v8 = vrot.slane %v613_v53, 4  ;;  %v671_v49 = vld [vmem:[%s4493_s7] sm:$0xe] }
  0x5c   : > { %v646_v14 = vsel %vm4521_vm2, %v641_v54, %v645_v38  ;;  %v2166_v15 = vunpack.c.l.b16 %v636_v4  ;;  %v621_v17 = vrot.slane %v619_v0, 5  ;;  %v578_v18 = vrot.slane %v576_v3, 4 }
  0x5d   : > { %2204 = vrot.lane.b32.xlu0 %v2179_v5, %s4396_s8  ;;  %v2167_v19 = vunpack.c.l.b16 %v646_v14  ;;  %v607_v20 = vrot.slane %v606_v7, 4  ;;  %v616_v22 = vor.u32 %v615_v8, %v611_v60  ;;  %v579_v27 = vshll.u32 %v260_v44, 16 }
  0x5e   : > { %v585_v30 = vshll.u32 %v4704_v11, 16  ;;  %v589_v32 = vshrl.u32 %v4704_v11, 16  ;;  %v595_v35 = vshll.u32 %v4707_v13, 16  ;;  %v3673_v52 = vrot.slane %v672_v34, 9 }
  0x5f   : > { %v2184_v39 = vpack.c.b16 %v2167_v19, %v2166_v15  ;;  %v612_v38 = vsel %vm4521_vm2, %v607_v20, %v611_v60  ;;  %v617_v41 = vrot.slane %v616_v22, 4  ;;  %v581_v42 = vrot.slane %v579_v27, 5  ;;  %v266_v19 = vld [vmem:[%s4493_s7 + $0xb4] sm:$0xf] }
  0x60   : > { %v2164_v45 = vunpack.c.l.b16 %v612_v38  ;;  %v587_v46 = vrot.slane %v585_v30, 5  ;;  %v591_v47 = vrot.slane %v589_v32, 4  ;;  %v597_v48 = vrot.slane %v595_v35, 5  ;;  %v4747_v35 = vld [vmem:[%s4493_s7 + $0xbc] sm:$0x1] }
  0x61   : > { %2214 = vrot.lane.b32.xlu2 %v2184_v39, %s4396_s8  ;;  %v622_v44 = vsel %vm4521_vm2, %v617_v41, %v621_v17  ;;  %v582_v51 = vor.u32 %v581_v42, %v578_v18  ;;  %v747_v0 = vrot.slane %v4567_v37, 5  ;;  %v750_v3 = vrot.slane %v4570_v43, 5 }
  0x62   : > { %v2165_v53 = vunpack.c.l.b16 %v622_v44  ;;  %v592_v54 = vor.u32 %v591_v47, %v587_v46  ;;  %v3672_v4 = vrot.slane %v671_v49, 9  ;;  %v740_v7 = vrot.slane %v4517_v25, 5  ;;  %v4739_v25 = vld [vmem:[%s4493_s7 + $0xb8] sm:$0xf] }
  0x63   : > { %v583_v5 = vrot.slane %v582_v51, 4  ;;  %v743_v8 = vrot.slane %v4526_v36, 5  ;;  %v748_v17 = vsel %vm4723_vm5, %v3673_v52, %v747_v0  ;;  %v749_v18 = vrot.slane %v747_v0, 4 }
  0x64   : > { %v2183_v14 = vpack.c.b16 %v2165_v53, %v2164_v45  ;;  %v593_v15 = vrot.slane %v592_v54, 4  ;;  %v2220_v37 = vunpack.c.l.b16 %v748_v17  ;;  %v741_v43 = vsel %vm4723_vm5, %v3672_v4, %v740_v7  ;;  %v674_v53 = vld [vmem:[%s4493_s7 + $0x24] sm:$0xe]  ;;  %v673_v4 = vld [vmem:[%s4493_s7 + $0x18] sm:$0xe] }
  0x65   : > { %v588_v20 = vsel %vm4521_vm2, %v583_v5, %v587_v46  ;;  %v742_v22 = vrot.slane %v740_v7, 4  ;;  %v751_v30 = vsel %vm4723_vm5, %v749_v18, %v750_v3  ;;  %v2218_v32 = vunpack.c.l.b16 %v741_v43 }
  0x66   : > { %2212 = vrot.lane.b32.xlu1 %v2183_v14, %s4396_s8  ;;  %v598_v36 = vsel %vm4521_vm2, %v593_v15, %v597_v48  ;;  %v2162_v27 = vunpack.c.l.b16 %v588_v20  ;;  %v2221_v39 = vunpack.c.l.b16 %v751_v30  ;;  %v648_v41 = vshrl.u32 %v266_v19, 16  ;;  %v675_v48 = vld [vmem:[%s4493_s7 + $0x30] sm:$0xe] }
  0x67   : > { %v2163_v34 = vunpack.c.l.b16 %v598_v36  ;;  %v744_v38 = vsel %vm4723_vm5, %v742_v22, %v743_v8  ;;  %v651_v45 = vshll.u32 %v266_v19, 16  ;;  %v657_v46 = vshll.u32 %v4739_v25, 16 }
  0x68   : > { %v2219_v42 = vunpack.c.l.b16 %v744_v38  ;;  %v661_v47 = vshrl.u32 %v4739_v25, 16  ;;  %v2251_v44 = vpack.c.b16 %v2221_v39, %v2220_v37  ;;  %v650_v51 = vrot.slane %v648_v41, 4 }
  0x69   : > { %v2182_v49 = vpack.c.b16 %v2163_v34, %v2162_v27  ;;  %v667_v52 = vshll.u32 %v4747_v35, 16  ;;  %v653_v0 = vrot.slane %v651_v45, 5  ;;  %v659_v3 = vrot.slane %v657_v46, 5  ;;  %v678_v45 = vld [vmem:[%s4493_s7 + $0x54] sm:$0xe] }
  0x6a   : > { %v2250_v54 = vpack.c.b16 %v2219_v42, %v2218_v32  ;;  %v663_v5 = vrot.slane %v661_v47, 4  ;;  %2268 = vrot.lane.b32.xlu2 %v2251_v44, %s4397_s9  ;;  %v3676_v8 = vrot.slane %v675_v48, 9  ;;  %v768_v14 = vrot.slane %v4497_v1, 5 }
  0x6b   : > { %2210 = vrot.lane.b32.xlu0 %v2182_v49, %s4396_s8  ;;  %v669_v7 = vrot.slane %v667_v52, 5  ;;  %v771_v15 = vrot.slane %v4500_v2, 5  ;;  %v654_v17 = vor.u32 %v653_v0, %v650_v51  ;;  %v3675_v19 = vrot.slane %v674_v53, 9 }
  0x6c   : > { %v664_v18 = vor.u32 %v663_v5, %v659_v3  ;;  %v761_v20 = vrot.slane %v4553_v12, 5  ;;  %v769_v37 = vsel %vm4723_vm5, %v3676_v8, %v768_v14  ;;  %v770_v43 = vrot.slane %v768_v14, 4  ;;  %v676_v5 = vld [vmem:[%s4493_s7 + $0x3c] sm:$0xe] }
  0x6d   : > { %v764_v22 = vrot.slane %v4557_v16, 5  ;;  %v3674_v36 = vrot.slane %v673_v4, 9  ;;  %v655_v27 = vrot.slane %v654_v17, 4  ;;  %v2226_v1 = vunpack.c.l.b16 %v769_v37 }
  0x6e   : > { %2266 = vrot.lane.b32.xlu1 %v2250_v54, %s4397_s9  ;;  %v665_v30 = vrot.slane %v664_v18, 4  ;;  %v762_v2 = vsel %vm4723_vm5, %v3675_v19, %v761_v20  ;;  %v772_v12 = vsel %vm4723_vm5, %v770_v43, %v771_v15  ;;  %v763_v32 = vrot.slane %v761_v20, 4  ;;  %v681_v18 = vld [vmem:[%s4493_s7 + $0x78] sm:$0xe] }
  0x6f   : > { %v2224_v34 = vunpack.c.l.b16 %v762_v2  ;;  %v754_v39 = vrot.slane %v4507_v9, 5  ;;  %v660_v16 = vsel %vm4521_vm2, %v655_v27, %v659_v3  ;;  %v2227_v41 = vunpack.c.l.b16 %v772_v12  ;;  %v677_v9 = vld [vmem:[%s4493_s7 + $0x48] sm:$0xe] }
  0x70   : > { %v670_v38 = vsel %vm4521_vm2, %v665_v30, %v669_v7  ;;  %v757_v42 = vrot.slane %v4510_v10, 5  ;;  %v2168_v46 = vunpack.c.l.b16 %v660_v16  ;;  %v765_v48 = vsel %vm4723_vm5, %v763_v32, %v764_v22  ;;  %v680_v30 = vld [vmem:[%s4493_s7 + $0x6c] sm:$0xe] }
  0x71   : > { %v2169_v47 = vunpack.c.l.b16 %v670_v38  ;;  %v755_v49 = vsel %vm4723_vm5, %v3674_v36, %v754_v39  ;;  %v2254_v44 = vpack.c.b16 %v2227_v41, %v2226_v1  ;;  %v2225_v51 = vunpack.c.l.b16 %v765_v48 }
  0x72   : > { %v756_v52 = vrot.slane %v754_v39, 4  ;;  %v2222_v53 = vunpack.c.l.b16 %v755_v49  ;;  %v3679_v0 = vrot.slane %v678_v45, 9  ;;  %v789_v3 = vrot.slane %v4597_v23, 5 }
  0x73   : > { %v2185_v54 = vpack.c.b16 %v2169_v47, %v2168_v46  ;;  %v792_v10 = vrot.slane %v4602_v31, 5  ;;  %2274 = vrot.lane.b32.xlu2 %v2254_v44, %s4397_s9  ;;  %v2253_v4 = vpack.c.b16 %v2225_v51, %v2224_v34  ;;  %v3678_v8 = vrot.slane %v677_v9, 9 }
  0x74   : > { %v758_v7 = vsel %vm4723_vm5, %v756_v52, %v757_v42  ;;  %v782_v14 = vrot.slane %v4612_v55, 5  ;;  %v790_v17 = vsel %vm4723_vm5, %v3679_v0, %v789_v3  ;;  %v791_v23 = vrot.slane %v789_v3, 4  ;;  %v679_v42 = vld [vmem:[%s4493_s7 + $0x60] sm:$0xe]  ;;  %v683_v3 = vld [vmem:[%s4493_s7 + $0x90] sm:$0xe] }
  0x75   : > { %2216 = vrot.lane.b32.xlu0 %v2185_v54, %s4396_s8  ;;  %v2223_v15 = vunpack.c.l.b16 %v758_v7  ;;  %v785_v31 = vrot.slane %v4617_v63, 5  ;;  %v2232_v19 = vunpack.c.l.b16 %v790_v17  ;;  %v3677_v43 = vrot.slane %v676_v5, 9 }
  0x76   : > { %2272 = vrot.lane.b32.xlu1 %v2253_v4, %s4397_s9  ;;  %v783_v20 = vsel %vm4723_vm5, %v3678_v8, %v782_v14  ;;  %v784_v37 = vrot.slane %v782_v14, 4  ;;  %v793_v22 = vsel %vm4723_vm5, %v791_v23, %v792_v10  ;;  %v775_v27 = vrot.slane %v4539_v56, 5 }
  0x77   : > { %v2252_v55 = vpack.c.b16 %v2223_v15, %v2222_v53  ;;  %v2230_v36 = vunpack.c.l.b16 %v783_v20  ;;  %v2233_v1 = vunpack.c.l.b16 %v793_v22  ;;  %v778_v2 = vrot.slane %v4544_v62, 5  ;;  %v682_v15 = vld [vmem:[%s4493_s7 + $0x84] sm:$0xe] }
  0x78   : > { %v786_v63 = vsel %vm4723_vm5, %v784_v37, %v785_v31  ;;  %v3682_v12 = vrot.slane %v681_v18, 9  ;;  %v776_v34 = vsel %vm4723_vm5, %v3677_v43, %v775_v27  ;;  %v777_v39 = vrot.slane %v775_v27, 4 }
  0x79   : > { %v2231_v32 = vunpack.c.l.b16 %v786_v63  ;;  %v810_v16 = vrot.slane %v4644_v50, 5  ;;  %v2257_v38 = vpack.c.b16 %v2233_v1, %v2232_v19  ;;  %v813_v41 = vrot.slane %v4647_v58, 5  ;;  %v684_v58 = vld [vmem:[%s4493_s7 + $0x9c] sm:$0xe] }
  0x7a   : > { %v3681_v56 = vrot.slane %v680_v30, 9  ;;  %v779_v46 = vsel %vm4723_vm5, %v777_v39, %v778_v2  ;;  %v2228_v48 = vunpack.c.l.b16 %v776_v34  ;;  %v803_v50 = vrot.slane %v4657_v21, 5 }
  0x7b   : > { %v2256_v45 = vpack.c.b16 %v2231_v32, %v2230_v36  ;;  %v811_v62 = vsel %vm4723_vm5, %v3682_v12, %v810_v16  ;;  %v812_v47 = vrot.slane %v810_v16, 4  ;;  %2280 = vrot.lane.b32.xlu2 %v2257_v38, %s4397_s9  ;;  %v806_v9 = vrot.slane %v4662_v33, 5  ;;  %v686_v36 = vld [vmem:[%s4493_s7 + $0xb4] sm:$0xe] }
  0x7c   : > { %v2238_v49 = vunpack.c.l.b16 %v811_v62  ;;  %v2229_v44 = vunpack.c.l.b16 %v779_v46  ;;  %v3680_v52 = vrot.slane %v679_v42, 9  ;;  %v796_v53 = vrot.slane %v4584_v61, 5 }
  0x7d   : > { %2270 = vrot.lane.b32.xlu0 %v2252_v55, %s4397_s9  ;;  %v814_v51 = vsel %vm4723_vm5, %v812_v47, %v813_v41  ;;  %v804_v0 = vsel %vm4723_vm5, %v3681_v56, %v803_v50  ;;  %v805_v21 = vrot.slane %v803_v50, 4  ;;  %v799_v33 = vrot.slane %v4587_v6, 5 }
  0x7e   : > { %2278 = vrot.lane.b32.xlu1 %v2256_v45, %s4397_s9  ;;  %v2239_v54 = vunpack.c.l.b16 %v814_v51  ;;  %v2236_v10 = vunpack.c.l.b16 %v804_v0  ;;  %v798_v5 = vrot.slane %v796_v53, 4  ;;  %v3685_v4 = vrot.slane %v684_v58, 9 }
  0x7f   : > { %v807_v8 = vsel %vm4723_vm5, %v805_v21, %v806_v9  ;;  %v797_v61 = vsel %vm4723_vm5, %v3680_v52, %v796_v53  ;;  %v831_v14 = vrot.slane %v4687_v24, 5  ;;  %v2255_v17 = vpack.c.b16 %v2229_v44, %v2228_v48  ;;  %v685_v48 = vld [vmem:[%s4493_s7 + $0xa8] sm:$0xe]  ;;  %v4085_v53 = vld [vmem:[%s4493_s7 + $0xc] sm:$0xff] }
  0x80   : > { %v2260_v7 = vpack.c.b16 %v2239_v54, %v2238_v49  ;;  %v2237_v23 = vunpack.c.l.b16 %v807_v8  ;;  %v834_v31 = vrot.slane %v4693_v40, 5  ;;  %v3684_v6 = vrot.slane %v683_v3, 9  ;;  %v4088_v3 = vld [vmem:[%s4493_s7 + $0x30] sm:$0xff]  ;;  %v4074_v8 = vld [vmem:[%s4493_s7 + $0x3c] sm:$0xff] }
  0x81   : > { %v800_v18 = vsel %vm4723_vm5, %v798_v5, %v799_v33  ;;  %v832_v19 = vsel %vm4723_vm5, %v3685_v4, %v831_v14  ;;  %v833_v20 = vrot.slane %v831_v14, 4  ;;  %v824_v37 = vrot.slane %v4704_v11, 5  ;;  %v4087_v4 = vld [vmem:[%s4493_s7 + $0x24] sm:$0xff] }
  0x82   : > { %v2259_v43 = vpack.c.b16 %v2237_v23, %v2236_v10  ;;  %v2234_v55 = vunpack.c.l.b16 %v797_v61  ;;  %v827_v22 = vrot.slane %v4707_v13, 5  ;;  %v3683_v24 = vrot.slane %v682_v15, 9  ;;  %v4077_v61 = vld [vmem:[%s4493_s7 + $0x60] sm:$0xff]  ;;  %v4885_v15 = vld [vmem:[%s4493_s7 + $0x28] sm:$0xf] }
  0x83   : > { %2286 = vrot.lane.b32.xlu2 %v2260_v7, %s4397_s9  ;;  %v835_v40 = vsel %vm4723_vm5, %v833_v20, %v834_v31  ;;  %v2244_v27 = vunpack.c.l.b16 %v832_v19  ;;  %v825_v30 = vsel %vm4723_vm5, %v3684_v6, %v824_v37  ;;  %v826_v1 = vrot.slane %v824_v37, 4  ;;  %v2195_v52 = vpop.permute.xlu2 %2194  ;;  %v4073_v7 = vld [vmem:[%s4493_s7 + $0x30] sm:$0xff]  ;;  %v3692_v14 = vld [vmem:[%s4493_s7 + $0x24] sm:$0xf]  ;;  %v4071_v6 = vld [vmem:[%s4493_s7 + $0x18] sm:$0xff] }
  0x84   : > { %v2235_v63 = vunpack.c.l.b16 %v800_v18  ;;  %v2245_v11 = vunpack.c.l.b16 %v835_v40  ;;  %v817_v2 = vrot.slane %v4629_v28, 5  ;;  %v820_v13 = vrot.slane %v4632_v29, 5  ;;  %v4091_v31 = vld [vmem:[%s4493_s7 + $0x54] sm:$0xff]  ;;  %v4894_v20 = vld [vmem:[%s4493_s7 + $0x1c] sm:$0xf] }
  0x85   : > { %2276 = vrot.lane.b32.xlu0 %v2255_v17, %s4397_s9  ;;  %v828_v12 = vsel %vm4723_vm5, %v826_v1, %v827_v22  ;;  %v2242_v32 = vunpack.c.l.b16 %v825_v30  ;;  %v3687_v34 = vrot.slane %v686_v36, 9  ;;  %v845_v39 = vrot.slane %v4739_v25, 5  ;;  %v3690_v17 = vld [vmem:[%s4493_s7 + $0x18] sm:$0xf] }
  0x86   : > { %2284 = vrot.lane.b32.xlu1 %v2259_v43, %s4397_s9  ;;  %v2243_v16 = vunpack.c.l.b16 %v828_v12  ;;  %v818_v38 = vsel %vm4723_vm5, %v3683_v24, %v817_v2  ;;  %v819_v41 = vrot.slane %v817_v2, 4  ;;  %v848_v56 = vrot.slane %v4747_v35, 5  ;;  %v4086_v37 = vld [vmem:[%s4493_s7 + $0x18] sm:$0xff]  ;;  %v4090_v43 = vld [vmem:[%s4493_s7 + $0x48] sm:$0xff] }
  0x87   : > { %v2263_v28 = vpack.c.b16 %v2245_v11, %v2244_v27  ;;  %v2240_v42 = vunpack.c.l.b16 %v818_v38  ;;  %v847_v29 = vrot.slane %v845_v39, 4  ;;  %v2258_v45 = vpack.c.b16 %v2235_v63, %v2234_v55  ;;  %v3688_v11 = vld [vmem:[%s4493_s7 + $0xc] sm:$0xf] }
  0x88   : > { %v821_v46 = vsel %vm4723_vm5, %v819_v41, %v820_v13  ;;  %v2262_v62 = vpack.c.b16 %v2243_v16, %v2242_v32  ;;  %v838_v25 = vrot.slane %v4674_v57, 5  ;;  %v846_v49 = vsel %vm4723_vm5, %v3687_v34, %v845_v39  ;;  %v4910_v32 = vld [vmem:[%s4493_s7 + $0x2c] sm:$0x1]  ;;  %v4913_v16 = vld [vmem:[%s4493_s7 + $0x20] sm:$0x1] }
  0x89   : > { %v2241_v47 = vunpack.c.l.b16 %v821_v46  ;;  %v849_v50 = vsel %vm4723_vm5, %v847_v29, %v848_v56  ;;  %v3686_v9 = vrot.slane %v685_v48, 9  ;;  %v2248_v58 = vunpack.c.l.b16 %v846_v49 }
  0x8a   : > { %v2249_v44 = vunpack.c.l.b16 %v849_v50  ;;  %v840_v51 = vrot.slane %v838_v25, 4  ;;  %v841_v57 = vrot.slane %v4677_v59, 5  ;;  %v4889_v23 = vsel %vm2810_vm6, %v4073_v7, %v2195_v52  ;;  %v4094_v50 = vld [vmem:[%s4493_s7 + $0x78] sm:$0xff]  ;;  %v4093_v7 = vld [vmem:[%s4493_s7 + $0x6c] sm:$0xff] }
  0x8b   : > { %2292 = vrot.lane.b32.xlu2 %v2263_v28, %s4397_s9  ;;  %v2261_v35 = vpack.c.b16 %v2241_v47, %v2240_v42  ;;  %v839_v0 = vsel %vm4723_vm5, %v3686_v9, %v838_v25  ;;  %v951_v18 = vshrl.u32 %v3692_v14, 16  ;;  %v954_v19 = vshll.u32 %v3692_v14, 16 }
  0x8c   : > { %v2265_v54 = vpack.c.b16 %v2249_v44, %v2248_v58  ;;  %v842_v21 = vsel %vm4723_vm5, %v840_v51, %v841_v57  ;;  %v2246_v59 = vunpack.c.l.b16 %v839_v0  ;;  %v960_v55 = vshll.u32 %v4885_v15, 16  ;;  %v4928_v44 = vld [vmem:[%s4493_s7 + $0x14] sm:$0x1]  ;;  %v4069_v57 = vld [vmem:[%s4493_s7] sm:$0xff] }
  0x8d   : > { %2282 = vrot.lane.b32.xlu0 %v2258_v45, %s4397_s9  ;;  %v2247_v33 = vunpack.c.l.b16 %v842_v21  ;;  %v964_v22 = vshrl.u32 %v4885_v15, 16  ;;  %v927_v24 = vshrl.u32 %v3690_v17, 16  ;;  %v930_v36 = vshll.u32 %v3690_v17, 16  ;;  %v3698_v21 = vld [vmem:[%s4493_s7 + $0x48] sm:$0xf] }
  0x8e   : > { %2290 = vrot.lane.b32.xlu1 %v2262_v62, %s4397_s9  ;;  %v953_v27 = vrot.slane %v951_v18, 4  ;;  %v956_v30 = vrot.slane %v954_v19, 5  ;;  %v936_v1 = vshll.u32 %v4894_v20, 16  ;;  %v940_v63 = vshrl.u32 %v4894_v20, 16  ;;  %v4922_v62 = vld [vmem:[%s4493_s7 + $0x10] sm:$0xf] }
  0x8f   : > { %v2264_v5 = vpack.c.b16 %v2247_v33, %v2246_v59  ;;  %v962_v34 = vrot.slane %v960_v55, 5  ;;  %v966_v39 = vrot.slane %v964_v22, 4  ;;  %v970_v56 = vshll.u32 %v4910_v32, 16  ;;  %v4089_v59 = vld [vmem:[%s4493_s7 + $0x3c] sm:$0xff] }
  0x90   : > { %v957_v41 = vor.u32 %v956_v30, %v953_v27  ;;  %v929_v28 = vrot.slane %v927_v24, 4  ;;  %v932_v29 = vrot.slane %v930_v36, 5  ;;  %v938_v45 = vrot.slane %v936_v1, 5  ;;  %v3696_v27 = vld [vmem:[%s4493_s7 + $0x3c] sm:$0xf] }
  0x91   : > { %v2197_v10 = vpop.permute.xlu2 %2196  ;;  %v967_v42 = vor.u32 %v966_v39, %v962_v34  ;;  %v942_v46 = vrot.slane %v940_v63, 4  ;;  %v972_v48 = vrot.slane %v970_v56, 5  ;;  %v946_v25 = vshll.u32 %v4913_v16, 16 }
  0x92   : > { %v4904_v2 = vsel %vm2810_vm6, %v4074_v8, %v2197_v10  ;;  %v958_v47 = vrot.slane %v957_v41, 4  ;;  %v903_v49 = vshrl.u32 %v3688_v11, 16  ;;  %v933_v9 = vor.u32 %v932_v29, %v929_v28  ;;  %v4080_v8 = vld [vmem:[%s4493_s7 + $0x84] sm:$0xff]  ;;  %v4097_v29 = vld [vmem:[%s4493_s7 + $0x9c] sm:$0xff] }
  0x93   : > { %2362 = vrot.lane.b32.xlu2 %v4085_v53, %s4398_s10  ;;  %v943_v58 = vor.u32 %v942_v46, %v938_v45  ;;  %v906_v51 = vshll.u32 %v3688_v11, 16  ;;  %v948_v53 = vrot.slane %v946_v25, 5  ;;  %v912_v0 = vshll.u32 %v4922_v62, 16  ;;  %v4070_v25 = vld [vmem:[%s4493_s7 + $0xc] sm:$0xff] }
  0x94   : > { %v963_v52 = vsel %vm4521_vm2, %v958_v47, %v962_v34  ;;  %v3725_v34 = vld [vmem:[%s4493_s7 + $0x50] sm:$0x1]  ;;  %v1026_v46 = vshll.u32 %v3698_v21, 16 }
  0x95   : > { %2288 = vrot.lane.b32.xlu0 %v2261_v35, %s4397_s9  ;;  %v968_v35 = vrot.slane %v967_v42, 4  ;;  %v4938_v10 = vunpack.c.l.b16 %v963_v52  ;;  %v908_v17 = vrot.slane %v906_v51, 5  ;;  %v4092_v51 = vld [vmem:[%s4493_s7 + $0x60] sm:$0xff] }
  0x96   : > { %2296 = vrot.lane.b32.xlu1 %v2265_v54, %s4397_s9  ;;  %v905_v54 = vrot.slane %v903_v49, 4 }
  0x98   : > { %v909_v36 = vor.u32 %v908_v17, %v905_v54  ;;  %v1028_v54 = vrot.slane %v1026_v46, 5 }
  0x9a   : > { %v910_v42 = vrot.slane %v909_v36, 4 }
  0x9b   : > { %2368 = vrot.lane.b32.xlu2 %v4088_v3, %s4398_s10  ;;  %v973_v3 = vsel %vm4521_vm2, %v968_v35, %v972_v48  ;;  %v4979_v35 = vld [vmem:[%s4493_s7 + $0x40] sm:$0xf] }
  0x9c   : > { %v4943_v14 = vunpack.c.l.b16 %v973_v3  ;;  %v1012_v17 = vshrl.u32 %v4979_v35, 16 }
  0x9d   : > { %2294 = vrot.lane.b32.xlu0 %v2264_v5, %s4397_s9  ;;  %v934_v5 = vrot.slane %v933_v9, 4  ;;  %v999_v9 = vshrl.u32 %v3696_v27, 16 }
  0x9e   : > { %2366 = vrot.lane.b32.xlu1 %v4087_v4, %s4398_s10  ;;  %v944_v4 = vrot.slane %v943_v58, 4  ;;  %v2428_v63 = vpack.c.b16 %v4943_v14, %v4938_v10  ;;  %v1002_v58 = vshll.u32 %v3696_v27, 16  ;;  %v3726_v10 = vld [vmem:[%s4493_s7 + $0x5c] sm:$0x1] }
  0x9f   : > { %v2203_v40 = vpop.permute.xlu2 %2202  ;;  %v2191_v12 = vpop.permute.xlu1 %2190  ;;  %v939_v18 = vsel %vm4521_vm2, %v934_v5, %v938_v45  ;;  %v1001_v3 = vrot.slane %v999_v9, 4 }
  0xa0   : > { %v4907_v13 = vsel %vm2810_vm6, %v4077_v61, %v2203_v40  ;;  %v4917_v38 = vsel %vm2810_vm6, %v4071_v6, %v2191_v12  ;;  %v4072_v61 = vld [vmem:[%s4493_s7 + $0x24] sm:$0xff]  ;;  %v916_v6 = vshrl.u32 %v4922_v62, 16  ;;  %v949_v19 = vsel %vm4521_vm2, %v944_v4, %v948_v53  ;;  %v3699_v40 = vld [vmem:[%s4493_s7 + $0x4c] sm:$0xf] }
  0xa1   : > { %v4955_v22 = vunpack.c.l.b16 %v939_v18  ;;  %v4957_v24 = vunpack.c.l.b16 %v949_v19  ;;  %v1032_v47 = vshll.u32 %v3699_v40, 16  ;;  %v1036_v48 = vshrl.u32 %v3699_v40, 16 }
  0xa2   : > { %v918_v11 = vrot.slane %v916_v6, 4  ;;  %v1004_v5 = vrot.slane %v1002_v58, 5  ;;  %v1014_v40 = vrot.slane %v1012_v17, 4 }
  0xa3   : > { %2374 = vrot.lane.b32.xlu2 %v4091_v31, %s4398_s10  ;;  %v2187_v33 = vpop.permute.xlu0 %2186  ;;  %v914_v31 = vrot.slane %v912_v0, 5  ;;  %v2427_v28 = vpack.c.b16 %v4957_v24, %v4955_v22  ;;  %v1034_v0 = vrot.slane %v1032_v47, 5  ;;  %v3704_v47 = vld [vmem:[%s4493_s7 + $0x6c] sm:$0xf] }
  0xa4   : > { %v4953_v55 = vsel %vm2810_vm6, %v4069_v57, %v2187_v33  ;;  %v4096_v57 = vld [vmem:[%s4493_s7 + $0x90] sm:$0xff]  ;;  %v4986_v33 = vld [vmem:[%s4493_s7 + $0x44] sm:$0x1] }
  0xa5   : > { %2364 = vrot.lane.b32.xlu0 %v4086_v37, %s4398_s10  ;;  %v922_v37 = vshll.u32 %v4928_v44, 16  ;;  %v919_v45 = vor.u32 %v918_v11, %v914_v31  ;;  %v915_v49 = vsel %vm4521_vm2, %v910_v42, %v914_v31  ;;  %v3694_v31 = vld [vmem:[%s4493_s7 + $0x30] sm:$0xf]  ;;  %v1018_v27 = vshll.u32 %v4986_v33, 16 }
  0xa6   : > { %2372 = vrot.lane.b32.xlu1 %v4090_v43, %s4398_s10  ;;  %v1023_v43 = vshrl.u32 %v3698_v21, 16  ;;  %v4983_v53 = vunpack.c.l.b16 %v915_v49  ;;  %v1038_v21 = vrot.slane %v1036_v48, 4  ;;  %v978_v46 = vshll.u32 %v3694_v31, 16  ;;  %v4100_v48 = vld [vmem:[%s4493_s7 + $0xc0] sm:$0xff]  ;;  %v4076_v49 = vld [vmem:[%s4493_s7 + $0x54] sm:$0xff] }
  0xa7   : > { %v924_v12 = vrot.slane %v922_v37, 5  ;;  %v920_v52 = vrot.slane %v919_v45, 4  ;;  %v1005_v37 = vor.u32 %v1004_v5, %v1001_v3  ;;  %v5010_v45 = vld [vmem:[%s4493_s7 + $0x38] sm:$0x1] }
  0xa8   : > { %v1025_v39 = vrot.slane %v1023_v43, 4  ;;  %v1039_v19 = vor.u32 %v1038_v21, %v1034_v0  ;;  %v980_v21 = vrot.slane %v978_v46, 5  ;;  %v4099_v3 = vld [vmem:[%s4493_s7 + $0xb4] sm:$0xff] }
  0xa9   : > { %v1006_v11 = vrot.slane %v1005_v37, 4  ;;  %v5036_v37 = vld [vmem:[%s4493_s7 + $0x70] sm:$0xf] }
  0xab   : > { %2380 = vrot.lane.b32.xlu2 %v4094_v50, %s4398_s10  ;;  %v1042_v50 = vshll.u32 %v3725_v34, 16  ;;  %v975_v34 = vshrl.u32 %v3694_v31, 16 }
  0xad   : > { %2370 = vrot.lane.b32.xlu0 %v4089_v59, %s4398_s10  ;;  %v2209_v30 = vpop.permute.xlu2 %2208  ;;  %v2193_v1 = vpop.permute.xlu1 %2192  ;;  %v1044_v59 = vrot.slane %v1042_v50, 5 }
  0xae   : > { %2378 = vrot.lane.b32.xlu1 %v4093_v7, %s4398_s10  ;;  %v4967_v41 = vsel %vm2810_vm6, %v4080_v8, %v2209_v30  ;;  %v4970_v56 = vsel %vm2810_vm6, %v4072_v61, %v2193_v1  ;;  %v925_v7 = vsel %vm4521_vm2, %v920_v52, %v924_v12  ;;  %v1029_v8 = vor.u32 %v1028_v54, %v1025_v39  ;;  %v5005_v12 = vld [vmem:[%s4493_s7 + $0x34] sm:$0xf] }
  0xaf   : > { %v1008_v61 = vshll.u32 %v4979_v35, 16  ;;  %v4997_v18 = vunpack.c.l.b16 %v925_v7  ;;  %v1040_v1 = vrot.slane %v1039_v19, 4  ;;  %v984_v5 = vshll.u32 %v5005_v12, 16 }
  0xb0   : > { %v1030_v43 = vrot.slane %v1029_v8, 4  ;;  %v1095_v7 = vshrl.u32 %v3704_v47, 16 }
  0xb1   : > { %v1010_v36 = vrot.slane %v1008_v61, 5  ;;  %v1045_v50 = vsel %vm4521_vm2, %v1040_v1, %v1044_v59  ;;  %v994_v59 = vshll.u32 %v5010_v45, 16  ;;  %v986_v1 = vrot.slane %v984_v5, 5 }
  0xb2   : > { %v1035_v39 = vsel %vm4521_vm2, %v1030_v43, %v1034_v0  ;;  %v5023_v52 = vunpack.c.l.b16 %v1045_v50  ;;  %v1098_v43 = vshll.u32 %v3704_v47, 16  ;;  %v1097_v46 = vrot.slane %v1095_v7, 4  ;;  %v4075_v47 = vld [vmem:[%s4493_s7 + $0x48] sm:$0xff] }
  0xb3   : > { %v2189_v4 = vpop.permute.xlu0 %2188  ;;  %2386 = vrot.lane.b32.xlu2 %v4097_v29, %s4398_s10  ;;  %v1015_v42 = vor.u32 %v1014_v40, %v1010_v36  ;;  %v1020_v29 = vrot.slane %v1018_v27, 5  ;;  %v5018_v9 = vunpack.c.l.b16 %v1035_v39  ;;  %v1011_v58 = vsel %vm4521_vm2, %v1006_v11, %v1010_v36  ;;  %v5048_v11 = vld [vmem:[%s4493_s7 + $0x74] sm:$0x1]  ;;  %v3727_v7 = vld [vmem:[%s4493_s7 + $0x68] sm:$0x1] }
  0xb4   : > { %v4995_v6 = vsel %vm2810_vm6, %v4070_v25, %v2189_v4  ;;  %v4083_v25 = vld [vmem:[%s4493_s7 + $0xa8] sm:$0xff]  ;;  %v5025_v0 = vunpack.c.l.b16 %v1011_v58  ;;  %v988_v4 = vshrl.u32 %v5005_v12, 16  ;;  %v1108_v50 = vshrl.u32 %v5036_v37, 16 }
  0xb5   : > { %2376 = vrot.lane.b32.xlu0 %v4092_v51, %s4398_s10  ;;  %v977_v51 = vrot.slane %v975_v34, 4  ;;  %v1016_v54 = vrot.slane %v1015_v42, 4  ;;  %v2431_v17 = vpack.c.b16 %v5023_v52, %v5018_v9  ;;  %v3702_v34 = vld [vmem:[%s4493_s7 + $0x60] sm:$0xf] }
  0xb6   : > { %2384 = vrot.lane.b32.xlu1 %v4096_v57, %s4398_s10  ;;  %v4095_v57 = vld [vmem:[%s4493_s7 + $0x84] sm:$0xff]  ;;  %v990_v42 = vrot.slane %v988_v4, 4 }
  0xb7   : > { %v1021_v31 = vsel %vm4521_vm2, %v1016_v54, %v1020_v29  ;;  %v981_v19 = vor.u32 %v980_v21, %v977_v51  ;;  %v996_v29 = vrot.slane %v994_v59, 5  ;;  %v3703_v54 = vld [vmem:[%s4493_s7 + $0x64] sm:$0xf]  ;;  %v1071_v21 = vshrl.u32 %v3702_v34, 16 }
  0xb8   : > { %v5045_v27 = vunpack.c.l.b16 %v1021_v31  ;;  %v991_v51 = vor.u32 %v990_v42, %v986_v1  ;;  %v1110_v59 = vrot.slane %v1108_v50, 4  ;;  %v1080_v30 = vshll.u32 %v3703_v54, 16  ;;  %v3700_v50 = vld [vmem:[%s4493_s7 + $0x54] sm:$0xf] }
  0xb9   : > { %v982_v39 = vrot.slane %v981_v19, 4 }
  0xba   : > { %v992_v31 = vrot.slane %v991_v51, 4  ;;  %v6421_v9 = vpack.c.b16 %v5045_v27, %v5025_v0  ;;  %v3730_v0 = vld [vmem:[%s4493_s7 + $0x8c] sm:$0x1] }
  0xbb   : > { %v2215_v8 = vpop.permute.xlu2 %2214  ;;  %v2201_v61 = vpop.permute.xlu1 %2200  ;;  %2392 = vrot.lane.b32.xlu2 %v4100_v48, %s4398_s10  ;;  %v987_v58 = vsel %vm4521_vm2, %v982_v39, %v986_v1  ;;  %v1074_v48 = vshll.u32 %v3702_v34, 16 }
  0xbc   : > { %v5040_v36 = vsel %vm2810_vm6, %v4083_v25, %v2215_v8  ;;  %v5043_v40 = vsel %vm2810_vm6, %v4076_v49, %v2201_v61  ;;  %v1100_v25 = vrot.slane %v1098_v43, 5  ;;  %v1104_v49 = vshll.u32 %v5036_v37, 16  ;;  %v4098_v8 = vld [vmem:[%s4493_s7 + $0xa8] sm:$0xff] }
  0xbd   : > { %2382 = vrot.lane.b32.xlu0 %v4095_v57, %s4398_s10  ;;  %v1114_v57 = vshll.u32 %v5048_v11, 16  ;;  %v5062_v5 = vunpack.c.l.b16 %v987_v58  ;;  %v1073_v43 = vrot.slane %v1071_v21, 4  ;;  %v997_v58 = vsel %vm4521_vm2, %v992_v31, %v996_v29 }
  0xbe   : > { %2390 = vrot.lane.b32.xlu1 %v4099_v3, %s4398_s10  ;;  %v1101_v3 = vor.u32 %v1100_v25, %v1097_v46  ;;  %v1106_v4 = vrot.slane %v1104_v49, 5  ;;  %v1076_v46 = vrot.slane %v1074_v48, 5  ;;  %v1084_v25 = vshrl.u32 %v3703_v54, 16 }
  0xbf   : > { %v1116_v19 = vrot.slane %v1114_v57, 5  ;;  %v1090_v49 = vshll.u32 %v3727_v7, 16  ;;  %v5076_v34 = vunpack.c.l.b16 %v997_v58  ;;  %v1082_v29 = vrot.slane %v1080_v30, 5  ;;  %v4079_v30 = vld [vmem:[%s4493_s7 + $0x78] sm:$0xff] }
  0xc0   : > { %v1102_v1 = vrot.slane %v1101_v3, 4  ;;  %v1111_v42 = vor.u32 %v1110_v59, %v1106_v4  ;;  %v1077_v54 = vor.u32 %v1076_v46, %v1073_v43  ;;  %v1086_v21 = vrot.slane %v1084_v25, 4  ;;  %v3701_v59 = vld [vmem:[%s4493_s7 + $0x58] sm:$0xf] }
  0xc1   : > { %v2199_v61 = vpop.permute.xlu0 %2198  ;;  %v1092_v3 = vrot.slane %v1090_v49, 5  ;;  %v1047_v7 = vshrl.u32 %v3700_v50, 16  ;;  %v1050_v43 = vshll.u32 %v3700_v50, 16  ;;  %v1056_v24 = vshll.u32 %v3701_v59, 16  ;;  %v3711_v49 = vld [vmem:[%s4493_s7 + $0x94] sm:$0xf] }
  0xc2   : > { %v5067_v39 = vsel %vm2810_vm6, %v4075_v47, %v2199_v61  ;;  %v1107_v47 = vsel %vm4521_vm2, %v1102_v1, %v1106_v4  ;;  %v1112_v51 = vrot.slane %v1111_v42, 4  ;;  %v1078_v61 = vrot.slane %v1077_v54, 4  ;;  %v3710_v1 = vld [vmem:[%s4493_s7 + $0x90] sm:$0xf]  ;;  %v3731_v54 = vld [vmem:[%s4493_s7 + $0x98] sm:$0x1] }
  0xc3   : > { %2446 = vrot.lane.b32.xlu2 %v2428_v63, %s4399_s11  ;;  %v5081_v57 = vunpack.c.l.b16 %v1107_v47  ;;  %v2429_v63 = vpack.c.b16 %v5076_v34, %v5062_v5  ;;  %v1087_v31 = vor.u32 %v1086_v21, %v1082_v29  ;;  %v1049_v22 = vrot.slane %v1047_v7, 4 }
  0xc4   : > { %v2269_v48 = vpop.permute.xlu2 %2268  ;;  %v1117_v4 = vsel %vm4521_vm2, %v1112_v51, %v1116_v19  ;;  %v1083_v19 = vsel %vm4521_vm2, %v1078_v61, %v1082_v29  ;;  %v1052_v25 = vrot.slane %v1050_v43, 5  ;;  %v1058_v51 = vrot.slane %v1056_v24, 5  ;;  %v4078_v29 = vld [vmem:[%s4493_s7 + $0x6c] sm:$0xff] }
  0xc5   : > { %2388 = vrot.lane.b32.xlu0 %v4098_v8, %s4398_s10  ;;  %v5091_v14 = vsel %vm2859_vm7, %v4995_v6, %v2269_v48  ;;  %v5098_v8 = vunpack.c.l.b16 %v1117_v4  ;;  %v1066_v6 = vshll.u32 %v3726_v10, 16  ;;  %v1088_v46 = vrot.slane %v1087_v31, 4 }
  0xc6   : > { %2444 = vrot.lane.b32.xlu1 %v2427_v28, %s4399_s11  ;;  %v1060_v28 = vshrl.u32 %v3701_v59, 16  ;;  %v2408_v50 = vunpack.c.l.b16 %v1083_v19  ;;  %v1053_v59 = vor.u32 %v1052_v25, %v1049_v22  ;;  %v1167_v4 = vshrl.u32 %v3710_v1, 16  ;;  %v3709_v25 = vld [vmem:[%s4493_s7 + $0x88] sm:$0xf] }
  0xc7   : > { %v2434_v58 = vpack.c.b16 %v5098_v8, %v5081_v57  ;;  %v1093_v21 = vsel %vm4521_vm2, %v1088_v46, %v1092_v3  ;;  %v1068_v10 = vrot.slane %v1066_v6, 5  ;;  %v1170_v7 = vshll.u32 %v3710_v1, 16  ;;  %v3708_v1 = vld [vmem:[%s4493_s7 + $0x84] sm:$0xf] }
  0xc8   : > { %v1062_v48 = vrot.slane %v1060_v28, 4  ;;  %v2409_v57 = vunpack.c.l.b16 %v1093_v21  ;;  %v1176_v8 = vshll.u32 %v3711_v49, 16  ;;  %v6420_v61 = vpack.c.b16 %v4997_v18, %v4983_v53 }
  0xc9   : > { %v2207_v42 = vpop.permute.xlu1 %2206  ;;  %v1054_v3 = vrot.slane %v1053_v59, 4  ;;  %v1169_v31 = vrot.slane %v1167_v4, 4  ;;  %v1180_v43 = vshrl.u32 %v3711_v49, 16  ;;  %v1186_v22 = vshll.u32 %v3731_v54, 16 }
  0xca   : > { %v5107_v47 = vsel %vm2810_vm6, %v4079_v30, %v2207_v42  ;;  %v1063_v30 = vor.u32 %v1062_v48, %v1058_v51  ;;  %v1172_v28 = vrot.slane %v1170_v7, 5  ;;  %v1178_v6 = vrot.slane %v1176_v8, 5  ;;  %v3706_v7 = vld [vmem:[%s4493_s7 + $0x78] sm:$0xf] }
  0xcb   : > { %2452 = vrot.lane.b32.xlu2 %v2431_v17, %s4399_s11  ;;  %v2433_v17 = vpack.c.b16 %v2409_v57, %v2408_v50  ;;  %v1059_v42 = vsel %vm4521_vm2, %v1054_v3, %v1058_v51  ;;  %v1182_v19 = vrot.slane %v1180_v43, 4  ;;  %v1188_v46 = vrot.slane %v1186_v22, 5 }
  0xcc   : > { %v1064_v24 = vrot.slane %v1063_v30, 4  ;;  %v5139_v50 = vunpack.c.l.b16 %v1059_v42  ;;  %v1143_v21 = vshrl.u32 %v3708_v1, 16  ;;  %v1146_v59 = vshll.u32 %v3708_v1, 16 }
  0xcd   : > { %2442 = vrot.lane.b32.xlu0 %v6420_v61, %s4399_s11  ;;  %v2275_v52 = vpop.permute.xlu2 %2274  ;;  %v1183_v54 = vor.u32 %v1182_v19, %v1178_v6  ;;  %v1152_v4 = vshll.u32 %v3709_v25, 16  ;;  %v1156_v57 = vshrl.u32 %v3709_v25, 16  ;;  %v1162_v30 = vshll.u32 %v3730_v0, 16  ;;  %v5158_v19 = vld [vmem:[%s4493_s7 + $0x80] sm:$0x1] }
  0xce   : > { %2450 = vrot.lane.b32.xlu1 %v6421_v9, %s4399_s11  ;;  %v5128_v53 = vsel %vm2859_vm7, %v4889_v23, %v2275_v52  ;;  %v1069_v49 = vsel %vm4521_vm2, %v1064_v24, %v1068_v10  ;;  %v1173_v23 = vor.u32 %v1172_v28, %v1169_v31  ;;  %v1145_v61 = vrot.slane %v1143_v21, 4  ;;  %v5144_v10 = vld [vmem:[%s4493_s7 + $0x7c] sm:$0xf] }
  0xcf   : > { %v2205_v18 = vpop.permute.xlu0 %2204  ;;  %v2407_v48 = vunpack.c.l.b16 %v1069_v49  ;;  %v1184_v8 = vrot.slane %v1183_v54, 4  ;;  %v1148_v3 = vrot.slane %v1146_v59, 5  ;;  %v1154_v43 = vrot.slane %v1152_v4, 5  ;;  %v4082_v52 = vld [vmem:[%s4493_s7 + $0x9c] sm:$0xff]  ;;  %v3717_v4 = vld [vmem:[%s4493_s7 + $0xb8] sm:$0xf] }
  0xd0   : > { %v5135_v27 = vsel %vm2810_vm6, %v4078_v29, %v2205_v18  ;;  %v1174_v51 = vrot.slane %v1173_v23, 4  ;;  %v1158_v22 = vrot.slane %v1156_v57, 4  ;;  %v1164_v9 = vrot.slane %v1162_v30, 5  ;;  %v4081_v57 = vld [vmem:[%s4493_s7 + $0x90] sm:$0xff] }
  0xd1   : > { %v2432_v29 = vpack.c.b16 %v2407_v48, %v5139_v50  ;;  %v1189_v24 = vsel %vm4521_vm2, %v1184_v8, %v1188_v46  ;;  %v1149_v1 = vor.u32 %v1148_v3, %v1145_v61  ;;  %v1119_v18 = vshrl.u32 %v3706_v7, 16  ;;  %v3734_v61 = vld [vmem:[%s4493_s7 + $0xbc] sm:$0x1] }
  0xd2   : > { %v1179_v31 = vsel %vm4521_vm2, %v1174_v51, %v1178_v6  ;;  %v2417_v6 = vunpack.c.l.b16 %v1189_v24  ;;  %v1159_v42 = vor.u32 %v1158_v22, %v1154_v43  ;;  %v1122_v25 = vshll.u32 %v3706_v7, 16 }
  0xd3   : > { %2458 = vrot.lane.b32.xlu2 %v2434_v58, %s4399_s11  ;;  %v2416_v28 = vunpack.c.l.b16 %v1179_v31  ;;  %v1128_v5 = vshll.u32 %v5144_v10, 16  ;;  %v1121_v46 = vrot.slane %v1119_v18, 4  ;;  %v1132_v0 = vshrl.u32 %v5144_v10, 16 }
  0xd4   : > { %v1160_v23 = vrot.slane %v1159_v42, 4  ;;  %v1124_v48 = vrot.slane %v1122_v25, 5  ;;  %v1252_v18 = vshrl.u32 %v3717_v4, 16  ;;  %v1258_v25 = vshll.u32 %v3734_v61, 16 }
  0xd5   : > { %2448 = vrot.lane.b32.xlu0 %v2429_v63, %s4399_s11  ;;  %v2281_v58 = vpop.permute.xlu2 %2280  ;;  %v1150_v63 = vrot.slane %v1149_v1, 4  ;;  %v2437_v50 = vpack.c.b16 %v2417_v6, %v2416_v28  ;;  %v1130_v54 = vrot.slane %v1128_v5, 5  ;;  %v1134_v51 = vrot.slane %v1132_v0, 4  ;;  %v3714_v5 = vld [vmem:[%s4493_s7 + $0xa8] sm:$0xf] }
  0xd6   : > { %2456 = vrot.lane.b32.xlu1 %v2433_v17, %s4399_s11  ;;  %v5163_v34 = vsel %vm2859_vm7, %v5043_v40, %v2281_v58  ;;  %v3716_v17 = vld [vmem:[%s4493_s7 + $0xb4] sm:$0xf]  ;;  %v1138_v40 = vshll.u32 %v5158_v19, 16  ;;  %v1165_v30 = vsel %vm4521_vm2, %v1160_v23, %v1164_v9  ;;  %v1125_v8 = vor.u32 %v1124_v48, %v1121_v46 }
  0xd7   : > { %v1155_v59 = vsel %vm4521_vm2, %v1150_v63, %v1154_v43  ;;  %v1239_v3 = vshrl.u32 %v3716_v17, 16  ;;  %v2415_v31 = vunpack.c.l.b16 %v1165_v30  ;;  %v1135_v22 = vor.u32 %v1134_v51, %v1130_v54 }
  0xd8   : > { %v2213_v49 = vpop.permute.xlu1 %2212  ;;  %v2414_v7 = vunpack.c.l.b16 %v1155_v59  ;;  %v1242_v24 = vshll.u32 %v3716_v17, 16  ;;  %v1126_v43 = vrot.slane %v1125_v8, 4  ;;  %v1248_v1 = vshll.u32 %v3717_v4, 16 }
  0xd9   : > { %v5168_v21 = vsel %vm2810_vm6, %v4082_v52, %v2213_v49  ;;  %v1140_v52 = vrot.slane %v1138_v40, 5  ;;  %v1241_v28 = vrot.slane %v1239_v3, 4  ;;  %v1136_v6 = vrot.slane %v1135_v22, 4 }
  0xda   : > { %v2436_v9 = vpack.c.b16 %v2415_v31, %v2414_v7  ;;  %v1244_v42 = vrot.slane %v1242_v24, 5  ;;  %v1131_v46 = vsel %vm4521_vm2, %v1126_v43, %v1130_v54  ;;  %v1250_v17 = vrot.slane %v1248_v1, 5  ;;  %v3712_v31 = vld [vmem:[%s4493_s7 + $0x9c] sm:$0xf] }
  0xdb   : > { %2464 = vrot.lane.b32.xlu2 %v2437_v50, %s4399_s11  ;;  %v1254_v49 = vrot.slane %v1252_v18, 4  ;;  %v3715_v50 = vld [vmem:[%s4493_s7 + $0xac] sm:$0xf]  ;;  %v2412_v23 = vunpack.c.l.b16 %v1131_v46  ;;  %v1260_v54 = vrot.slane %v1258_v25, 5  ;;  %v1215_v30 = vshrl.u32 %v3714_v5, 16 }
  0xdc   : > { %v1245_v59 = vor.u32 %v1244_v42, %v1241_v28  ;;  %v1218_v61 = vshll.u32 %v3714_v5, 16  ;;  %v1224_v3 = vshll.u32 %v3715_v50, 16  ;;  %v1228_v24 = vshrl.u32 %v3715_v50, 16  ;;  %v5209_v25 = vld [vmem:[%s4493_s7 + $0xa4] sm:$0x1] }
  0xdd   : > { %2454 = vrot.lane.b32.xlu0 %v2432_v29, %s4399_s11  ;;  %v2211_v58 = vpop.permute.xlu0 %2210  ;;  %v2287_v0 = vpop.permute.xlu2 %2286  ;;  %v1141_v29 = vsel %vm4521_vm2, %v1136_v6, %v1140_v52  ;;  %v1255_v4 = vor.u32 %v1254_v49, %v1250_v17  ;;  %v1217_v52 = vrot.slane %v1215_v30, 4  ;;  %v1191_v5 = vshrl.u32 %v3712_v31, 16 }
  0xde   : > { %v5182_v63 = vsel %vm2810_vm6, %v4081_v57, %v2211_v58  ;;  %2462 = vrot.lane.b32.xlu1 %v2436_v9, %s4399_s11  ;;  %v5192_v48 = vsel %vm2859_vm7, %v5107_v47, %v2287_v0  ;;  %v2413_v51 = vunpack.c.l.b16 %v1141_v29  ;;  %v3733_v57 = vld [vmem:[%s4493_s7 + $0xb0] sm:$0x1]  ;;  %v1246_v8 = vrot.slane %v1245_v59, 4  ;;  %v5203_v58 = vld [vmem:[%s4493_s7 + $0xa0] sm:$0xf]  ;;  %v4084_v9 = vld [vmem:[%s4493_s7 + $0xb4] sm:$0xff] }
  0xdf   : > { %v1256_v22 = vrot.slane %v1255_v4, 4  ;;  %v1220_v28 = vrot.slane %v1218_v61, 5  ;;  %v1226_v1 = vrot.slane %v1224_v3, 5  ;;  %v1234_v18 = vshll.u32 %v3733_v57, 16 }
  0xe0   : > { %v2267_v40 = vpop.permute.xlu1 %2266  ;;  %v2435_v47 = vpack.c.b16 %v2413_v51, %v2412_v23  ;;  %v1251_v43 = vsel %vm4521_vm2, %v1246_v8, %v1250_v17  ;;  %v1230_v42 = vrot.slane %v1228_v24, 4  ;;  %v1194_v17 = vshll.u32 %v3712_v31, 16 }
  0xe1   : > { %v5197_v7 = vsel %vm2859_vm7, %v4953_v55, %v2267_v40  ;;  %v1261_v55 = vsel %vm4521_vm2, %v1256_v22, %v1260_v54  ;;  %v2422_v6 = vunpack.c.l.b16 %v1251_v43  ;;  %v1221_v0 = vor.u32 %v1220_v28, %v1217_v52  ;;  %v3737_v22 = vld [vmem:[%s4493_s7 + $0x18] sm:$0xe] }
  0xe2   : > { %v2423_v46 = vunpack.c.l.b16 %v1261_v55  ;;  %v1236_v49 = vrot.slane %v1234_v18, 5  ;;  %v1231_v50 = vor.u32 %v1230_v42, %v1226_v1  ;;  %v1193_v29 = vrot.slane %v1191_v5, 4  ;;  %v3736_v18 = vld [vmem:[%s4493_s7 + $0xc] sm:$0xe] }
  0xe3   : > { %v1200_v23 = vshll.u32 %v5203_v58, 16  ;;  %v1204_v59 = vshrl.u32 %v5203_v58, 16  ;;  %v1222_v54 = vrot.slane %v1221_v0, 4  ;;  %v1196_v57 = vrot.slane %v1194_v17, 5 }
  0xe4   : > { %v2440_v4 = vpack.c.b16 %v2423_v46, %v2422_v6  ;;  %v1210_v30 = vshll.u32 %v5209_v25, 16  ;;  %v1232_v61 = vrot.slane %v1231_v50, 4  ;;  %v1359_v0 = vrot.slane %v4894_v20, 5 }
  0xe5   : > { %2460 = vrot.lane.b32.xlu0 %v2435_v47, %s4399_s11  ;;  %v2293_v51 = vpop.permute.xlu2 %2292  ;;  %v1202_v3 = vrot.slane %v1200_v23, 5  ;;  %v1206_v31 = vrot.slane %v1204_v59, 4  ;;  %v1227_v52 = vsel %vm4521_vm2, %v1222_v54, %v1226_v1  ;;  %v1197_v24 = vor.u32 %v1196_v57, %v1193_v29  ;;  %v3719_v54 = vld [vmem:[%s4493_s7 + $0xc4] sm:$0xf] }
  0xe6   : > { %2470 = vrot.lane.b32.xlu2 %v2440_v4, %s4399_s11  ;;  %v1212_v43 = vrot.slane %v1210_v30, 5  ;;  %v5224_v28 = vsel %vm2859_vm7, %v5168_v21, %v2293_v51  ;;  %v2420_v55 = vunpack.c.l.b16 %v1227_v52  ;;  %v3753_v1 = vrot.slane %v3737_v22, 9  ;;  %v3718_v51 = vld [vmem:[%s4493_s7 + $0xc0] sm:$0xf] }
  0xe7   : > { %v2217_v40 = vpop.permute.xlu0 %2216  ;;  %v1207_v6 = vor.u32 %v1206_v31, %v1202_v3  ;;  %v1198_v46 = vrot.slane %v1197_v24, 4  ;;  %v1362_v21 = vrot.slane %v4913_v16, 5  ;;  %v3752_v50 = vrot.slane %v3736_v18, 9  ;;  %v3735_v24 = vld [vmem:[%s4493_s7 + $0xc8] sm:$0x1] }
  0xe8   : > { %v5216_v8 = vsel %vm2810_vm6, %v4084_v9, %v2217_v40  ;;  %v2273_v47 = vpop.permute.xlu1 %2272  ;;  %v1237_v9 = vsel %vm4521_vm2, %v1232_v61, %v1236_v49  ;;  %v1352_v29 = vrot.slane %v4922_v62, 5  ;;  %v1361_v59 = vrot.slane %v1359_v0, 4 }
  0xe9   : > { %v5231_v42 = vsel %vm2859_vm7, %v4970_v56, %v2273_v47  ;;  %v2421_v5 = vunpack.c.l.b16 %v1237_v9  ;;  %v1208_v17 = vrot.slane %v1207_v6, 4  ;;  %v1203_v23 = vsel %vm4521_vm2, %v1198_v46, %v1202_v3 }
  0xea   : > { %v1360_v56 = vsel %vm4723_vm5, %v3753_v1, %v1359_v0  ;;  %v2418_v20 = vunpack.c.l.b16 %v1203_v23  ;;  %v1353_v16 = vsel %vm4723_vm5, %v3752_v50, %v1352_v29  ;;  %v1363_v61 = vsel %vm4723_vm5, %v1361_v59, %v1362_v21 }
  0xeb   : > { %v2439_v49 = vpack.c.b16 %v2421_v5, %v2420_v55  ;;  %v1213_v40 = vsel %vm4521_vm2, %v1208_v17, %v1212_v43  ;;  %v2476_v4 = vunpack.c.l.b16 %v1360_v56  ;;  %v1354_v3 = vrot.slane %v1352_v29, 4  ;;  %v3768_v17 = vld [vmem:[%s4493_s7 + $0x18] sm:$0xf] }
  0xec   : > { %v2419_v57 = vunpack.c.l.b16 %v1213_v40  ;;  %v1355_v31 = vrot.slane %v4928_v44, 5  ;;  %v2477_v22 = vunpack.c.l.b16 %v1363_v61  ;;  %v2474_v52 = vunpack.c.l.b16 %v1353_v16  ;;  %v3738_v40 = vld [vmem:[%s4493_s7 + $0x24] sm:$0xe] }
  0xed   : > { %v2363_v62 = vpop.permute.xlu2 %2362  ;;  %2468 = vrot.lane.b32.xlu1 %v2439_v49, %s4399_s11  ;;  %v1263_v43 = vshrl.u32 %v3718_v51, 16  ;;  %v1266_v6 = vshll.u32 %v3718_v51, 16  ;;  %v1272_v5 = vshll.u32 %v3719_v54, 16  ;;  %v1276_v0 = vshrl.u32 %v3719_v54, 16  ;;  %v5263_v49 = vld [vmem:[%s4493_s7 + $0x20] sm:$0x1] }
  0xee   : > { %v2438_v9 = vpack.c.b16 %v2419_v57, %v2418_v20  ;;  %v1356_v55 = vsel %vm4723_vm5, %v1354_v3, %v1355_v31  ;;  %v2507_v46 = vpack.c.b16 %v2477_v22, %v2476_v4  ;;  %v1282_v29 = vshll.u32 %v3735_v24, 16 }
  0xef   : > { %v2271_v30 = vpop.permute.xlu0 %2270  ;;  %v2475_v1 = vunpack.c.l.b16 %v1356_v55  ;;  %v1265_v44 = vrot.slane %v1263_v43, 4  ;;  %v1268_v21 = vrot.slane %v1266_v6, 5  ;;  %v1274_v50 = vrot.slane %v1272_v5, 5 }
  0xf0   : > { %v5252_v47 = vsel %vm2859_vm7, %v4917_v38, %v2271_v30  ;;  %v2279_v18 = vpop.permute.xlu1 %2278  ;;  %v5259_v38 = vld [vmem:[%s4493_s7 + $0x1c] sm:$0xf]  ;;  %2466 = vrot.lane.b32.xlu0 %v2438_v9, %s4399_s11  ;;  %2524 = vrot.lane.b32.xlu2 %v2507_v46, %s4400_s12  ;;  %v1278_v56 = vrot.slane %v1276_v0, 4  ;;  %v5268_v59 = vsel %vm2892_vm8, %v5197_v7, %v2363_v62  ;;  %v1284_v4 = vrot.slane %v1282_v29, 5 }
  0xf1   : > { %v2506_v23 = vpack.c.b16 %v2475_v1, %v2474_v52  ;;  %v5272_v51 = vsel %vm2859_vm7, %v5067_v39, %v2279_v18  ;;  %v1269_v20 = vor.u32 %v1268_v21, %v1265_v44  ;;  %v1515_v16 = vshrl.u32 %v3768_v17, 16 }
  0xf2   : > { %v1518_v54 = vshll.u32 %v3768_v17, 16  ;;  %v1279_v57 = vor.u32 %v1278_v56, %v1274_v50  ;;  %v1524_v30 = vshll.u32 %v5259_v38, 16  ;;  %v1528_v61 = vshrl.u32 %v5259_v38, 16  ;;  %v4101_v56 = vld [vmem:[%s4493_s7 + $0x18] sm:$0xff] }
  0xf3   : > { %v1534_v3 = vshll.u32 %v5263_v49, 16  ;;  %v1270_v7 = vrot.slane %v1269_v20, 4  ;;  %v1517_v22 = vrot.slane %v1515_v16, 4  ;;  %v3754_v52 = vrot.slane %v3738_v40, 9 }
  0xf4   : > { %v1520_v39 = vrot.slane %v1518_v54, 5  ;;  %v1280_v24 = vrot.slane %v1279_v57, 4  ;;  %v1526_v18 = vrot.slane %v1524_v30, 5  ;;  %v1530_v9 = vrot.slane %v1528_v61, 4  ;;  %v3739_v54 = vld [vmem:[%s4493_s7 + $0x30] sm:$0xe] }
  0xf5   : > { %v2369_v31 = vpop.permute.xlu2 %2368  ;;  %2522 = vrot.lane.b32.xlu1 %v2506_v23, %s4400_s12  ;;  %v1275_v6 = vsel %vm4521_vm2, %v1270_v7, %v1274_v50  ;;  %v1536_v46 = vrot.slane %v1534_v3, 5  ;;  %v1366_v1 = vrot.slane %v4885_v15, 5  ;;  %v1369_v21 = vrot.slane %v4910_v32, 5 }
  0xf6   : > { %v1521_v5 = vor.u32 %v1520_v39, %v1517_v22  ;;  %v1285_v44 = vsel %vm4521_vm2, %v1280_v24, %v1284_v4  ;;  %v2424_v0 = vunpack.c.l.b16 %v1275_v6  ;;  %v1531_v17 = vor.u32 %v1530_v9, %v1526_v18 }
  0xf7   : > { %v2277_v62 = vpop.permute.xlu0 %2276  ;;  %v2425_v29 = vunpack.c.l.b16 %v1285_v44  ;;  %v1367_v40 = vsel %vm4723_vm5, %v3754_v52, %v1366_v1  ;;  %v1368_v50 = vrot.slane %v1366_v1, 4  ;;  %v5295_v15 = vsel %vm2892_vm8, %v5231_v42, %v2369_v31 }
  0xf8   : > { %v5281_v43 = vsel %vm2859_vm7, %v4904_v2, %v2277_v62  ;;  %v2285_v55 = vpop.permute.xlu1 %2284  ;;  %v3740_v2 = vld [vmem:[%s4493_s7 + $0x3c] sm:$0xe]  ;;  %v1522_v23 = vrot.slane %v1521_v5, 4  ;;  %v1532_v20 = vrot.slane %v1531_v17, 4  ;;  %v2478_v16 = vunpack.c.l.b16 %v1367_v40 }
  0xf9   : > { %v2879_v4 = vsel %vm2859_vm7, %v5135_v27, %v2285_v55  ;;  %v2441_v57 = vpack.c.b16 %v2425_v29, %v2424_v0  ;;  %v1370_v30 = vsel %vm4723_vm5, %v1368_v50, %v1369_v21  ;;  %v3756_v61 = vrot.slane %v3740_v2, 9  ;;  %v3744_v0 = vld [vmem:[%s4493_s7 + $0x6c] sm:$0xe] }
  0xfa   : > { %v1527_v32 = vsel %vm4521_vm2, %v1522_v23, %v1526_v18  ;;  %v1537_v3 = vsel %vm4521_vm2, %v1532_v20, %v1536_v46  ;;  %v2479_v62 = vunpack.c.l.b16 %v1370_v30  ;;  %v1380_v42 = vrot.slane %v4979_v35, 5  ;;  %v3816_v18 = vld [vmem:[%s4493_s7 + $0x18] sm:$0xe] }
  0xfb   : > { %v2650_v7 = vunpack.c.l.b16 %v1527_v32  ;;  %2472 = vrot.lane.b32.xlu0 %v2441_v57, %s4399_s11  ;;  %v2651_v27 = vunpack.c.l.b16 %v1537_v3  ;;  %v1383_v39 = vrot.slane %v4986_v33, 5  ;;  %v3755_v52 = vrot.slane %v3739_v54, 9  ;;  %v3776_v57 = vld [vmem:[%s4493_s7 + $0x48] sm:$0xf]  ;;  %v5345_v3 = vld [vmem:[%s4493_s7 + $0x4c] sm:$0xf]  ;;  %s3511_s11 = scalar_lea.hbm %s6411_s3, %s4386_s18 }
  0xfc   : > { %v1373_v24 = vrot.slane %v5005_v12, 5  ;;  %v2508_v9 = vpack.c.b16 %v2479_v62, %v2478_v16  ;;  %v1381_v35 = vsel %vm4723_vm5, %v3756_v61, %v1380_v42  ;;  %v1382_v6 = vrot.slane %v1380_v42, 4  ;;  %s6318_s30 = sshll.u32 %s3511_s11, 4  ;;  %s3516_s30 = int_to_ptr.hbm [resolvable:$true] %s6318_s30 }
  0xfd   : > { %v2375_v31 = vpop.permute.xlu2 %2374  ;;  %2618 = vrot.lane.b32.xlu1 %v4101_v56, %s4401_s13  ;;  %v2682_v46 = vpack.c.b16 %v2651_v27, %v2650_v7  ;;  %v2482_v1 = vunpack.c.l.b16 %v1381_v35  ;;  %v1376_v17 = vrot.slane %v5010_v45, 5  ;;  %v1964_v29 = vrot.slane %v5259_v38, 5  ;;  %v5354_v27 = vld [vmem:[%s4493_s7 + $0x50] sm:$0x1]  ;;  %s4270_s9 = sshra.s32 %s3516_s30, 4  ;;  %s4271_s9 = int_to_ptr.hbm [resolvable:$true] %s4270_s9 }
  0xfe   : > { %v1374_v44 = vsel %vm4723_vm5, %v3755_v52, %v1373_v24  ;;  %v1375_v33 = vrot.slane %v1373_v24, 4  ;;  %v1384_v12 = vsel %vm4723_vm5, %v1382_v6, %v1383_v39  ;;  %v1967_v23 = vrot.slane %v5263_v49, 5  ;;  %s4272_s10 = scalar_lea.hbm %s4271_s9, 1  ;;  %p4277_p1 = scmp.lt.s32.totalorder %s4271_s9, %s6411_s3 }
  0xff   : > { %v2283_v22 = vpop.permute.xlu0 %2282  ;;  %v2480_v21 = vunpack.c.l.b16 %v1374_v44  ;;  %2698 = vrot.lane.b32.xlu2 %v2682_v46, %s4402_s14  ;;  %v2483_v2 = vunpack.c.l.b16 %v1384_v12  ;;  %v5329_v56 = vsel %vm2892_vm8, %v5272_v51, %v2375_v31  ;;  %v3760_v50 = vrot.slane %v3744_v0, 9  ;;  %p4273_p12 = scmp.ne.s32.totalorder %s4271_s9, %s4272_s10 }
 0x100   : > { %v5314_v55 = vsel %vm2859_vm7, %v4907_v13, %v2283_v22  ;;  %v2291_v5 = vpop.permute.xlu1 %2290  ;;  %v3832_v13 = vrot.slane %v3816_v18, 9  ;;  %v1377_v40 = vsel %vm4723_vm5, %v1375_v33, %v1376_v17  ;;  %v1408_v20 = vrot.slane %v5036_v37, 5  ;;  %v3770_v18 = vld [vmem:[%s4493_s7 + $0x24] sm:$0xf]  ;;  %v5375_v33 = vld [vmem:[%s4493_s7 + $0x2c] sm:$0x1] }
 0x101   : > { %v5335_v45 = vsel %vm2859_vm7, %v5182_v63, %v2291_v5  ;;  %v2510_v16 = vpack.c.b16 %v2483_v2, %v2482_v1  ;;  %v2481_v54 = vunpack.c.l.b16 %v1377_v40  ;;  %v1966_v49 = vrot.slane %v1964_v29, 4  ;;  %v5370_v5 = vld [vmem:[%s4493_s7 + $0x28] sm:$0xf]  ;;  %p4274_p13 = pnand %p4273_p12, %p4471_p4 }
 0x102   : > { %v1965_v38 = vsel %vm4723_vm5, %v3832_v13, %v1964_v29  ;;  %v1409_v32 = vsel %vm4723_vm5, %v3760_v50, %v1408_v20  ;;  %v1410_v30 = vrot.slane %v1408_v20, 4  ;;  %v1411_v63 = vrot.slane %v5048_v11, 5  ;;  %v4102_v40 = vld [vmem:[%s4493_s7 + $0x24] sm:$0xff] }
 0x103   : > { %v2730_v51 = vunpack.c.l.b16 %v1965_v38  ;;  %2526 = vrot.lane.b32.xlu0 %v2508_v9, %s4400_s12  ;;  %v2509_v37 = vpack.c.b16 %v2481_v54, %v2480_v21  ;;  %v1968_v7 = vsel %vm4723_vm5, %v1966_v49, %v1967_v23  ;;  %v2490_v42 = vunpack.c.l.b16 %v1409_v32  ;;  %v3820_v21 = vld [vmem:[%s4493_s7 + $0x48] sm:$0xe]  ;;  %p4275_p0 = pneg %p4274_p13 }
 0x104   : > { %v2731_v22 = vunpack.c.l.b16 %v1968_v7  ;;  %v1412_v39 = vsel %vm4723_vm5, %v1410_v30, %v1411_v63  ;;  %v1611_v24 = vshrl.u32 %v3776_v57, 16  ;;  %v1614_v35 = vshll.u32 %v3776_v57, 16  ;;  %v4105_v30 = vld [vmem:[%s4493_s7 + $0x48] sm:$0xff] }
 0x105   : > { %v2381_v61 = vpop.permute.xlu2 %2380  ;;  %2528 = vrot.lane.b32.xlu1 %v2509_v37, %s4400_s12  ;;  %v2491_v9 = vunpack.c.l.b16 %v1412_v39  ;;  %v1620_v6 = vshll.u32 %v5345_v3, 16  ;;  %v1624_v1 = vshrl.u32 %v5345_v3, 16  ;;  %v1630_v44 = vshll.u32 %v5354_v27, 16 }
 0x106   : > { %v5351_v31 = vsel %vm2892_vm8, %v2879_v4, %v2381_v61  ;;  %v1613_v46 = vrot.slane %v1611_v24, 4  ;;  %v1616_v12 = vrot.slane %v1614_v35, 5  ;;  %v1539_v17 = vshrl.u32 %v3770_v18, 16 }
 0x107   : > { %v2289_v62 = vpop.permute.xlu0 %2288  ;;  %2530 = vrot.lane.b32.xlu2 %v2510_v16, %s4400_s12  ;;  %v2514_v0 = vpack.c.b16 %v2491_v9, %v2490_v42  ;;  %v1626_v13 = vrot.slane %v1624_v1, 4  ;;  %v1632_v2 = vrot.slane %v1630_v44, 5  ;;  %v1542_v29 = vshll.u32 %v3770_v18, 16 }
 0x108   : > { %v5358_v11 = vsel %vm2859_vm7, %v4967_v41, %v2289_v62  ;;  %v2297_v52 = vpop.permute.xlu1 %2296  ;;  %v2762_v41 = vpack.c.b16 %v2731_v22, %v2730_v51  ;;  %v1548_v23 = vshll.u32 %v5370_v5, 16  ;;  %v1617_v50 = vor.u32 %v1616_v12, %v1613_v46 }
 0x109   : > { %v5366_v4 = vsel %vm2859_vm7, %v5216_v8, %v2297_v52  ;;  %v1622_v8 = vrot.slane %v1620_v6, 5  ;;  %v1541_v20 = vrot.slane %v1539_v17, 4  ;;  %v1552_v54 = vshrl.u32 %v5370_v5, 16 }
 0x10a   : > { %v1558_v38 = vshll.u32 %v5375_v33, 16  ;;  %v1544_v16 = vrot.slane %v1542_v29, 5  ;;  %v1550_v57 = vrot.slane %v1548_v23, 5  ;;  %v3836_v32 = vrot.slane %v3820_v21, 9 }
 0x10b   : > { %v1627_v49 = vor.u32 %v1626_v13, %v1622_v8  ;;  %2778 = vrot.lane.b32.xlu0 %v2762_v41, %s4403_s24  ;;  %v1618_v61 = vrot.slane %v1617_v50, 4  ;;  %v1554_v37 = vrot.slane %v1552_v54, 4  ;;  %v1992_v24 = vrot.slane %v5345_v3, 5 }
 0x10c   : > { %v1560_v7 = vrot.slane %v1558_v38, 5  ;;  %v1545_v39 = vor.u32 %v1544_v16, %v1541_v20  ;;  %v1995_v35 = vrot.slane %v5354_v27, 5  ;;  %v1971_v21 = vrot.slane %v5370_v5, 5 }
 0x10d   : > { %v2387_v51 = vpop.permute.xlu2 %2386  ;;  %v1628_v22 = vrot.slane %v1627_v49, 4  ;;  %2620 = vrot.lane.b32.xlu1 %v4102_v40, %s4401_s13  ;;  %v1623_v18 = vsel %vm4521_vm2, %v1618_v61, %v1622_v8  ;;  %v1555_v9 = vor.u32 %v1554_v37, %v1550_v57  ;;  %v1993_v46 = vsel %vm4723_vm5, %v3836_v32, %v1992_v24 }
 0x10e   : > { %v5387_v62 = vsel %vm2892_vm8, %v5335_v45, %v2387_v51  ;;  %v2658_v41 = vunpack.c.l.b16 %v1623_v18  ;;  %v1546_v3 = vrot.slane %v1545_v39, 4  ;;  %v1994_v12 = vrot.slane %v1992_v24, 4 }
 0x10f   : > { %v2295_v63 = vpop.permute.xlu0 %2294  ;;  %v1633_v6 = vsel %vm4521_vm2, %v1628_v22, %v1632_v2  ;;  %2626 = vrot.lane.b32.xlu2 %v4105_v30, %s4401_s13  ;;  %v1556_v44 = vrot.slane %v1555_v9, 4  ;;  %v2738_v8 = vunpack.c.l.b16 %v1993_v46  ;;  %v1974_v13 = vrot.slane %v5375_v33, 5  ;;  %v5414_v2 = vld [vmem:[%s4493_s7 + $0x7c] sm:$0xf]  ;;  %v3745_v22 = vld [vmem:[%s4493_s7 + $0x78] sm:$0xe] }
 0x110   : > { %v5391_v42 = vsel %vm2859_vm7, %v5040_v36, %v2295_v63  ;;  %v2367_v52 = vpop.permute.xlu1 %2366  ;;  %v3817_v36 = vld [vmem:[%s4493_s7 + $0x24] sm:$0xe]  ;;  %v2659_v1 = vunpack.c.l.b16 %v1633_v6  ;;  %v1551_v27 = vsel %vm4521_vm2, %v1546_v3, %v1550_v57  ;;  %v1996_v50 = vsel %vm4723_vm5, %v1994_v12, %v1995_v35  ;;  %v5424_v57 = vld [vmem:[%s4493_s7 + $0x80] sm:$0x1]  ;;  %v3741_v9 = vld [vmem:[%s4493_s7 + $0x48] sm:$0xe] }
 0x111   : > { %v5399_v45 = vsel %vm2892_vm8, %v5252_v47, %v2367_v52  ;;  %v3784_v47 = vld [vmem:[%s4493_s7 + $0x78] sm:$0xf]  ;;  %v3833_v17 = vrot.slane %v3817_v36, 9  ;;  %v1561_v23 = vsel %vm4521_vm2, %v1556_v44, %v1560_v7  ;;  %v2652_v40 = vunpack.c.l.b16 %v1551_v27 }
 0x112   : > { %v2686_v29 = vpack.c.b16 %v2659_v1, %v2658_v41  ;;  %v2653_v20 = vunpack.c.l.b16 %v1561_v23  ;;  %v2739_v54 = vunpack.c.l.b16 %v1996_v50  ;;  %v1973_v49 = vrot.slane %v1971_v21, 4  ;;  %v4109_v41 = vld [vmem:[%s4493_s7 + $0x78] sm:$0xff]  ;;  %v4241_v50 = vld [vmem:[%s4493_s7 + $0x50] sm:$0x1] }
 0x113   : > { %v1972_v38 = vsel %vm4723_vm5, %v3833_v17, %v1971_v21  ;;  %2538 = vrot.lane.b32.xlu0 %v2514_v0, %s4400_s12  ;;  %v1707_v51 = vshrl.u32 %v3784_v47, 16  ;;  %v1710_v32 = vshll.u32 %v3784_v47, 16  ;;  %v1716_v30 = vshll.u32 %v5414_v2, 16  ;;  %v3824_v12 = vld [vmem:[%s4493_s7 + $0x78] sm:$0xe] }
 0x114   : > { %v2732_v16 = vunpack.c.l.b16 %v1972_v38  ;;  %v2683_v63 = vpack.c.b16 %v2653_v20, %v2652_v40  ;;  %v2766_v37 = vpack.c.b16 %v2739_v54, %v2738_v8  ;;  %v1975_v7 = vsel %vm4723_vm5, %v1973_v49, %v1974_v13  ;;  %v4240_v13 = vld [vmem:[%s4493_s7 + $0x4c] sm:$0xf] }
 0x115   : > { %v2393_v5 = vpop.permute.xlu2 %2392  ;;  %v2733_v39 = vunpack.c.l.b16 %v1975_v7  ;;  %v1709_v52 = vrot.slane %v1707_v51, 4  ;;  %v1712_v24 = vrot.slane %v1710_v32, 5  ;;  %v1718_v18 = vrot.slane %v1716_v30, 5 }
 0x116   : > { %2700 = vrot.lane.b32.xlu1 %v2683_v63, %s4402_s14  ;;  %v1720_v35 = vshrl.u32 %v5414_v2, 16  ;;  %v5440_v36 = vsel %vm2892_vm8, %v5366_v4, %v2393_v5  ;;  %v3761_v1 = vrot.slane %v3745_v22, 9  ;;  %v1415_v44 = vrot.slane %v5144_v10, 5 }
 0x117   : > { %v2365_v33 = vpop.permute.xlu0 %2364  ;;  %2706 = vrot.lane.b32.xlu2 %v2686_v29, %s4402_s14  ;;  %v2763_v3 = vpack.c.b16 %v2733_v39, %v2732_v16  ;;  %v1713_v46 = vor.u32 %v1712_v24, %v1709_v52  ;;  %v1418_v4 = vrot.slane %v5158_v19, 5  ;;  %v3757_v27 = vrot.slane %v3741_v9, 9  ;;  %v3786_v52 = vld [vmem:[%s4493_s7 + $0x84] sm:$0xf]  ;;  %v5475_v9 = vld [vmem:[%s4493_s7 + $0x88] sm:$0xf] }
 0x118   : > { %v5429_v61 = vsel %vm2892_vm8, %v5091_v14, %v2365_v33  ;;  %v2373_v0 = vpop.permute.xlu1 %2372  ;;  %v1726_v14 = vshll.u32 %v5424_v57, 16  ;;  %v1722_v8 = vrot.slane %v1720_v35, 4  ;;  %v1417_v21 = vrot.slane %v1415_v44, 4 }
 0x119   : > { %v5444_v6 = vsel %vm2892_vm8, %v5281_v43, %v2373_v0  ;;  %v1714_v17 = vrot.slane %v1713_v46, 4  ;;  %v1416_v43 = vsel %vm4723_vm5, %v3761_v1, %v1415_v44  ;;  %v1387_v29 = vrot.slane %v4240_v13, 5 }
 0x11a   : > { %v1728_v47 = vrot.slane %v1726_v14, 5  ;;  %v1723_v23 = vor.u32 %v1722_v8, %v1718_v18  ;;  %v2492_v40 = vunpack.c.l.b16 %v1416_v43  ;;  %v1390_v20 = vrot.slane %v4241_v50, 5  ;;  %v5506_v50 = vld [vmem:[%s4493_s7 + $0x5c] sm:$0x1] }
 0x11b   : > { %v3840_v54 = vrot.slane %v3824_v12, 9  ;;  %2634 = vrot.lane.b32.xlu0 %v4109_v41, %s4401_s13  ;;  %v1719_v10 = vsel %vm4521_vm2, %v1714_v17, %v1718_v18  ;;  %v1419_v49 = vsel %vm4723_vm5, %v1417_v21, %v1418_v4  ;;  %v1388_v5 = vsel %vm4723_vm5, %v3757_v27, %v1387_v29  ;;  %v5485_v41 = vld [vmem:[%s4493_s7 + $0x8c] sm:$0x1] }
 0x11c   : > { %v1389_v33 = vrot.slane %v1387_v29, 4  ;;  %v1724_v16 = vrot.slane %v1723_v23, 4  ;;  %v2666_v51 = vunpack.c.l.b16 %v1719_v10  ;;  %v2493_v30 = vunpack.c.l.b16 %v1419_v49 }
 0x11d   : > { %v2447_v38 = vpop.permute.xlu2 %2446  ;;  %v2484_v0 = vunpack.c.l.b16 %v1388_v5  ;;  %v2020_v22 = vrot.slane %v5414_v2, 5  ;;  %v2023_v39 = vrot.slane %v5424_v57, 5  ;;  %v1731_v44 = vshrl.u32 %v3786_v52, 16  ;;  %v3772_v5 = vld [vmem:[%s4493_s7 + $0x30] sm:$0xf] }
 0x11e   : > { %v1391_v7 = vsel %vm4723_vm5, %v1389_v33, %v1390_v20  ;;  %2780 = vrot.lane.b32.xlu1 %v2763_v3, %s4403_s24  ;;  %v1729_v24 = vsel %vm4521_vm2, %v1724_v16, %v1728_v47  ;;  %v5482_v57 = vsel %vm2925_vm9, %v5399_v45, %v2447_v38  ;;  %v1734_v47 = vshll.u32 %v3786_v52, 16 }
 0x11f   : > { %v2371_v19 = vpop.permute.xlu0 %2370  ;;  %v2485_v18 = vunpack.c.l.b16 %v1391_v7  ;;  %2786 = vrot.lane.b32.xlu2 %v2766_v37, %s4403_s24  ;;  %v2667_v35 = vunpack.c.l.b16 %v1729_v24  ;;  %v2021_v2 = vsel %vm4723_vm5, %v3840_v54, %v2020_v22  ;;  %v2022_v14 = vrot.slane %v2020_v22, 4  ;;  %v3778_v37 = vld [vmem:[%s4493_s7 + $0x54] sm:$0xf] }
 0x120   : > { %v5464_v32 = vsel %vm2892_vm8, %v5128_v53, %v2371_v19  ;;  %v2379_v63 = vpop.permute.xlu1 %2378  ;;  %v2515_v53 = vpack.c.b16 %v2493_v30, %v2492_v40  ;;  %v2746_v46 = vunpack.c.l.b16 %v2021_v2  ;;  %v1740_v45 = vshll.u32 %v5475_v9, 16 }
 0x121   : > { %v2511_v3 = vpack.c.b16 %v2485_v18, %v2484_v0  ;;  %v5489_v1 = vsel %vm2892_vm8, %v5314_v55, %v2379_v63  ;;  %v2690_v12 = vpack.c.b16 %v2667_v35, %v2666_v51  ;;  %v2024_v8 = vsel %vm4723_vm5, %v2022_v14, %v2023_v39  ;;  %v5498_v55 = vld [vmem:[%s4493_s7 + $0x58] sm:$0xf] }
 0x122   : > { %v2747_v4 = vunpack.c.l.b16 %v2024_v8  ;;  %v1733_v17 = vrot.slane %v1731_v44, 4  ;;  %v1744_v43 = vshrl.u32 %v5475_v9, 16  ;;  %v1750_v21 = vshll.u32 %v5485_v41, 16 }
 0x123   : > { %2714 = vrot.lane.b32.xlu0 %v2690_v12, %s4402_s14  ;;  %v1736_v23 = vrot.slane %v1734_v47, 5  ;;  %v1742_v40 = vrot.slane %v1740_v45, 5  ;;  %v1635_v20 = vshrl.u32 %v3778_v37, 16  ;;  %v1638_v51 = vshll.u32 %v3778_v37, 16 }
 0x124   : > { %v2770_v54 = vpack.c.b16 %v2747_v4, %v2746_v46  ;;  %v1746_v19 = vrot.slane %v1744_v43, 4  ;;  %v1752_v49 = vrot.slane %v1750_v21, 5  ;;  %v1644_v63 = vshll.u32 %v5498_v55, 16  ;;  %v5528_v46 = vld [vmem:[%s4493_s7 + $0x38] sm:$0x1] }
 0x125   : > { %v2453_v27 = vpop.permute.xlu2 %2452  ;;  %v1637_v16 = vrot.slane %v1635_v20, 4  ;;  %v1654_v7 = vshll.u32 %v5506_v50, 16  ;;  %v1640_v22 = vrot.slane %v1638_v51, 5  ;;  %v1563_v39 = vshrl.u32 %v3772_v5, 16 }
 0x126   : > { %v5503_v29 = vsel %vm2925_vm9, %v5444_v6, %v2453_v27  ;;  %v1737_v6 = vor.u32 %v1736_v23, %v1733_v17  ;;  %2532 = vrot.lane.b32.xlu1 %v2511_v3, %s4400_s12  ;;  %v1747_v30 = vor.u32 %v1746_v19, %v1742_v40  ;;  %v1566_v52 = vshll.u32 %v3772_v5, 16  ;;  %v4110_v27 = vld [vmem:[%s4493_s7 + $0x84] sm:$0xff] }
 0x127   : > { %v2377_v13 = vpop.permute.xlu0 %2376  ;;  %2540 = vrot.lane.b32.xlu2 %v2515_v53, %s4400_s12  ;;  %v1646_v18 = vrot.slane %v1644_v63, 5  ;;  %v1656_v2 = vrot.slane %v1654_v7, 5  ;;  %v1641_v3 = vor.u32 %v1640_v22, %v1637_v16  ;;  %v1565_v44 = vrot.slane %v1563_v39, 4  ;;  %v4106_v53 = vld [vmem:[%s4493_s7 + $0x54] sm:$0xff]  ;;  %v3825_v16 = vld [vmem:[%s4493_s7 + $0x84] sm:$0xe] }
 0x128   : > { %v5510_v38 = vsel %vm2892_vm8, %v5163_v34, %v2377_v13  ;;  %v2385_v10 = vpop.permute.xlu1 %2384  ;;  %v1648_v34 = vshrl.u32 %v5498_v55, 16  ;;  %v1738_v0 = vrot.slane %v1737_v6, 4  ;;  %v1748_v24 = vrot.slane %v1747_v30, 4  ;;  %v4103_v7 = vld [vmem:[%s4493_s7 + $0x30] sm:$0xff] }
 0x129   : > { %v5515_v33 = vsel %vm2892_vm8, %v5358_v11, %v2385_v10  ;;  %v5523_v11 = vld [vmem:[%s4493_s7 + $0x34] sm:$0xf]  ;;  %v1568_v37 = vrot.slane %v1566_v52, 5  ;;  %v1642_v21 = vrot.slane %v1641_v3, 4  ;;  %v1582_v19 = vshll.u32 %v5528_v46, 16 }
 0x12a   : > { %v1650_v35 = vrot.slane %v1648_v34, 4  ;;  %v1743_v14 = vsel %vm4521_vm2, %v1738_v0, %v1742_v40  ;;  %v1753_v12 = vsel %vm4521_vm2, %v1748_v24, %v1752_v49  ;;  %v1572_v45 = vshll.u32 %v5523_v11, 16  ;;  %v3821_v34 = vld [vmem:[%s4493_s7 + $0x54] sm:$0xe] }
 0x12b   : > { %v5533_v8 = vunpack.c.l.b16 %v1743_v14  ;;  %2794 = vrot.lane.b32.xlu0 %v2770_v54, %s4403_s24  ;;  %v2669_v43 = vunpack.c.l.b16 %v1753_v12  ;;  %v1569_v13 = vor.u32 %v1568_v37, %v1565_v44  ;;  %v1576_v23 = vshrl.u32 %v5523_v11, 16 }
 0x12c   : > { %v1651_v47 = vor.u32 %v1650_v35, %v1646_v18  ;;  %v1574_v10 = vrot.slane %v1572_v45, 5  ;;  %v1647_v54 = vsel %vm4521_vm2, %v1642_v21, %v1646_v18  ;;  %v1584_v30 = vrot.slane %v1582_v19, 5 }
 0x12d   : > { %v2459_v4 = vpop.permute.xlu2 %2458  ;;  %v1570_v5 = vrot.slane %v1569_v13, 4  ;;  %v1578_v6 = vrot.slane %v1576_v23, 4  ;;  %v2691_v24 = vpack.c.b16 %v2669_v43, %v5533_v8  ;;  %v3841_v18 = vrot.slane %v3825_v16, 9  ;;  %v3792_v13 = vld [vmem:[%s4493_s7 + $0xa8] sm:$0xf] }
 0x12e   : > { %v1652_v20 = vrot.slane %v1651_v47, 4  ;;  %2628 = vrot.lane.b32.xlu1 %v4106_v53, %s4401_s13  ;;  %v5552_v63 = vsel %vm2925_vm9, %v5489_v1, %v2459_v4  ;;  %v2027_v35 = vrot.slane %v5475_v9, 5  ;;  %v2030_v1 = vrot.slane %v5485_v41, 5  ;;  %v5600_v16 = vld [vmem:[%s4493_s7 + $0xb0] sm:$0x1] }
 0x12f   : > { %v2383_v17 = vpop.permute.xlu0 %2382  ;;  %2636 = vrot.lane.b32.xlu2 %v4110_v27, %s4401_s13  ;;  %v1575_v22 = vsel %vm4521_vm2, %v1570_v5, %v1574_v10  ;;  %v1579_v39 = vor.u32 %v1578_v6, %v1574_v10  ;;  %v3837_v44 = vrot.slane %v3821_v34, 9  ;;  %v1999_v37 = vrot.slane %v5498_v55, 5 }
 0x130   : > { %v5541_v40 = vsel %vm2892_vm8, %v5192_v48, %v2383_v17  ;;  %v2391_v49 = vpop.permute.xlu1 %2390  ;;  %v1657_v51 = vsel %vm4521_vm2, %v1652_v20, %v1656_v2  ;;  %v2660_v48 = vunpack.c.l.b16 %v1647_v54  ;;  %v3818_v2 = vld [vmem:[%s4493_s7 + $0x30] sm:$0xe]  ;;  %v2654_v3 = vunpack.c.l.b16 %v1575_v22 }
 0x131   : > { %v2661_v0 = vunpack.c.l.b16 %v1657_v51  ;;  %v5561_v52 = vsel %vm2892_vm8, %v5391_v42, %v2391_v49  ;;  %v1580_v14 = vrot.slane %v1579_v39, 4  ;;  %v2028_v12 = vsel %vm4723_vm5, %v3841_v18, %v2027_v35  ;;  %v5588_v49 = vld [vmem:[%s4493_s7 + $0xac] sm:$0xf]  ;;  %v3746_v18 = vld [vmem:[%s4493_s7 + $0x84] sm:$0xe] }
 0x132   : > { %v2029_v42 = vrot.slane %v2027_v35, 4  ;;  %v2002_v47 = vrot.slane %v5506_v50, 5  ;;  %v2000_v8 = vsel %vm4723_vm5, %v3837_v44, %v1999_v37  ;;  %v2001_v45 = vrot.slane %v1999_v37, 4 }
 0x133   : > { %v2687_v53 = vpack.c.b16 %v2661_v0, %v2660_v48  ;;  %2622 = vrot.lane.b32.xlu0 %v4103_v7, %s4401_s13  ;;  %v1585_v9 = vsel %vm4521_vm2, %v1580_v14, %v1584_v30  ;;  %v3834_v55 = vrot.slane %v3818_v2, 9  ;;  %v2740_v43 = vunpack.c.l.b16 %v2000_v8  ;;  %v3748_v30 = vld [vmem:[%s4493_s7 + $0x9c] sm:$0xe] }
 0x134   : > { %v2655_v27 = vunpack.c.l.b16 %v1585_v9  ;;  %v2031_v50 = vsel %vm4723_vm5, %v2029_v42, %v2030_v1  ;;  %v2748_v23 = vunpack.c.l.b16 %v2028_v12  ;;  %v2003_v20 = vsel %vm4723_vm5, %v2001_v45, %v2002_v47 }
 0x135   : > { %v2465_v4 = vpop.permute.xlu2 %2464  ;;  %v1978_v10 = vrot.slane %v5523_v11, 5  ;;  %v1981_v19 = vrot.slane %v5528_v46, 5  ;;  %v2741_v54 = vunpack.c.l.b16 %v2003_v20  ;;  %v1803_v48 = vshrl.u32 %v3792_v13, 16 }
 0x136   : > { %2708 = vrot.lane.b32.xlu1 %v2687_v53, %s4402_s14  ;;  %v5593_v5 = vsel %vm2925_vm9, %v5515_v33, %v2465_v4  ;;  %v2684_v11 = vpack.c.b16 %v2655_v27, %v2654_v3  ;;  %v1806_v33 = vshll.u32 %v3792_v13, 16  ;;  %v1812_v0 = vshll.u32 %v5588_v49, 16 }
 0x137   : > { %v2389_v41 = vpop.permute.xlu0 %2388  ;;  %2716 = vrot.lane.b32.xlu2 %v2691_v24, %s4402_s14  ;;  %v1979_v46 = vsel %vm4723_vm5, %v3834_v55, %v1978_v10  ;;  %v1980_v51 = vrot.slane %v1978_v10, 4  ;;  %v2767_v34 = vpack.c.b16 %v2741_v54, %v2740_v43  ;;  %v1805_v22 = vrot.slane %v1803_v48, 4 }
 0x138   : > { %v5578_v17 = vsel %vm2892_vm8, %v5224_v28, %v2389_v41  ;;  %v2445_v21 = vpop.permute.xlu1 %2444  ;;  %v2749_v28 = vunpack.c.l.b16 %v2031_v50  ;;  %v2734_v7 = vunpack.c.l.b16 %v1979_v46  ;;  %v1816_v39 = vshrl.u32 %v5588_v49, 16  ;;  %v3742_v41 = vld [vmem:[%s4493_s7 + $0x54] sm:$0xe] }
 0x139   : > { %v5597_v6 = vsel %vm2925_vm9, %v5429_v61, %v2445_v21  ;;  %v1982_v61 = vsel %vm4723_vm5, %v1980_v51, %v1981_v19  ;;  %v1822_v24 = vshll.u32 %v5600_v16, 16  ;;  %v1808_v1 = vrot.slane %v1806_v33, 5  ;;  %v4244_v19 = vld [vmem:[%s4493_s7 + $0x58] sm:$0xf]  ;;  %v3828_v51 = vld [vmem:[%s4493_s7 + $0xa8] sm:$0xe] }
 0x13a   : > { %v2735_v35 = vunpack.c.l.b16 %v1982_v61  ;;  %v1814_v2 = vrot.slane %v1812_v0, 5  ;;  %v3764_v14 = vrot.slane %v3748_v30, 9  ;;  %v2771_v3 = vpack.c.b16 %v2749_v28, %v2748_v23  ;;  %v4113_v0 = vld [vmem:[%s4493_s7 + $0xa8] sm:$0xff] }
 0x13b   : > { %2702 = vrot.lane.b32.xlu0 %v2684_v11, %s4402_s14  ;;  %v1818_v37 = vrot.slane %v1816_v39, 4  ;;  %v1436_v53 = vrot.slane %v5203_v58, 5  ;;  %v1439_v12 = vrot.slane %v5209_v25, 5  ;;  %v1809_v42 = vor.u32 %v1808_v1, %v1805_v22  ;;  %v4242_v58 = vld [vmem:[%s4493_s7 + $0x88] sm:$0xf] }
 0x13c   : > { %v3762_v9 = vrot.slane %v3746_v18, 9  ;;  %v2764_v8 = vpack.c.b16 %v2735_v35, %v2734_v7  ;;  %v1824_v55 = vrot.slane %v1822_v24, 5  ;;  %v1422_v43 = vrot.slane %v4242_v58, 5  ;;  %v4243_v25 = vld [vmem:[%s4493_s7 + $0x8c] sm:$0x1] }
 0x13d   : > { %v1819_v45 = vor.u32 %v1818_v37, %v1814_v2  ;;  %v1438_v4 = vrot.slane %v1436_v53, 4  ;;  %v1810_v27 = vrot.slane %v1809_v42, 4  ;;  %v1437_v50 = vsel %vm4723_vm5, %v3764_v14, %v1436_v53  ;;  %v4245_v35 = vld [vmem:[%s4493_s7 + $0x5c] sm:$0x1]  ;;  %v3788_v42 = vld [vmem:[%s4493_s7 + $0x90] sm:$0xf] }
 0x13e   : > { %2788 = vrot.lane.b32.xlu1 %v2767_v34, %s4403_s24  ;;  %v1425_v21 = vrot.slane %v4243_v25, 5  ;;  %v3758_v10 = vrot.slane %v3742_v41, 9  ;;  %v1394_v28 = vrot.slane %v4244_v19, 5  ;;  %v1423_v46 = vsel %vm4723_vm5, %v3762_v9, %v1422_v43  ;;  %v5654_v9 = vld [vmem:[%s4493_s7 + $0x94] sm:$0xf] }
 0x13f   : > { %v5613_v44 = vpop.permute.xlu0 %2442  ;;  %2796 = vrot.lane.b32.xlu2 %v2771_v3, %s4403_s24  ;;  %v1820_v13 = vrot.slane %v1819_v45, 4  ;;  %v1440_v23 = vsel %vm4723_vm5, %v1438_v4, %v1439_v12  ;;  %v1815_v54 = vsel %vm4521_vm2, %v1810_v27, %v1814_v2  ;;  %v2498_v34 = vunpack.c.l.b16 %v1437_v50 }
 0x140   : > { %v5617_v47 = vpop.permute.xlu1 %2450  ;;  %v2471_v20 = vpop.permute.xlu2 %2470  ;;  %v2674_v30 = vunpack.c.l.b16 %v1815_v54  ;;  %v1424_v7 = vrot.slane %v1422_v43, 4  ;;  %v2499_v61 = vunpack.c.l.b16 %v1440_v23  ;;  %v2494_v22 = vunpack.c.l.b16 %v1423_v46  ;;  %v3780_v43 = vld [vmem:[%s4493_s7 + $0x60] sm:$0xf] }
 0x141   : > { %v5633_v11 = vsel %vm2925_vm9, %v5561_v52, %v2471_v20  ;;  %v1825_v48 = vsel %vm4521_vm2, %v1820_v13, %v1824_v55  ;;  %v1396_v39 = vrot.slane %v1394_v28, 4  ;;  %v1395_v18 = vsel %vm4723_vm5, %v3758_v10, %v1394_v28  ;;  %v5664_v55 = vld [vmem:[%s4493_s7 + $0x98] sm:$0x1]  ;;  %v5677_v20 = vld [vmem:[%s4493_s7 + $0x64] sm:$0xf] }
 0x142   : > { %v2675_v33 = vunpack.c.l.b16 %v1825_v48  ;;  %v1426_v24 = vsel %vm4723_vm5, %v1424_v7, %v1425_v21  ;;  %v1397_v1 = vrot.slane %v4245_v35, 5  ;;  %v3844_v2 = vrot.slane %v3828_v51, 9  ;;  %v5680_v48 = vld [vmem:[%s4493_s7 + $0x68] sm:$0x1] }
 0x143   : > { %2782 = vrot.lane.b32.xlu0 %v2764_v8, %s4403_s24  ;;  %v2495_v37 = vunpack.c.l.b16 %v1426_v24  ;;  %v2048_v53 = vrot.slane %v5588_v49, 5  ;;  %v2051_v8 = vrot.slane %v5600_v16, 5  ;;  %v2518_v50 = vpack.c.b16 %v2499_v61, %v2498_v34 }
 0x144   : > { %v2694_v14 = vpack.c.b16 %v2675_v33, %v2674_v30  ;;  %v1398_v41 = vsel %vm4723_vm5, %v1396_v39, %v1397_v1  ;;  %v1755_v16 = vshrl.u32 %v3788_v42, 16  ;;  %v1758_v58 = vshll.u32 %v3788_v42, 16  ;;  %v3774_v39 = vld [vmem:[%s4493_s7 + $0x3c] sm:$0xf] }
 0x145   : > { %v2487_v49 = vunpack.c.l.b16 %v1398_v41  ;;  %v2049_v4 = vsel %vm4723_vm5, %v3844_v2, %v2048_v53  ;;  %v2050_v27 = vrot.slane %v2048_v53, 4  ;;  %v2516_v25 = vpack.c.b16 %v2495_v37, %v2494_v22  ;;  %v5697_v41 = vld [vmem:[%s4493_s7 + $0x40] sm:$0xf] }
 0x146   : > { %2642 = vrot.lane.b32.xlu1 %v4113_v0, %s4401_s13  ;;  %v1768_v13 = vshrl.u32 %v5654_v9, 16  ;;  %v1774_v23 = vshll.u32 %v5664_v55, 16  ;;  %v2754_v10 = vunpack.c.l.b16 %v2049_v4  ;;  %v1757_v19 = vrot.slane %v1755_v16, 4 }
 0x147   : > { %v2449_v52 = vpop.permute.xlu0 %2448  ;;  %2722 = vrot.lane.b32.xlu2 %v2694_v14, %s4402_s14  ;;  %v2052_v21 = vsel %vm4723_vm5, %v2050_v27, %v2051_v8  ;;  %v1760_v28 = vrot.slane %v1758_v58, 5  ;;  %v1659_v30 = vshrl.u32 %v3780_v43, 16  ;;  %v1662_v34 = vshll.u32 %v3780_v43, 16  ;;  %v3826_v43 = vld [vmem:[%s4493_s7 + $0x90] sm:$0xe] }
 0x148   : > { %v5649_v3 = vsel %vm2925_vm9, %v5295_v15, %v2449_v52  ;;  %v2457_v12 = vpop.permute.xlu1 %2456  ;;  %v2486_v15 = vunpack.c.l.b16 %v1395_v18  ;;  %v1770_v51 = vrot.slane %v1768_v13, 4  ;;  %v2755_v7 = vunpack.c.l.b16 %v2052_v21 }
 0x149   : > { %v5661_v45 = vsel %vm2925_vm9, %v5510_v38, %v2457_v12  ;;  %v1764_v38 = vshll.u32 %v5654_v9, 16  ;;  %v1761_v0 = vor.u32 %v1760_v28, %v1757_v19  ;;  %v1776_v61 = vrot.slane %v1774_v23, 5 }
 0x14a   : > { %v2512_v46 = vpack.c.b16 %v2487_v49, %v2486_v15  ;;  %v1668_v22 = vshll.u32 %v5677_v20, 16  ;;  %v1661_v18 = vrot.slane %v1659_v30, 4  ;;  %v1664_v35 = vrot.slane %v1662_v34, 5  ;;  %v5700_v49 = vpop.permute.xlu2 %2524 }
 0x14b   : > { %v1766_v54 = vrot.slane %v1764_v38, 5  ;;  %2546 = vrot.lane.b32.xlu0 %v2518_v50, %s4400_s12  ;;  %v1762_v2 = vrot.slane %v1761_v0, 4  ;;  %v1672_v37 = vshrl.u32 %v5677_v20, 16  ;;  %v1678_v53 = vshll.u32 %v5680_v48, 16  ;;  %v5705_v50 = vld [vmem:[%s4493_s7 + $0x44] sm:$0x1] }
 0x14c   : > { %v1670_v14 = vrot.slane %v1668_v22, 5  ;;  %v1665_v42 = vor.u32 %v1664_v35, %v1661_v18  ;;  %v1587_v8 = vshrl.u32 %v3774_v39, 16  ;;  %v2774_v15 = vpack.c.b16 %v2755_v7, %v2754_v10  ;;  %v4107_v10 = vld [vmem:[%s4493_s7 + $0x60] sm:$0xff] }
 0x14d   : > { %v1771_v24 = vor.u32 %v1770_v51, %v1766_v54  ;;  %v1767_v4 = vsel %vm4521_vm2, %v1762_v2, %v1766_v54  ;;  %v1674_v27 = vrot.slane %v1672_v37, 4  ;;  %v1680_v58 = vrot.slane %v1678_v53, 5  ;;  %v4111_v51 = vld [vmem:[%s4493_s7 + $0x90] sm:$0xff] }
 0x14e   : > { %2534 = vrot.lane.b32.xlu1 %v2512_v46, %s4400_s12  ;;  %v1666_v16 = vrot.slane %v1665_v42, 4  ;;  %v1589_v38 = vrot.slane %v1587_v8, 4  ;;  %v1596_v23 = vshll.u32 %v5697_v41, 16  ;;  %v5712_v19 = vunpack.c.l.b16 %v1767_v4  ;;  %v4104_v42 = vld [vmem:[%s4493_s7 + $0x3c] sm:$0xff] }
 0x14f   : > { %v2455_v33 = vpop.permute.xlu0 %2454  ;;  %2542 = vrot.lane.b32.xlu2 %v2516_v25, %s4400_s12  ;;  %v1675_v25 = vor.u32 %v1674_v27, %v1670_v14  ;;  %v1600_v54 = vshrl.u32 %v5697_v41, 16  ;;  %v1606_v46 = vshll.u32 %v5705_v50, 16  ;;  %v3842_v0 = vrot.slane %v3826_v43, 9  ;;  %v3819_v27 = vld [vmem:[%s4493_s7 + $0x3c] sm:$0xe] }
 0x150   : > { %v5687_v52 = vsel %vm2925_vm9, %v5329_v56, %v2455_v33  ;;  %v2463_v1 = vpop.permute.xlu1 %2462  ;;  %v1772_v56 = vrot.slane %v1771_v24, 4  ;;  %v1671_v28 = vsel %vm4521_vm2, %v1666_v16, %v1670_v14  ;;  %v2034_v2 = vrot.slane %v5654_v9, 5 }
 0x151   : > { %v5694_v12 = vsel %vm2925_vm9, %v5541_v40, %v2463_v1  ;;  %v1590_v40 = vshll.u32 %v3774_v39, 16  ;;  %v1676_v34 = vrot.slane %v1675_v25, 4  ;;  %v2662_v7 = vunpack.c.l.b16 %v1671_v28 }
 0x152   : > { %v1777_v21 = vsel %vm4521_vm2, %v1772_v56, %v1776_v61  ;;  %v3822_v61 = vld [vmem:[%s4493_s7 + $0x60] sm:$0xe]  ;;  %v1598_v39 = vrot.slane %v1596_v23, 5  ;;  %v1602_v24 = vrot.slane %v1600_v54, 4  ;;  %v1608_v18 = vrot.slane %v1606_v46, 5 }
 0x153   : > { %v1592_v13 = vrot.slane %v1590_v40, 5  ;;  %2802 = vrot.lane.b32.xlu0 %v2774_v15, %s4403_s24  ;;  %v1681_v35 = vsel %vm4521_vm2, %v1676_v34, %v1680_v58  ;;  %v2037_v14 = vrot.slane %v5664_v55, 5  ;;  %v3838_v56 = vrot.slane %v3822_v61, 9  ;;  %v3794_v23 = vld [vmem:[%s4493_s7 + $0xb4] sm:$0xf] }
 0x154   : > { %v2663_v37 = vunpack.c.l.b16 %v1681_v35  ;;  %v1603_v53 = vor.u32 %v1602_v24, %v1598_v39  ;;  %v2671_v8 = vunpack.c.l.b16 %v1777_v21  ;;  %v2036_v4 = vrot.slane %v2034_v2, 4  ;;  %v5758_v61 = vld [vmem:[%s4493_s7 + $0xbc] sm:$0x1] }
 0x155   : > { %v1593_v33 = vor.u32 %v1592_v13, %v1589_v38  ;;  %v2009_v9 = vrot.slane %v5680_v48, 5  ;;  %v2035_v40 = vsel %vm4723_vm5, %v3842_v0, %v2034_v2  ;;  %v3835_v25 = vrot.slane %v3819_v27, 9 }
 0x156   : > { %2630 = vrot.lane.b32.xlu1 %v4107_v10, %s4401_s13  ;;  %v1604_v55 = vrot.slane %v1603_v53, 4  ;;  %v2038_v38 = vsel %vm4723_vm5, %v2036_v4, %v2037_v14  ;;  %v1985_v13 = vrot.slane %v5697_v41, 5  ;;  %v2692_v10 = vpack.c.b16 %v2671_v8, %v5712_v19  ;;  %v3749_v53 = vld [vmem:[%s4493_s7 + $0xa8] sm:$0xe] }
 0x157   : > { %v2461_v30 = vpop.permute.xlu0 %2460  ;;  %v1594_v1 = vrot.slane %v1593_v33, 4  ;;  %2638 = vrot.lane.b32.xlu2 %v4111_v51, %s4401_s13  ;;  %v1988_v46 = vrot.slane %v5705_v50, 5  ;;  %v5755_v51 = vld [vmem:[%s4493_s7 + $0xb8] sm:$0xf]  ;;  %v2751_v34 = vunpack.c.l.b16 %v2038_v38  ;;  %v1830_v19 = vshll.u32 %v3794_v23, 16 }
 0x158   : > { %v5723_v22 = vsel %vm2925_vm9, %v5351_v31, %v2461_v30  ;;  %v2006_v31 = vrot.slane %v5677_v20, 5  ;;  %v2688_v20 = vpack.c.b16 %v2663_v37, %v2662_v7  ;;  %v1609_v21 = vsel %vm4521_vm2, %v1604_v55, %v1608_v18 }
 0x159   : > { %v1599_v15 = vsel %vm4521_vm2, %v1594_v1, %v1598_v39  ;;  %v5739_v16 = vpop.permute.xlu2 %2698  ;;  %v2657_v28 = vunpack.c.l.b16 %v1609_v21  ;;  %v2750_v30 = vunpack.c.l.b16 %v2035_v40  ;;  %v1987_v7 = vrot.slane %v1985_v13, 4 }
 0x15a   : > { %v2656_v58 = vunpack.c.l.b16 %v1599_v15  ;;  %v2008_v43 = vrot.slane %v2006_v31, 4  ;;  %v2007_v48 = vsel %vm4723_vm5, %v3838_v56, %v2006_v31  ;;  %v1827_v39 = vshrl.u32 %v3794_v23, 16 }
 0x15b   : > { %2624 = vrot.lane.b32.xlu0 %v4104_v42, %s4401_s13  ;;  %v2742_v0 = vunpack.c.l.b16 %v2007_v48  ;;  %v1986_v18 = vsel %vm4723_vm5, %v3835_v25, %v1985_v13  ;;  %v1836_v35 = vshll.u32 %v5755_v51, 16  ;;  %v1989_v1 = vsel %vm4723_vm5, %v1987_v7, %v1988_v46  ;;  %v4246_v42 = vld [vmem:[%s4493_s7 + $0xac] sm:$0xf]  ;;  %v4247_v48 = vld [vmem:[%s4493_s7 + $0xb0] sm:$0x1] }
 0x15c   : > { %v2010_v54 = vsel %vm4723_vm5, %v2008_v43, %v2009_v9  ;;  %v2685_v24 = vpack.c.b16 %v2657_v28, %v2656_v58  ;;  %v1829_v2 = vrot.slane %v1827_v39, 4  ;;  %v1832_v14 = vrot.slane %v1830_v19, 5  ;;  %v3747_v58 = vld [vmem:[%s4493_s7 + $0x90] sm:$0xe]  ;;  %v4248_v7 = vld [vmem:[%s4493_s7 + $0x94] sm:$0xf] }
 0x15d   : > { %v2743_v41 = vunpack.c.l.b16 %v2010_v54  ;;  %v1840_v37 = vshrl.u32 %v5755_v51, 16  ;;  %v2772_v56 = vpack.c.b16 %v2751_v34, %v2750_v30  ;;  %v1846_v31 = vshll.u32 %v5758_v61, 16 }
 0x15e   : > { %2710 = vrot.lane.b32.xlu1 %v2688_v20, %s4402_s14  ;;  %v1443_v8 = vrot.slane %v4246_v42, 5  ;;  %v2736_v27 = vunpack.c.l.b16 %v1986_v18  ;;  %v1833_v55 = vor.u32 %v1832_v14, %v1829_v2  ;;  %v3094_v20 = vld [vmem:[%s6409_s1 + $0x10] sm:$0x3]  ;;  %v2737_v43 = vunpack.c.l.b16 %v1989_v1  ;;  %v4249_v2 = vld [vmem:[%s4493_s7 + $0x98] sm:$0x1] }
 0x15f   : > { %v2469_v33 = vpop.permute.xlu1 %2468  ;;  %2718 = vrot.lane.b32.xlu2 %v2692_v10, %s4402_s14  ;;  %v2768_v9 = vpack.c.b16 %v2743_v41, %v2742_v0  ;;  %v1842_v40 = vrot.slane %v1840_v37, 4  ;;  %v3765_v21 = vrot.slane %v3749_v53, 9  ;;  %v1446_v25 = vrot.slane %v4247_v48, 5  ;;  %v3829_v37 = vld [vmem:[%s4493_s7 + $0xb4] sm:$0xe] }
 0x160   : > { %v5763_v50 = vsel %vm2925_vm9, %v5578_v17, %v2469_v33  ;;  %v1838_v17 = vrot.slane %v1836_v35, 5  ;;  %v1834_v13 = vrot.slane %v1833_v55, 4  ;;  %v1848_v10 = vrot.slane %v1846_v31, 5  ;;  %v4251_v55 = vld [vmem:[%s4493_s7 + $0x68] sm:$0x1] }
 0x161   : > { %v5775_v15 = vpop.permute.xlu2 %2530  ;;  %v1445_v28 = vrot.slane %v1443_v8, 4  ;;  %v3104_v54 = vunpack.c.l.b16 %v3094_v20  ;;  %v3763_v46 = vrot.slane %v3747_v58, 9  ;;  %v1429_v33 = vrot.slane %v4248_v7, 5  ;;  %v4114_v20 = vld [vmem:[%s4493_s7 + $0xb4] sm:$0xff] }
 0x162   : > { %v2467_v4 = vpop.permute.xlu0 %2466  ;;  %v1843_v23 = vor.u32 %v1842_v40, %v1838_v17  ;;  %v2765_v0 = vpack.c.b16 %v2737_v43, %v2736_v27  ;;  %v1444_v41 = vsel %vm4723_vm5, %v3765_v21, %v1443_v8  ;;  %v1432_v14 = vrot.slane %v4249_v2, 5 }
 0x163   : > { %v5783_v38 = vsel %vm2925_vm9, %v5387_v62, %v2467_v4  ;;  %2704 = vrot.lane.b32.xlu0 %v2685_v24, %s4402_s14  ;;  %v1839_v62 = vsel %vm4521_vm2, %v1834_v13, %v1838_v17  ;;  %v1447_v39 = vsel %vm4723_vm5, %v1445_v28, %v1446_v25  ;;  %v3107_v19 = vpack.c.b16 %v3104_v54, %v3104_v54  ;;  %v3743_v24 = vld [vmem:[%s4493_s7 + $0x60] sm:$0xe] }
 0x164   : > { %v1844_v34 = vrot.slane %v1843_v23, 4  ;;  %v2676_v35 = vunpack.c.l.b16 %v1839_v62  ;;  %v1431_v1 = vrot.slane %v1429_v33, 4  ;;  %v1430_v31 = vsel %vm4723_vm5, %v3763_v46, %v1429_v33  ;;  %v5822_v46 = vld [vmem:[%s4493_s7 + $0x70] sm:$0xf] }
 0x165   : > { %v3145_v17 = vsel %vm3143_vm10, %v3107_v19, 0  ;;  %v3759_v4 = vrot.slane %v3743_v24, 9  ;;  %v1404_v40 = vrot.slane %v4251_v55, 5  ;;  %v2500_v58 = vunpack.c.l.b16 %v1444_v41  ;;  %v3823_v24 = vld [vmem:[%s4493_s7 + $0x6c] sm:$0xe] }
 0x166   : > { %2790 = vrot.lane.b32.xlu1 %v2768_v9, %s4403_s24  ;;  %v1849_v18 = vsel %vm4521_vm2, %v1844_v34, %v1848_v10  ;;  %3152 = vmatpush.bf16.msra.mxu0 %v3145_v17  ;;  %v1433_v8 = vsel %vm4723_vm5, %v1431_v1, %v1432_v14  ;;  %v4250_v9 = vld [vmem:[%s4493_s7 + $0x64] sm:$0xf]  ;;  %v2501_v43 = vunpack.c.l.b16 %v1447_v39  ;;  %v3845_v21 = vrot.slane %v3829_v37, 9  ;;  %v5845_v1 = vld [vmem:[%s4493_s7 + $0x74] sm:$0x1] }
 0x167   : > { %v5787_v30 = vpop.permute.xlu1 %2522  ;;  %2798 = vrot.lane.b32.xlu2 %v2772_v56, %s4403_s24  ;;  %v2677_v53 = vunpack.c.l.b16 %v1849_v18  ;;  %4120 = vmatpush.bf16.msra.mxu1 %v3145_v17  ;;  %v4118_v56 = vld [vmem:[%s6409_s1 + $0x8] sm:$0xff]  ;;  %v1401_v27 = vrot.slane %v4250_v9, 5  ;;  %v2055_v23 = vrot.slane %v5755_v51, 5  ;;  %v2496_v10 = vunpack.c.l.b16 %v1430_v31  ;;  %v4117_v51 = vld [vmem:[%s6409_s1] sm:$0xff] }
 0x168   : > { %4121 = vmatpush.bf16.msra.mxu2 %v3145_v17  ;;  %4122 = vmatpush.bf16.msra.mxu3 %v3145_v17  ;;  %v2497_v28 = vunpack.c.l.b16 %v1433_v8  ;;  %v2058_v54 = vrot.slane %v5758_v61, 5  ;;  %v5841_v18 = vld [vmem:[%s4493_s7 + $0xa0] sm:$0xf]  ;;  %v2013_v2 = vrot.slane %v5822_v46, 5  ;;  %v3839_v8 = vrot.slane %v3823_v24, 9 }
 0x169   : > { %v5806_v42 = vpop.permute.xlu2 %2626  ;;  %v2695_v48 = vpack.c.b16 %v2677_v53, %v2676_v35  ;;  %v1402_v25 = vsel %vm4723_vm5, %v3759_v4, %v1401_v27  ;;  %v1403_v13 = vrot.slane %v1401_v27, 4  ;;  %v2057_v33 = vrot.slane %v2055_v23, 4  ;;  %v4112_v24 = vld [vmem:[%s4493_s7 + $0x9c] sm:$0xff] }
 0x16a   : > { %3153 = vmatpush.bf16.msra.mxu0 %v4118_v56  ;;  %v2488_v41 = vunpack.c.l.b16 %v1402_v25  ;;  %v2056_v19 = vsel %vm4723_vm5, %v3845_v21, %v2055_v23  ;;  %v2519_v35 = vpack.c.b16 %v2501_v43, %v2500_v58  ;;  %v1788_v4 = vshll.u32 %v5841_v18, 16  ;;  %v5860_v25 = vld [vmem:[%s4493_s7 + $0xa4] sm:$0x1] }
 0x16b   : > { %2784 = vrot.lane.b32.xlu0 %v2765_v0, %s4403_s24  ;;  %4123 = vmatpush.bf16.msra.mxu1 %v4118_v56  ;;  %v1405_v7 = vsel %vm4723_vm5, %v1403_v13, %v1404_v40  ;;  %v3790_v0 = vld [vmem:[%s4493_s7 + $0x9c] sm:$0xf]  ;;  %v2059_v14 = vsel %vm4723_vm5, %v2057_v33, %v2058_v54  ;;  %v2756_v31 = vunpack.c.l.b16 %v2056_v19  ;;  %v1792_v9 = vshrl.u32 %v5841_v18, 16 }
 0x16c   : > { %v2489_v39 = vunpack.c.l.b16 %v1405_v7  ;;  %4124 = vmatpush.bf16.msra.mxu2 %v4118_v56  ;;  %4125 = vmatpush.bf16.msra.mxu3 %v4118_v56  ;;  %v1779_v37 = vshrl.u32 %v3790_v0, 16  ;;  %v1782_v53 = vshll.u32 %v3790_v0, 16  ;;  %v2015_v55 = vrot.slane %v2013_v2, 4 }
 0x16d   : > { %v2473_v62 = vpop.permute.xlu0 %2472  ;;  %v2016_v56 = vrot.slane %v5845_v1, 5  ;;  %v5854_v43 = vrot.slane %v1788_v4, 5  ;;  %v1794_v21 = vrot.slane %v1792_v9, 4  ;;  %v2927_v13 = vsel %vm2925_vm9, %v5268_v59, %v5613_v44  ;;  %v4253_v4 = vld [vmem:[%s4493_s7 + $0xbc] sm:$0x1] }
 0x16e   : > { %v5834_v61 = vsel %vm2925_vm9, %v5440_v36, %v2473_v62  ;;  %2644 = vrot.lane.b32.xlu1 %v4114_v20, %s4401_s13  ;;  %v2517_v36 = vpack.c.b16 %v2497_v28, %v2496_v10  ;;  %3154 = vmatpush.bf16.msra.mxu0 %v4117_v51  ;;  %v2513_v27 = vpack.c.b16 %v2489_v39, %v2488_v41  ;;  %v1781_v40 = vrot.slane %v1779_v37, 4  ;;  %v5893_v37 = vld [vmem:[%s4493_s7 + $0xc0] sm:$0xe] }
 0x16f   : > { %v5824_v34 = vpop.permute.xlu1 %2618  ;;  %2724 = vrot.lane.b32.xlu2 %v2695_v48, %s4402_s14  ;;  %4126 = vmatpush.bf16.msra.mxu1 %v4117_v51  ;;  %v2757_v20 = vunpack.c.l.b16 %v2059_v14  ;;  %v1784_v58 = vrot.slane %v1782_v53, 5  ;;  %v2935_v48 = vsel %vm2925_vm9, %v5464_v32, %v5617_v47  ;;  %v2960_v28 = vsel %vm2958_vm11, %v2927_v13, %v5787_v30  ;;  %v3750_v30 = vld [vmem:[%s4493_s7 + $0xb4] sm:$0xe] }
 0x170   : > { %4127 = vmatpush.bf16.msra.mxu2 %v4117_v51  ;;  %4128 = vmatpush.bf16.msra.mxu3 %v4117_v51  ;;  %v2968_v23 = vsel %vm2958_vm11, %v2935_v48, %v5775_v15  ;;  %v2014_v32 = vsel %vm4723_vm5, %v3839_v8, %v2013_v2  ;;  %v2017_v59 = vsel %vm4723_vm5, %v2015_v55, %v2016_v56  ;;  %v1798_v62 = vshll.u32 %v5860_v25, 16  ;;  %v4252_v51 = vld [vmem:[%s4493_s7 + $0xb8] sm:$0xf]  ;;  %v4108_v48 = vld [vmem:[%s4493_s7 + $0x6c] sm:$0xff] }
 0x171   : > { %v2707_v17 = vpop.permute.xlu2 %2706  ;;  %v1785_v44 = vor.u32 %v1784_v58, %v1781_v40  ;;  %v2775_v47 = vpack.c.b16 %v2757_v20, %v2756_v31  ;;  %v1795_v54 = vor.u32 %v1794_v21, %v5854_v43  ;;  %v3001_v7 = vsel %vm2991_vm12, %v2968_v23, %v5806_v42 }
 0x172   : > { %v1450_v0 = vrot.slane %v4252_v51, 5  ;;  %v3034_v41 = vsel %vm3024_vm13, %v3001_v7, %v2707_v17  ;;  %v2993_v39 = vsel %vm2991_vm12, %v2960_v28, %v5824_v34  ;;  %v2745_v2 = vunpack.c.l.b16 %v2017_v59  ;;  %v3830_v28 = vld [vmem:[%s4493_s7 + $0xc0] sm:$0xe]  ;;  %v4255_v51 = vld [vmem:[%s4493_s7 + $0xc8] sm:$0x1] }
 0x173   : > { %2548 = vrot.lane.b32.xlu0 %v2519_v35, %s4400_s12  ;;  %v2744_v35 = vunpack.c.l.b16 %v2014_v32  ;;  %v1786_v42 = vrot.slane %v1785_v44, 4  ;;  %v3766_v14 = vrot.slane %v3750_v30, 9  ;;  %v1796_v53 = vrot.slane %v1795_v54, 4 }
 0x174   : > { %v1800_v17 = vrot.slane %v1798_v62, 5  ;;  %v5901_v34 = vsel %vm2958_vm11, %v5597_v6, %v5700_v49  ;;  %v3026_v31 = vsel %vm3024_vm13, %v2993_v39, %v5739_v16  ;;  %v1452_v8 = vrot.slane %v1450_v0, 4  ;;  %v5917_v16 = vld [vmem:[%s4493_s7 + $0xc4] sm:$0xf] }
 0x175   : > { %v5867_v10 = vpop.permute.xlu0 %2526  ;;  %v1453_v9 = vrot.slane %v4253_v4, 5  ;;  %v2769_v55 = vpack.c.b16 %v2745_v2, %v2744_v35  ;;  %v3767_v56 = vrot.slane %v5893_v37, 9  ;;  %v1791_v6 = vsel %vm4521_vm2, %v1786_v42, %v5854_v43  ;;  %v3827_v42 = vld [vmem:[%s4493_s7 + $0x9c] sm:$0xe] }
 0x176   : > { %2536 = vrot.lane.b32.xlu1 %v2513_v27, %s4400_s12  ;;  %v5914_v49 = vsel %vm4723_vm5, %v3766_v14, %v1450_v0  ;;  %v1692_v21 = vshll.u32 %v5822_v46, 16  ;;  %v1801_v23 = vsel %vm4521_vm2, %v1796_v53, %v1800_v17  ;;  %v1696_v59 = vshrl.u32 %v5822_v46, 16  ;;  %v5938_v46 = vld [vmem:[%s4493_s7 + $0xd0] sm:$0xf]  ;;  %v5944_v17 = vld [vmem:[%s4493_s7 + $0xc8] sm:$0x1] }
 0x177   : > { %2544 = vrot.lane.b32.xlu2 %v2517_v36, %s4400_s12  ;;  %v2529_v15 = vpop.permute.xlu1 %2528  ;;  %v1454_v44 = vsel %vm4723_vm5, %v1452_v8, %v1453_v9  ;;  %v1702_v62 = vshll.u32 %v5845_v1, 16  ;;  %v2502_v7 = vunpack.c.l.b16 %v5914_v49  ;;  %v1460_v0 = vrot.slane %v4255_v51, 5 }
 0x178   : > { %v5884_v33 = vsel %vm2958_vm11, %v5649_v3, %v2529_v15  ;;  %v3782_v3 = vld [vmem:[%s4493_s7 + $0x6c] sm:$0xf]  ;;  %v1694_v54 = vrot.slane %v1692_v21, 5  ;;  %v1698_v39 = vrot.slane %v1696_v59, 4  ;;  %v2673_v35 = vunpack.c.l.b16 %v1801_v23 }
 0x179   : > { %v2787_v19 = vpop.permute.xlu2 %2786  ;;  %v1683_v40 = vshrl.u32 %v3782_v3, 16  ;;  %v1686_v20 = vshll.u32 %v3782_v3, 16  ;;  %v3846_v2 = vrot.slane %v3830_v28, 9  ;;  %v2503_v1 = vunpack.c.l.b16 %v1454_v44 }
 0x17a   : > { %v3067_v36 = vsel %vm3057_vm14, %v3034_v41, %v2787_v19  ;;  %v3798_v19 = vld [vmem:[%s4493_s7 + $0xcc] sm:$0xf]  ;;  %v1699_v37 = vor.u32 %v1698_v39, %v1694_v54  ;;  %v1704_v3 = vrot.slane %v1702_v62, 5  ;;  %v1884_v4 = vshll.u32 %v5938_v46, 16  ;;  %v4115_v39 = vld [vmem:[%s4493_s7 + $0xc0] sm:$0xff] }
 0x17b   : > { %2804 = vrot.lane.b32.xlu0 %v2775_v47, %s4403_s24  ;;  %4052 = vmatmul.msk.bf16.vlgmr.msra.gmra.mxu1 %vm3110_vm15, %v3067_v36  ;;  %v1685_v43 = vrot.slane %v1683_v40, 4  ;;  %v1688_v32 = vrot.slane %v1686_v20, 5  ;;  %v4254_v47 = vld [vmem:[%s4493_s7 + $0xc4] sm:$0xf]  ;;  %v2062_v36 = vrot.slane %v5917_v16, 5  ;;  %v1878_v8 = vshll.u32 %v3798_v19, 16 }
 0x17c   : > { %v1457_v15 = vrot.slane %v4254_v47, 5  ;;  %v1700_v40 = vrot.slane %v1699_v37, 4  ;;  %v3843_v20 = vrot.slane %v3827_v42, 9  ;;  %v2065_v28 = vrot.slane %v5944_v17, 5  ;;  %v3831_v37 = vld [vmem:[%s4493_s7 + $0xcc] sm:$0xe] }
 0x17d   : > { %v2779_v27 = vpop.permute.xlu0 %2778  ;;  %v1689_v41 = vor.u32 %v1688_v32, %v1685_v43  ;;  %v2064_v49 = vrot.slane %v2062_v36, 4  ;;  %v2044_v44 = vrot.slane %v5860_v25, 5  ;;  %v1880_v62 = vrot.slane %v1878_v8, 5  ;;  %v3796_v25 = vld [vmem:[%s4493_s7 + $0xc0] sm:$0xf] }
 0x17e   : > { %v3059_v58 = vsel %vm3057_vm14, %v3026_v31, %v2779_v27  ;;  %2640 = vrot.lane.b32.xlu1 %v4112_v24, %s4401_s13  ;;  %v2672_v24 = vunpack.c.l.b16 %v1791_v6  ;;  %v1459_v53 = vrot.slane %v1457_v15, 4  ;;  %v1875_v31 = vshrl.u32 %v3798_v19, 16 }
 0x17f   : > { %4048 = vmatmul.msk.bf16.vlgmr.msra.gmra.mxu0 %vm3110_vm15, %v3059_v58  ;;  %v5922_v13 = vpop.permute.xlu1 %2620  ;;  %v1690_v14 = vrot.slane %v1689_v41, 4  ;;  %v2041_v58 = vrot.slane %v5841_v18, 5  ;;  %v1458_v6 = vsel %vm4723_vm5, %v3767_v56, %v1457_v15  ;;  %v1705_v43 = vsel %vm4521_vm2, %v1700_v40, %v1704_v3  ;;  %v3815_v15 = vld [vmem:[%s4493_s7 + $0xd4] sm:$0x1] }
 0x180   : > { %v2693_v23 = vpack.c.b16 %v2673_v35, %v2672_v24  ;;  %v1461_v18 = vsel %vm4723_vm5, %v1459_v53, %v1460_v0  ;;  %v2665_v56 = vunpack.c.l.b16 %v1705_v43  ;;  %v5969_v51 = vrot.slane %v1884_v4, 5 }
 0x181   : > { %v5932_v30 = vpop.permute.xlu2 %2540  ;;  %v1695_v27 = vsel %vm4521_vm2, %v1690_v14, %v1694_v54  ;;  %v2043_v32 = vrot.slane %v2041_v58, 4  ;;  %v1877_v54 = vrot.slane %v1875_v31, 4  ;;  %v2042_v41 = vsel %vm4723_vm5, %v3843_v20, %v2041_v58 }
 0x182   : > { %v2664_v21 = vunpack.c.l.b16 %v1695_v27  ;;  %v2069_v35 = vrot.slane %v5938_v46, 5  ;;  %v2505_v42 = vunpack.c.l.b16 %v1461_v18  ;;  %v2066_v14 = vsel %vm4723_vm5, %v2064_v49, %v2065_v28 }
 0x183   : > { %2632 = vrot.lane.b32.xlu0 %v4108_v48, %s4401_s13  ;;  %v1888_v48 = vshrl.u32 %v5938_v46, 16  ;;  %v2045_v24 = vsel %vm4723_vm5, %v2043_v32, %v2044_v44  ;;  %v2995_v3 = vsel %vm2991_vm12, %v5901_v34, %v5922_v13  ;;  %v1894_v53 = vshll.u32 %v3815_v15, 16 }
 0x184   : > { %v2689_v0 = vpack.c.b16 %v2665_v56, %v2664_v21  ;;  %v2752_v31 = vunpack.c.l.b16 %v2042_v41  ;;  %v2753_v8 = vunpack.c.l.b16 %v2045_v24  ;;  %v1881_v4 = vor.u32 %v1880_v62, %v1877_v54 }
 0x185   : > { %v5947_v9 = vpop.permute.xlu0 %2538  ;;  %v1890_v19 = vrot.slane %v1888_v48, 4  ;;  %v1851_v27 = vshrl.u32 %v3796_v25, 16  ;;  %v1854_v40 = vshll.u32 %v3796_v25, 16  ;;  %v3847_v20 = vrot.slane %v3831_v37, 9 }
 0x186   : > { %2792 = vrot.lane.b32.xlu1 %v2769_v55, %s4403_s24  ;;  %v5963_v55 = vsel %vm4723_vm5, %v3846_v2, %v2062_v36  ;;  %v2520_v2 = vpack.c.b16 %v2503_v1, %v2502_v7  ;;  %v2504_v36 = vunpack.c.l.b16 %v1458_v6  ;;  %2712 = vrot.lane.b32.xlu2 %v2689_v0, %s4402_s14  ;;  %v1860_v7 = vshll.u32 %v5917_v16, 16 }
 0x187   : > { %v1891_v1 = vor.u32 %v1890_v19, %v5969_v51  ;;  %v2071_v58 = vrot.slane %v2069_v35, 4  ;;  %v1864_v6 = vshrl.u32 %v5917_v16, 16  ;;  %v2072_v34 = vrot.slane %v3815_v15, 5 }
 0x188   : > { %v2701_v59 = vpop.permute.xlu1 %2700  ;;  %v1853_v13 = vrot.slane %v1851_v27, 4  ;;  %v1856_v49 = vrot.slane %v1854_v40, 5  ;;  %v1862_v21 = vrot.slane %v1860_v7, 5  ;;  %v2773_v28 = vpack.c.b16 %v2753_v8, %v2752_v31 }
 0x189   : > { %v5966_v47 = vpop.permute.xlu2 %2636  ;;  %v3028_v48 = vsel %vm3024_vm13, %v2995_v3, %v2701_v59  ;;  %v1866_v43 = vrot.slane %v1864_v6, 4  ;;  %v1870_v32 = vshll.u32 %v5944_v17, 16  ;;  %v2521_v54 = vpack.c.b16 %v2505_v42, %v2504_v36 }
 0x18a   : > { %v1857_v44 = vor.u32 %v1856_v49, %v1853_v13  ;;  %v2758_v16 = vunpack.c.l.b16 %v5963_v55  ;;  %v2759_v41 = vunpack.c.l.b16 %v2066_v14  ;;  %v2070_v59 = vsel %vm4723_vm5, %v3847_v20, %v2069_v35 }
 0x18b   : > { %2720 = vrot.lane.b32.xlu0 %v2693_v23, %s4402_s14  ;;  %v1867_v15 = vor.u32 %v1866_v43, %v1862_v21  ;;  %v1872_v62 = vrot.slane %v1870_v32, 5  ;;  %v2073_v17 = vsel %vm4723_vm5, %v2071_v58, %v2072_v34  ;;  %v1882_v0 = vrot.slane %v1881_v4, 4 }
 0x18c   : > { %v1892_v19 = vrot.slane %v1891_v1, 4  ;;  %v1896_v24 = vrot.slane %v1894_v53, 5  ;;  %v2761_v42 = vunpack.c.l.b16 %v2073_v17  ;;  %v2776_v14 = vpack.c.b16 %v2759_v41, %v2758_v16 }
 0x18d   : > { %v2635_v46 = vpop.permute.xlu0 %2634  ;;  %v1868_v25 = vrot.slane %v1867_v15, 4  ;;  %v1887_v53 = vsel %vm4521_vm2, %v1882_v0, %v5969_v51  ;;  %v2976_v40 = vsel %vm2958_vm11, %v5552_v63, %v5947_v9  ;;  %v4116_v63 = vld [vmem:[%s4493_s7 + $0xcc] sm:$0xff]  ;;  %s6299_s7 = sand.u32 1, %s4378_s16  }
 0x18e   : > { %2646 = vrot.lane.b32.xlu1 %v4115_v39, %s4401_s13  ;;  %v1858_v39 = vrot.slane %v1857_v44, 4  ;;  %2800 = vrot.lane.b32.xlu2 %v2773_v28, %s4403_s24  ;;  %v1897_v31 = vsel %vm4521_vm2, %v1892_v19, %v1896_v24  ;;  %v2680_v7 = vunpack.c.l.b16 %v1887_v53  ;;  %v3009_v20 = vsel %vm2991_vm12, %v2976_v40, %v2635_v46  ;;  %s218_s26 = scalar_lea.vmem [#allocation4], %s6299_s7 }
 0x18f   : > { %v1873_v35 = vsel %vm4521_vm2, %v1868_v25, %v1872_v62  ;;  %v2681_v1 = vunpack.c.l.b16 %v1897_v31  ;;  %s6316_s29 = sshll.u32 %s218_s26, 4  ;;  %s3514_s29 = int_to_ptr.vmem [resolvable:$true] %s6316_s29 }
 0x190   : > { %v2781_v23 = vpop.permute.xlu1 %2780  ;;  %v1863_v55 = vsel %vm4521_vm2, %v1858_v39, %v1862_v21  ;;  %v2679_v37 = vunpack.c.l.b16 %v1873_v35  ;;  %v2978_v21 = vsel %vm2958_vm11, %v5723_v22, %v5932_v30  ;;  %v2964_v30 = vsel %vm2958_vm11, %v5482_v57, %v5867_v10 }
 0x191   : > { %v2717_v18 = vpop.permute.xlu2 %2716  ;;  %v3061_v56 = vsel %vm3057_vm14, %v3028_v48, %v2781_v23  ;;  %v2678_v60 = vunpack.c.l.b16 %v1863_v55  ;;  %v2697_v6 = vpack.c.b16 %v2681_v1, %v2680_v7  ;;  %v3011_v48 = vsel %vm2991_vm12, %v2978_v21, %v5966_v47 }
 0x192   : > { %4049 = vmatmul.msk.bf16.gmra.mxu0 %vm3110_vm15, %v3061_v56  ;;  %v3044_v23 = vsel %vm3024_vm13, %v3011_v48, %v2717_v18 }
 0x193   : > { %2550 = vrot.lane.b32.xlu0 %v2520_v2, %s4400_s12  ;;  %v2760_v2 = vunpack.c.l.b16 %v2070_v59  ;;  %v2696_v4 = vpack.c.b16 %v2679_v37, %v2678_v60 }
 0x195   : > { %v2715_v36 = vpop.permute.xlu0 %2714  ;;  %v2777_v27 = vpack.c.b16 %v2761_v42, %v2760_v2 }
 0x196   : > { %2552 = vrot.lane.b32.xlu1 %v2521_v54, %s4400_s12  ;;  %2726 = vrot.lane.b32.xlu2 %v2696_v4, %s4402_s14  ;;  %v3042_v51 = vsel %vm3024_vm13, %v3009_v20, %v2715_v36  ;;  %s6307_s12 = sand.u32 1, %s3665_s21   ;;  %s224_s21 = scalar_lea.vmem [#allocation6], %s6299_s7 }
 0x197   : > { %s6321_s5 = sshll.u32 %s224_s21, 4  ;;  %s3481_s8 = scalar_lea.sflag [#allocation5], %s6307_s12  ;;  %s3528_s5 = int_to_ptr.vmem [resolvable:$true] %s6321_s5 }
 0x198   : > { %v2533_v3 = vpop.permute.xlu1 %2532 }
 0x199   : > { %v2797_v8 = vpop.permute.xlu2 %2796  ;;  %v2970_v43 = vsel %vm2958_vm11, %v5503_v29, %v2533_v3 }
 0x19a   : > { %v3077_v32 = vsel %vm3057_vm14, %v3044_v23, %v2797_v8 }
 0x19b   : > { %2806 = vrot.lane.b32.xlu0 %v2776_v14, %s4403_s24 }
 0x19d   : > { %v2795_v26 = vpop.permute.xlu0 %2794 }
 0x19e   : > { %v3075_v58 = vsel %vm3057_vm14, %v3042_v51, %v2795_v26  ;;  %2808 = vrot.lane.b32.xlu1 %v2777_v27, %s4403_s24  ;;  %2648 = vrot.lane.b32.xlu2 %v4116_v63, %s4401_s13  ;;  %s3525_s24 = scalar_lea.hbm %s6412_s4, %s4386_s18 }
 0x19f   : > { %4056 = vmatmul.msk.bf16.vlgmr.msra.gmra.mxu2 %vm3110_vm15, %v3075_v58  ;;  %s6323_s6 = sshll.u32 %s3525_s24, 4  ;;  %s3530_s6 = int_to_ptr.hbm [resolvable:$true] %s6323_s6 }
 0x1a0   : > { %v2629_v34 = vpop.permute.xlu1 %2628 }
 0x1a1   : > { %v2723_v9 = vpop.permute.xlu2 %2722  ;;  %v3003_v56 = vsel %vm2991_vm12, %v2970_v43, %v2629_v34 }
 0x1a3   : > { %2728 = vrot.lane.b32.xlu0 %v2697_v6, %s4402_s14  ;;  %s4276_s14 = scalar_lea.hbm %s6411_s3, 2 }
 0x1a4   : > { %p4278_p2 = scmp.lt.s32.totalorder %s4276_s14, %s4272_s10 }
 0x1a5   : > { %v2623_v46 = vpop.permute.xlu0 %2622 }
 0x1a6   : > { %v2997_v29 = vsel %vm2991_vm12, %v2964_v30, %v2623_v46  ;;  %p4279_p3 = por %p4278_p2, %p4277_p1 }
 0x1a8   : > { %v2709_v13 = vpop.permute.xlu1 %2708  ;;  %p4280_p5 = pnand %p4279_p3, %p4275_p0 }
 0x1a9   : > { %v2543_v49 = vpop.permute.xlu2 %2542  ;;  %v3036_v44 = vsel %vm3024_vm13, %v3003_v56, %v2709_v13 }
 0x1aa   : > { %v2980_v17 = vsel %vm2958_vm11, %v5694_v12, %v2543_v49 }
 0x1ad   : > { %v2703_v28 = vpop.permute.xlu0 %2702 }
 0x1ae   : > { %v3030_v47 = vsel %vm3024_vm13, %v2997_v29, %v2703_v28 }
 0x1af   : > { %4057 = vmatmul.msk.bf16.gmra.mxu2 %vm3110_vm15, %v3077_v32 }
 0x1b0   : > { %v2789_v54 = vpop.permute.xlu1 %2788 }
 0x1b1   : > { %v2639_v16 = vpop.permute.xlu2 %2638  ;;  %v3069_v22 = vsel %vm3057_vm14, %v3036_v44, %v2789_v54 }
 0x1b2   : > { %4053 = vmatmul.msk.bf16.gmra.mxu1 %vm3110_vm15, %v3069_v22  ;;  %v3013_v57 = vsel %vm2991_vm12, %v2980_v17, %v2639_v16 }
 0x1b5   : > { %v2783_v18 = vpop.permute.xlu0 %2782 }
 0x1b6   : > { %v3063_v15 = vsel %vm3057_vm14, %v3030_v47, %v2783_v18 }
 0x1b7   : > { %4050 = vmatmul.msk.bf16.gmra.mxu0 %vm3110_vm15, %v3063_v15 }
 0x1b8   : > { %v2643_v62 = vpop.permute.xlu1 %2642 }
 0x1b9   : > { %v2719_v41 = vpop.permute.xlu2 %2718 }
 0x1ba   : > { %v3046_v0 = vsel %vm3024_vm13, %v3013_v57, %v2719_v41 }
 0x1bd   : > { %v2547_v59 = vpop.permute.xlu0 %2546 }
 0x1be   : > { %v2984_v39 = vsel %vm2958_vm11, %v5783_v38, %v2547_v59 }
 0x1bf   : > { %v3017_v24 = vsel %vm2991_vm12, %v2984_v39, %v2643_v62 }
 0x1c0   : > { %v2535_v10 = vpop.permute.xlu1 %2534  ;;  %v3050_v55 = vsel %vm3024_vm13, %v3017_v24, %v2723_v9 }
 0x1c1   : > { %v2799_v19 = vpop.permute.xlu2 %2798  ;;  %v2972_v60 = vsel %vm2958_vm11, %v5687_v52, %v2535_v10 }
 0x1c2   : > { %v3079_v25 = vsel %vm3057_vm14, %v3046_v0, %v2799_v19 }
 0x1c3   : > { %4058 = vmatmul.msk.bf16.gmra.mxu2 %vm3110_vm15, %v3079_v25 }
 0x1c5   : > { %v2803_v36 = vpop.permute.xlu0 %2802 }
 0x1c6   : > { %v3083_v12 = vsel %vm3057_vm14, %v3050_v55, %v2803_v36 }
 0x1c7   : > { %4060 = vmatmul.msk.bf16.vlgmr.msra.gmra.mxu3 %vm3110_vm15, %v3083_v12 }
 0x1c8   : > { %v2631_v38 = vpop.permute.xlu1 %2630 }
 0x1c9   : > { %v3005_v14 = vsel %vm2991_vm12, %v2972_v60, %v2631_v38  ;;  %v2725_v52 = vpop.permute.xlu2 %2724 }
 0x1cd   : > { %v2625_v2 = vpop.permute.xlu0 %2624 }
 0x1ce   : > { %v2999_v31 = vsel %vm2991_vm12, %v5884_v33, %v2625_v2 }
 0x1d0   : > { %v2711_v42 = vpop.permute.xlu1 %2710 }
 0x1d1   : > { %v3038_v37 = vsel %vm3024_vm13, %v3005_v14, %v2711_v42  ;;  %v2545_v51 = vpop.permute.xlu2 %2544 }
 0x1d2   : > { %v2982_v48 = vsel %vm2958_vm11, %v5593_v5, %v2545_v51 }
 0x1d5   : > { %v2705_v35 = vpop.permute.xlu0 %2704 }
 0x1d6   : > { %v3032_v8 = vsel %vm3024_vm13, %v2999_v31, %v2705_v35 }
 0x1d8   : > { %v2791_v3 = vpop.permute.xlu1 %2790 }
 0x1d9   : > { %v3071_v53 = vsel %vm3057_vm14, %v3038_v37, %v2791_v3 }
 0x1da   : > { %4054 = vmatmul.msk.bf16.gmra.mxu1 %vm3110_vm15, %v3071_v53 }
 0x1dd   : > { %v2785_v4 = vpop.permute.xlu0 %2784 }
 0x1de   : > { %v3065_v27 = vsel %vm3057_vm14, %v3032_v8, %v2785_v4 }
 0x1df   : > { %4051 = vmatmul.msk.bf16.gmra.mxu0 %vm3110_vm15, %v3065_v27 }
 0x1e0   : > { %v2645_v40 = vpop.permute.xlu1 %2644  ;;  %v2713_v63 = vpop.permute.xlu2 %2712 }
 0x1e5   : > { %v2549_v7 = vpop.permute.xlu0 %2548 }
 0x1e6   : > { %v2986_v1 = vsel %vm2958_vm11, %v5763_v50, %v2549_v7 }
 0x1e7   : > { %v3019_v26 = vsel %vm2991_vm12, %v2986_v1, %v2645_v40 }
 0x1e8   : > { %v2537_v20 = vpop.permute.xlu1 %2536  ;;  %v3052_v33 = vsel %vm3024_vm13, %v3019_v26, %v2725_v52  ;;  %v2801_v28 = vpop.permute.xlu2 %2800 }
 0x1e9   : > { %v2974_v9 = vsel %vm2958_vm11, %v5661_v45, %v2537_v20 }
 0x1ed   : > { %v2805_v58 = vpop.permute.xlu0 %2804 }
 0x1ee   : > { %v3085_v6 = vsel %vm3057_vm14, %v3052_v33, %v2805_v58 }
 0x1ef   : > { %4061 = vmatmul.msk.bf16.gmra.mxu3 %vm3110_vm15, %v3085_v6 }
 0x1f0   : > { %v2641_v34 = vpop.permute.xlu1 %2640  ;;  %v2727_v59 = vpop.permute.xlu2 %2726 }
 0x1f1   : > { %v3015_v43 = vsel %vm2991_vm12, %v2982_v48, %v2641_v34 }
 0x1f5   : > { %v2633_v46 = vpop.permute.xlu0 %2632 }
 0x1f6   : > { %v3007_v13 = vsel %vm2991_vm12, %v2974_v9, %v2633_v46 }
 0x1f7   : > { %v3040_v50 = vsel %vm3024_vm13, %v3007_v13, %v2713_v63 }
 0x1f8   : > { %v2793_v49 = vpop.permute.xlu1 %2792  ;;  %v2649_v24 = vpop.permute.xlu2 %2648 }
 0x1f9   : > { %v3073_v21 = vsel %vm3057_vm14, %v3040_v50, %v2793_v49  ;;  %v6114_v31 = vpop.f32.mrf.mxu1 }
 0x1fa   : > { %4055 = vmatmul.msk.bf16.gmra.mxu1 %vm3110_vm15, %v3073_v21 }
 0x1fc   : > { %v3156_v23 = vpop.f32.mrf.mxu0 }
 0x1fd   : > { %v2721_v32 = vpop.permute.xlu0 %2720  ;;  %v3373_v44 = vmul.f32 %v3156_v23, %v3156_v23  ;;  %v3302_v16 = vsel %vm2859_vm7, %v3156_v23, 0.0 }
 0x1fe   : > { %v3048_v45 = vsel %vm3024_vm13, %v3015_v43, %v2721_v32 }
 0x1ff   : > { %v3081_v56 = vsel %vm3057_vm14, %v3048_v45, %v2801_v28  ;;  %v3405_v47 = vsel %vm2859_vm7, %v3373_v44, 0.0 }
 0x200   : > { %4059 = vmatmul.msk.bf16.gmra.mxu2 %vm3110_vm15, %v3081_v56  ;;  %v2647_v15 = vpop.permute.xlu1 %2646 }
 0x201   : > { %v6119_v52 = vpop.f32.mrf.mxu1 }
 0x204   : > { %v3158_v54 = vpop.f32.mrf.mxu0 }
 0x205   : > { %v3303_v22 = vsel %vm2859_vm7, %v3158_v54, 0.0  ;;  %v3374_v30 = vmul.f32 %v3158_v54, %v3158_v54  ;;  %v2551_v29 = vpop.permute.xlu0 %2550 }
 0x206   : > { %v3304_v5 = vadd.f32 %v3303_v22, %v3302_v16  ;;  %v2988_v62 = vsel %vm2958_vm11, %v5633_v11, %v2551_v29 }
 0x207   : > { %v3406_v18 = vsel %vm2859_vm7, %v3374_v30, 0.0  ;;  %v3021_v17 = vsel %vm2991_vm12, %v2988_v62, %v2647_v15  ;;  %v3381_v62 = vmul.f32 %v6114_v31, %v6114_v31 }
 0x208   : > { %v3407_v41 = vadd.f32 %v3406_v18, %v3405_v47  ;;  %v3054_v39 = vsel %vm3024_vm13, %v3021_v17, %v2727_v59  ;;  %v2553_v0 = vpop.permute.xlu1 %2552 }
 0x209   : > { %v2990_v19 = vsel %vm2958_vm11, %v5834_v61, %v2553_v0  ;;  %v3420_v0 = vsel %vm2859_vm7, %v3381_v62, 0.0 }
 0x20a   : > { %v3023_v36 = vsel %vm2991_vm12, %v2990_v19, %v2649_v24  ;;  %v3382_v19 = vmul.f32 %v6119_v52, %v6119_v52 }
 0x20d   : > { %v2807_v57 = vpop.permute.xlu0 %2806 }
 0x20e   : > { %v3087_v10 = vsel %vm3057_vm14, %v3054_v39, %v2807_v57  ;;  %v3317_v39 = vsel %vm2859_vm7, %v6114_v31, 0.0 }
 0x20f   : > { %4062 = vmatmul.msk.bf16.gmra.mxu3 %vm3110_vm15, %v3087_v10  ;;  %v3161_v35 = vpop.f32.mrf.mxu0 }
 0x210   : > { %v2809_v55 = vpop.permute.xlu1 %2808  ;;  %v3375_v51 = vmul.f32 %v3161_v35, %v3161_v35  ;;  %v3305_v26 = vsel %vm2859_vm7, %v3161_v35, 0.0 }
 0x211   : > { %v3306_v63 = vadd.f32 %v3305_v26, %v3304_v5 }
 0x212   : > { %v3408_v33 = vsel %vm2859_vm7, %v3375_v51, 0.0 }
 0x213   : > { %v3409_v21 = vadd.f32 %v3408_v33, %v3407_v41 }
 0x215   : > { %v2729_v25 = vpop.permute.xlu0 %2728 }
 0x216   : > { %v3056_v11 = vsel %vm3024_vm13, %v3023_v36, %v2729_v25  ;;  %v3319_v25 = vsel %vm2859_vm7, %v6119_v52, 0.0 }
 0x217   : > { %v3089_v12 = vsel %vm3057_vm14, %v3056_v11, %v2809_v55  ;;  %v3163_v37 = vpop.f32.mrf.mxu0  ;;  %v3422_v11 = vsel %vm2859_vm7, %v3382_v19, 0.0 }
 0x218   : > { %v3376_v58 = vmul.f32 %v3163_v37, %v3163_v37  ;;  %v3307_v6 = vsel %vm2859_vm7, %v3163_v37, 0.0 }
 0x219   : > { %v3308_v48 = vadd.f32 %v3307_v6, %v3306_v63 }
 0x21a   : > { %v3410_v46 = vsel %vm2859_vm7, %v3376_v58, 0.0 }
 0x21b   : > { %v3411_v32 = vadd.f32 %v3410_v46, %v3409_v21 }
 0x21f   : > { %4063 = vmatmul.msk.bf16.gmra.mxu3 %vm3110_vm15, %v3089_v12 }
 0x222   : > { %v6102_v38 = vpop.f32.mrf.mxu2 }
 0x223   : > { %v4203_v2 = vpack.i.bf16 %v6102_v38, %v3156_v23 }
 0x225   : > { %4204 = vxpose.xlu2.b32.start [1/16] (narrow) %v4203_v2, 8 }
 0x22a   : > { %v6105_v42 = vpop.f32.mrf.mxu2 }
 0x22b   : > { %v4205_v61 = vpack.i.bf16 %v6105_v42, %v3158_v54 }
 0x22d   : > { %4206 = vxpose.xlu2.b32.cont [2/16] (narrow) %v4205_v61, 8 }
 0x22f   : > { %v6124_v20 = vpop.f32.mrf.mxu1 }
 0x230   : > { %v3383_v55 = vmul.f32 %v6124_v20, %v6124_v20 }
 0x232   : > { %v6108_v60 = vpop.f32.mrf.mxu2 }
 0x233   : > { %v4207_v14 = vpack.i.bf16 %v6108_v60, %v3161_v35  ;;  %v3321_v35 = vsel %vm2859_vm7, %v6124_v20, 0.0 }
 0x234   : > { %v3166_v8 = vpop.f32.mrf.mxu0 }
 0x235   : > { %4208 = vxpose.xlu2.b32.cont [3/16] (narrow) %v4207_v14, 8  ;;  %v3377_v34 = vmul.f32 %v3166_v8, %v3166_v8  ;;  %v3309_v13 = vsel %vm2859_vm7, %v3166_v8, 0.0 }
 0x236   : > { %v3310_v45 = vadd.f32 %v3309_v13, %v3308_v48 }
 0x237   : > { %v6133_v49 = vpop.f32.mrf.mxu1  ;;  %v3412_v23 = vsel %vm2859_vm7, %v3377_v34, 0.0 }
 0x238   : > { %v3413_v54 = vadd.f32 %v3412_v23, %v3411_v32 }
 0x23a   : > { %v6111_v3 = vpop.f32.mrf.mxu2 }
 0x23b   : > { %v4209_v53 = vpack.i.bf16 %v6111_v3, %v3163_v37  ;;  %v3424_v37 = vsel %vm2859_vm7, %v3383_v55, 0.0 }
 0x23c   : > { %v3168_v40 = vpop.f32.mrf.mxu0 }
 0x23d   : > { %4210 = vxpose.xlu2.b32.cont [4/16] (narrow) %v4209_v53, 8  ;;  %v3378_v50 = vmul.f32 %v3168_v40, %v3168_v40  ;;  %v3311_v28 = vsel %vm2859_vm7, %v3168_v40, 0.0  ;;  %v3384_v53 = vmul.f32 %v6133_v49, %v6133_v49 }
 0x23e   : > { %v3312_v16 = vadd.f32 %v3311_v28, %v3310_v45 }
 0x23f   : > { %v3414_v56 = vsel %vm2859_vm7, %v3378_v50, 0.0 }
 0x240   : > { %v3415_v30 = vadd.f32 %v3414_v56, %v3413_v54 }
 0x246   : > { %v6116_v4 = vpop.f32.mrf.mxu2 }
 0x247   : > { %v4211_v27 = vpack.i.bf16 %v6116_v4, %v3166_v8 }
 0x249   : > { %4212 = vxpose.xlu2.b32.cont [5/16] (narrow) %v4211_v27, 8  ;;  %v3323_v27 = vsel %vm2859_vm7, %v6133_v49, 0.0 }
 0x24a   : > { %v6164_v12 = vpop.f32.mrf.mxu3 }
 0x24e   : > { %v6121_v7 = vpop.f32.mrf.mxu2 }
 0x24f   : > { %v4213_v1 = vpack.i.bf16 %v6121_v7, %v3168_v40 }
 0x251   : > { %4214 = vxpose.xlu2.b32.cont [6/16] (narrow) %v4213_v1, 8  ;;  %v3426_v1 = vsel %vm2859_vm7, %v3384_v53, 0.0  ;;  %v3394_v53 = vmul.f32 %v6121_v7, %v6121_v7 }
 0x252   : > { %v6180_v33 = vpop.f32.mrf.mxu3 }
 0x257   : > { %v6145_v47 = vpop.f32.mrf.mxu1 }
 0x258   : > { %v3385_v51 = vmul.f32 %v6145_v47, %v6145_v47  ;;  %v3325_v6 = vsel %vm2859_vm7, %v6145_v47, 0.0 }
 0x25a   : > { %v3428_v63 = vsel %vm2859_vm7, %v3385_v51, 0.0  ;;  %v3343_v51 = vsel %vm2859_vm7, %v6121_v7, 0.0 }
 0x25c   : > { %v6129_v9 = vpop.f32.mrf.mxu0 }
 0x25d   : > { %v3379_v43 = vmul.f32 %v6129_v9, %v6129_v9  ;;  %v3313_v44 = vsel %vm2859_vm7, %v6129_v9, 0.0 }
 0x25e   : > { %v3314_v29 = vadd.f32 %v3313_v44, %v3312_v16  ;;  %v3389_v44 = vmul.f32 %v6102_v38, %v6102_v38 }
 0x25f   : > { %v3416_v22 = vsel %vm2859_vm7, %v3379_v43, 0.0  ;;  %v6166_v61 = vpop.f32.mrf.mxu1 }
 0x260   : > { %v3417_v41 = vadd.f32 %v3416_v22, %v3415_v30  ;;  %v3386_v46 = vmul.f32 %v6166_v61, %v6166_v61  ;;  %v3327_v21 = vsel %vm2859_vm7, %v6166_v61, 0.0 }
 0x262   : > { %v3430_v28 = vsel %vm2859_vm7, %v3386_v46, 0.0 }
 0x264   : > { %v6143_v5 = vpop.f32.mrf.mxu0 }
 0x265   : > { %v3315_v18 = vsel %vm2859_vm7, %v6143_v5, 0.0  ;;  %v3380_v15 = vmul.f32 %v6143_v5, %v6143_v5 }
 0x266   : > { %v3316_v59 = vadd.f32 %v3315_v18, %v3314_v29  ;;  %v3333_v18 = vsel %vm2859_vm7, %v6102_v38, 0.0 }
 0x267   : > { %v3418_v17 = vsel %vm2859_vm7, %v3380_v15, 0.0  ;;  %v3390_v15 = vmul.f32 %v6105_v42, %v6105_v42 }
 0x268   : > { %v3419_v57 = vadd.f32 %v3418_v17, %v3417_v41  ;;  %v3318_v10 = vadd.f32 %v3317_v39, %v3316_v59  ;;  %v3436_v39 = vsel %vm2859_vm7, %v3389_v44, 0.0  ;;  %v3398_v44 = vmul.f32 %v6180_v33, %v6180_v33 }
 0x26a   : > { %v3421_v24 = vadd.f32 %v3420_v0, %v3419_v57  ;;  %v3320_v36 = vadd.f32 %v3319_v25, %v3318_v10  ;;  %v3335_v57 = vsel %vm2859_vm7, %v6105_v42, 0.0  ;;  %v3391_v10 = vmul.f32 %v6108_v60, %v6108_v60 }
 0x26b   : > { %v3337_v25 = vsel %vm2859_vm7, %v6108_v60, 0.0  ;;  %v3341_v60 = vsel %vm2859_vm7, %v6116_v4, 0.0 }
 0x26c   : > { %v3423_v2 = vadd.f32 %v3422_v11, %v3421_v24  ;;  %v3322_v14 = vadd.f32 %v3321_v35, %v3320_v36  ;;  %v3438_v24 = vsel %vm2859_vm7, %v3390_v15, 0.0  ;;  %v3392_v36 = vmul.f32 %v6111_v3, %v6111_v3 }
 0x26d   : > { %v3440_v42 = vsel %vm2859_vm7, %v3391_v10, 0.0 }
 0x26e   : > { %v3425_v8 = vadd.f32 %v3424_v37, %v3423_v2  ;;  %v3324_v40 = vadd.f32 %v3323_v27, %v3322_v14  ;;  %v3339_v2 = vsel %vm2859_vm7, %v6111_v3, 0.0  ;;  %v3442_v37 = vsel %vm2859_vm7, %v3392_v36, 0.0 }
 0x270   : > { %v3427_v26 = vadd.f32 %v3426_v1, %v3425_v8  ;;  %v3326_v34 = vadd.f32 %v3325_v6, %v3324_v40 }
 0x272   : > { %v3429_v50 = vadd.f32 %v3428_v63, %v3427_v26  ;;  %v3328_v23 = vadd.f32 %v3327_v21, %v3326_v34  ;;  %v6199_v54 = vpop.f32.mrf.mxu3 }
 0x274   : > { %v3431_v32 = vadd.f32 %v3430_v28, %v3429_v50 }
 0x277   : > { %v6178_v58 = vpop.f32.mrf.mxu1 }
 0x278   : > { %v3387_v13 = vmul.f32 %v6178_v58, %v6178_v58  ;;  %v3329_v48 = vsel %vm2859_vm7, %v6178_v58, 0.0 }
 0x279   : > { %v3330_v45 = vadd.f32 %v3329_v48, %v3328_v23  ;;  %v3397_v48 = vmul.f32 %v6164_v12, %v6164_v12 }
 0x27a   : > { %v3432_v43 = vsel %vm2859_vm7, %v3387_v13, 0.0  ;;  %v6231_v8 = vpop.f32.mrf.mxu3 }
 0x27b   : > { %v3433_v30 = vadd.f32 %v3432_v43, %v3431_v32 }
 0x27f   : > { %v6195_v56 = vpop.f32.mrf.mxu1 }
 0x280   : > { %v3331_v16 = vsel %vm2859_vm7, %v6195_v56, 0.0  ;;  %v3388_v22 = vmul.f32 %v6195_v56, %v6195_v56 }
 0x281   : > { %v3332_v29 = vadd.f32 %v3331_v16, %v3330_v45 }
 0x282   : > { %v3434_v62 = vsel %vm2859_vm7, %v3388_v22, 0.0 }
 0x283   : > { %v3211_v41 = vpop.f32.mrf.mxu2  ;;  %v3334_v59 = vadd.f32 %v3333_v18, %v3332_v29  ;;  %v3435_v17 = vadd.f32 %v3434_v62, %v3433_v30  ;;  %v4219_v30 = vpack.i.bf16 %v6164_v12, %v6114_v31  ;;  %v3452_v29 = vsel %vm2859_vm7, %v3397_v48, 0.0 }
 0x284   : > { %v4215_v0 = vpack.i.bf16 %v3211_v41, %v6129_v9  ;;  %v3393_v9 = vmul.f32 %v6116_v4, %v6116_v4  ;;  %v3395_v26 = vmul.f32 %v3211_v41, %v3211_v41  ;;  %v3446_v4 = vsel %vm2859_vm7, %v3394_v53, 0.0 }
 0x285   : > { %v3336_v19 = vadd.f32 %v3335_v57, %v3334_v59  ;;  %v3437_v38 = vadd.f32 %v3436_v39, %v3435_v17  ;;  %v3345_v46 = vsel %vm2859_vm7, %v3211_v41, 0.0  ;;  %v3351_v18 = vsel %vm2859_vm7, %v6180_v33, 0.0 }
 0x286   : > { %4216 = vxpose.xlu2.b32.cont [7/16] (narrow) %v4215_v0, 8  ;;  %v3444_v3 = vsel %vm2859_vm7, %v3393_v9, 0.0  ;;  %v3448_v23 = vsel %vm2859_vm7, %v3395_v26, 0.0  ;;  %v3454_v41 = vsel %vm2859_vm7, %v3398_v44, 0.0  ;;  %v3399_v59 = vmul.f32 %v6199_v54, %v6199_v54 }
 0x287   : > { %v3338_v11 = vadd.f32 %v3337_v25, %v3336_v19  ;;  %v3439_v55 = vadd.f32 %v3438_v24, %v3437_v38  ;;  %v3353_v39 = vsel %vm2859_vm7, %v6199_v54, 0.0  ;;  %v4221_v0 = vpack.i.bf16 %v6180_v33, %v6119_v52 }
 0x288   : > { %v3456_v31 = vsel %vm2859_vm7, %v3399_v59, 0.0  ;;  %v3355_v38 = vsel %vm2859_vm7, %v6231_v8, 0.0  ;;  %v4223_v9 = vpack.i.bf16 %v6199_v54, %v6124_v20  ;;  %v4225_v26 = vpack.i.bf16 %v6231_v8, %v6133_v49 }
 0x289   : > { %v3441_v35 = vadd.f32 %v3440_v42, %v3439_v55  ;;  %v3340_v14 = vadd.f32 %v3339_v2, %v3338_v11 }
 0x28b   : > { %v3213_v27 = vpop.f32.mrf.mxu2  ;;  %v3342_v40 = vadd.f32 %v3341_v60, %v3340_v14  ;;  %v3443_v1 = vadd.f32 %v3442_v37, %v3441_v35 }
 0x28c   : > { %v4217_v6 = vpack.i.bf16 %v3213_v27, %v6143_v5  ;;  %v3396_v13 = vmul.f32 %v3213_v27, %v3213_v27  ;;  %v3347_v7 = vsel %vm2859_vm7, %v3213_v27, 0.0  ;;  %v3349_v5 = vsel %vm2859_vm7, %v6164_v12, 0.0 }
 0x28d   : > { %v3344_v34 = vadd.f32 %v3343_v51, %v3342_v40  ;;  %v3445_v63 = vadd.f32 %v3444_v3, %v3443_v1  ;;  %v3400_v12 = vmul.f32 %v6231_v8, %v6231_v8 }
 0x28e   : > { %4218 = vxpose.xlu2.b32.cont [8/16] (narrow) %v4217_v6, 8  ;;  %v3450_v32 = vsel %vm2859_vm7, %v3396_v13, 0.0 }
 0x28f   : > { %v3346_v50 = vadd.f32 %v3345_v46, %v3344_v34  ;;  %v3447_v21 = vadd.f32 %v3446_v4, %v3445_v63  ;;  %v3458_v25 = vsel %vm2859_vm7, %v3400_v12, 0.0 }
 0x291   : > { %v3449_v28 = vadd.f32 %v3448_v23, %v3447_v21  ;;  %v3348_v43 = vadd.f32 %v3347_v7, %v3346_v50 }
 0x292   : > { %v6246_v45 = vpop.f32.mrf.mxu3 }
 0x293   : > { %v3350_v16 = vadd.f32 %v3349_v5, %v3348_v43  ;;  %v3451_v22 = vadd.f32 %v3450_v32, %v3449_v28  ;;  %v3401_v36 = vmul.f32 %v6246_v45, %v6246_v45  ;;  %v3357_v55 = vsel %vm2859_vm7, %v6246_v45, 0.0 }
 0x294   : > { %v4227_v49 = vpack.i.bf16 %v6246_v45, %v6145_v47 }
 0x295   : > { %v3453_v15 = vadd.f32 %v3452_v29, %v3451_v22  ;;  %v3352_v62 = vadd.f32 %v3351_v18, %v3350_v16  ;;  %v3460_v52 = vsel %vm2859_vm7, %v3401_v36, 0.0 }
 0x296   : > { %4220 = vxpose.xlu2.b32.cont [9/16] (narrow) %v4219_v30, 8 }
 0x297   : > { %v3455_v17 = vadd.f32 %v3454_v41, %v3453_v15  ;;  %v3354_v57 = vadd.f32 %v3353_v39, %v3352_v62 }
 0x299   : > { %v3457_v19 = vadd.f32 %v3456_v31, %v3455_v17  ;;  %v3356_v24 = vadd.f32 %v3355_v38, %v3354_v57 }
 0x29a   : > { %v6260_v10 = vpop.f32.mrf.mxu3 }
 0x29b   : > { %v3459_v11 = vadd.f32 %v3458_v25, %v3457_v19  ;;  %v3358_v42 = vadd.f32 %v3357_v55, %v3356_v24  ;;  %v3402_v33 = vmul.f32 %v6260_v10, %v6260_v10  ;;  %v3359_v14 = vsel %vm2859_vm7, %v6260_v10, 0.0 }
 0x29d   : > { %v3461_v35 = vadd.f32 %v3460_v52, %v3459_v11  ;;  %v3360_v60 = vadd.f32 %v3359_v14, %v3358_v42  ;;  %v3462_v53 = vsel %vm2859_vm7, %v3402_v33, 0.0 }
 0x29e   : > { %4222 = vxpose.xlu2.b32.cont [10/16] (narrow) %v4221_v0, 8 }
 0x29f   : > { %v3463_v40 = vadd.f32 %v3462_v53, %v3461_v35 }
 0x2a2   : > { %v6274_v2 = vpop.f32.mrf.mxu3 }
 0x2a3   : > { %v3403_v37 = vmul.f32 %v6274_v2, %v6274_v2  ;;  %v3361_v27 = vsel %vm2859_vm7, %v6274_v2, 0.0 }
 0x2a4   : > { %v3362_v3 = vadd.f32 %v3361_v27, %v3360_v60 }
 0x2a5   : > { %v3464_v1 = vsel %vm2859_vm7, %v3403_v37, 0.0 }
 0x2a6   : > { %4224 = vxpose.xlu2.b32.cont [11/16] (narrow) %v4223_v9, 8  ;;  %v3465_v6 = vadd.f32 %v3464_v1, %v3463_v40 }
 0x2aa   : > { %v6289_v20 = vpop.f32.mrf.mxu3 }
 0x2ab   : > { %v3363_v54 = vsel %vm2859_vm7, %v6289_v20, 0.0  ;;  %v3404_v51 = vmul.f32 %v6289_v20, %v6289_v20 }
 0x2ac   : > { %v3364_v34 = vadd.f32 %v3363_v54, %v3362_v3 }
 0x2ad   : > { %v3466_v63 = vsel %vm2859_vm7, %v3404_v51, 0.0 }
 0x2ae   : > { %v3365_v4 = vrot.slane %v3364_v34, 4  ;;  %v3467_v46 = vadd.f32 %v3466_v63, %v3465_v6  ;;  %4226 = vxpose.xlu2.b32.cont [12/16] (narrow) %v4225_v26, 8 }
 0x2b0   : > { %v3366_v13 = vadd.f32 %v3365_v4, %v3364_v34  ;;  %v3468_v50 = vrot.slane %v3467_v46, 4 }
 0x2b2   : > { %v3367_v21 = vrot.slane %v3366_v13, 2  ;;  %v3469_v48 = vadd.f32 %v3468_v50, %v3467_v46 }
 0x2b4   : > { %v3368_v8 = vadd.f32 %v3367_v21, %v3366_v13  ;;  %v3470_v23 = vrot.slane %v3469_v48, 2 }
 0x2b6   : > { %v3369_v7 = vrot.slane %v3368_v8, 1  ;;  %v3471_v28 = vadd.f32 %v3470_v23, %v3469_v48  ;;  %4228 = vxpose.xlu2.b32.cont [13/16] (narrow) %v4227_v49, 8 }
 0x2b8   : > { %v3472_v47 = vrot.slane %v3471_v28, 1  ;;  %v3370_v43 = vadd.f32 %v3369_v7, %v3368_v8 }
 0x2ba   : > { %3372 = vst.msk [vmem:[%s218_s26] sm:$0x1] %vm3371_vm0, %v3370_v43  ;;  %v3473_v5 = vadd.f32 %v3472_v47, %v3471_v28 }
 0x2bb   : > { %4283 = shalt.err (!%p4280_p5)
}
 0x2bc   : > { %4131 = dma.vmem_to_hbm [thread:$0]  (%p4471_p4), %s3514_s29, 16, %s3516_s30, %s3481_s8   ;;  %v4229_v32 = vpack.i.bf16 %v6260_v10, %v6166_v61  ;;  %3474 = vst.msk [vmem:[%s224_s21] sm:$0x1] %vm3371_vm0, %v3473_v5 }
 0x2bd   : > { %s4298_s26 = sshra.s32 %s3530_s6, 4  ;;  %s4304_s11 = scalar_lea.hbm %s6412_s4, 2  ;;  %s4299_s26 = int_to_ptr.hbm [resolvable:$true] %s4298_s26 }
 0x2be   : > { %s4300_s22 = scalar_lea.hbm %s4299_s26, 1  ;;  %p4305_p10 = scmp.lt.s32.totalorder %s4299_s26, %s6412_s4 }
 0x2bf   : > { %p4301_p6 = scmp.ne.s32.totalorder %s4299_s26, %s4300_s22  ;;  %p4306_p11 = scmp.lt.s32.totalorder %s4304_s11, %s4300_s22 }
 0x2c1   : > { %p4302_p7 = pnand %p4301_p6, %p4471_p4  ;;  %p4307_p12 = por %p4306_p11, %p4305_p10 }
 0x2c3   : > { %p4303_p9 = pneg %p4302_p7 }
 0x2c5   : > { %p4308_p13 = pnand %p4307_p12, %p4303_p9 }
 0x2c7   : > { %4311 = shalt.err (!%p4308_p13)
}
 0x2c8   : > { %4132 = dma.vmem_to_hbm [thread:$0]  (%p4471_p4), %s3528_s5, 16, %s3530_s6, %s3481_s8   ;;  %4230 = vxpose.xlu2.b32.cont [14/16] (narrow) %v4229_v32, 8  ;;  %v4231_v61 = vpack.i.bf16 %v6274_v2, %v6178_v58  ;;  %v4233_v45 = vpack.i.bf16 %v6289_v20, %v6195_v56 }
 0x2c9   : > { %s3670_s29 = sshll.u32 %s6299_s7, 3  ;;  %s4119_s30 = sshll.u32 %s4386_s18, 3 }
 0x2ca   : > { %s3497_s24 = scalar_lea.hbm %s6410_s2, %s4119_s30  ;;  %s212_s26 = scalar_lea.vmem [#allocation2], %s3670_s29 }
 0x2cb   : > { %s3499_s5 = sshll.u32 %s212_s26, 4  ;;  %s3501_s6 = sshll.u32 %s3497_s24, 4  ;;  %s3500_s5 = int_to_ptr.vmem [resolvable:$true] %s3499_s5  ;;  %s3502_s6 = int_to_ptr.hbm [resolvable:$true] %s3501_s6 }
 0x2cc   : > { %s3476_s8 = scalar_lea.sflag [#allocation3], %s6299_s7  ;;  %s4326_s22 = sshra.s32 %s3502_s6, 4  ;;  %s4327_s22 = int_to_ptr.hbm [resolvable:$true] %s4326_s22 }
 0x2cd   : > { %s4328_s9 = scalar_lea.hbm %s4327_s22, 8  ;;  %s4332_s11 = scalar_lea.hbm %s6410_s2, 16 }
 0x2ce   : > { %p4329_p0 = scmp.ne.s32.totalorder %s4327_s22, %s4328_s9  ;;  %p4333_p3 = scmp.lt.s32.totalorder %s4327_s22, %s6410_s2 }
 0x2cf   : > { %p4334_p5 = scmp.lt.s32.totalorder %s4332_s11, %s4328_s9 }
 0x2d0   : > { %4232 = vxpose.xlu2.b32.cont [15/16] (narrow) %v4231_v61, 8  ;;  %p4330_p1 = pnand %p4329_p0, %p4471_p4 }
 0x2d1   : > { %p4335_p6 = por %p4334_p5, %p4333_p3 }
 0x2d2   : > { %p4331_p2 = pneg %p4330_p1 }
 0x2d4   : > { %p4336_p7 = pnand %p4335_p6, %p4331_p2 }
 0x2d8   : > { %4234 = vxpose.xlu2.b32.end [16/16] (narrow) %v4233_v45, 8 }
 0x2f9   : > { %v4235_v44 = vpop.trf.xlu2 }
 0x2fa   : > { %v4239_v16 = vunpack.i.h.bf16 %v4235_v44  ;;  %v4236_v22 = vunpack.i.l.bf16 %v4235_v44 }
 0x2fc   : > { %v3300_v58 = vpack.c.bf16 %v4239_v16, %v4236_v22 }
 0x2fe   : > { %3301 = vst [vmem:[%s212_s26] sm:$0xff] %v3300_v58 }
 0x2ff   : > { %4339 = shalt.err (!%p4336_p7)
}
 0x300   : > { %4130 = dma.vmem_to_hbm [thread:$0]  (%p4471_p4), %s3500_s5, 128, %s3502_s6, %s3476_s8  }
 0x301 PF: > { %p4146_p9 = scmp.ge.s32.totalorder %s4394_s20, 2  ;;  %s3541_s7 = sand.u32 1, %s4374_s15  }
 0x302   : > { %s3542_s29 = scalar_lea.sflag [#allocation3], %s3541_s7 }
 0x303   : > { %p4137_p10 = pnand %p4146_p9, %p4480_p8 }
 0x305   : > { %p4138_p11 = pneg %p4137_p10 }
 0x307   : > { %4365 = dma.done.wait (%p4138_p11), %s3542_s29, 128  }
 0x308   : > { %4367 = vsyncadd (%p4138_p11), %s3542_s29, 4294967168  ;;  %s6422_s30 = sadd.s32 4294967294, %s4394_s20  }
 0x309   : > { %s3551_s12 = sand.u32 1, %s6422_s30  }
 0x30a   : > { %s3552_s21 = scalar_lea.sflag [#allocation5], %s3551_s12 }
 0x30b   : > { %4369 = dma.done.wait (%p4138_p11), %s3552_s21, 32  }
 0x30c   : > { %4371 = vsyncadd (%p4138_p11), %s3552_s21, 4294967264  ;;  %s21_s20 = sadd.s32 1, %s4394_s20   ;;  %s6423_s15 = smov %s4378_s16 }
 0x30d   : > { %p18_p4 = scmp.ge.s32.totalorder %s21_s20, 4   ;;  %s6424_s16 = smov %s4382_s17 }
 0x30e   : > { %s6425_s17 = smov %s4486_s28  ;;  %s6426_s18 = smov %s4390_s19 }
 0x30f   : > { %s6427_s19 = smov %s6429_s23  ;;  %20 = sbr.rel (!%p18_p4) target bundleno = 6 (0x6), region = 98 }
 0x314   :  { %3566 = vsyncpa [#allocation3], 1 }
 0x315   :  { %3568 = vsyncpa [#allocation3 + $0x1], 1 }
 0x316   :  { %3569 = vsyncpa [#allocation5], 1 }
 0x317   :  { %3571 = vsyncpa [#allocation5 + $0x1], 1 }

// kernel: tpu_custom_call.1
= control target key start
LH: loop header
LB: loop body
LE: loop exit
PB: predicated region body
PF: predicated region fallthrough
CT: control target
= control target key end

     0   :  { %10 = vsyncpa [#allocation3], 0  ;;  %s7175_s0 = inlined_call_operand.vmem [shape: bf16[2,18,18,4], index: 0, kind: input, shape index: {}]   ;;  %s7176_s1 = inlined_call_operand.vmem [shape: bf16[9,4,8], index: 1, kind: input, shape index: {}]   ;;  %s7177_s2 = inlined_call_operand.hbm [shape: bf16[2,8,256], index: 2, kind: output, shape index: {0}]   ;;  %s7178_s3 = inlined_call_operand.hbm [shape: f32[2,1,8], index: 3, kind: output, shape index: {1}]   ;;  %s7179_s4 = inlined_call_operand.hbm [shape: f32[2,1,8], index: 4, kind: output, shape index: {2}]  }
   0x1   :  { %12 = vsyncpa [#allocation3 + $0x1], 0 }
   0x2   :  { %13 = vsyncpa [#allocation5], 0 }
   0x3   :  { %15 = vsyncpa [#allocation5 + $0x1], 0  ;;  %s5549_s15 = smov 0   ;;  %s5551_s16 = smov 0  }
   0x4   :  { %s5553_s17 = smov 0   ;;  %s5555_s18 = smov 0  }
   0x5   :  { %s5557_s19 = smov 0   ;;  %s5559_s20 = smov 0  }
   0x6 LB: > { %s4583_s21 = sadd.s32 4294967295, %s5522_s20   ;;  %s7180_s22 = sadd.s32 4294967294, %s5522_s20   ;;  %s5522_s20 = sphi %s5559_s20, %s21_s20   ;;  %s5518_s19 = sphi %s5557_s19, %s7200_s19   ;;  %s5514_s18 = sphi %s5555_s18, %s7199_s18   ;;  %s5510_s17 = sphi %s5553_s17, %s7198_s17   ;;  %s5506_s16 = sphi %s5551_s16, %s7197_s16   ;;  %s5502_s15 = sphi %s5549_s15, %s7196_s15  }
   0x7   : > { %s33_s23 = sadd.s32 1, %s5518_s19  ;;  %s89_s24 = sadd.s32 1, %s5510_s17 }
   0x8   : > { %p35_p0 = scmp.ge.s32.totalorder %s33_s23, 2  ;;  %p99_p1 = scmp.ne.s32.totalorder %s5510_s17, %s5506_s16 }
   0x9   : > { %p100_p2 = scmp.eq.s32.totalorder %s4583_s21, 1  ;;  %p105_p3 = scmp.ne.s32.totalorder %s5506_s16, %s5502_s15 }
   0xa   : > { %s7202_s23 = smov (%p35_p0, %s33_s23), 0  ;;  %p106_p5 = scmp.eq.s32.totalorder %s7180_s22, 1 }
   0xb   : > { %p5591_p4 = por %p100_p2, %p99_p1  ;;  %s84_s26 = ssub.s32 %s5518_s19, %s7202_s23 }
   0xc   : > { %p4587_p6 = scmp.ge.s32.totalorder %s5522_s20, 1  ;;  %p87_p7 = scmp.eq.s32.totalorder %s84_s26, 0 }
   0xd   : > { %p5600_p8 = por %p106_p5, %p105_p3  ;;  %p191_p9 = scmp.lt.s32.totalorder %s5522_s20, 3 }
   0xe   : > { %s5606_s28 = scalar_select %p87_p7, %s5510_s17, %s89_s24  }
   0xf   : > { %p192_p10 = pnand %p4587_p6, %p191_p9 }
  0x11   : > { %195 = sbr.rel (%p192_p10) target bundleno = 819 (0x333), region = 28 }
  0x16   : > { %v4590_v0 = vld [vmem:[%s7176_s1 + $0x2] sm:$0x3]  ;;  %vm771_vm0 = vcmask 1041408   ;;  %p225_p11 = scmp.lt.s32.totalorder %s5514_s18, 1  ;;  %v4703_v2 = vld [vmem:[%s7176_s1 + $0x4] sm:$0x3]  ;;  %s4429_s24 = scalar_lea.hbm %s7178_s3, %s5514_s18 }
  0x17   : > { %v773_v1 = vsel %vm771_vm0, %v4590_v0, 0  ;;  %v1346_v3 = vsel %vm771_vm0, %v4703_v2, 0  ;;  %v4752_v4 = vld [vmem:[%s7176_s1 + $0x6] sm:$0x3]  ;;  %v268_v5 = vld [vmem:[%s7176_s1] sm:$0x3]  ;;  %s4443_s5 = scalar_lea.hbm %s7179_s4, %s5514_s18 }
  0x18   : > { %5228 = vmatpush.bf16.msra.mxu1 %v773_v1  ;;  %5229 = vmatpush.bf16.msra.mxu2 %v773_v1  ;;  %s226_s7 = scalar_select %p225_p11, %s5514_s18, 1  ;;  %v4881_v6 = vld [vmem:[%s7176_s1 + $0x8] sm:$0x3]  ;;  %v1636_v7 = vsel %vm771_vm0, %v4752_v4, 0  ;;  %v993_v8 = vsel %vm771_vm0, %v268_v5, 0  ;;  %vm722_vm4 = vcmask 31744  }
  0x19   : > { %5230 = vmatpush.bf16.msra.mxu3 %v773_v1  ;;  %782 = vmatpush.bf16.msra.mxu0 %v773_v1  ;;  %v2290_v9 = vsel %vm771_vm0, %v4881_v6, 0  ;;  %vm285_vm1 = vsmask.f32 3328  ;;  %vm286_vm2 = vsmask.f32 7440  ;;  %vm1132_vm5 = vcmask 1042432  }
  0x1a   : > { %s5231_s14 = smul.u32 216, %s226_s7  ;;  %vm5645_vm3 = vmor %vm285_vm1, %vm286_vm2  ;;  %vm1133_vm6 = vcmask 1046532   ;;  %vm4219_vm8 = vcmask 64512   ;;  %s7078_s12 = sand.u32 1, %s5506_s16   ;;  %vm4289_vm9 = vcmask 57344  }
  0x1b   : > { %vm5819_vm7 = vmor %vm1132_vm5, %vm1133_vm6  ;;  %s7086_s26 = sand.u32 1, %s4583_s21   ;;  %s218_s6 = scalar_lea.vmem [#allocation4], %s7078_s12 }
  0x1c   : > { %1355 = vmatpush.bf16.msrb.mxu2 %v1346_v3  ;;  %1002 = vmatpush.bf16.msrb.mxu1 %v993_v8  ;;  %s5633_s29 = scalar_lea.vmem %s7175_s0, %s5231_s14  ;;  %s7093_s7 = sshll.u32 %s218_s6, 4  ;;  %s4432_s7 = int_to_ptr.vmem [resolvable:$true] %s7093_s7 }
  0x1d   : > { %1645 = vmatpush.bf16.msrb.mxu3 %v1636_v7  ;;  %2299 = vmatpush.bf16.msrb.mxu0 %v2290_v9  ;;  %v244_v10 = vld [vmem:[%s5633_s29 + $0x30] sm:$0xf]  ;;  %v245_v11 = vld [vmem:[%s5633_s29 + $0x34] sm:$0xf]  ;;  %v273_v12 = vld [vmem:[%s5633_s29 + $0x38] sm:$0x1] }
  0x1e   : > { %v385_v13 = vshrl.u32 %v244_v10, 16  ;;  %v388_v14 = vshll.u32 %v244_v10, 16  ;;  %v394_v15 = vshll.u32 %v245_v11, 16  ;;  %v398_v16 = vshrl.u32 %v245_v11, 16  ;;  %v252_v17 = vld [vmem:[%s5633_s29 + $0x60] sm:$0xf] }
  0x1f   : > { %v404_v18 = vshll.u32 %v273_v12, 16  ;;  %v253_v19 = vld [vmem:[%s5633_s29 + $0x64] sm:$0xf]  ;;  %v277_v20 = vld [vmem:[%s5633_s29 + $0x68] sm:$0x1]  ;;  %v481_v21 = vshrl.u32 %v252_v17, 16 }
  0x20   : > { %v387_v22 = vrot.slane %v385_v13, 4  ;;  %v390_v23 = vrot.slane %v388_v14, 5  ;;  %v396_v24 = vrot.slane %v394_v15, 5  ;;  %v400_v25 = vrot.slane %v398_v16, 4  ;;  %v260_v26 = vld [vmem:[%s5633_s29 + $0x90] sm:$0xf] }
  0x21   : > { %v406_v27 = vrot.slane %v404_v18, 5  ;;  %v483_v28 = vrot.slane %v481_v21, 4  ;;  %v484_v29 = vshll.u32 %v252_v17, 16  ;;  %v490_v30 = vshll.u32 %v253_v19, 16  ;;  %v261_v35 = vld [vmem:[%s5633_s29 + $0x94] sm:$0xf] }
  0x22   : > { %v391_v31 = vor.u32 %v390_v23, %v387_v22  ;;  %v401_v32 = vor.u32 %v400_v25, %v396_v24  ;;  %v494_v33 = vshrl.u32 %v253_v19, 16  ;;  %v500_v34 = vshll.u32 %v277_v20, 16  ;;  %v281_v45 = vld [vmem:[%s5633_s29 + $0x98] sm:$0x1]  ;;  %v236_v61 = vld [vmem:[%s5633_s29] sm:$0xf] }
  0x23   : > { %v486_v37 = vrot.slane %v484_v29, 5  ;;  %v492_v38 = vrot.slane %v490_v30, 5  ;;  %v577_v39 = vshrl.u32 %v260_v26, 16  ;;  %v580_v47 = vshll.u32 %v260_v26, 16  ;;  %v5658_v1 = vld [vmem:[%s5633_s29 + $0x4] sm:$0xf] }
  0x24   : > { %v392_v40 = vrot.slane %v391_v31, 4  ;;  %v402_v41 = vrot.slane %v401_v32, 4  ;;  %v496_v42 = vrot.slane %v494_v33, 4  ;;  %v502_v43 = vrot.slane %v500_v34, 5  ;;  %v5661_v2 = vld [vmem:[%s5633_s29 + $0x8] sm:$0x1] }
  0x25   : > { %v487_v44 = vor.u32 %v486_v37, %v483_v28  ;;  %v579_v46 = vrot.slane %v577_v39, 4  ;;  %v586_v48 = vshll.u32 %v261_v35, 16  ;;  %v590_v52 = vshrl.u32 %v261_v35, 16  ;;  %v246_v19 = vld [vmem:[%s5633_s29 + $0x3c] sm:$0xf]  ;;  %s7095_s8 = sshll.u32 %s4429_s24, 4  ;;  %s4434_s8 = int_to_ptr.hbm [resolvable:$true] %s7095_s8 }
  0x26   : > { %v397_v49 = vsel %vm5645_vm3, %v392_v40, %v396_v24  ;;  %v407_v50 = vsel %vm5645_vm3, %v402_v41, %v406_v27  ;;  %v497_v51 = vor.u32 %v496_v42, %v492_v38  ;;  %v582_v56 = vrot.slane %v580_v47, 5  ;;  %v5673_v20 = vld [vmem:[%s5633_s29 + $0x40] sm:$0xf]  ;;  %v5678_v25 = vld [vmem:[%s5633_s29 + $0x44] sm:$0x1]  ;;  %s224_s9 = scalar_lea.vmem [#allocation6], %s7078_s12 }
  0x27   : > { %v682_v53 = vunpack.c.l.b16 %v397_v49  ;;  %v683_v54 = vunpack.c.l.b16 %v407_v50  ;;  %v488_v55 = vrot.slane %v487_v44, 4  ;;  %v588_v58 = vrot.slane %v586_v48, 5  ;;  %v254_v33 = vld [vmem:[%s5633_s29 + $0x6c] sm:$0xf]  ;;  %v278_v47 = vld [vmem:[%s5633_s29 + $0x74] sm:$0x1] }
  0x28   : > { %v498_v57 = vrot.slane %v497_v51, 4  ;;  %v592_v59 = vrot.slane %v590_v52, 4  ;;  %v596_v60 = vshll.u32 %v281_v45, 16  ;;  %v583_v0 = vor.u32 %v582_v56, %v579_v46  ;;  %s7098_s21 = sshll.u32 %s224_s9, 4  ;;  %s7100_s10 = sshll.u32 %s4443_s5, 4  ;;  %s4446_s21 = int_to_ptr.vmem [resolvable:$true] %s7098_s21  ;;  %s4448_s10 = int_to_ptr.hbm [resolvable:$true] %s7100_s10 }
  0x29   : > { %v710_v62 = vpack.c.b16 %v683_v54, %v682_v53  ;;  %v493_v63 = vsel %vm5645_vm3, %v488_v55, %v492_v38  ;;  %v289_v9 = vshrl.u32 %v236_v61, 16  ;;  %v292_v10 = vshll.u32 %v236_v61, 16  ;;  %v262_v61 = vld [vmem:[%s5633_s29 + $0x9c] sm:$0xf]  ;;  %s4399_s11 = scalar_lea.sflag [#allocation5], %s7086_s26  ;;  %s5398_s13 = sshra.s32 %s4434_s8, 4  ;;  %s5399_s13 = int_to_ptr.hbm [resolvable:$true] %s5398_s13 }
  0x2a   : > { %v503_v3 = vsel %vm5645_vm3, %v498_v57, %v502_v43  ;;  %v690_v4 = vunpack.c.l.b16 %v493_v63  ;;  %v593_v5 = vor.u32 %v592_v59, %v588_v58  ;;  %v598_v6 = vrot.slane %v596_v60, 5  ;;  %v255_v43 = vld [vmem:[%s5633_s29 + $0x70] sm:$0xf]  ;;  %s5400_s14 = scalar_lea.hbm %s5399_s13, 1  ;;  %s5404_s30 = scalar_lea.hbm %s7178_s3, 2 }
  0x2b   : > { %4595 = vmatmul.msk.bf16.vlgmr.msra.gmra.mxu1 %vm722_vm4, %v710_v62  ;;  %v691_v7 = vunpack.c.l.b16 %v503_v3  ;;  %v584_v8 = vrot.slane %v583_v0, 4  ;;  %v298_v12 = vshll.u32 %v5658_v1, 16  ;;  %v302_v13 = vshrl.u32 %v5658_v1, 16  ;;  %v263_v3 = vld [vmem:[%s5633_s29 + $0xa0] sm:$0xf]  ;;  %p5401_p12 = scmp.ne.s32.totalorder %s5399_s13, %s5400_s14  ;;  %p5405_p1 = scmp.lt.s32.totalorder %s5399_s13, %s7178_s3 }
  0x2c   : > { %v594_v11 = vrot.slane %v593_v5, 4  ;;  %v308_v14 = vshll.u32 %v5661_v2, 16  ;;  %v291_v17 = vrot.slane %v289_v9, 4  ;;  %v294_v18 = vrot.slane %v292_v10, 5  ;;  %p5406_p2 = scmp.lt.s32.totalorder %s5404_s30, %s5400_s14 }
  0x2d   : > { %v714_v15 = vpack.c.b16 %v691_v7, %v690_v4  ;;  %v589_v16 = vsel %vm5645_vm3, %v584_v8, %v588_v58  ;;  %v300_v23 = vrot.slane %v298_v12, 5  ;;  %v304_v24 = vrot.slane %v302_v13, 4  ;;  %v282_v8 = vld [vmem:[%s5633_s29 + $0xa4] sm:$0x1]  ;;  %p5402_p13 = pnand %p5401_p12, %p5591_p4 }
  0x2e   : > { %v599_v21 = vsel %vm5645_vm3, %v594_v11, %v598_v6  ;;  %v698_v22 = vunpack.c.l.b16 %v589_v16  ;;  %v295_v27 = vor.u32 %v294_v18, %v291_v17  ;;  %v310_v28 = vrot.slane %v308_v14, 5  ;;  %p5407_p3 = por %p5406_p2, %p5405_p1 }
  0x2f   : > { %4599 = vmatmul.msk.bf16.vlgmr.msra.gmra.mxu2 %vm722_vm4, %v714_v15  ;;  %v699_v26 = vunpack.c.l.b16 %v599_v21  ;;  %v305_v29 = vor.u32 %v304_v24, %v300_v23  ;;  %v409_v30 = vshrl.u32 %v246_v19, 16  ;;  %v412_v31 = vshll.u32 %v246_v19, 16  ;;  %p5403_p0 = pneg %p5402_p13 }
  0x30   : > { %v418_v32 = vshll.u32 %v5673_v20, 16  ;;  %v296_v35 = vrot.slane %v295_v27, 4  ;;  %v422_v37 = vshrl.u32 %v5673_v20, 16  ;;  %v428_v38 = vshll.u32 %v5678_v25, 16 }
  0x31   : > { %v718_v34 = vpack.c.b16 %v699_v26, %v698_v22  ;;  %v306_v39 = vrot.slane %v305_v29, 4  ;;  %v411_v40 = vrot.slane %v409_v30, 4  ;;  %v414_v41 = vrot.slane %v412_v31, 5  ;;  %v238_v22 = vld [vmem:[%s5633_s29 + $0xc] sm:$0xf]  ;;  %p5408_p5 = pnand %p5407_p3, %p5403_p0 }
  0x32   : > { %v420_v42 = vrot.slane %v418_v32, 5  ;;  %v301_v44 = vsel %vm5645_vm3, %v296_v35, %v300_v23  ;;  %v424_v45 = vrot.slane %v422_v37, 4  ;;  %v430_v46 = vrot.slane %v428_v38, 5  ;;  %v5707_v32 = vld [vmem:[%s5633_s29 + $0x14] sm:$0x1] }
  0x33   : > { %4603 = vmatmul.msk.bf16.vlgmr.msra.gmra.mxu3 %vm722_vm4, %v718_v34  ;;  %v505_v48 = vshrl.u32 %v254_v33, 16  ;;  %v311_v49 = vsel %vm5645_vm3, %v306_v39, %v310_v28  ;;  %v674_v50 = vunpack.c.l.b16 %v301_v44  ;;  %v415_v51 = vor.u32 %v414_v41, %v411_v40  ;;  %v5704_v28 = vld [vmem:[%s5633_s29 + $0x10] sm:$0xf] }
  0x34   : > { %v508_v52 = vshll.u32 %v254_v33, 16  ;;  %v675_v53 = vunpack.c.l.b16 %v311_v49  ;;  %v425_v54 = vor.u32 %v424_v45, %v420_v42  ;;  %v514_v56 = vshll.u32 %v255_v43, 16 }
  0x35   : > { %v507_v55 = vrot.slane %v505_v48, 4  ;;  %v416_v57 = vrot.slane %v415_v51, 4  ;;  %v518_v59 = vshrl.u32 %v255_v43, 16  ;;  %v524_v60 = vshll.u32 %v278_v47, 16  ;;  %v5717_v47 = vld [vmem:[%s5633_s29 + $0x4c] sm:$0xf] }
  0x36   : > { %v510_v58 = vrot.slane %v508_v52, 5  ;;  %v706_v62 = vpack.c.b16 %v675_v53, %v674_v50  ;;  %v426_v63 = vrot.slane %v425_v54, 4  ;;  %v516_v0 = vrot.slane %v514_v56, 5  ;;  %v5722_v56 = vld [vmem:[%s5633_s29 + $0x50] sm:$0x1] }
  0x37   : > { %v421_v4 = vsel %vm5645_vm3, %v416_v57, %v420_v42  ;;  %v520_v6 = vrot.slane %v518_v59, 4  ;;  %v526_v7 = vrot.slane %v524_v60, 5  ;;  %v601_v11 = vshrl.u32 %v262_v61, 16  ;;  %v248_v42 = vld [vmem:[%s5633_s29 + $0x48] sm:$0xf] }
  0x38   : > { %v511_v5 = vor.u32 %v510_v58, %v507_v55  ;;  %4591 = vmatmul.msk.bf16.vlgmr.msra.gmra.mxu0 %vm722_vm4, %v706_v62  ;;  %v431_v9 = vsel %vm5645_vm3, %v426_v63, %v430_v46  ;;  %v684_v10 = vunpack.c.l.b16 %v421_v4  ;;  %v604_v12 = vshll.u32 %v262_v61, 16 }
  0x39   : > { %v685_v13 = vunpack.c.l.b16 %v431_v9  ;;  %v521_v15 = vor.u32 %v520_v6, %v516_v0  ;;  %v610_v16 = vshll.u32 %v263_v3, 16  ;;  %v603_v17 = vrot.slane %v601_v11, 4 }
  0x3a   : > { %v512_v14 = vrot.slane %v511_v5, 4  ;;  %v606_v18 = vrot.slane %v604_v12, 5  ;;  %v614_v19 = vshrl.u32 %v263_v3, 16  ;;  %v620_v21 = vshll.u32 %v282_v8, 16  ;;  %v256_v3 = vld [vmem:[%s5633_s29 + $0x78] sm:$0xf] }
  0x3b   : > { %v711_v23 = vpack.c.b16 %v685_v13, %v684_v10  ;;  %v522_v26 = vrot.slane %v521_v15, 4  ;;  %v612_v27 = vrot.slane %v610_v16, 5  ;;  %v313_v35 = vshrl.u32 %v238_v22, 16  ;;  %v257_v8 = vld [vmem:[%s5633_s29 + $0x7c] sm:$0xf] }
  0x3c   : > { %v517_v24 = vsel %vm5645_vm3, %v512_v14, %v516_v0  ;;  %v607_v30 = vor.u32 %v606_v18, %v603_v17  ;;  %v616_v31 = vrot.slane %v614_v19, 4  ;;  %v622_v34 = vrot.slane %v620_v21, 5  ;;  %v279_v16 = vld [vmem:[%s5633_s29 + $0x80] sm:$0x1] }
  0x3d   : > { %v692_v29 = vunpack.c.l.b16 %v517_v24  ;;  %4596 = vmatmul.msk.bf16.gmra.mxu1 %vm722_vm4, %v711_v23  ;;  %v527_v33 = vsel %vm5645_vm3, %v522_v26, %v526_v7  ;;  %v316_v37 = vshll.u32 %v238_v22, 16  ;;  %v322_v41 = vshll.u32 %v5704_v28, 16 }
  0x3e   : > { %v693_v38 = vunpack.c.l.b16 %v527_v33  ;;  %v608_v39 = vrot.slane %v607_v30, 4  ;;  %v617_v40 = vor.u32 %v616_v31, %v612_v27  ;;  %v315_v43 = vrot.slane %v313_v35, 4 }
  0x3f   : > { %v318_v44 = vrot.slane %v316_v37, 5  ;;  %v326_v45 = vshrl.u32 %v5704_v28, 16  ;;  %v332_v46 = vshll.u32 %v5707_v32, 16  ;;  %v324_v51 = vrot.slane %v322_v41, 5 }
  0x40   : > { %v715_v48 = vpack.c.b16 %v693_v38, %v692_v29  ;;  %v613_v49 = vsel %vm5645_vm3, %v608_v39, %v612_v27  ;;  %v618_v50 = vrot.slane %v617_v40, 4  ;;  %v433_v58 = vshrl.u32 %v248_v42, 16  ;;  %v265_v39 = vld [vmem:[%s5633_s29 + $0xac] sm:$0xf]  ;;  %v283_v40 = vld [vmem:[%s5633_s29 + $0xb0] sm:$0x1] }
  0x41   : > { %v700_v52 = vunpack.c.l.b16 %v613_v49  ;;  %v319_v53 = vor.u32 %v318_v44, %v315_v43  ;;  %v328_v54 = vrot.slane %v326_v45, 4  ;;  %v334_v55 = vrot.slane %v332_v46, 5 }
  0x42   : > { %4600 = vmatmul.msk.bf16.gmra.mxu2 %vm722_vm4, %v715_v48  ;;  %v623_v57 = vsel %vm5645_vm3, %v618_v50, %v622_v34  ;;  %v436_v59 = vshll.u32 %v248_v42, 16  ;;  %v442_v60 = vshll.u32 %v5717_v47, 16  ;;  %v446_v0 = vshrl.u32 %v5717_v47, 16  ;;  %v264_v34 = vld [vmem:[%s5633_s29 + $0xa8] sm:$0xf] }
  0x43   : > { %v701_v61 = vunpack.c.l.b16 %v623_v57  ;;  %v320_v62 = vrot.slane %v319_v53, 4  ;;  %v329_v63 = vor.u32 %v328_v54, %v324_v51  ;;  %v435_v4 = vrot.slane %v433_v58, 4 }
  0x44   : > { %v438_v5 = vrot.slane %v436_v59, 5  ;;  %v444_v6 = vrot.slane %v442_v60, 5  ;;  %v452_v7 = vshll.u32 %v5722_v56, 16  ;;  %v448_v12 = vrot.slane %v446_v0, 4  ;;  %v240_v59 = vld [vmem:[%s5633_s29 + $0x18] sm:$0xf] }
  0x45   : > { %v719_v9 = vpack.c.b16 %v701_v61, %v700_v52  ;;  %v325_v10 = vsel %vm5645_vm3, %v320_v62, %v324_v51  ;;  %v330_v11 = vrot.slane %v329_v63, 4  ;;  %v529_v17 = vshrl.u32 %v256_v3, 16  ;;  %v5750_v63 = vld [vmem:[%s5633_s29 + $0x1c] sm:$0xf]  ;;  %v5753_v0 = vld [vmem:[%s5633_s29 + $0x20] sm:$0x1] }
  0x46   : > { %v676_v13 = vunpack.c.l.b16 %v325_v10  ;;  %v439_v14 = vor.u32 %v438_v5, %v435_v4  ;;  %v454_v15 = vrot.slane %v452_v7, 5  ;;  %v449_v19 = vor.u32 %v448_v12, %v444_v6 }
  0x47   : > { %4604 = vmatmul.msk.bf16.gmra.mxu3 %vm722_vm4, %v719_v9  ;;  %v335_v18 = vsel %vm5645_vm3, %v330_v11, %v334_v55  ;;  %v532_v21 = vshll.u32 %v256_v3, 16  ;;  %v538_v22 = vshll.u32 %v257_v8, 16  ;;  %v531_v26 = vrot.slane %v529_v17, 4 }
  0x48   : > { %v677_v23 = vunpack.c.l.b16 %v335_v18  ;;  %v440_v24 = vrot.slane %v439_v14, 4  ;;  %v542_v27 = vshrl.u32 %v257_v8, 16  ;;  %v450_v29 = vrot.slane %v449_v19, 4 }
  0x49   : > { %v534_v30 = vrot.slane %v532_v21, 5  ;;  %v540_v31 = vrot.slane %v538_v22, 5  ;;  %v548_v33 = vshll.u32 %v279_v16, 16  ;;  %v625_v48 = vshrl.u32 %v264_v34, 16  ;;  %v5763_v21 = vld [vmem:[%s5633_s29 + $0x58] sm:$0xf] }
  0x4a   : > { %v707_v35 = vpack.c.b16 %v677_v23, %v676_v13  ;;  %v445_v37 = vsel %vm5645_vm3, %v440_v24, %v444_v6  ;;  %v544_v38 = vrot.slane %v542_v27, 4  ;;  %v455_v41 = vsel %vm5645_vm3, %v450_v29, %v454_v15  ;;  %v250_v15 = vld [vmem:[%s5633_s29 + $0x54] sm:$0xf]  ;;  %v5768_v27 = vld [vmem:[%s5633_s29 + $0x5c] sm:$0x1] }
  0x4b   : > { %v686_v42 = vunpack.c.l.b16 %v445_v37  ;;  %v535_v43 = vor.u32 %v534_v30, %v531_v26  ;;  %v550_v44 = vrot.slane %v548_v33, 5  ;;  %v687_v45 = vunpack.c.l.b16 %v455_v41 }
  0x4c   : > { %4592 = vmatmul.msk.bf16.gmra.mxu0 %vm722_vm4, %v707_v35  ;;  %v545_v46 = vor.u32 %v544_v38, %v540_v31  ;;  %v628_v49 = vshll.u32 %v264_v34, 16  ;;  %v634_v51 = vshll.u32 %v265_v39, 16  ;;  %v638_v52 = vshrl.u32 %v265_v39, 16  ;;  %v258_v39 = vld [vmem:[%s5633_s29 + $0x84] sm:$0xf] }
  0x4d   : > { %v536_v50 = vrot.slane %v535_v43, 4  ;;  %v644_v53 = vshll.u32 %v283_v40, 16  ;;  %v712_v54 = vpack.c.b16 %v687_v45, %v686_v42  ;;  %v627_v57 = vrot.slane %v625_v48, 4 }
  0x4e   : > { %v546_v55 = vrot.slane %v545_v46, 4  ;;  %v630_v58 = vrot.slane %v628_v49, 5  ;;  %v636_v61 = vrot.slane %v634_v51, 5  ;;  %v640_v62 = vrot.slane %v638_v52, 4  ;;  %v259_v49 = vld [vmem:[%s5633_s29 + $0x88] sm:$0xf] }
  0x4f   : > { %v541_v60 = vsel %vm5645_vm3, %v536_v50, %v540_v31  ;;  %4597 = vmatmul.msk.bf16.gmra.mxu1 %vm722_vm4, %v712_v54  ;;  %v646_v6 = vrot.slane %v644_v53, 5  ;;  %v337_v9 = vshrl.u32 %v240_v59, 16  ;;  %v340_v10 = vshll.u32 %v240_v59, 16  ;;  %v280_v53 = vld [vmem:[%s5633_s29 + $0x8c] sm:$0x1] }
  0x50   : > { %v551_v3 = vsel %vm5645_vm3, %v546_v55, %v550_v44  ;;  %v694_v4 = vunpack.c.l.b16 %v541_v60  ;;  %v631_v5 = vor.u32 %v630_v58, %v627_v57  ;;  %v641_v8 = vor.u32 %v640_v62, %v636_v61 }
  0x51   : > { %v695_v7 = vunpack.c.l.b16 %v551_v3  ;;  %v346_v12 = vshll.u32 %v5750_v63, 16  ;;  %v350_v13 = vshrl.u32 %v5750_v63, 16  ;;  %v356_v14 = vshll.u32 %v5753_v0, 16 }
  0x52   : > { %v632_v11 = vrot.slane %v631_v5, 4  ;;  %v642_v17 = vrot.slane %v641_v8, 4  ;;  %v339_v18 = vrot.slane %v337_v9, 4  ;;  %v342_v19 = vrot.slane %v340_v10, 5  ;;  %v266_v8 = vld [vmem:[%s5633_s29 + $0xb4] sm:$0xf] }
  0x53   : > { %v716_v16 = vpack.c.b16 %v695_v7, %v694_v4  ;;  %v348_v23 = vrot.slane %v346_v12, 5  ;;  %v352_v24 = vrot.slane %v350_v13, 4  ;;  %v358_v26 = vrot.slane %v356_v14, 5  ;;  %v267_v12 = vld [vmem:[%s5633_s29 + $0xb8] sm:$0xf] }
  0x54   : > { %v637_v22 = vsel %vm5645_vm3, %v632_v11, %v636_v61  ;;  %v647_v29 = vsel %vm5645_vm3, %v642_v17, %v646_v6  ;;  %v343_v31 = vor.u32 %v342_v19, %v339_v18  ;;  %v457_v33 = vshrl.u32 %v250_v15, 16  ;;  %v284_v17 = vld [vmem:[%s5633_s29 + $0xbc] sm:$0x1] }
  0x55   : > { %4601 = vmatmul.msk.bf16.gmra.mxu2 %vm722_vm4, %v716_v16  ;;  %v702_v30 = vunpack.c.l.b16 %v637_v22  ;;  %v703_v34 = vunpack.c.l.b16 %v647_v29  ;;  %v353_v35 = vor.u32 %v352_v24, %v348_v23  ;;  %v460_v37 = vshll.u32 %v250_v15, 16 }
  0x56   : > { %v466_v38 = vshll.u32 %v5763_v21, 16  ;;  %v344_v40 = vrot.slane %v343_v31, 4  ;;  %v459_v41 = vrot.slane %v457_v33, 4  ;;  %v470_v42 = vshrl.u32 %v5763_v21, 16 }
  0x57   : > { %v476_v43 = vshll.u32 %v5768_v27, 16  ;;  %v720_v44 = vpack.c.b16 %v703_v34, %v702_v30  ;;  %v354_v45 = vrot.slane %v353_v35, 4  ;;  %v462_v46 = vrot.slane %v460_v37, 5  ;;  %v242_v37 = vld [vmem:[%s5633_s29 + $0x24] sm:$0xf] }
  0x58   : > { %v468_v48 = vrot.slane %v466_v38, 5  ;;  %v349_v50 = vsel %vm5645_vm3, %v344_v40, %v348_v23  ;;  %v472_v51 = vrot.slane %v470_v42, 4  ;;  %v553_v54 = vshrl.u32 %v258_v39, 16  ;;  %v5796_v42 = vld [vmem:[%s5633_s29 + $0x28] sm:$0xf] }
  0x59   : > { %v478_v52 = vrot.slane %v476_v43, 5  ;;  %4605 = vmatmul.msk.bf16.gmra.mxu3 %vm722_vm4, %v720_v44  ;;  %v359_v55 = vsel %vm5645_vm3, %v354_v45, %v358_v26  ;;  %v678_v57 = vunpack.c.l.b16 %v349_v50  ;;  %v463_v58 = vor.u32 %v462_v46, %v459_v41 }
  0x5a   : > { %v556_v59 = vshll.u32 %v258_v39, 16  ;;  %v679_v60 = vunpack.c.l.b16 %v359_v55  ;;  %v473_v61 = vor.u32 %v472_v51, %v468_v48  ;;  %v555_v62 = vrot.slane %v553_v54, 4 }
  0x5b   : > { %v562_v3 = vshll.u32 %v259_v49, 16  ;;  %v464_v4 = vrot.slane %v463_v58, 4  ;;  %v566_v6 = vshrl.u32 %v259_v49, 16  ;;  %v572_v7 = vshll.u32 %v280_v53, 16 }
  0x5c   : > { %v558_v5 = vrot.slane %v556_v59, 5  ;;  %v708_v9 = vpack.c.b16 %v679_v60, %v678_v57  ;;  %v474_v10 = vrot.slane %v473_v61, 4  ;;  %v649_v22 = vshrl.u32 %v266_v8, 16  ;;  %v1084_v61 = vld [vmem:[%s5633_s29] sm:$0xe] }
  0x5d   : > { %v564_v11 = vrot.slane %v562_v3, 5  ;;  %v469_v13 = vsel %vm5645_vm3, %v464_v4, %v468_v48  ;;  %v568_v15 = vrot.slane %v566_v6, 4  ;;  %v574_v16 = vrot.slane %v572_v7, 5  ;;  %v5800_v48 = vld [vmem:[%s5633_s29 + $0x2c] sm:$0x1] }
  0x5e   : > { %v559_v14 = vor.u32 %v558_v5, %v555_v62  ;;  %4593 = vmatmul.msk.bf16.gmra.mxu0 %vm722_vm4, %v708_v9  ;;  %v479_v18 = vsel %vm5645_vm3, %v474_v10, %v478_v52  ;;  %v688_v19 = vunpack.c.l.b16 %v469_v13  ;;  %v652_v23 = vshll.u32 %v266_v8, 16  ;;  %v4833_v6 = vld [vmem:[%s5633_s29 + $0xc] sm:$0xf] }
  0x5f   : > { %v689_v24 = vunpack.c.l.b16 %v479_v18  ;;  %v569_v29 = vor.u32 %v568_v15, %v564_v11  ;;  %v658_v30 = vshll.u32 %v267_v12, 16  ;;  %v651_v31 = vrot.slane %v649_v22, 4 }
  0x60   : > { %v560_v26 = vrot.slane %v559_v14, 4  ;;  %v654_v33 = vrot.slane %v652_v23, 5  ;;  %v662_v34 = vshrl.u32 %v267_v12, 16  ;;  %v668_v35 = vshll.u32 %v284_v17, 16  ;;  %v4834_v12 = vld [vmem:[%s5633_s29 + $0x10] sm:$0xf] }
  0x61   : > { %v713_v38 = vpack.c.b16 %v689_v24, %v688_v19  ;;  %v570_v40 = vrot.slane %v569_v29, 4  ;;  %v660_v41 = vrot.slane %v658_v30, 5  ;;  %v1140_v43 = vrot.slane %v5661_v2, 5 }
  0x62   : > { %v565_v39 = vsel %vm5645_vm3, %v560_v26, %v564_v11  ;;  %v655_v45 = vor.u32 %v654_v33, %v651_v31  ;;  %v664_v46 = vrot.slane %v662_v34, 4  ;;  %v670_v50 = vrot.slane %v668_v35, 5  ;;  %v4979_v11 = vld [vmem:[%s7176_s1 + $0xc] sm:$0x3] }
  0x63   : > { %v696_v44 = vunpack.c.l.b16 %v565_v39  ;;  %4598 = vmatmul.msk.bf16.gmra.mxu1 %vm722_vm4, %v713_v38  ;;  %v575_v49 = vsel %vm5645_vm3, %v570_v40, %v574_v16  ;;  %v361_v51 = vshrl.u32 %v242_v37, 16  ;;  %v364_v52 = vshll.u32 %v242_v37, 16  ;;  %v4835_v38 = vld [vmem:[%s5633_s29 + $0x14] sm:$0x1] }
  0x64   : > { %v697_v53 = vunpack.c.l.b16 %v575_v49  ;;  %v656_v54 = vrot.slane %v655_v45, 4  ;;  %v665_v55 = vor.u32 %v664_v46, %v660_v41  ;;  %v370_v2 = vshll.u32 %v5796_v42, 16  ;;  %v5108_v45 = vld [vmem:[%s7176_s1 + $0xe] sm:$0x3] }
  0x65   : > { %v363_v57 = vrot.slane %v361_v51, 4  ;;  %v366_v58 = vrot.slane %v364_v52, 5  ;;  %v374_v59 = vshrl.u32 %v5796_v42, 16  ;;  %v380_v60 = vshll.u32 %v5800_v48, 16  ;;  %v5179_v51 = vld [vmem:[%s5633_s29] sm:$0xff] }
  0x66   : > { %v717_v62 = vpack.c.b16 %v697_v53, %v696_v44  ;;  %v661_v3 = vsel %vm5645_vm3, %v656_v54, %v660_v41  ;;  %v666_v4 = vrot.slane %v665_v55, 4  ;;  %v372_v5 = vrot.slane %v370_v2, 5  ;;  %v5157_v2 = vld [vmem:[%s7176_s1 + $0x10] sm:$0x3] }
  0x67   : > { %v704_v7 = vunpack.c.l.b16 %v661_v3  ;;  %v367_v8 = vor.u32 %v366_v58, %v363_v57  ;;  %v376_v9 = vrot.slane %v374_v59, 4  ;;  %v382_v10 = vrot.slane %v380_v60, 5 }
  0x68   : > { %4602 = vmatmul.msk.bf16.gmra.mxu2 %vm722_vm4, %v717_v62  ;;  %v671_v13 = vsel %vm5645_vm3, %v666_v4, %v670_v50  ;;  %v4687_v14 = vrot.slane %v1084_v61, 9  ;;  %v1137_v19 = vrot.slane %v5658_v1, 5  ;;  %v2978_v22 = vsel %vm771_vm0, %v4979_v11, 0  ;;  %v4930_v50 = vld [vmem:[%s7176_s1 + $0xa] sm:$0x3] }
  0x69   : > { %v705_v15 = vunpack.c.l.b16 %v671_v13  ;;  %v368_v16 = vrot.slane %v367_v8, 4  ;;  %v377_v17 = vor.u32 %v376_v9, %v372_v5  ;;  %v1808_v23 = vshrl.u32 %v4833_v6, 16  ;;  %2987 = vmatpush.bf16.msra.mxu2 %v2978_v22  ;;  %v1085_v8 = vld [vmem:[%s5633_s29 + $0xc] sm:$0xe] }
  0x6a   : > { %v1811_v24 = vshll.u32 %v4833_v6, 16  ;;  %v1817_v26 = vshll.u32 %v4834_v12, 16  ;;  %v1138_v33 = vsel %vm5819_vm7, %v4687_v14, %v1137_v19  ;;  %v1139_v35 = vrot.slane %v1137_v19, 4  ;;  %v4837_v6 = vld [vmem:[%s5633_s29 + $0x1c] sm:$0xf] }
  0x6b   : > { %v721_v29 = vpack.c.b16 %v705_v15, %v704_v7  ;;  %v373_v30 = vsel %vm5645_vm3, %v368_v16, %v372_v5  ;;  %v378_v31 = vrot.slane %v377_v17, 4  ;;  %v1249_v37 = vunpack.c.l.b16 %v1138_v33  ;;  %v4836_v5 = vld [vmem:[%s5633_s29 + $0x18] sm:$0xf]  ;;  %v5195_v15 = vld [vmem:[%s5633_s29 + $0xc] sm:$0xff] }
  0x6c   : > { %v680_v34 = vunpack.c.l.b16 %v373_v30  ;;  %v1810_v1 = vrot.slane %v1808_v23, 4  ;;  %v1813_v40 = vrot.slane %v1811_v24, 5  ;;  %v1819_v41 = vrot.slane %v1817_v26, 5  ;;  %v4838_v30 = vld [vmem:[%s5633_s29 + $0x20] sm:$0x1] }
  0x6d   : > { %4606 = vmatmul.msk.bf16.gmra.mxu3 %vm722_vm4, %v721_v29  ;;  %v383_v39 = vsel %vm5645_vm3, %v378_v31, %v382_v10  ;;  %v1821_v44 = vshrl.u32 %v4834_v12, 16  ;;  %v1141_v49 = vsel %vm5819_vm7, %v1139_v35, %v1140_v43  ;;  %v1827_v55 = vshll.u32 %v4835_v38, 16  ;;  %v5180_v35 = vld [vmem:[%s5633_s29 + $0xc] sm:$0xff] }
  0x6e   : > { %v681_v46 = vunpack.c.l.b16 %v383_v39  ;;  %v1250_v52 = vunpack.c.l.b16 %v1141_v49  ;;  %v1814_v53 = vor.u32 %v1813_v40, %v1810_v1  ;;  %v3632_v58 = vsel %vm771_vm0, %v5108_v45, 0 }
  0x6f   : > { %v1823_v54 = vrot.slane %v1821_v44, 4  ;;  %3641 = vmatpush.bf16.msra.mxu3 %v3632_v58  ;;  %v2688_v60 = vsel %vm771_vm0, %v4930_v50, 0  ;;  %v4030_v61 = vsel %vm771_vm0, %v5157_v2, 0  ;;  %v1829_v4 = vrot.slane %v1827_v55, 5  ;;  %v1086_v50 = vld [vmem:[%s5633_s29 + $0x18] sm:$0xe] }
  0x70   : > { %v709_v57 = vpack.c.b16 %v681_v46, %v680_v34  ;;  %v1281_v43 = vpack.c.b16 %v1250_v52, %v1249_v37  ;;  %2697 = vmatpush.bf16.msra.mxu1 %v2688_v60  ;;  %v1815_v62 = vrot.slane %v1814_v53, 4  ;;  %4039 = vmatpush.bf16.msra.mxu0 %v4030_v61  ;;  %v1144_v7 = vrot.slane %v5704_v28, 5  ;;  %v4840_v46 = vld [vmem:[%s5633_s29 + $0x28] sm:$0xf] }
  0x71   : > { %v1824_v59 = vor.u32 %v1823_v54, %v1819_v41  ;;  %v1832_v9 = vshrl.u32 %v4836_v5, 16  ;;  %v1835_v10 = vshll.u32 %v4836_v5, 16  ;;  %v1841_v13 = vshll.u32 %v4837_v6, 16 }
  0x72   : > { %4594 = vmatmul.msk.bf16.gmra.mxu0 %vm722_vm4, %v709_v57  ;;  %v1820_v11 = vsel %vm5645_vm3, %v1815_v62, %v1819_v41  ;;  %v1845_v14 = vshrl.u32 %v4837_v6, 16  ;;  %v4688_v16 = vrot.slane %v1085_v8, 9  ;;  %v1146_v17 = vrot.slane %v1144_v7, 4  ;;  %v4839_v41 = vld [vmem:[%s5633_s29 + $0x24] sm:$0xf] }
  0x73   : > { %4671 = vmatmul.msk.bf16.vlgmr.msrb.gmra.mxu1 %vm722_vm4, %v5179_v51  ;;  %v1825_v3 = vrot.slane %v1824_v59, 4  ;;  %v1147_v28 = vrot.slane %v5707_v32, 5  ;;  %v2193_v19 = vunpack.c.l.b16 %v1820_v11  ;;  %v1834_v23 = vrot.slane %v1832_v9, 4  ;;  %v4841_v6 = vld [vmem:[%s5633_s29 + $0x2c] sm:$0x1] }
  0x74   : > { %v1837_v24 = vrot.slane %v1835_v10, 5  ;;  %v1843_v26 = vrot.slane %v1841_v13, 5  ;;  %v1847_v29 = vrot.slane %v1845_v14, 4  ;;  %v1145_v31 = vsel %vm5819_vm7, %v4688_v16, %v1144_v7 }
  0x75   : > { %v1830_v12 = vsel %vm5645_vm3, %v1825_v3, %v1829_v4  ;;  %v1148_v33 = vsel %vm5819_vm7, %v1146_v17, %v1147_v28  ;;  %v1851_v38 = vshll.u32 %v4838_v30, 16  ;;  %v1251_v1 = vunpack.c.l.b16 %v1145_v31 }
  0x76   : > { %v2194_v22 = vunpack.c.l.b16 %v1830_v12  ;;  %v1838_v32 = vor.u32 %v1837_v24, %v1834_v23  ;;  %v1848_v37 = vor.u32 %v1847_v29, %v1843_v26  ;;  %v1252_v39 = vunpack.c.l.b16 %v1148_v33  ;;  %v5181_v12 = vld [vmem:[%s5633_s29 + $0x18] sm:$0xff]  ;;  %v1087_v29 = vld [vmem:[%s5633_s29 + $0x24] sm:$0xe] }
  0x77   : > { %v1853_v45 = vrot.slane %v1851_v38, 5  ;;  %v1151_v51 = vrot.slane %v5750_v63, 5  ;;  %v1856_v52 = vshrl.u32 %v4839_v41, 16  ;;  %v1859_v54 = vshll.u32 %v4839_v41, 16 }
  0x78   : > { %4704 = vmatmul.msk.bf16.vlgmr.msrb.gmra.mxu2 %vm722_vm4, %v1281_v43  ;;  %v2225_v34 = vpack.c.b16 %v2194_v22, %v2193_v19  ;;  %v1839_v40 = vrot.slane %v1838_v32, 4  ;;  %v1849_v44 = vrot.slane %v1848_v37, 4  ;;  %v1282_v49 = vpack.c.b16 %v1252_v39, %v1251_v1  ;;  %v5196_v43 = vld [vmem:[%s5633_s29 + $0x18] sm:$0xff]  ;;  %v4842_v19 = vld [vmem:[%s5633_s29 + $0x30] sm:$0xf]  ;;  %v5197_v32 = vld [vmem:[%s5633_s29 + $0x24] sm:$0xff] }
  0x79   : > { %v1865_v55 = vshll.u32 %v4840_v46, 16  ;;  %v1869_v2 = vshrl.u32 %v4840_v46, 16  ;;  %v4689_v58 = vrot.slane %v1086_v50, 9  ;;  %v1153_v60 = vrot.slane %v1151_v51, 4  ;;  %v4843_v22 = vld [vmem:[%s5633_s29 + $0x34] sm:$0xf] }
  0x7a   : > { %v1844_v53 = vsel %vm5645_vm3, %v1839_v40, %v1843_v26  ;;  %v1854_v57 = vsel %vm5645_vm3, %v1849_v44, %v1853_v45  ;;  %v1154_v63 = vrot.slane %v5753_v0, 5  ;;  %v1858_v61 = vrot.slane %v1856_v52, 4  ;;  %v4844_v45 = vld [vmem:[%s5633_s29 + $0x38] sm:$0x1] }
  0x7b   : > { %v2195_v59 = vunpack.c.l.b16 %v1844_v53  ;;  %v2196_v62 = vunpack.c.l.b16 %v1854_v57  ;;  %v1861_v3 = vrot.slane %v1859_v54, 5  ;;  %v1867_v4 = vrot.slane %v1865_v55, 5  ;;  %v4846_v57 = vld [vmem:[%s5633_s29 + $0x40] sm:$0xf] }
  0x7c   : > { %v1871_v5 = vrot.slane %v1869_v2, 4  ;;  %v1152_v7 = vsel %vm5819_vm7, %v4689_v58, %v1151_v51  ;;  %v1155_v8 = vsel %vm5819_vm7, %v1153_v60, %v1154_v63  ;;  %v1875_v0 = vshll.u32 %v4841_v6, 16  ;;  %v4845_v2 = vld [vmem:[%s5633_s29 + $0x3c] sm:$0xf]  ;;  %v5334_v63 = vld [vmem:[%s5633_s29 + $0x34] sm:$0xf] }
  0x7d   : > { %4817 = vmatmul.msk.bf16.vlgmr.msrb.gmra.mxu3 %vm722_vm4, %v5195_v15  ;;  %v2226_v9 = vpack.c.b16 %v2196_v62, %v2195_v59  ;;  %v1862_v10 = vor.u32 %v1861_v3, %v1858_v61  ;;  %v1253_v13 = vunpack.c.l.b16 %v1152_v7  ;;  %v1254_v14 = vunpack.c.l.b16 %v1155_v8  ;;  %v1088_v62 = vld [vmem:[%s5633_s29 + $0x30] sm:$0xe] }
  0x7e   : > { %v1872_v11 = vor.u32 %v1871_v5, %v1867_v4  ;;  %v1877_v17 = vrot.slane %v1875_v0, 5  ;;  %v1158_v23 = vrot.slane %v5796_v42, 5  ;;  %v1880_v30 = vshrl.u32 %v4842_v19, 16  ;;  %v5335_v0 = vld [vmem:[%s5633_s29 + $0x38] sm:$0x1] }
  0x7f   : > { %v1863_v15 = vrot.slane %v1862_v10, 4  ;;  %v1283_v28 = vpack.c.b16 %v1254_v14, %v1253_v13  ;;  %v1883_v31 = vshll.u32 %v4842_v19, 16  ;;  %v1889_v33 = vshll.u32 %v4843_v22, 16  ;;  %v5198_v13 = vld [vmem:[%s5633_s29 + $0x30] sm:$0xff] }
  0x80   : > { %v1873_v16 = vrot.slane %v1872_v11, 4  ;;  %v1160_v37 = vrot.slane %v1158_v23, 4  ;;  %v1161_v42 = vrot.slane %v5800_v48, 5  ;;  %v1882_v39 = vrot.slane %v1880_v30, 4  ;;  %v5182_v48 = vld [vmem:[%s5633_s29 + $0x24] sm:$0xff] }
  0x81   : > { %v1868_v24 = vsel %vm5645_vm3, %v1863_v15, %v1867_v4  ;;  %v1885_v40 = vrot.slane %v1883_v31, 5  ;;  %v1891_v41 = vrot.slane %v1889_v33, 5  ;;  %v1899_v53 = vshll.u32 %v4844_v45, 16  ;;  %v5183_v33 = vld [vmem:[%s5633_s29 + $0x30] sm:$0xff] }
  0x82   : > { %4882 = vmatmul.msk.bf16.vlgmr.msrb.gmra.mxu0 %vm722_vm4, %v2225_v34  ;;  %v1878_v26 = vsel %vm5645_vm3, %v1873_v16, %v1877_v17  ;;  %v1893_v34 = vshrl.u32 %v4843_v22, 16  ;;  %v2197_v38 = vunpack.c.l.b16 %v1868_v24  ;;  %v1165_v61 = vrot.slane %v5334_v63, 5  ;;  %v4847_v22 = vld [vmem:[%s5633_s29 + $0x44] sm:$0x1] }
  0x83   : > { %4672 = vmatmul.msk.bf16.gmra.mxu1 %vm722_vm4, %v5180_v35  ;;  %v4690_v35 = vrot.slane %v1087_v29, 9  ;;  %v2198_v1 = vunpack.c.l.b16 %v1878_v26  ;;  %v1886_v51 = vor.u32 %v1885_v40, %v1882_v39  ;;  %v1901_v59 = vrot.slane %v1899_v53, 5  ;;  %v4848_v39 = vld [vmem:[%s5633_s29 + $0x48] sm:$0xf]  ;;  %v4849_v40 = vld [vmem:[%s5633_s29 + $0x4c] sm:$0xf] }
  0x84   : > { %v1895_v44 = vrot.slane %v1893_v34, 4  ;;  %v1904_v3 = vshrl.u32 %v4845_v2, 16  ;;  %v1907_v4 = vshll.u32 %v4845_v2, 16  ;;  %v1913_v5 = vshll.u32 %v4846_v57, 16  ;;  %v5199_v2 = vld [vmem:[%s5633_s29 + $0x3c] sm:$0xff] }
  0x85   : > { %v1159_v46 = vsel %vm5819_vm7, %v4690_v35, %v1158_v23  ;;  %v2227_v50 = vpack.c.b16 %v2198_v1, %v2197_v38  ;;  %v1887_v58 = vrot.slane %v1886_v51, 4  ;;  %v1917_v6 = vshrl.u32 %v4846_v57, 16 }
  0x86   : > { %v1896_v52 = vor.u32 %v1895_v44, %v1891_v41  ;;  %v1255_v54 = vunpack.c.l.b16 %v1159_v46  ;;  %v4691_v10 = vrot.slane %v1088_v62, 9  ;;  %v1167_v11 = vrot.slane %v1165_v61, 4 }
  0x87   : > { %v1892_v8 = vsel %vm5645_vm3, %v1887_v58, %v1891_v41  ;;  %v1906_v14 = vrot.slane %v1904_v3, 4  ;;  %v1909_v15 = vrot.slane %v1907_v4, 5  ;;  %v1915_v16 = vrot.slane %v1913_v5, 5  ;;  %v4850_v4 = vld [vmem:[%s5633_s29 + $0x50] sm:$0x1] }
  0x88   : > { %4705 = vmatmul.msk.bf16.gmra.mxu2 %vm722_vm4, %v1282_v49  ;;  %v1162_v49 = vsel %vm5819_vm7, %v1160_v37, %v1161_v42  ;;  %v1919_v17 = vrot.slane %v1917_v6, 4  ;;  %v1166_v23 = vsel %vm5819_vm7, %v4691_v10, %v1165_v61  ;;  %v1923_v30 = vshll.u32 %v4847_v22, 16 }
  0x89   : > { %v1256_v55 = vunpack.c.l.b16 %v1162_v49  ;;  %v1910_v26 = vor.u32 %v1909_v15, %v1906_v14  ;;  %v1928_v51 = vshrl.u32 %v4848_v39, 16  ;;  %v1937_v53 = vshll.u32 %v4849_v40, 16 }
  0x8a   : > { %v1920_v29 = vor.u32 %v1919_v17, %v1915_v16  ;;  %v1925_v1 = vrot.slane %v1923_v30, 5 }
  0x8b   : > { %v1284_v60 = vpack.c.b16 %v1256_v55, %v1255_v54  ;;  %v1911_v42 = vrot.slane %v1910_v26, 4  ;;  %v1941_v54 = vshrl.u32 %v4849_v40, 16  ;;  %v1939_v62 = vrot.slane %v1937_v53, 5 }
  0x8c   : > { %v1921_v38 = vrot.slane %v1920_v29, 4  ;;  %v1179_v26 = vrot.slane %v5717_v47, 5 }
  0x8d   : > { %4818 = vmatmul.msk.bf16.gmra.mxu3 %vm722_vm4, %v5196_v43  ;;  %v1897_v43 = vrot.slane %v1896_v52, 4  ;;  %v1916_v45 = vsel %vm5645_vm3, %v1911_v42, %v1915_v16  ;;  %v1931_v52 = vshll.u32 %v4848_v39, 16  ;;  %v1943_v3 = vrot.slane %v1941_v54, 4  ;;  %v4853_v54 = vld [vmem:[%s5633_s29 + $0x5c] sm:$0x1] }
  0x8e   : > { %v1926_v46 = vsel %vm5645_vm3, %v1921_v38, %v1925_v1  ;;  %v2201_v55 = vunpack.c.l.b16 %v1916_v45  ;;  %v5200_v1 = vld [vmem:[%s5633_s29 + $0x48] sm:$0xff]  ;;  %v1181_v40 = vrot.slane %v1179_v26, 4 }
  0x8f   : > { %v2202_v57 = vunpack.c.l.b16 %v1926_v46  ;;  %v1933_v61 = vrot.slane %v1931_v52, 5  ;;  %v1944_v10 = vor.u32 %v1943_v3, %v1939_v62 }
  0x91   : > { %v1945_v16 = vrot.slane %v1944_v10, 4 }
  0x92   : > { %4883 = vmatmul.msk.bf16.gmra.mxu0 %vm722_vm4, %v2226_v9  ;;  %v1902_v9 = vsel %vm5645_vm3, %v1897_v43, %v1901_v59 }
  0x93   : > { %4673 = vmatmul.msk.bf16.gmra.mxu1 %vm722_vm4, %v5181_v12  ;;  %v1168_v12 = vrot.slane %v5335_v0, 5  ;;  %v2200_v19 = vunpack.c.l.b16 %v1902_v9 }
  0x95   : > { %v1169_v24 = vsel %vm5819_vm7, %v1167_v11, %v1168_v12  ;;  %v1947_v11 = vshll.u32 %v4850_v4, 16  ;;  %v5184_v12 = vld [vmem:[%s5633_s29 + $0x3c] sm:$0xff] }
  0x96   : > { %v1258_v35 = vunpack.c.l.b16 %v1169_v24  ;;  %v4852_v24 = vld [vmem:[%s5633_s29 + $0x58] sm:$0xf]  ;;  %v4854_v4 = vld [vmem:[%s5633_s29 + $0x60] sm:$0xf] }
  0x97   : > { %v1949_v17 = vrot.slane %v1947_v11, 5  ;;  %v1965_v42 = vshrl.u32 %v4852_v24, 16 }
  0x98   : > { %4706 = vmatmul.msk.bf16.gmra.mxu2 %vm722_vm4, %v1283_v28  ;;  %v2199_v28 = vunpack.c.l.b16 %v1892_v8  ;;  %v2229_v8 = vpack.c.b16 %v2202_v57, %v2201_v55 }
  0x99   : > { %v1950_v30 = vsel %vm5645_vm3, %v1945_v16, %v1949_v17  ;;  %v1967_v52 = vrot.slane %v1965_v42, 4 }
  0x9a   : > { %v2228_v31 = vpack.c.b16 %v2200_v19, %v2199_v28  ;;  %v2204_v46 = vunpack.c.l.b16 %v1950_v30 }
  0x9d   : > { %4819 = vmatmul.msk.bf16.gmra.mxu3 %vm722_vm4, %v5197_v32  ;;  %v1257_v32 = vunpack.c.l.b16 %v1166_v23  ;;  %v4851_v23 = vld [vmem:[%s5633_s29 + $0x54] sm:$0xf] }
  0x9f   : > { %v1285_v44 = vpack.c.b16 %v1258_v35, %v1257_v32  ;;  %v1955_v32 = vshll.u32 %v4851_v23, 16  ;;  %v1961_v35 = vshll.u32 %v4852_v24, 16 }
  0xa2   : > { %4884 = vmatmul.msk.bf16.gmra.mxu0 %vm722_vm4, %v2227_v50  ;;  %v1172_v50 = vrot.slane %v5673_v20, 5  ;;  %v1930_v20 = vrot.slane %v1928_v51, 4  ;;  %v1963_v51 = vrot.slane %v1961_v35, 5  ;;  %v1189_v35 = vrot.slane %v5768_v27, 5 }
  0xa3   : > { %4674 = vmatmul.msk.bf16.gmra.mxu1 %vm722_vm4, %v5182_v48  ;;  %v1089_v48 = vld [vmem:[%s5633_s29 + $0x3c] sm:$0xe] }
  0xa4   : > { %v4692_v43 = vrot.slane %v1089_v48, 9  ;;  %v1174_v59 = vrot.slane %v1172_v50, 4  ;;  %v1957_v48 = vrot.slane %v1955_v32, 5 }
  0xa6   : > { %v1173_v5 = vsel %vm5819_vm7, %v4692_v43, %v1172_v50  ;;  %v5185_v43 = vld [vmem:[%s5633_s29 + $0x48] sm:$0xff] }
  0xa8   : > { %v5914_v7 = vpop.f32.mrf.mxu1  ;;  %4707 = vmatmul.msk.bf16.gmra.mxu2 %vm722_vm4, %v1284_v60  ;;  %v1175_v60 = vrot.slane %v5678_v25, 5  ;;  %v1934_v25 = vor.u32 %v1933_v61, %v1930_v20  ;;  %v1971_v20 = vshll.u32 %v4853_v54, 16  ;;  %v5186_v54 = vld [vmem:[%s5633_s29 + $0x54] sm:$0xff] }
  0xaa   : > { %v1176_v6 = vsel %vm5819_vm7, %v1174_v59, %v1175_v60  ;;  %v1935_v15 = vrot.slane %v1934_v25, 4  ;;  %v1968_v60 = vor.u32 %v1967_v52, %v1963_v51  ;;  %v1973_v10 = vrot.slane %v1971_v20, 5 }
  0xab   : > { %v1260_v14 = vunpack.c.l.b16 %v1176_v6 }
  0xac   : > { %v1940_v29 = vsel %vm5645_vm3, %v1935_v15, %v1939_v62  ;;  %v1969_v25 = vrot.slane %v1968_v60, 4  ;;  %v1186_v15 = vrot.slane %v5763_v21, 5 }
  0xad   : > { %4820 = vmatmul.msk.bf16.gmra.mxu3 %vm722_vm4, %v5198_v13  ;;  %v1259_v13 = vunpack.c.l.b16 %v1173_v5  ;;  %v2203_v45 = vunpack.c.l.b16 %v1940_v29  ;;  %v4855_v5 = vld [vmem:[%s5633_s29 + $0x64] sm:$0xf] }
  0xae   : > { %v1989_v16 = vshrl.u32 %v4855_v5, 16  ;;  %v1974_v24 = vsel %vm5645_vm3, %v1969_v25, %v1973_v10  ;;  %v1188_v32 = vrot.slane %v1186_v15, 4  ;;  %v5336_v10 = vld [vmem:[%s5633_s29 + $0x64] sm:$0xf] }
  0xaf   : > { %v1286_v19 = vpack.c.b16 %v1260_v14, %v1259_v13  ;;  %v2230_v57 = vpack.c.b16 %v2204_v46, %v2203_v45  ;;  %v1979_v13 = vshll.u32 %v4854_v4, 16  ;;  %v1985_v14 = vshll.u32 %v4855_v5, 16 }
  0xb0   : > { %v5930_v34 = vpop.f32.mrf.mxu1  ;;  %v1991_v42 = vrot.slane %v1989_v16, 4 }
  0xb1   : > { %v1981_v30 = vrot.slane %v1979_v13, 5  ;;  %v1092_v13 = vld [vmem:[%s5633_s29 + $0x60] sm:$0xe] }
  0xb2   : > { %v5932_v37 = vpop.f32.mrf.mxu2  ;;  %4885 = vmatmul.msk.bf16.gmra.mxu0 %vm722_vm4, %v2228_v31  ;;  %v1090_v31 = vld [vmem:[%s5633_s29 + $0x48] sm:$0xe] }
  0xb3   : > { %4675 = vmatmul.msk.bf16.gmra.mxu1 %vm722_vm4, %v5183_v33  ;;  %v1952_v33 = vshrl.u32 %v4851_v23, 16  ;;  %v4693_v47 = vrot.slane %v1090_v31, 9  ;;  %v1987_v31 = vrot.slane %v1985_v14, 5 }
  0xb5   : > { %v5938_v41 = vpop.f32.mrf.mxu0  ;;  %v1954_v50 = vrot.slane %v1952_v33, 4  ;;  %v5201_v33 = vld [vmem:[%s5633_s29 + $0x54] sm:$0xff]  ;;  %v1992_v27 = vor.u32 %v1991_v42, %v1987_v31 }
  0xb6   : > { %v5944_v49 = vpop.f32.mrf.mxu3 }
  0xb7   : > { %v1958_v59 = vor.u32 %v1957_v48, %v1954_v50  ;;  %v1190_v48 = vsel %vm5819_vm7, %v1188_v32, %v1189_v35  ;;  %v1993_v60 = vrot.slane %v1992_v27, 4 }
  0xb8   : > { %4708 = vmatmul.msk.bf16.gmra.mxu2 %vm722_vm4, %v1285_v44  ;;  %v1182_v44 = vrot.slane %v5722_v56, 5 }
  0xba   : > { %v5950_v58 = vpop.f32.mrf.mxu1  ;;  %v5953_v63 = vpop.f32.mrf.mxu2  ;;  %v1183_v56 = vsel %vm5819_vm7, %v1181_v40, %v1182_v44  ;;  %v4856_v40 = vld [vmem:[%s5633_s29 + $0x68] sm:$0x1] }
  0xbb   : > { %v1262_v62 = vunpack.c.l.b16 %v1183_v56 }
  0xbd   : > { %4821 = vmatmul.msk.bf16.gmra.mxu3 %vm722_vm4, %v5199_v2  ;;  %v5961_v9 = vpop.f32.mrf.mxu0  ;;  %v1180_v2 = vsel %vm5819_vm7, %v4693_v47, %v1179_v26  ;;  %v2206_v47 = vunpack.c.l.b16 %v1974_v24 }
  0xbe   : > { %v5963_v0 = vpop.f32.mrf.mxu3  ;;  %v1261_v61 = vunpack.c.l.b16 %v1180_v2 }
  0xc0   : > { %v1287_v11 = vpack.c.b16 %v1262_v62, %v1261_v61  ;;  %v4857_v61 = vld [vmem:[%s5633_s29 + $0x6c] sm:$0xf]  ;;  %v4858_v62 = vld [vmem:[%s5633_s29 + $0x70] sm:$0xf] }
  0xc1   : > { %v2000_v14 = vshrl.u32 %v4857_v61, 16  ;;  %v2009_v16 = vshll.u32 %v4858_v62, 16 }
  0xc2   : > { %4886 = vmatmul.msk.bf16.gmra.mxu0 %vm722_vm4, %v2229_v8  ;;  %v5967_v28 = vpop.f32.mrf.mxu1  ;;  %v1959_v8 = vrot.slane %v1958_v59, 4 }
  0xc3   : > { %4676 = vmatmul.msk.bf16.gmra.mxu1 %vm722_vm4, %v5184_v12  ;;  %v1976_v12 = vshrl.u32 %v4854_v4, 16  ;;  %v2002_v35 = vrot.slane %v2000_v14, 4  ;;  %v4861_v14 = vld [vmem:[%s5633_s29 + $0x7c] sm:$0xf] }
  0xc4   : > { %v1964_v23 = vsel %vm5645_vm3, %v1959_v8, %v1963_v51  ;;  %v1995_v51 = vshll.u32 %v4856_v40, 16 }
  0xc5   : > { %v5970_v22 = vpop.f32.mrf.mxu2  ;;  %v1978_v29 = vrot.slane %v1976_v12, 4 }
  0xc6   : > { %v1997_v20 = vrot.slane %v1995_v51, 5 }
  0xc7   : > { %v1982_v46 = vor.u32 %v1981_v30, %v1978_v29  ;;  %v5202_v30 = vld [vmem:[%s5633_s29 + $0x60] sm:$0xff] }
  0xc8   : > { %4709 = vmatmul.msk.bf16.gmra.mxu2 %vm722_vm4, %v1286_v19  ;;  %v1091_v19 = vld [vmem:[%s5633_s29 + $0x54] sm:$0xe]  ;;  %v1998_v25 = vsel %vm5645_vm3, %v1993_v60, %v1997_v20 }
  0xc9   : > { %v5980_v38 = vpop.f32.mrf.mxu0  ;;  %v4694_v21 = vrot.slane %v1091_v19, 9  ;;  %v1983_v59 = vrot.slane %v1982_v46, 4  ;;  %v2013_v19 = vshrl.u32 %v4858_v62, 16  ;;  %v4859_v46 = vld [vmem:[%s5633_s29 + $0x74] sm:$0x1] }
  0xca   : > { %v5984_v39 = vpop.f32.mrf.mxu3 }
  0xcb   : > { %v1187_v50 = vsel %vm5819_vm7, %v4694_v21, %v1186_v15  ;;  %v1988_v8 = vsel %vm5645_vm3, %v1983_v59, %v1987_v31  ;;  %v2003_v15 = vshll.u32 %v4857_v61, 16  ;;  %v4695_v21 = vrot.slane %v1092_v13, 9  ;;  %v4860_v13 = vld [vmem:[%s5633_s29 + $0x78] sm:$0xf] }
  0xcc   : > { %v5987_v53 = vpop.f32.mrf.mxu1  ;;  %v1263_v56 = vunpack.c.l.b16 %v1187_v50  ;;  %v2207_v31 = vunpack.c.l.b16 %v1988_v8 }
  0xcd   : > { %4822 = vmatmul.msk.bf16.gmra.mxu3 %vm722_vm4, %v5200_v1  ;;  %v5991_v55 = vpop.f32.mrf.mxu2  ;;  %v2205_v1 = vunpack.c.l.b16 %v1964_v23  ;;  %v5337_v23 = vld [vmem:[%s5633_s29 + $0x68] sm:$0x1]  ;;  %v2005_v42 = vrot.slane %v2003_v15, 5  ;;  %v5338_v15 = vld [vmem:[%s5633_s29 + $0x70] sm:$0xf] }
  0xce   : > { %v1196_v24 = vrot.slane %v5337_v23, 5  ;;  %v1093_v23 = vld [vmem:[%s5633_s29 + $0x6c] sm:$0xe] }
  0xcf   : > { %v2231_v52 = vpack.c.b16 %v2206_v47, %v2205_v1  ;;  %v2011_v1 = vrot.slane %v2009_v16, 5  ;;  %v2015_v47 = vrot.slane %v2013_v19, 4  ;;  %v2006_v51 = vor.u32 %v2005_v42, %v2002_v35  ;;  %v5339_v42 = vld [vmem:[%s5633_s29 + $0x74] sm:$0x1] }
  0xd0   : > { %v1200_v16 = vrot.slane %v5338_v15, 5 }
  0xd1   : > { %v5998_v3 = vpop.f32.mrf.mxu0 }
  0xd2   : > { %4887 = vmatmul.msk.bf16.gmra.mxu0 %vm722_vm4, %v2230_v57  ;;  %v6003_v6 = vpop.f32.mrf.mxu3  ;;  %v1264_v57 = vunpack.c.l.b16 %v1190_v48 }
  0xd3   : > { %4677 = vmatmul.msk.bf16.gmra.mxu1 %vm722_vm4, %v5185_v43 }
  0xd4   : > { %v6007_v17 = vpop.f32.mrf.mxu1  ;;  %v1288_v4 = vpack.c.b16 %v1264_v57, %v1263_v56  ;;  %v5187_v57 = vld [vmem:[%s5633_s29 + $0x60] sm:$0xff] }
  0xd8   : > { %v6014_v26 = vpop.f32.mrf.mxu2  ;;  %4710 = vmatmul.msk.bf16.gmra.mxu2 %vm722_vm4, %v1287_v11  ;;  %v1193_v11 = vrot.slane %v5336_v10, 5 }
  0xda   : > { %v1195_v32 = vrot.slane %v1193_v11, 4  ;;  %v1194_v50 = vsel %vm5819_vm7, %v4695_v21, %v1193_v11  ;;  %v2037_v21 = vshrl.u32 %v4861_v14, 16 }
  0xdb   : > { %v6020_v44 = vpop.f32.mrf.mxu0  ;;  %v1265_v20 = vunpack.c.l.b16 %v1194_v50  ;;  %v4696_v50 = vrot.slane %v1093_v23, 9 }
  0xdc   : > { %v6022_v45 = vpop.f32.mrf.mxu3  ;;  %v1197_v48 = vsel %vm5819_vm7, %v1195_v32, %v1196_v24 }
  0xdd   : > { %4823 = vmatmul.msk.bf16.gmra.mxu3 %vm722_vm4, %v5201_v33  ;;  %v2208_v33 = vunpack.c.l.b16 %v1998_v25  ;;  %v1266_v61 = vunpack.c.l.b16 %v1197_v48  ;;  %v1202_v48 = vrot.slane %v1200_v16, 4 }
  0xdf   : > { %v2232_v27 = vpack.c.b16 %v2208_v33, %v2207_v31  ;;  %v1289_v11 = vpack.c.b16 %v1266_v61, %v1265_v20  ;;  %v2027_v31 = vshll.u32 %v4860_v13, 16  ;;  %v2033_v33 = vshll.u32 %v4861_v14, 16 }
  0xe0   : > { %v6030_v2 = vpop.f32.mrf.mxu1  ;;  %v6032_v43 = vpop.f32.mrf.mxu2  ;;  %v2039_v20 = vrot.slane %v2037_v21, 4 }
  0xe2   : > { %4888 = vmatmul.msk.bf16.gmra.mxu0 %vm722_vm4, %v2231_v52  ;;  %v2016_v52 = vor.u32 %v2015_v47, %v2011_v1  ;;  %v1203_v47 = vrot.slane %v5339_v42, 5 }
  0xe3   : > { %4678 = vmatmul.msk.bf16.gmra.mxu1 %vm722_vm4, %v5186_v54  ;;  %v6038_v5 = vpop.f32.mrf.mxu0  ;;  %v2019_v54 = vshll.u32 %v4859_v46, 16  ;;  %v5203_v46 = vld [vmem:[%s5633_s29 + $0x6c] sm:$0xff] }
  0xe4   : > { %v6045_v12 = vpop.f32.mrf.mxu3  ;;  %v2017_v8 = vrot.slane %v2016_v52, 4 }
  0xe5   : > { %v2021_v25 = vrot.slane %v2019_v54, 5 }
  0xe8   : > { %4711 = vmatmul.msk.bf16.gmra.mxu2 %vm722_vm4, %v1288_v4  ;;  %v6050_v29 = vpop.f32.mrf.mxu1  ;;  %v2007_v4 = vrot.slane %v2006_v51, 4 }
  0xea   : > { %v2012_v19 = vsel %vm5645_vm3, %v2007_v4, %v2011_v1  ;;  %v4862_v4 = vld [vmem:[%s5633_s29 + $0x80] sm:$0x1] }
  0xeb   : > { %v6053_v40 = vpop.f32.mrf.mxu2 }
  0xed   : > { %4824 = vmatmul.msk.bf16.gmra.mxu3 %vm722_vm4, %v5202_v30  ;;  %v2024_v30 = vshrl.u32 %v4860_v13, 16  ;;  %v5188_v13 = vld [vmem:[%s5633_s29 + $0x6c] sm:$0xff] }
  0xef   : > { %v6061_v56 = vpop.f32.mrf.mxu0  ;;  %v2026_v54 = vrot.slane %v2024_v30, 4 }
  0xf0   : > { %v6064_v59 = vpop.f32.mrf.mxu3  ;;  %v1004_v60 = vpop.f32.mrf.mxu1 }
  0xf1   : > { %v1005_v62 = vadd.f32 %v1004_v60, %v5938_v41  ;;  %v2022_v41 = vsel %vm5645_vm3, %v2017_v8, %v2021_v25  ;;  %v2035_v60 = vrot.slane %v2033_v33, 5  ;;  %v1201_v8 = vsel %vm5819_vm7, %v4696_v50, %v1200_v16 }
  0xf2   : > { %4889 = vmatmul.msk.bf16.gmra.mxu0 %vm722_vm4, %v2232_v27  ;;  %v2209_v27 = vunpack.c.l.b16 %v2012_v19  ;;  %v2210_v51 = vunpack.c.l.b16 %v2022_v41  ;;  %v2043_v19 = vshll.u32 %v4862_v4, 16 }
  0xf3   : > { %v6068_v10 = vpop.f32.mrf.mxu2  ;;  %4679 = vmatmul.msk.bf16.gmra.mxu1 %vm722_vm4, %v5187_v57  ;;  %v2029_v57 = vrot.slane %v2027_v31, 5  ;;  %v2040_v15 = vor.u32 %v2039_v20, %v2035_v60 }
  0xf4   : > { %v2233_v25 = vpack.c.b16 %v2210_v51, %v2209_v27  ;;  %v2045_v42 = vrot.slane %v2043_v19, 5  ;;  %v4864_v27 = vld [vmem:[%s5633_s29 + $0x88] sm:$0xf]  ;;  %v5340_v51 = vld [vmem:[%s5633_s29 + $0x7c] sm:$0xf] }
  0xf5   : > { %v2030_v14 = vor.u32 %v2029_v57, %v2026_v54  ;;  %v1094_v54 = vld [vmem:[%s5633_s29 + $0x78] sm:$0xe] }
  0xf7   : > { %v6079_v24 = vpop.f32.mrf.mxu0  ;;  %v2031_v21 = vrot.slane %v2030_v14, 4 }
  0xf8   : > { %v6081_v32 = vpop.f32.mrf.mxu3  ;;  %4712 = vmatmul.msk.bf16.gmra.mxu2 %vm722_vm4, %v1289_v11  ;;  %v1006_v35 = vpop.f32.mrf.mxu1 }
  0xf9   : > { %v1007_v1 = vadd.f32 %v1006_v35, %v5961_v9  ;;  %v1204_v9 = vsel %vm5819_vm7, %v1202_v48, %v1203_v47  ;;  %v2041_v35 = vrot.slane %v2040_v15, 4  ;;  %v4863_v47 = vld [vmem:[%s5633_s29 + $0x84] sm:$0xf]  ;;  %v5204_v15 = vld [vmem:[%s5633_s29 + $0x78] sm:$0xff] }
  0xfa   : > { %v1268_v30 = vunpack.c.l.b16 %v1204_v9  ;;  %v2051_v57 = vshll.u32 %v4863_v47, 16  ;;  %v2061_v9 = vshrl.u32 %v4864_v27, 16 }
  0xfb   : > { %v1357_v52 = vpop.f32.mrf.mxu2  ;;  %v2046_v4 = vsel %vm5645_vm3, %v2041_v35, %v2045_v42 }
  0xfc   : > { %v1437_v61 = vadd.f32 %v1357_v52, %v1005_v62  ;;  %v1267_v62 = vunpack.c.l.b16 %v1201_v8  ;;  %v1207_v52 = vrot.slane %v5340_v51, 5  ;;  %v2057_v8 = vshll.u32 %v4864_v27, 16 }
  0xfd   : > { %4825 = vmatmul.msk.bf16.gmra.mxu3 %vm722_vm4, %v5203_v46  ;;  %v2063_v35 = vrot.slane %v2061_v9, 4 }
  0xfe   : > { %v1290_v48 = vpack.c.b16 %v1268_v30, %v1267_v62 }
  0xff   : > { %v2301_v11 = vpop.f32.mrf.mxu0 }
 0x100   : > { %v1647_v41 = vpop.f32.mrf.mxu3  ;;  %v1009_v23 = vpop.f32.mrf.mxu1 }
 0x101   : > { %v1727_v31 = vadd.f32 %v1647_v41, %v1437_v61  ;;  %v1010_v16 = vadd.f32 %v1009_v23, %v5980_v38  ;;  %v2048_v38 = vshrl.u32 %v4863_v47, 16  ;;  %v2036_v61 = vsel %vm5645_vm3, %v2031_v21, %v2035_v60 }
 0x102   : > { %4890 = vmatmul.msk.bf16.gmra.mxu0 %vm722_vm4, %v2233_v25  ;;  %v5341_v25 = vld [vmem:[%s5633_s29 + $0x80] sm:$0x1]  ;;  %v4697_v41 = vrot.slane %v1094_v54, 9  ;;  %v1209_v23 = vrot.slane %v1207_v52, 4  ;;  %v2211_v62 = vunpack.c.l.b16 %v2036_v61  ;;  %v2212_v60 = vunpack.c.l.b16 %v2046_v4 }
 0x103   : > { %v1359_v33 = vpop.f32.mrf.mxu2  ;;  %4680 = vmatmul.msk.bf16.gmra.mxu1 %vm722_vm4, %v5188_v13  ;;  %v6098_v46 = vadd.f32 %v2301_v11, %v1727_v31  ;;  %v1210_v11 = vrot.slane %v5341_v25, 5  ;;  %v2050_v30 = vrot.slane %v2048_v38, 4  ;;  %v2053_v31 = vrot.slane %v2051_v57, 5  ;;  %v5189_v38 = vld [vmem:[%s5633_s29 + $0x78] sm:$0xff] }
 0x104   : > { %v1438_v50 = vadd.f32 %v1359_v33, %v1007_v1  ;;  %v2059_v21 = vrot.slane %v2057_v8, 5  ;;  %v2234_v27 = vpack.c.b16 %v2212_v60, %v2211_v62  ;;  %v4867_v62 = vld [vmem:[%s5633_s29 + $0x94] sm:$0xf]  ;;  %v5342_v60 = vld [vmem:[%s5633_s29 + $0x88] sm:$0xf] }
 0x105   : > { %v2054_v51 = vor.u32 %v2053_v31, %v2050_v30  ;;  %v1214_v30 = vrot.slane %v5342_v60, 5  ;;  %v1095_v31 = vld [vmem:[%s5633_s29 + $0x84] sm:$0xe] }
 0x106   : > { %v2064_v57 = vor.u32 %v2063_v35, %v2059_v21 }
 0x107   : > { %v2303_v20 = vpop.f32.mrf.mxu0  ;;  %v2055_v25 = vrot.slane %v2054_v51, 4 }
 0x108   : > { %v1649_v1 = vpop.f32.mrf.mxu3  ;;  %4713 = vmatmul.msk.bf16.gmra.mxu2 %vm722_vm4, %v1290_v48  ;;  %v1011_v13 = vpop.f32.mrf.mxu1  ;;  %v4865_v48 = vld [vmem:[%s5633_s29 + $0x8c] sm:$0x1] }
 0x109   : > { %v1728_v14 = vadd.f32 %v1649_v1, %v1438_v50  ;;  %v1012_v19 = vadd.f32 %v1011_v13, %v5998_v3  ;;  %v1208_v50 = vsel %vm5819_vm7, %v4697_v41, %v1207_v52  ;;  %v1211_v3 = vsel %vm5819_vm7, %v1209_v23, %v1210_v11 }
 0x10a   : > { %v2067_v61 = vshll.u32 %v4865_v48, 16  ;;  %v1270_v8 = vunpack.c.l.b16 %v1211_v3  ;;  %v2065_v1 = vrot.slane %v2064_v57, 4  ;;  %v2085_v3 = vshrl.u32 %v4867_v62, 16  ;;  %v5205_v57 = vld [vmem:[%s5633_s29 + $0x84] sm:$0xff] }
 0x10b   : > { %v1362_v33 = vpop.f32.mrf.mxu2  ;;  %v6111_v42 = vadd.f32 %v2303_v20, %v1728_v14  ;;  %v4866_v14 = vld [vmem:[%s5633_s29 + $0x90] sm:$0xf] }
 0x10c   : > { %v1439_v47 = vadd.f32 %v1362_v33, %v1010_v16  ;;  %v1269_v16 = vunpack.c.l.b16 %v1208_v50  ;;  %v2069_v13 = vrot.slane %v2067_v61, 5  ;;  %v2072_v33 = vshrl.u32 %v4866_v14, 16 }
 0x10d   : > { %4826 = vmatmul.msk.bf16.gmra.mxu3 %vm722_vm4, %v5204_v15  ;;  %v2075_v48 = vshll.u32 %v4866_v14, 16  ;;  %v2081_v50 = vshll.u32 %v4867_v62, 16  ;;  %v4698_v61 = vrot.slane %v1095_v31, 9 }
 0x10e   : > { %v1291_v23 = vpack.c.b16 %v1270_v8, %v1269_v16  ;;  %v2074_v8 = vrot.slane %v2072_v33, 4 }
 0x10f   : > { %v2306_v54 = vpop.f32.mrf.mxu0 }
 0x110   : > { %v1652_v4 = vpop.f32.mrf.mxu3  ;;  %v1014_v20 = vpop.f32.mrf.mxu1 }
 0x111   : > { %v1729_v9 = vadd.f32 %v1652_v4, %v1439_v47  ;;  %v1015_v52 = vadd.f32 %v1014_v20, %v6020_v44  ;;  %v2060_v44 = vsel %vm5645_vm3, %v2055_v25, %v2059_v21  ;;  %v2070_v47 = vsel %vm5645_vm3, %v2065_v1, %v2069_v13 }
 0x112   : > { %4891 = vmatmul.msk.bf16.gmra.mxu0 %vm722_vm4, %v2234_v27  ;;  %v5343_v27 = vld [vmem:[%s5633_s29 + $0x8c] sm:$0x1]  ;;  %v1216_v4 = vrot.slane %v1214_v30, 4  ;;  %v2213_v20 = vunpack.c.l.b16 %v2060_v44  ;;  %v2214_v16 = vunpack.c.l.b16 %v2070_v47  ;;  %v2077_v25 = vrot.slane %v2075_v48, 5  ;;  %v5190_v44 = vld [vmem:[%s5633_s29 + $0x84] sm:$0xff] }
 0x113   : > { %v1364_v11 = vpop.f32.mrf.mxu2  ;;  %4681 = vmatmul.msk.bf16.gmra.mxu1 %vm722_vm4, %v5189_v38  ;;  %v6124_v15 = vadd.f32 %v2306_v54, %v1729_v9  ;;  %v1217_v51 = vrot.slane %v5343_v27, 5  ;;  %v2087_v1 = vrot.slane %v2085_v3, 4 }
 0x114   : > { %v1440_v41 = vadd.f32 %v1364_v11, %v1012_v19  ;;  %v2083_v11 = vrot.slane %v2081_v50, 5  ;;  %v2235_v62 = vpack.c.b16 %v2214_v16, %v2213_v20  ;;  %v2078_v31 = vor.u32 %v2077_v25, %v2074_v8  ;;  %v4870_v20 = vld [vmem:[%s5633_s29 + $0xa0] sm:$0xf]  ;;  %v1096_v25 = vld [vmem:[%s5633_s29 + $0x90] sm:$0xe] }
 0x116   : > { %v2088_v33 = vor.u32 %v2087_v1, %v2083_v11 }
 0x117   : > { %v2308_v35 = vpop.f32.mrf.mxu0 }
 0x118   : > { %v1654_v19 = vpop.f32.mrf.mxu3  ;;  %4714 = vmatmul.msk.bf16.gmra.mxu2 %vm722_vm4, %v1291_v23  ;;  %v1016_v54 = vpop.f32.mrf.mxu1  ;;  %v4868_v23 = vld [vmem:[%s5633_s29 + $0x98] sm:$0x1] }
 0x119   : > { %v1730_v38 = vadd.f32 %v1654_v19, %v1440_v41  ;;  %v1017_v21 = vadd.f32 %v1016_v54, %v6038_v5  ;;  %v1215_v5 = vsel %vm5819_vm7, %v4698_v61, %v1214_v30  ;;  %v1218_v41 = vsel %vm5819_vm7, %v1216_v4, %v1217_v51  ;;  %v4869_v30 = vld [vmem:[%s5633_s29 + $0x9c] sm:$0xf] }
 0x11a   : > { %v2091_v47 = vshll.u32 %v4868_v23, 16  ;;  %v1272_v50 = vunpack.c.l.b16 %v1218_v41  ;;  %v2079_v19 = vrot.slane %v2078_v31, 4  ;;  %v2089_v54 = vrot.slane %v2088_v33, 4 }
 0x11b   : > { %v1367_v9 = vpop.f32.mrf.mxu2  ;;  %v6137_v13 = vadd.f32 %v2308_v35, %v1730_v38  ;;  %v2096_v16 = vshrl.u32 %v4869_v30, 16  ;;  %v2099_v8 = vshll.u32 %v4869_v30, 16  ;;  %v2109_v41 = vshrl.u32 %v4870_v20, 16 }
 0x11c   : > { %v1441_v14 = vadd.f32 %v1367_v9, %v1015_v52  ;;  %v1271_v52 = vunpack.c.l.b16 %v1215_v5  ;;  %v2093_v38 = vrot.slane %v2091_v47, 5  ;;  %v5344_v9 = vld [vmem:[%s5633_s29 + $0x94] sm:$0xf]  ;;  %v2105_v5 = vshll.u32 %v4870_v20, 16 }
 0x11d   : > { %4827 = vmatmul.msk.bf16.gmra.mxu3 %vm722_vm4, %v5205_v57  ;;  %v2098_v31 = vrot.slane %v2096_v16, 4  ;;  %v2101_v33 = vrot.slane %v2099_v8, 5 }
 0x11e   : > { %v1292_v4 = vpack.c.b16 %v1272_v50, %v1271_v52  ;;  %v2094_v23 = vsel %vm5645_vm3, %v2089_v54, %v2093_v38  ;;  %v4699_v52 = vrot.slane %v1096_v25, 9 }
 0x11f   : > { %v2311_v60 = vpop.f32.mrf.mxu0  ;;  %v2102_v20 = vor.u32 %v2101_v33, %v2098_v31  ;;  %v4873_v31 = vld [vmem:[%s5633_s29 + $0xac] sm:$0xf] }
 0x120   : > { %v1657_v48 = vpop.f32.mrf.mxu3  ;;  %v1019_v35 = vpop.f32.mrf.mxu1 }
 0x121   : > { %v1731_v3 = vadd.f32 %v1657_v48, %v1441_v14  ;;  %v1020_v27 = vadd.f32 %v1019_v35, %v6061_v56  ;;  %v1221_v56 = vrot.slane %v5344_v9, 5  ;;  %v2084_v14 = vsel %vm5645_vm3, %v2079_v19, %v2083_v11  ;;  %v5206_v48 = vld [vmem:[%s5633_s29 + $0x90] sm:$0xff] }
 0x122   : > { %4892 = vmatmul.msk.bf16.gmra.mxu0 %vm722_vm4, %v2235_v62  ;;  %v5345_v62 = vld [vmem:[%s5633_s29 + $0x98] sm:$0x1]  ;;  %v2215_v50 = vunpack.c.l.b16 %v2084_v14  ;;  %v2111_v19 = vrot.slane %v2109_v41, 4  ;;  %v5191_v9 = vld [vmem:[%s5633_s29 + $0x90] sm:$0xff] }
 0x123   : > { %v1369_v51 = vpop.f32.mrf.mxu2  ;;  %4682 = vmatmul.msk.bf16.gmra.mxu1 %vm722_vm4, %v5190_v44  ;;  %v6150_v57 = vadd.f32 %v2311_v60, %v1731_v3  ;;  %v1224_v60 = vrot.slane %v5345_v62, 5  ;;  %v1223_v11 = vrot.slane %v1221_v56, 4  ;;  %v2216_v3 = vunpack.c.l.b16 %v2094_v23 }
 0x124   : > { %v1442_v61 = vadd.f32 %v1369_v51, %v1017_v21  ;;  %v2107_v51 = vrot.slane %v2105_v5, 5  ;;  %v2103_v62 = vrot.slane %v2102_v20, 4  ;;  %v5347_v20 = vld [vmem:[%s5633_s29 + $0xa4] sm:$0x1] }
 0x125   : > { %v2236_v16 = vpack.c.b16 %v2216_v3, %v2215_v50  ;;  %v5346_v50 = vld [vmem:[%s5633_s29 + $0xa0] sm:$0xf] }
 0x126   : > { %v2112_v25 = vor.u32 %v2111_v19, %v2107_v51  ;;  %v1228_v3 = vrot.slane %v5346_v50, 5  ;;  %v1097_v19 = vld [vmem:[%s5633_s29 + $0x9c] sm:$0xe] }
 0x127   : > { %v2313_v1 = vpop.f32.mrf.mxu0 }
 0x128   : > { %v1659_v21 = vpop.f32.mrf.mxu3  ;;  %4715 = vmatmul.msk.bf16.gmra.mxu2 %vm722_vm4, %v1292_v4  ;;  %v1021_v44 = vpop.f32.mrf.mxu1  ;;  %v4871_v4 = vld [vmem:[%s5633_s29 + $0xa4] sm:$0x1] }
 0x129   : > { %v1732_v47 = vadd.f32 %v1659_v21, %v1442_v61  ;;  %v1022_v35 = vadd.f32 %v1021_v44, %v6079_v24  ;;  %v1222_v61 = vsel %vm5819_vm7, %v4699_v52, %v1221_v56  ;;  %v1225_v24 = vsel %vm5819_vm7, %v1223_v11, %v1224_v60  ;;  %v4872_v21 = vld [vmem:[%s5633_s29 + $0xa8] sm:$0xf] }
 0x12a   : > { %v2115_v14 = vshll.u32 %v4871_v4, 16  ;;  %v1274_v5 = vunpack.c.l.b16 %v1225_v24  ;;  %v2113_v60 = vrot.slane %v2112_v25, 4  ;;  %v2120_v52 = vshrl.u32 %v4872_v21, 16 }
 0x12b   : > { %v1372_v30 = vpop.f32.mrf.mxu2  ;;  %v6163_v54 = vadd.f32 %v2313_v1, %v1732_v47  ;;  %v2108_v11 = vsel %vm5645_vm3, %v2103_v62, %v2107_v51  ;;  %v2133_v4 = vshrl.u32 %v4873_v31, 16 }
 0x12c   : > { %v1443_v38 = vadd.f32 %v1372_v30, %v1020_v27  ;;  %v1273_v27 = vunpack.c.l.b16 %v1222_v61  ;;  %v2117_v44 = vrot.slane %v2115_v14, 5  ;;  %v2123_v30 = vshll.u32 %v4872_v21, 16  ;;  %v5207_v14 = vld [vmem:[%s5633_s29 + $0x9c] sm:$0xff] }
 0x12d   : > { %4828 = vmatmul.msk.bf16.gmra.mxu3 %vm722_vm4, %v5206_v48  ;;  %v2122_v51 = vrot.slane %v2120_v52, 4 }
 0x12e   : > { %v1293_v48 = vpack.c.b16 %v1274_v5, %v1273_v27  ;;  %v2118_v24 = vsel %vm5645_vm3, %v2113_v60, %v2117_v44  ;;  %v1230_v27 = vrot.slane %v1228_v3, 4  ;;  %v2125_v5 = vrot.slane %v2123_v30, 5  ;;  %v4874_v44 = vld [vmem:[%s5633_s29 + $0xb0] sm:$0x1] }
 0x12f   : > { %v2316_v8 = vpop.f32.mrf.mxu0  ;;  %v2218_v62 = vunpack.c.l.b16 %v2118_v24 }
 0x130   : > { %v1662_v1 = vpop.f32.mrf.mxu3  ;;  %v1024_v23 = vpop.f32.mrf.mxu1  ;;  %v2126_v52 = vor.u32 %v2125_v5, %v2122_v51 }
 0x131   : > { %v1733_v41 = vadd.f32 %v1662_v1, %v1443_v38  ;;  %v2129_v38 = vshll.u32 %v4873_v31, 16  ;;  %v4700_v1 = vrot.slane %v1097_v19, 9  ;;  %v5192_v19 = vld [vmem:[%s5633_s29 + $0x9c] sm:$0xff] }
 0x132   : > { %4893 = vmatmul.msk.bf16.gmra.mxu0 %vm722_vm4, %v2236_v16  ;;  %v1231_v16 = vrot.slane %v5347_v20, 5 }
 0x133   : > { %v1374_v56 = vpop.f32.mrf.mxu2  ;;  %4683 = vmatmul.msk.bf16.gmra.mxu1 %vm722_vm4, %v5191_v9  ;;  %v6176_v33 = vadd.f32 %v2316_v8, %v1733_v41  ;;  %v2217_v8 = vunpack.c.l.b16 %v2108_v11  ;;  %v1025_v41 = vadd.f32 %v1024_v23, %v5914_v7  ;;  %v2131_v21 = vrot.slane %v2129_v38, 5 }
 0x134   : > { %v1444_v47 = vadd.f32 %v1374_v56, %v1022_v35  ;;  %v2135_v56 = vrot.slane %v2133_v4, 4  ;;  %v2139_v11 = vshll.u32 %v4874_v44, 16 }
 0x135   : > { %v2237_v7 = vpack.c.b16 %v2218_v62, %v2217_v8  ;;  %v4875_v8 = vld [vmem:[%s5633_s29 + $0xb4] sm:$0xf] }
 0x136   : > { %v2136_v23 = vor.u32 %v2135_v56, %v2131_v21  ;;  %v2141_v51 = vrot.slane %v2139_v11, 5  ;;  %v2147_v44 = vshll.u32 %v4875_v8, 16 }
 0x137   : > { %v2318_v61 = vpop.f32.mrf.mxu0 }
 0x138   : > { %v1664_v35 = vpop.f32.mrf.mxu3  ;;  %4716 = vmatmul.msk.bf16.gmra.mxu2 %vm722_vm4, %v1293_v48  ;;  %v1026_v9 = vpop.f32.mrf.mxu1  ;;  %v1232_v48 = vsel %vm5819_vm7, %v1230_v27, %v1231_v16  ;;  %v2137_v16 = vrot.slane %v2136_v23, 4 }
 0x139   : > { %v1734_v25 = vadd.f32 %v1664_v35, %v1444_v47  ;;  %v1229_v47 = vsel %vm5819_vm7, %v4700_v1, %v1228_v3  ;;  %v1276_v24 = vunpack.c.l.b16 %v1232_v48  ;;  %v2127_v35 = vrot.slane %v2126_v52, 4  ;;  %v5349_v52 = vld [vmem:[%s5633_s29 + $0xb0] sm:$0x1] }
 0x13a   : > { %v1027_v3 = vadd.f32 %v1026_v9, %v5930_v34  ;;  %v2144_v34 = vshrl.u32 %v4875_v8, 16  ;;  %v2142_v9 = vsel %vm5645_vm3, %v2137_v16, %v2141_v51 }
 0x13b   : > { %v1377_v60 = vpop.f32.mrf.mxu2  ;;  %v6189_v31 = vadd.f32 %v2318_v61, %v1734_v25  ;;  %v1275_v61 = vunpack.c.l.b16 %v1229_v47  ;;  %v2132_v56 = vsel %vm5645_vm3, %v2127_v35, %v2131_v21 }
 0x13c   : > { %v1445_v50 = vadd.f32 %v1377_v60, %v1025_v41  ;;  %v5348_v41 = vld [vmem:[%s5633_s29 + $0xac] sm:$0xf]  ;;  %v1098_v60 = vld [vmem:[%s5633_s29 + $0xa8] sm:$0xe] }
 0x13d   : > { %4829 = vmatmul.msk.bf16.gmra.mxu3 %vm722_vm4, %v5207_v14  ;;  %v4876_v14 = vld [vmem:[%s5633_s29 + $0xb8] sm:$0xf]  ;;  %v1294_v5 = vpack.c.b16 %v1276_v24, %v1275_v61  ;;  %v1235_v62 = vrot.slane %v5348_v41, 5  ;;  %v2219_v61 = vunpack.c.l.b16 %v2132_v56  ;;  %v2220_v24 = vunpack.c.l.b16 %v2142_v9  ;;  %v4877_v41 = vld [vmem:[%s5633_s29 + $0xbc] sm:$0x1] }
 0x13e   : > { %v2157_v47 = vshrl.u32 %v4876_v14, 16 }
 0x13f   : > { %v2321_v30 = vpop.f32.mrf.mxu0 }
 0x140   : > { %v1667_v38 = vpop.f32.mrf.mxu3  ;;  %v1029_v4 = vpop.f32.mrf.mxu1  ;;  %v2159_v51 = vrot.slane %v2157_v47, 4 }
 0x141   : > { %v1735_v20 = vadd.f32 %v1667_v38, %v1445_v50  ;;  %v2153_v50 = vshll.u32 %v4876_v14, 16  ;;  %v5208_v38 = vld [vmem:[%s5633_s29 + $0xa8] sm:$0xff]  ;;  %v1030_v35 = vadd.f32 %v1029_v4, %v5950_v58  ;;  %v2238_v58 = vpack.c.b16 %v2220_v24, %v2219_v61 }
 0x142   : > { %4894 = vmatmul.msk.bf16.gmra.mxu0 %vm722_vm4, %v2237_v7  ;;  %v1238_v7 = vrot.slane %v5349_v52, 5 }
 0x143   : > { %v1379_v25 = vpop.f32.mrf.mxu2  ;;  %4684 = vmatmul.msk.bf16.gmra.mxu1 %vm722_vm4, %v5192_v19  ;;  %v6202_v1 = vadd.f32 %v2321_v30, %v1735_v20  ;;  %v4701_v30 = vrot.slane %v1098_v60, 9  ;;  %v1237_v19 = vrot.slane %v1235_v62, 4  ;;  %v2146_v20 = vrot.slane %v2144_v34, 4  ;;  %v5193_v34 = vld [vmem:[%s5633_s29 + $0xa8] sm:$0xff] }
 0x144   : > { %v1446_v27 = vadd.f32 %v1379_v25, %v1027_v3  ;;  %v2149_v3 = vrot.slane %v2147_v44, 5  ;;  %v6214_v16 = vrot.slane %v2153_v50, 5  ;;  %v2163_v50 = vshll.u32 %v4877_v41, 16 }
 0x146   : > { %v2150_v4 = vor.u32 %v2149_v3, %v2146_v20  ;;  %v2160_v56 = vor.u32 %v2159_v51, %v6214_v16  ;;  %v2165_v20 = vrot.slane %v2163_v50, 5 }
 0x147   : > { %v2323_v48 = vpop.f32.mrf.mxu0 }
 0x148   : > { %v1669_v23 = vpop.f32.mrf.mxu3  ;;  %4717 = vmatmul.msk.bf16.gmra.mxu2 %vm722_vm4, %v1294_v5  ;;  %v1031_v11 = vpop.f32.mrf.mxu1  ;;  %v1236_v5 = vsel %vm5819_vm7, %v4701_v30, %v1235_v62  ;;  %v4878_v62 = vld [vmem:[%s5633_s29 + $0xc0] sm:$0xf]  ;;  %v5350_v30 = vld [vmem:[%s5633_s29 + $0x10] sm:$0xf] }
 0x149   : > { %v1736_v21 = vadd.f32 %v1669_v23, %v1446_v27  ;;  %v1239_v27 = vsel %vm5819_vm7, %v1237_v19, %v1238_v7  ;;  %v1277_v9 = vunpack.c.l.b16 %v1236_v5  ;;  %v4879_v23 = vld [vmem:[%s5633_s29 + $0xc4] sm:$0xf]  ;;  %v2479_v7 = vrot.slane %v5350_v30, 5 }
 0x14a   : > { %v1278_v44 = vunpack.c.l.b16 %v1239_v27  ;;  %v1032_v19 = vadd.f32 %v1031_v11, %v5967_v28  ;;  %v2171_v3 = vshll.u32 %v4878_v62, 16  ;;  %v5351_v27 = vld [vmem:[%s5633_s29 + $0xb8] sm:$0xf]  ;;  %v1099_v11 = vld [vmem:[%s5633_s29 + $0xb4] sm:$0xe] }
 0x14b   : > { %v1382_v8 = vpop.f32.mrf.mxu2  ;;  %v6216_v25 = vadd.f32 %v2323_v48, %v1736_v21  ;;  %v2151_v21 = vrot.slane %v2150_v4, 4  ;;  %v1242_v41 = vrot.slane %v5351_v27, 5  ;;  %v2481_v4 = vrot.slane %v2479_v7, 4  ;;  %v5209_v27 = vld [vmem:[%s5633_s29 + $0xb4] sm:$0xff] }
 0x14c   : > { %v1447_v14 = vadd.f32 %v1382_v8, %v1030_v35  ;;  %v1295_v24 = vpack.c.b16 %v1278_v44, %v1277_v9  ;;  %v2168_v35 = vshrl.u32 %v4878_v62, 16  ;;  %v2177_v8 = vshll.u32 %v4879_v23, 16 }
 0x14d   : > { %4830 = vmatmul.msk.bf16.gmra.mxu3 %vm722_vm4, %v5208_v38  ;;  %v2161_v38 = vrot.slane %v2160_v56, 4  ;;  %v5353_v56 = vld [vmem:[%s5633_s29 + $0x14] sm:$0x1]  ;;  %v2156_v9 = vsel %vm5645_vm3, %v2151_v21, %v6214_v16 }
 0x14e   : > { %v2170_v62 = vrot.slane %v2168_v35, 4  ;;  %v2221_v21 = vunpack.c.l.b16 %v2156_v9 }
 0x14f   : > { %v2326_v60 = vpop.f32.mrf.mxu0  ;;  %v2166_v44 = vsel %vm5645_vm3, %v2161_v38, %v2165_v20 }
 0x150   : > { %v1672_v47 = vpop.f32.mrf.mxu3  ;;  %v1034_v48 = vpop.f32.mrf.mxu1  ;;  %v2222_v38 = vunpack.c.l.b16 %v2166_v44 }
 0x151   : > { %v1737_v52 = vadd.f32 %v1672_v47, %v1447_v14  ;;  %v2181_v14 = vshrl.u32 %v4879_v23, 16  ;;  %v2482_v47 = vrot.slane %v5353_v56, 5  ;;  %v6244_v23 = vrot.slane %v2177_v8, 5 }
 0x152   : > { %4895 = vmatmul.msk.bf16.gmra.mxu0 %vm722_vm4, %v2238_v58  ;;  %v5352_v58 = vld [vmem:[%s5633_s29 + $0xbc] sm:$0x1]  ;;  %v1244_v56 = vrot.slane %v1242_v41, 4  ;;  %v1035_v16 = vadd.f32 %v1034_v48, %v5987_v53 }
 0x153   : > { %v1384_v61 = vpop.f32.mrf.mxu2  ;;  %4685 = vmatmul.msk.bf16.gmra.mxu1 %vm722_vm4, %v5193_v34  ;;  %v6232_v5 = vadd.f32 %v2326_v60, %v1737_v52  ;;  %v1245_v28 = vrot.slane %v5352_v58, 5  ;;  %v2173_v52 = vrot.slane %v2171_v3, 5  ;;  %v2183_v30 = vrot.slane %v2181_v14, 4 }
 0x154   : > { %v1448_v51 = vadd.f32 %v1384_v61, %v1032_v19  ;;  %v4898_v19 = vld [vmem:[%s5633_s29 + $0xc] sm:$0xe]  ;;  %v4702_v58 = vrot.slane %v1099_v11, 9  ;;  %v2483_v3 = vsel %vm5819_vm7, %v2481_v4, %v2482_v47  ;;  %v5060_v4 = vld [vmem:[%s5633_s29 + $0x18] sm:$0xf] }
 0x155   : > { %7187 = vst [vmem:[#allocation9_spill] sm:$0xff] %v6232_v5  ;;  %v4914_v5 = vrot.slane %v4898_v19, 9  ;;  %v2174_v8 = vor.u32 %v2173_v52, %v2170_v62  ;;  %v2592_v11 = vunpack.c.l.b16 %v2483_v3  ;;  %v1246_v48 = vsel %vm5819_vm7, %v1244_v56, %v1245_v28  ;;  %v5194_v62 = vld [vmem:[%s5633_s29 + $0xb4] sm:$0xff]  ;;  %v6267_v52 = vld [vmem:[%s5633_s29 + $0x1c] sm:$0xf] }
 0x156   : > { %v1243_v53 = vsel %vm5819_vm7, %v4702_v58, %v1242_v41  ;;  %v2184_v9 = vor.u32 %v2183_v30, %v6244_v23  ;;  %v1280_v41 = vunpack.c.l.b16 %v1246_v48  ;;  %v3150_v56 = vshrl.u32 %v5060_v4, 16 }
 0x157   : > { %v2328_v34 = vpop.f32.mrf.mxu0  ;;  %v2480_v35 = vsel %vm5819_vm7, %v4914_v5, %v2479_v7  ;;  %v2239_v7 = vpack.c.b16 %v2222_v38, %v2221_v21  ;;  %v2175_v58 = vrot.slane %v2174_v8, 4  ;;  %v3153_v30 = vshll.u32 %v5060_v4, 16 }
 0x158   : > { %v1674_v60 = vpop.f32.mrf.mxu3  ;;  %4718 = vmatmul.msk.bf16.gmra.mxu2 %vm722_vm4, %v1295_v24  ;;  %v1036_v50 = vpop.f32.mrf.mxu1  ;;  %v4880_v24 = vld [vmem:[%s5633_s29 + $0xc8] sm:$0x1]  ;;  %v2591_v14 = vunpack.c.l.b16 %v2480_v35  ;;  %v2185_v28 = vrot.slane %v2184_v9, 4  ;;  %v3163_v38 = vshrl.u32 %v6267_v52, 16  ;;  %v3152_v8 = vrot.slane %v3150_v56, 4 }
 0x159   : > { %v1738_v61 = vadd.f32 %v1674_v60, %v1448_v51  ;;  %v2187_v5 = vshll.u32 %v4880_v24, 16  ;;  %v1037_v21 = vadd.f32 %v1036_v50, %v6007_v17  ;;  %v2180_v17 = vsel %vm5645_vm3, %v2175_v58, %v6244_v23  ;;  %v5062_v9 = vld [vmem:[%s5633_s29 + $0x20] sm:$0x1]  ;;  %v5063_v56 = vld [vmem:[%s5633_s29 + $0x24] sm:$0xf] }
 0x15a   : > { %v6260_v44 = vpack.c.b16 %v2592_v11, %v2591_v14  ;;  %v3155_v14 = vrot.slane %v3153_v30, 5  ;;  %v3169_v58 = vshll.u32 %v5062_v9, 16  ;;  %v6287_v30 = vld [vmem:[%s5633_s29 + $0x28] sm:$0xf] }
 0x15b   : > { %v1387_v20 = vpop.f32.mrf.mxu2  ;;  %v6263_v47 = vadd.f32 %v2328_v34, %v1738_v61  ;;  %v2189_v34 = vrot.slane %v2187_v5, 5  ;;  %v3159_v61 = vshll.u32 %v6267_v52, 16 }
 0x15c   : > { %v1449_v51 = vadd.f32 %v1387_v20, %v1035_v16  ;;  %v1279_v16 = vunpack.c.l.b16 %v1243_v53  ;;  %v3165_v53 = vrot.slane %v3163_v38, 4  ;;  %v3171_v38 = vrot.slane %v3169_v58, 5 }
 0x15d   : > { %4831 = vmatmul.msk.bf16.gmra.mxu3 %vm722_vm4, %v5209_v27  ;;  %v2190_v50 = vsel %vm5645_vm3, %v2185_v28, %v2189_v34  ;;  %v3161_v11 = vrot.slane %v3159_v61, 5 }
 0x15e   : > { %v1296_v3 = vpack.c.b16 %v1280_v41, %v1279_v16  ;;  %v3156_v16 = vor.u32 %v3155_v14, %v3152_v8  ;;  %v3177_v8 = vshll.u32 %v5063_v56, 16  ;;  %v3183_v14 = vshll.u32 %v6287_v30, 16 }
 0x15f   : > { %v2331_v60 = vpop.f32.mrf.mxu0  ;;  %v3166_v41 = vor.u32 %v3165_v53, %v3161_v11 }
 0x160   : > { %v1677_v19 = vpop.f32.mrf.mxu3  ;;  %v1039_v27 = vpop.f32.mrf.mxu1  ;;  %v3157_v34 = vrot.slane %v3156_v16, 4 }
 0x161   : > { %v1739_v20 = vadd.f32 %v1677_v19, %v1449_v51  ;;  %v2224_v19 = vunpack.c.l.b16 %v2190_v50  ;;  %v1040_v23 = vadd.f32 %v1039_v27, %v6030_v2  ;;  %v3167_v61 = vrot.slane %v3166_v41, 4 }
 0x162   : > { %4896 = vmatmul.msk.bf16.gmra.mxu0 %vm722_vm4, %v2239_v7 }
 0x163   : > { %v1389_v24 = vpop.f32.mrf.mxu2  ;;  %4686 = vmatmul.msk.bf16.gmra.mxu1 %vm722_vm4, %v5194_v62  ;;  %v6274_v51 = vadd.f32 %v2331_v60, %v1739_v20  ;;  %v5210_v60 = vld [vmem:[%s5633_s29 + $0xc0] sm:$0xff]  ;;  %v2223_v62 = vunpack.c.l.b16 %v2180_v17  ;;  %v3187_v17 = vshrl.u32 %v6287_v30, 16  ;;  %v3172_v41 = vsel %vm5645_vm3, %v3167_v61, %v3171_v38  ;;  %v6313_v38 = vld [vmem:[%s5633_s29 + $0x2c] sm:$0x1] }
 0x164   : > { %v1450_v35 = vadd.f32 %v1389_v24, %v1037_v21  ;;  %v5125_v24 = vld [vmem:[%s5633_s29 + $0x18] sm:$0xe]  ;;  %v3536_v61 = vunpack.c.l.b16 %v3172_v41 }
 0x165   : > { %v2240_v21 = vpack.c.b16 %v2224_v19, %v2223_v62  ;;  %v5355_v62 = vld [vmem:[%s5633_s29 + $0x20] sm:$0x1] }
 0x166   : > { %v2489_v19 = vrot.slane %v5355_v62, 5 }
 0x167   : > { %v2333_v48 = vpop.f32.mrf.mxu0 }
 0x168   : > { %v1679_v7 = vpop.f32.mrf.mxu3  ;;  %4719 = vmatmul.msk.bf16.gmra.mxu2 %vm722_vm4, %v1296_v3  ;;  %v1041_v5 = vpop.f32.mrf.mxu1  ;;  %v3174_v3 = vshrl.u32 %v5063_v56, 16 }
 0x169   : > { %v1740_v4 = vadd.f32 %v1679_v7, %v1450_v35  ;;  %v3821_v35 = vrot.slane %v6267_v52, 5  ;;  %v5354_v7 = vld [vmem:[%s5633_s29 + $0x1c] sm:$0xf]  ;;  %v3162_v52 = vsel %vm5645_vm3, %v3157_v34, %v3161_v11  ;;  %v3189_v11 = vrot.slane %v3187_v17, 4 }
 0x16b   : > { %v1392_v20 = vpop.f32.mrf.mxu2  ;;  %v6292_v2 = vadd.f32 %v2333_v48, %v1740_v4  ;;  %v5141_v48 = vrot.slane %v5125_v24, 9  ;;  %v4899_v4 = vld [vmem:[%s5633_s29 + $0x18] sm:$0xe]  ;;  %v3823_v58 = vrot.slane %v3821_v35, 4 }
 0x16c   : > { %v1451_v28 = vadd.f32 %v1392_v20, %v1040_v23  ;;  %v1042_v23 = vadd.f32 %v1041_v5, %v6050_v29  ;;  %v3824_v20 = vrot.slane %v5062_v9, 5  ;;  %v5211_v24 = vld [vmem:[%s5633_s29 + $0x18] sm:$0xff]  ;;  %v3535_v5 = vunpack.c.l.b16 %v3162_v52 }
 0x16d   : > { %4832 = vmatmul.msk.bf16.gmra.mxu3 %vm722_vm4, %v5210_v60  ;;  %7188 = vst [vmem:[#allocation10_spill] sm:$0xff] %v6292_v2  ;;  %v2486_v60 = vrot.slane %v5354_v7, 5  ;;  %v6307_v7 = vrot.slane %v3183_v14, 5  ;;  %v3822_v2 = vsel %vm5819_vm7, %v5141_v48, %v3821_v35  ;;  %v3193_v35 = vshll.u32 %v6313_v38, 16 }
 0x16e   : > { %v3567_v48 = vpack.c.b16 %v3536_v61, %v3535_v5  ;;  %v5356_v5 = vld [vmem:[%s5633_s29 + $0x28] sm:$0xf] }
 0x16f   : > { %v2336_v27 = vpop.f32.mrf.mxu0  ;;  %v2488_v62 = vrot.slane %v2486_v60, 4  ;;  %v2493_v61 = vrot.slane %v5356_v5, 5 }
 0x170   : > { %v1682_v50 = vpop.f32.mrf.mxu3  ;;  %v1044_v53 = vpop.f32.mrf.mxu1 }
 0x171   : > { %v1741_v16 = vadd.f32 %v1682_v50, %v1451_v28  ;;  %v3176_v28 = vrot.slane %v3174_v3, 4  ;;  %v3179_v50 = vrot.slane %v3177_v8, 5  ;;  %v2490_v17 = vsel %vm5819_vm7, %v2488_v62, %v2489_v19  ;;  %v6332_v62 = vld [vmem:[%s5633_s29 + $0x34] sm:$0xf] }
 0x172   : > { %4897 = vmatmul.msk.bf16.gmra.mxu0 %vm722_vm4, %v2240_v21  ;;  %v4915_v21 = vrot.slane %v4899_v4, 9  ;;  %v1045_v4 = vadd.f32 %v1044_v53, %v5932_v37 }
 0x173   : > { %v1394_v56 = vpop.f32.mrf.mxu2  ;;  %4931 = vmatmul.msk.bf16.vlgmr.msra.gmra.mxu1 %vm722_vm4, %v6260_v44  ;;  %v6310_v29 = vadd.f32 %v2336_v27, %v1741_v16  ;;  %v3825_v44 = vsel %vm5819_vm7, %v3823_v58, %v3824_v20  ;;  %v3180_v3 = vor.u32 %v3179_v50, %v3176_v28  ;;  %v3190_v16 = vor.u32 %v3189_v11, %v6307_v7  ;;  %v5126_v11 = vld [vmem:[%s5633_s29 + $0x24] sm:$0xe] }
 0x174   : > { %v1452_v34 = vadd.f32 %v1394_v56, %v1042_v23  ;;  %v2487_v27 = vsel %vm5819_vm7, %v4915_v21, %v2486_v60  ;;  %v3933_v23 = vunpack.c.l.b16 %v3822_v2  ;;  %v3934_v41 = vunpack.c.l.b16 %v3825_v44 }
 0x175   : > { %v2593_v20 = vunpack.c.l.b16 %v2487_v27  ;;  %v2594_v60 = vunpack.c.l.b16 %v2490_v17  ;;  %v3181_v28 = vrot.slane %v3180_v3, 4  ;;  %v3191_v19 = vrot.slane %v3190_v16, 4 }
 0x176   : > { %v3195_v50 = vrot.slane %v3193_v35, 5  ;;  %v3828_v21 = vrot.slane %v6287_v30, 5  ;;  %v5142_v17 = vrot.slane %v5126_v11, 9  ;;  %v4900_v30 = vld [vmem:[%s5633_s29 + $0x24] sm:$0xe] }
 0x177   : > { %v2338_v9 = vpop.f32.mrf.mxu0  ;;  %v2624_v53 = vpack.c.b16 %v2594_v60, %v2593_v20 }
 0x178   : > { %v1684_v8 = vpop.f32.mrf.mxu3  ;;  %5044 = vmatmul.msk.bf16.vlgmr.msra.gmra.mxu2 %vm722_vm4, %v5211_v24  ;;  %v1046_v14 = vpop.f32.mrf.mxu1  ;;  %v5066_v24 = vld [vmem:[%s5633_s29 + $0x30] sm:$0xf]  ;;  %v3196_v27 = vsel %vm5645_vm3, %v3191_v19, %v3195_v50  ;;  %v5212_v50 = vld [vmem:[%s5633_s29 + $0x24] sm:$0xff] }
 0x179   : > { %v1742_v52 = vadd.f32 %v1684_v8, %v1452_v34  ;;  %v3965_v34 = vpack.c.b16 %v3934_v41, %v3933_v23  ;;  %v3186_v8 = vsel %vm5645_vm3, %v3181_v28, %v6307_v7  ;;  %v3198_v16 = vshrl.u32 %v5066_v24, 16  ;;  %v5357_v41 = vld [vmem:[%s5633_s29 + $0x2c] sm:$0x1] }
 0x17a   : > { %v3830_v23 = vrot.slane %v3828_v21, 4  ;;  %v3831_v7 = vrot.slane %v6313_v38, 5  ;;  %v3537_v60 = vunpack.c.l.b16 %v3186_v8  ;;  %v2495_v28 = vrot.slane %v2493_v61, 4 }
 0x17b   : > { %v1397_v58 = vpop.f32.mrf.mxu2  ;;  %v6334_v37 = vadd.f32 %v2338_v9, %v1742_v52  ;;  %v3201_v9 = vshll.u32 %v5066_v24, 16  ;;  %v3207_v52 = vshll.u32 %v6332_v62, 16  ;;  %v3538_v11 = vunpack.c.l.b16 %v3196_v27 }
 0x17c   : > { %v1453_v56 = vadd.f32 %v1397_v58, %v1045_v4  ;;  %v1047_v4 = vadd.f32 %v1046_v14, %v5953_v63  ;;  %v2496_v58 = vrot.slane %v5357_v41, 5  ;;  %v3829_v24 = vsel %vm5819_vm7, %v5142_v17, %v3828_v21 }
 0x17d   : > { %5109 = vmatmul.msk.bf16.vlgmr.msra.gmra.mxu3 %vm722_vm4, %v3567_v48  ;;  %v3211_v48 = vshrl.u32 %v6332_v62, 16  ;;  %v3200_v63 = vrot.slane %v3198_v16, 4  ;;  %v3203_v14 = vrot.slane %v3201_v9, 5  ;;  %v6355_v38 = vrot.slane %v3207_v52, 5 }
 0x17e   : > { %v2497_v27 = vsel %vm5819_vm7, %v2495_v28, %v2496_v58  ;;  %v3935_v17 = vunpack.c.l.b16 %v3829_v24  ;;  %v5127_v24 = vld [vmem:[%s5633_s29 + $0x30] sm:$0xe] }
 0x17f   : > { %v2341_v2 = vpop.f32.mrf.mxu0  ;;  %v3213_v5 = vrot.slane %v3211_v48, 4  ;;  %v3204_v52 = vor.u32 %v3203_v14, %v3200_v63 }
 0x180   : > { %v1687_v44 = vpop.f32.mrf.mxu3  ;;  %v1049_v3 = vpop.f32.mrf.mxu1 }
 0x181   : > { %v1743_v35 = vadd.f32 %v1687_v44, %v1453_v56  ;;  %v4916_v56 = vrot.slane %v4900_v30, 9  ;;  %v6364_v30 = vld [vmem:[%s5633_s29 + $0x38] sm:$0x1]  ;;  %v3214_v48 = vor.u32 %v3213_v5, %v6355_v38  ;;  %v3205_v28 = vrot.slane %v3204_v52, 4 }
 0x182   : > { %5158 = vmatmul.msk.bf16.vlgmr.msra.gmra.mxu0 %vm722_vm4, %v3965_v34 }
 0x183   : > { %v1399_v20 = vpop.f32.mrf.mxu2  ;;  %4932 = vmatmul.msk.bf16.gmra.mxu1 %vm722_vm4, %v2624_v53  ;;  %v6353_v34 = vadd.f32 %v2341_v2, %v1743_v35  ;;  %v3832_v53 = vsel %vm5819_vm7, %v3830_v23, %v3831_v7  ;;  %v2494_v8 = vsel %vm5819_vm7, %v4916_v56, %v2493_v61  ;;  %v3568_v2 = vpack.c.b16 %v3538_v11, %v3537_v60  ;;  %v6372_v56 = vld [vmem:[%s5633_s29 + $0x40] sm:$0xf] }
 0x184   : > { %v1454_v19 = vadd.f32 %v1399_v20, %v1047_v4  ;;  %v3936_v9 = vunpack.c.l.b16 %v3832_v53  ;;  %v1050_v61 = vadd.f32 %v1049_v3, %v5970_v22  ;;  %v2595_v4 = vunpack.c.l.b16 %v2494_v8  ;;  %v5069_v20 = vld [vmem:[%s5633_s29 + $0x3c] sm:$0xf] }
 0x185   : > { %v2596_v23 = vunpack.c.l.b16 %v2497_v27  ;;  %v3217_v7 = vshll.u32 %v6364_v30, 16  ;;  %v3835_v22 = vrot.slane %v6332_v62, 5  ;;  %v3222_v14 = vshrl.u32 %v5069_v20, 16 }
 0x186   : > { %v3966_v60 = vpack.c.b16 %v3936_v9, %v3935_v17  ;;  %v3225_v5 = vshll.u32 %v5069_v20, 16  ;;  %v3231_v53 = vshll.u32 %v6372_v56, 16  ;;  %v3235_v8 = vshrl.u32 %v6372_v56, 16  ;;  %v5359_v9 = vld [vmem:[%s5633_s29 + $0x38] sm:$0x1] }
 0x187   : > { %v2343_v44 = vpop.f32.mrf.mxu0  ;;  %v3219_v11 = vrot.slane %v3217_v7, 5  ;;  %v2503_v52 = vrot.slane %v5359_v9, 5  ;;  %v3838_v62 = vrot.slane %v6364_v30, 5  ;;  %v3837_v7 = vrot.slane %v3835_v22, 4  ;;  %v6399_v9 = vld [vmem:[%s5633_s29 + $0x44] sm:$0x1] }
 0x188   : > { %v1689_v21 = vpop.f32.mrf.mxu3  ;;  %5045 = vmatmul.msk.bf16.gmra.mxu2 %vm722_vm4, %v5212_v50  ;;  %v1051_v16 = vpop.f32.mrf.mxu1  ;;  %v2625_v50 = vpack.c.b16 %v2596_v23, %v2595_v4  ;;  %v3210_v4 = vsel %vm5645_vm3, %v3205_v28, %v6355_v38  ;;  %v3227_v20 = vrot.slane %v3225_v5, 5  ;;  %v6393_v30 = vrot.slane %v3231_v53, 5 }
 0x189   : > { %v1744_v35 = vadd.f32 %v1689_v21, %v1454_v19  ;;  %v3215_v19 = vrot.slane %v3214_v48, 4  ;;  %v3539_v38 = vunpack.c.l.b16 %v3210_v4 }
 0x18b   : > { %v1402_v41 = vpop.f32.mrf.mxu2  ;;  %v6377_v3 = vadd.f32 %v2343_v44, %v1744_v35  ;;  %v4901_v44 = vld [vmem:[%s5633_s29 + $0x30] sm:$0xe]  ;;  %v1052_v35 = vadd.f32 %v1051_v16, %v5991_v55  ;;  %v3220_v23 = vsel %vm5645_vm3, %v3215_v19, %v3219_v11 }
 0x18c   : > { %v1455_v58 = vadd.f32 %v1402_v41, %v1050_v61  ;;  %v5143_v61 = vrot.slane %v5127_v24, 9  ;;  %v3237_v24 = vrot.slane %v3235_v8, 4  ;;  %v4917_v55 = vrot.slane %v4901_v44, 9 }
 0x18d   : > { %5110 = vmatmul.msk.bf16.gmra.mxu3 %vm722_vm4, %v3568_v2  ;;  %v5358_v2 = vld [vmem:[%s5633_s29 + $0x34] sm:$0xf]  ;;  %v3540_v28 = vunpack.c.l.b16 %v3220_v23 }
 0x18e   : > { %v2500_v17 = vrot.slane %v5358_v2, 5  ;;  %v3836_v11 = vsel %vm5819_vm7, %v5143_v61, %v3835_v22  ;;  %v3241_v22 = vshll.u32 %v6399_v9, 16 }
 0x18f   : > { %v2346_v63 = vpop.f32.mrf.mxu0  ;;  %v3569_v44 = vpack.c.b16 %v3540_v28, %v3539_v38  ;;  %v5360_v28 = vld [vmem:[%s5633_s29 + $0x40] sm:$0xf] }
 0x190   : > { %v1692_v27 = vpop.f32.mrf.mxu3  ;;  %v1054_v21 = vpop.f32.mrf.mxu1  ;;  %v2502_v16 = vrot.slane %v2500_v17, 4 }
 0x191   : > { %v1745_v48 = vadd.f32 %v1692_v27, %v1455_v58  ;;  %v3224_v58 = vrot.slane %v3222_v14, 4  ;;  %v5213_v27 = vld [vmem:[%s5633_s29 + $0x30] sm:$0xff] }
 0x192   : > { %5159 = vmatmul.msk.bf16.gmra.mxu0 %vm722_vm4, %v3966_v60  ;;  %v2504_v8 = vsel %vm5819_vm7, %v2502_v16, %v2503_v52  ;;  %v6418_v16 = vld [vmem:[%s5633_s29 + $0x4c] sm:$0xf] }
 0x193   : > { %v1404_v41 = vpop.f32.mrf.mxu2  ;;  %4933 = vmatmul.msk.bf16.gmra.mxu1 %vm722_vm4, %v2625_v50  ;;  %v6396_v2 = vadd.f32 %v2346_v63, %v1745_v48  ;;  %v3839_v50 = vsel %vm5819_vm7, %v3837_v7, %v3838_v62  ;;  %v3228_v14 = vor.u32 %v3227_v20, %v3224_v58  ;;  %v2501_v63 = vsel %vm5819_vm7, %v4917_v55, %v2500_v17 }
 0x194   : > { %v1456_v60 = vadd.f32 %v1404_v41, %v1052_v35  ;;  %v3238_v48 = vor.u32 %v3237_v24, %v6393_v30  ;;  %v1055_v62 = vadd.f32 %v1054_v21, %v6014_v26  ;;  %v3937_v35 = vunpack.c.l.b16 %v3836_v11  ;;  %v5128_v24 = vld [vmem:[%s5633_s29 + $0x3c] sm:$0xe] }
 0x195   : > { %v3938_v4 = vunpack.c.l.b16 %v3839_v50  ;;  %v2597_v7 = vunpack.c.l.b16 %v2501_v63  ;;  %v2598_v17 = vunpack.c.l.b16 %v2504_v8  ;;  %v3229_v58 = vrot.slane %v3228_v14, 4 }
 0x196   : > { %v3239_v52 = vrot.slane %v3238_v48, 4  ;;  %v3243_v20 = vrot.slane %v3241_v22, 5  ;;  %v3842_v55 = vrot.slane %v6372_v56, 5  ;;  %v2507_v11 = vrot.slane %v5360_v28, 5  ;;  %v4902_v56 = vld [vmem:[%s5633_s29 + $0x3c] sm:$0xe] }
 0x197   : > { %v2348_v19 = vpop.f32.mrf.mxu0  ;;  %v2626_v38 = vpack.c.b16 %v2598_v17, %v2597_v7  ;;  %v5144_v8 = vrot.slane %v5128_v24, 9 }
 0x198   : > { %v1694_v5 = vpop.f32.mrf.mxu3  ;;  %5046 = vmatmul.msk.bf16.gmra.mxu2 %vm722_vm4, %v5213_v27  ;;  %v1056_v53 = vpop.f32.mrf.mxu1  ;;  %v5072_v27 = vld [vmem:[%s5633_s29 + $0x48] sm:$0xf]  ;;  %v3244_v63 = vsel %vm5645_vm3, %v3239_v52, %v3243_v20  ;;  %v5214_v20 = vld [vmem:[%s5633_s29 + $0x3c] sm:$0xff] }
 0x199   : > { %v1746_v61 = vadd.f32 %v1694_v5, %v1456_v60  ;;  %v3967_v60 = vpack.c.b16 %v3938_v4, %v3937_v35  ;;  %v3234_v5 = vsel %vm5645_vm3, %v3229_v58, %v6393_v30  ;;  %v3246_v48 = vshrl.u32 %v5072_v27, 16  ;;  %v5361_v4 = vld [vmem:[%s5633_s29 + $0x44] sm:$0x1] }
 0x19a   : > { %v3844_v35 = vrot.slane %v3842_v55, 4  ;;  %v3845_v30 = vrot.slane %v6399_v9, 5  ;;  %v3541_v17 = vunpack.c.l.b16 %v3234_v5  ;;  %v2509_v58 = vrot.slane %v2507_v11, 4 }
 0x19b   : > { %v1407_v23 = vpop.f32.mrf.mxu2  ;;  %v6420_v26 = vadd.f32 %v2348_v19, %v1746_v61  ;;  %v3249_v19 = vshll.u32 %v5072_v27, 16  ;;  %v3255_v61 = vshll.u32 %v6418_v16, 16  ;;  %v3542_v24 = vunpack.c.l.b16 %v3244_v63 }
 0x19c   : > { %v1457_v41 = vadd.f32 %v1407_v23, %v1055_v62  ;;  %v1057_v62 = vadd.f32 %v1056_v53, %v6032_v43  ;;  %v2510_v23 = vrot.slane %v5361_v4, 5  ;;  %v3843_v27 = vsel %vm5819_vm7, %v5144_v8, %v3842_v55 }
 0x19d   : > { %5111 = vmatmul.msk.bf16.gmra.mxu3 %vm722_vm4, %v3569_v44  ;;  %v3259_v44 = vshrl.u32 %v6418_v16, 16  ;;  %v3248_v43 = vrot.slane %v3246_v48, 4  ;;  %v3251_v53 = vrot.slane %v3249_v19, 5  ;;  %v6441_v9 = vrot.slane %v3255_v61, 5 }
 0x19e   : > { %v2511_v63 = vsel %vm5819_vm7, %v2509_v58, %v2510_v23  ;;  %v3939_v8 = vunpack.c.l.b16 %v3843_v27  ;;  %v5129_v27 = vld [vmem:[%s5633_s29 + $0x48] sm:$0xe] }
 0x19f   : > { %v2351_v21 = vpop.f32.mrf.mxu0  ;;  %v3261_v28 = vrot.slane %v3259_v44, 4  ;;  %v3252_v61 = vor.u32 %v3251_v53, %v3248_v43 }
 0x1a0   : > { %v1697_v50 = vpop.f32.mrf.mxu3  ;;  %v1059_v14 = vpop.f32.mrf.mxu1 }
 0x1a1   : > { %v1747_v22 = vadd.f32 %v1697_v50, %v1457_v41  ;;  %v4918_v41 = vrot.slane %v4902_v56, 9  ;;  %v6450_v56 = vld [vmem:[%s5633_s29 + $0x50] sm:$0x1]  ;;  %v3262_v44 = vor.u32 %v3261_v28, %v6441_v9  ;;  %v3253_v58 = vrot.slane %v3252_v61, 4 }
 0x1a2   : > { %5160 = vmatmul.msk.bf16.gmra.mxu0 %vm722_vm4, %v3967_v60 }
 0x1a3   : > { %v1409_v7 = vpop.f32.mrf.mxu2  ;;  %4934 = vmatmul.msk.bf16.gmra.mxu1 %vm722_vm4, %v2626_v38  ;;  %v6439_v60 = vadd.f32 %v2351_v21, %v1747_v22  ;;  %v3846_v38 = vsel %vm5819_vm7, %v3844_v35, %v3845_v30  ;;  %v2508_v5 = vsel %vm5819_vm7, %v4918_v41, %v2507_v11  ;;  %v3570_v21 = vpack.c.b16 %v3542_v24, %v3541_v17  ;;  %v6458_v41 = vld [vmem:[%s5633_s29 + $0x58] sm:$0xf] }
 0x1a4   : > { %v1458_v52 = vadd.f32 %v1409_v7, %v1057_v62  ;;  %v3940_v19 = vunpack.c.l.b16 %v3846_v38  ;;  %v1060_v11 = vadd.f32 %v1059_v14, %v6053_v40  ;;  %v2599_v62 = vunpack.c.l.b16 %v2508_v5  ;;  %v5075_v7 = vld [vmem:[%s5633_s29 + $0x54] sm:$0xf] }
 0x1a5   : > { %v2600_v35 = vunpack.c.l.b16 %v2511_v63  ;;  %v3265_v30 = vshll.u32 %v6450_v56, 16  ;;  %v3849_v40 = vrot.slane %v6418_v16, 5  ;;  %v3270_v53 = vshrl.u32 %v5075_v7, 16 }
 0x1a6   : > { %v3968_v17 = vpack.c.b16 %v3940_v19, %v3939_v8  ;;  %v3273_v28 = vshll.u32 %v5075_v7, 16  ;;  %v3279_v38 = vshll.u32 %v6458_v41, 16  ;;  %v3283_v5 = vshrl.u32 %v6458_v41, 16  ;;  %v5363_v19 = vld [vmem:[%s5633_s29 + $0x50] sm:$0x1] }
 0x1a7   : > { %v2353_v50 = vpop.f32.mrf.mxu0  ;;  %v3267_v24 = vrot.slane %v3265_v30, 5  ;;  %v2517_v61 = vrot.slane %v5363_v19, 5  ;;  %v3852_v16 = vrot.slane %v6450_v56, 5  ;;  %v3851_v30 = vrot.slane %v3849_v40, 4  ;;  %v6485_v19 = vld [vmem:[%s5633_s29 + $0x5c] sm:$0x1] }
 0x1a8   : > { %v1699_v55 = vpop.f32.mrf.mxu3  ;;  %5047 = vmatmul.msk.bf16.gmra.mxu2 %vm722_vm4, %v5214_v20  ;;  %v1061_v48 = vpop.f32.mrf.mxu1  ;;  %v2627_v20 = vpack.c.b16 %v2600_v35, %v2599_v62  ;;  %v3258_v62 = vsel %vm5645_vm3, %v3253_v58, %v6441_v9  ;;  %v3275_v7 = vrot.slane %v3273_v28, 5  ;;  %v6479_v56 = vrot.slane %v3279_v38, 5 }
 0x1a9   : > { %v1748_v22 = vadd.f32 %v1699_v55, %v1458_v52  ;;  %v3263_v52 = vrot.slane %v3262_v44, 4  ;;  %v3543_v9 = vunpack.c.l.b16 %v3258_v62 }
 0x1ab   : > { %v1412_v4 = vpop.f32.mrf.mxu2  ;;  %v6463_v14 = vadd.f32 %v2353_v50, %v1748_v22  ;;  %v4903_v50 = vld [vmem:[%s5633_s29 + $0x48] sm:$0xe]  ;;  %v1062_v22 = vadd.f32 %v1061_v48, %v6068_v10  ;;  %v3268_v35 = vsel %vm5645_vm3, %v3263_v52, %v3267_v24 }
 0x1ac   : > { %v1459_v23 = vadd.f32 %v1412_v4, %v1060_v11  ;;  %v5145_v11 = vrot.slane %v5129_v27, 9  ;;  %v3285_v27 = vrot.slane %v3283_v5, 4  ;;  %v4919_v10 = vrot.slane %v4903_v50, 9 }
 0x1ad   : > { %5112 = vmatmul.msk.bf16.gmra.mxu3 %vm722_vm4, %v3570_v21  ;;  %v5362_v21 = vld [vmem:[%s5633_s29 + $0x4c] sm:$0xf]  ;;  %v3544_v58 = vunpack.c.l.b16 %v3268_v35 }
 0x1ae   : > { %v2514_v8 = vrot.slane %v5362_v21, 5  ;;  %v3850_v24 = vsel %vm5819_vm7, %v5145_v11, %v3849_v40  ;;  %v3289_v40 = vshll.u32 %v6485_v19, 16 }
 0x1af   : > { %v2356_v43 = vpop.f32.mrf.mxu0  ;;  %v3571_v50 = vpack.c.b16 %v3544_v58, %v3543_v9  ;;  %v5364_v58 = vld [vmem:[%s5633_s29 + $0x58] sm:$0xf] }
 0x1b0   : > { %v1702_v63 = vpop.f32.mrf.mxu3  ;;  %v1064_v55 = vpop.f32.mrf.mxu1  ;;  %v2516_v48 = vrot.slane %v2514_v8, 4 }
 0x1b1   : > { %v1749_v44 = vadd.f32 %v1702_v63, %v1459_v23  ;;  %v3272_v23 = vrot.slane %v3270_v53, 4  ;;  %v5215_v63 = vld [vmem:[%s5633_s29 + $0x48] sm:$0xff] }
 0x1b2   : > { %5161 = vmatmul.msk.bf16.gmra.mxu0 %vm722_vm4, %v3968_v17  ;;  %v2518_v5 = vsel %vm5819_vm7, %v2516_v48, %v2517_v61  ;;  %v6504_v48 = vld [vmem:[%s5633_s29 + $0x64] sm:$0xf] }
 0x1b3   : > { %v1414_v4 = vpop.f32.mrf.mxu2  ;;  %4935 = vmatmul.msk.bf16.gmra.mxu1 %vm722_vm4, %v2627_v20  ;;  %v6482_v21 = vadd.f32 %v2356_v43, %v1749_v44  ;;  %v3853_v20 = vsel %vm5819_vm7, %v3851_v30, %v3852_v16  ;;  %v3276_v53 = vor.u32 %v3275_v7, %v3272_v23  ;;  %v2515_v43 = vsel %vm5819_vm7, %v4919_v10, %v2514_v8 }
 0x1b4   : > { %v1460_v17 = vadd.f32 %v1414_v4, %v1062_v22  ;;  %v3286_v44 = vor.u32 %v3285_v27, %v6479_v56  ;;  %v1065_v16 = vadd.f32 %v1064_v55, %v5944_v49  ;;  %v3941_v22 = vunpack.c.l.b16 %v3850_v24  ;;  %v5130_v27 = vld [vmem:[%s5633_s29 + $0x54] sm:$0xe] }
 0x1b5   : > { %v3942_v62 = vunpack.c.l.b16 %v3853_v20  ;;  %v2601_v30 = vunpack.c.l.b16 %v2515_v43  ;;  %v2602_v8 = vunpack.c.l.b16 %v2518_v5  ;;  %v3277_v23 = vrot.slane %v3276_v53, 4 }
 0x1b6   : > { %v3287_v61 = vrot.slane %v3286_v44, 4  ;;  %v3291_v7 = vrot.slane %v3289_v40, 5  ;;  %v3856_v10 = vrot.slane %v6458_v41, 5  ;;  %v2521_v24 = vrot.slane %v5364_v58, 5  ;;  %v4904_v41 = vld [vmem:[%s5633_s29 + $0x54] sm:$0xe] }
 0x1b7   : > { %v2358_v52 = vpop.f32.mrf.mxu0  ;;  %v2628_v9 = vpack.c.b16 %v2602_v8, %v2601_v30  ;;  %v5146_v5 = vrot.slane %v5130_v27, 9 }
 0x1b8   : > { %v1704_v28 = vpop.f32.mrf.mxu3  ;;  %5048 = vmatmul.msk.bf16.gmra.mxu2 %vm722_vm4, %v5215_v63  ;;  %v1066_v38 = vpop.f32.mrf.mxu1  ;;  %v5078_v63 = vld [vmem:[%s5633_s29 + $0x60] sm:$0xf]  ;;  %v3292_v43 = vsel %vm5645_vm3, %v3287_v61, %v3291_v7  ;;  %v5216_v7 = vld [vmem:[%s5633_s29 + $0x54] sm:$0xff] }
 0x1b9   : > { %v1750_v11 = vadd.f32 %v1704_v28, %v1460_v17  ;;  %v3969_v17 = vpack.c.b16 %v3942_v62, %v3941_v22  ;;  %v3282_v28 = vsel %vm5645_vm3, %v3277_v23, %v6479_v56  ;;  %v3294_v44 = vshrl.u32 %v5078_v63, 16  ;;  %v5365_v62 = vld [vmem:[%s5633_s29 + $0x5c] sm:$0x1] }
 0x1ba   : > { %v3858_v22 = vrot.slane %v3856_v10, 4  ;;  %v3859_v56 = vrot.slane %v6485_v19, 5  ;;  %v3545_v8 = vunpack.c.l.b16 %v3282_v28  ;;  %v2523_v23 = vrot.slane %v2521_v24, 4 }
 0x1bb   : > { %v1417_v35 = vpop.f32.mrf.mxu2  ;;  %v6506_v49 = vadd.f32 %v2358_v52, %v1750_v11  ;;  %v3297_v52 = vshll.u32 %v5078_v63, 16  ;;  %v3303_v11 = vshll.u32 %v6504_v48, 16  ;;  %v3546_v27 = vunpack.c.l.b16 %v3292_v43 }
 0x1bc   : > { %v1461_v4 = vadd.f32 %v1417_v35, %v1065_v16  ;;  %v1067_v16 = vadd.f32 %v1066_v38, %v5963_v0  ;;  %v2524_v35 = vrot.slane %v5365_v62, 5  ;;  %v3857_v63 = vsel %vm5819_vm7, %v5146_v5, %v3856_v10 }
 0x1bd   : > { %5113 = vmatmul.msk.bf16.gmra.mxu3 %vm722_vm4, %v3571_v50  ;;  %v3307_v50 = vshrl.u32 %v6504_v48, 16  ;;  %v3296_v0 = vrot.slane %v3294_v44, 4  ;;  %v3299_v38 = vrot.slane %v3297_v52, 5  ;;  %v6527_v19 = vrot.slane %v3303_v11, 5 }
 0x1be   : > { %v2525_v43 = vsel %vm5819_vm7, %v2523_v23, %v2524_v35  ;;  %v3943_v5 = vunpack.c.l.b16 %v3857_v63  ;;  %v5131_v63 = vld [vmem:[%s5633_s29 + $0x60] sm:$0xe] }
 0x1bf   : > { %v2361_v55 = vpop.f32.mrf.mxu0  ;;  %v3309_v58 = vrot.slane %v3307_v50, 4  ;;  %v3300_v11 = vor.u32 %v3299_v38, %v3296_v0 }
 0x1c0   : > { %v1707_v20 = vpop.f32.mrf.mxu3  ;;  %v1069_v53 = vpop.f32.mrf.mxu1 }
 0x1c1   : > { %v1751_v40 = vadd.f32 %v1707_v20, %v1461_v4  ;;  %v4920_v4 = vrot.slane %v4904_v41, 9  ;;  %v6536_v41 = vld [vmem:[%s5633_s29 + $0x68] sm:$0x1]  ;;  %v3310_v50 = vor.u32 %v3309_v58, %v6527_v19  ;;  %v3301_v23 = vrot.slane %v3300_v11, 4 }
 0x1c2   : > { %5162 = vmatmul.msk.bf16.gmra.mxu0 %vm722_vm4, %v3969_v17 }
 0x1c3   : > { %v1419_v30 = vpop.f32.mrf.mxu2  ;;  %4936 = vmatmul.msk.bf16.gmra.mxu1 %vm722_vm4, %v2628_v9  ;;  %v6525_v17 = vadd.f32 %v2361_v55, %v1751_v40  ;;  %v3860_v9 = vsel %vm5819_vm7, %v3858_v22, %v3859_v56  ;;  %v2522_v28 = vsel %vm5819_vm7, %v4920_v4, %v2521_v24  ;;  %v3572_v55 = vpack.c.b16 %v3546_v27, %v3545_v8  ;;  %v6544_v4 = vld [vmem:[%s5633_s29 + $0x70] sm:$0xf] }
 0x1c4   : > { %v1462_v61 = vadd.f32 %v1419_v30, %v1067_v16  ;;  %v3944_v52 = vunpack.c.l.b16 %v3860_v9  ;;  %v1070_v24 = vadd.f32 %v1069_v53, %v5984_v39  ;;  %v2603_v16 = vunpack.c.l.b16 %v2522_v28  ;;  %v5081_v30 = vld [vmem:[%s5633_s29 + $0x6c] sm:$0xf] }
 0x1c5   : > { %v2604_v22 = vunpack.c.l.b16 %v2525_v43  ;;  %v3313_v56 = vshll.u32 %v6536_v41, 16  ;;  %v3863_v39 = vrot.slane %v6504_v48, 5  ;;  %v3318_v38 = vshrl.u32 %v5081_v30, 16 }
 0x1c6   : > { %v3970_v8 = vpack.c.b16 %v3944_v52, %v3943_v5  ;;  %v3321_v58 = vshll.u32 %v5081_v30, 16  ;;  %v3327_v9 = vshll.u32 %v6544_v4, 16  ;;  %v3331_v28 = vshrl.u32 %v6544_v4, 16  ;;  %v5367_v52 = vld [vmem:[%s5633_s29 + $0x68] sm:$0x1] }
 0x1c7   : > { %v2363_v20 = vpop.f32.mrf.mxu0  ;;  %v3315_v27 = vrot.slane %v3313_v56, 5  ;;  %v2531_v11 = vrot.slane %v5367_v52, 5  ;;  %v3866_v48 = vrot.slane %v6536_v41, 5  ;;  %v3865_v56 = vrot.slane %v3863_v39, 4 }
 0x1c8   : > { %v1709_v10 = vpop.f32.mrf.mxu3  ;;  %5049 = vmatmul.msk.bf16.gmra.mxu2 %vm722_vm4, %v5216_v7  ;;  %v1071_v44 = vpop.f32.mrf.mxu1  ;;  %v2629_v7 = vpack.c.b16 %v2604_v22, %v2603_v16  ;;  %v3306_v16 = vsel %vm5645_vm3, %v3301_v23, %v6527_v19  ;;  %v3323_v30 = vrot.slane %v3321_v58, 5  ;;  %v3329_v41 = vrot.slane %v3327_v9, 5  ;;  %v5083_v23 = vld [vmem:[%s5633_s29 + $0x74] sm:$0x1] }
 0x1c9   : > { %v1752_v40 = vadd.f32 %v1709_v10, %v1462_v61  ;;  %v3311_v61 = vrot.slane %v3310_v50, 4  ;;  %v3547_v52 = vunpack.c.l.b16 %v3306_v16 }
 0x1cb   : > { %v1422_v62 = vpop.f32.mrf.mxu2  ;;  %v6549_v53 = vadd.f32 %v2363_v20, %v1752_v40  ;;  %v4905_v20 = vld [vmem:[%s5633_s29 + $0x60] sm:$0xe]  ;;  %v1072_v40 = vadd.f32 %v1071_v44, %v6003_v6  ;;  %v3316_v22 = vsel %vm5645_vm3, %v3311_v61, %v3315_v27 }
 0x1cc   : > { %v1463_v35 = vadd.f32 %v1422_v62, %v1070_v24  ;;  %v5147_v24 = vrot.slane %v5131_v63, 9  ;;  %v3333_v63 = vrot.slane %v3331_v28, 4  ;;  %v3548_v19 = vunpack.c.l.b16 %v3316_v22 }
 0x1cd   : > { %5114 = vmatmul.msk.bf16.gmra.mxu3 %vm722_vm4, %v3572_v55  ;;  %7189 = vst [vmem:[#allocation11_spill] sm:$0xff] %v6549_v53  ;;  %v5366_v55 = vld [vmem:[%s5633_s29 + $0x64] sm:$0xf] }
 0x1ce   : > { %v2528_v5 = vrot.slane %v5366_v55, 5  ;;  %v4921_v55 = vrot.slane %v4905_v20, 9  ;;  %v3864_v61 = vsel %vm5819_vm7, %v5147_v24, %v3863_v39  ;;  %v3334_v28 = vor.u32 %v3333_v63, %v3329_v41  ;;  %v5084_v63 = vld [vmem:[%s5633_s29 + $0x78] sm:$0xf] }
 0x1cf   : > { %v2366_v0 = vpop.f32.mrf.mxu0  ;;  %v3573_v39 = vpack.c.b16 %v3548_v19, %v3547_v52 }
 0x1d0   : > { %v1712_v43 = vpop.f32.mrf.mxu3  ;;  %v1074_v10 = vpop.f32.mrf.mxu1  ;;  %v2530_v6 = vrot.slane %v2528_v5, 4 }
 0x1d1   : > { %v1753_v50 = vadd.f32 %v1712_v43, %v1463_v35  ;;  %v3320_v35 = vrot.slane %v3318_v38, 4  ;;  %v1075_v24 = vadd.f32 %v1074_v10, %v6022_v45  ;;  %v6584_v10 = vld [vmem:[%s5633_s29 + $0x7c] sm:$0xf] }
 0x1d2   : > { %5163 = vmatmul.msk.bf16.gmra.mxu0 %vm722_vm4, %v3970_v8  ;;  %v5217_v8 = vld [vmem:[%s5633_s29 + $0x60] sm:$0xff]  ;;  %v2532_v9 = vsel %vm5819_vm7, %v2530_v6, %v2531_v11 }
 0x1d3   : > { %v1424_v62 = vpop.f32.mrf.mxu2  ;;  %4937 = vmatmul.msk.bf16.gmra.mxu1 %vm722_vm4, %v2629_v7  ;;  %v6566_v44 = vadd.f32 %v2366_v0, %v1753_v50  ;;  %v3867_v7 = vsel %vm5819_vm7, %v3865_v56, %v3866_v48  ;;  %v3324_v27 = vor.u32 %v3323_v30, %v3320_v35  ;;  %v2529_v0 = vsel %vm5819_vm7, %v4921_v55, %v2528_v5  ;;  %v5132_v35 = vld [vmem:[%s5633_s29 + $0x6c] sm:$0xe] }
 0x1d4   : > { %v1464_v43 = vadd.f32 %v1424_v62, %v1072_v40  ;;  %v3337_v50 = vshll.u32 %v5083_v23, 16  ;;  %v3945_v48 = vunpack.c.l.b16 %v3864_v61  ;;  %v3946_v40 = vunpack.c.l.b16 %v3867_v7 }
 0x1d5   : > { %v2605_v22 = vunpack.c.l.b16 %v2529_v0  ;;  %v2606_v56 = vunpack.c.l.b16 %v2532_v9  ;;  %v3325_v62 = vrot.slane %v3324_v27, 4  ;;  %v3870_v5 = vrot.slane %v6544_v4, 5  ;;  %v4906_v0 = vld [vmem:[%s5633_s29 + $0x6c] sm:$0xe]  ;;  %v5368_v9 = vld [vmem:[%s5633_s29 + $0x70] sm:$0xf] }
 0x1d6   : > { %v3339_v11 = vrot.slane %v3337_v50, 5  ;;  %v5148_v45 = vrot.slane %v5132_v35, 9  ;;  %v3873_v61 = vrot.slane %v5083_v23, 5  ;;  %v3342_v50 = vshrl.u32 %v5084_v63, 16  ;;  %v5218_v35 = vld [vmem:[%s5633_s29 + $0x6c] sm:$0xff] }
 0x1d7   : > { %v2368_v53 = vpop.f32.mrf.mxu0  ;;  %v2630_v52 = vpack.c.b16 %v2606_v56, %v2605_v22  ;;  %v3330_v19 = vsel %vm5645_vm3, %v3325_v62, %v3329_v41  ;;  %v3872_v4 = vrot.slane %v3870_v5, 4  ;;  %v4922_v56 = vrot.slane %v4906_v0, 9 }
 0x1d8   : > { %v1714_v38 = vpop.f32.mrf.mxu3  ;;  %5050 = vmatmul.msk.bf16.gmra.mxu2 %vm722_vm4, %v5217_v8  ;;  %v1076_v58 = vpop.f32.mrf.mxu1  ;;  %v3335_v8 = vrot.slane %v3334_v28, 4  ;;  %v2535_v28 = vrot.slane %v5368_v9, 5  ;;  %v3549_v23 = vunpack.c.l.b16 %v3330_v19  ;;  %v5086_v19 = vld [vmem:[%s5633_s29 + $0x80] sm:$0x1] }
 0x1d9   : > { %v1754_v20 = vadd.f32 %v1714_v38, %v1464_v43  ;;  %v3971_v43 = vpack.c.b16 %v3946_v40, %v3945_v48  ;;  %v1077_v41 = vadd.f32 %v1076_v58, %v6045_v12  ;;  %v3874_v22 = vsel %vm5819_vm7, %v3872_v4, %v3873_v61 }
 0x1da   : > { %v3340_v38 = vsel %vm5645_vm3, %v3335_v8, %v3339_v11  ;;  %v5369_v8 = vld [vmem:[%s5633_s29 + $0x74] sm:$0x1]  ;;  %v3344_v12 = vrot.slane %v3342_v50, 4  ;;  %v3948_v61 = vunpack.c.l.b16 %v3874_v22 }
 0x1db   : > { %v1427_v16 = vpop.f32.mrf.mxu2  ;;  %v6586_v55 = vadd.f32 %v2368_v53, %v1754_v20  ;;  %v3345_v53 = vshll.u32 %v5084_v63, 16  ;;  %v3351_v20 = vshll.u32 %v6584_v10, 16  ;;  %v3550_v40 = vunpack.c.l.b16 %v3340_v38 }
 0x1dc   : > { %v1465_v30 = vadd.f32 %v1427_v16, %v1075_v24  ;;  %v3355_v24 = vshrl.u32 %v6584_v10, 16  ;;  %v3871_v16 = vsel %vm5819_vm7, %v5148_v45, %v3870_v5  ;;  %v2538_v11 = vrot.slane %v5369_v8, 5 }
 0x1dd   : > { %5115 = vmatmul.msk.bf16.gmra.mxu3 %vm722_vm4, %v3573_v39  ;;  %v3347_v58 = vrot.slane %v3345_v53, 5  ;;  %v3947_v5 = vunpack.c.l.b16 %v3871_v16  ;;  %v3574_v4 = vpack.c.b16 %v3550_v40, %v3549_v23  ;;  %v3361_v53 = vshll.u32 %v5086_v19, 16  ;;  %v5087_v16 = vld [vmem:[%s5633_s29 + $0x84] sm:$0xf] }
 0x1df   : > { %v2371_v6 = vpop.f32.mrf.mxu0  ;;  %v3348_v50 = vor.u32 %v3347_v58, %v3344_v12  ;;  %v3972_v22 = vpack.c.b16 %v3948_v61, %v3947_v5 }
 0x1e0   : > { %v1717_v7 = vpop.f32.mrf.mxu3  ;;  %v1079_v27 = vpop.f32.mrf.mxu1 }
 0x1e1   : > { %v1755_v39 = vadd.f32 %v1717_v7, %v1465_v30  ;;  %v2537_v30 = vrot.slane %v2535_v28, 4 }
 0x1e2   : > { %5164 = vmatmul.msk.bf16.gmra.mxu0 %vm722_vm4, %v3971_v43  ;;  %v6607_v43 = vrot.slane %v3351_v20, 5  ;;  %v1080_v20 = vadd.f32 %v1079_v27, %v6064_v59  ;;  %v3880_v27 = vrot.slane %v5086_v19, 5 }
 0x1e3   : > { %v1429_v48 = vpop.f32.mrf.mxu2  ;;  %4938 = vmatmul.msk.bf16.gmra.mxu1 %vm722_vm4, %v2630_v52  ;;  %v6605_v63 = vadd.f32 %v2371_v6, %v1755_v39  ;;  %v3357_v52 = vrot.slane %v3355_v24, 4  ;;  %v2536_v6 = vsel %vm5819_vm7, %v4922_v56, %v2535_v28  ;;  %v2539_v0 = vsel %vm5819_vm7, %v2537_v30, %v2538_v11  ;;  %v5133_v24 = vld [vmem:[%s5633_s29 + $0x78] sm:$0xe]  ;;  %v6621_v28 = vld [vmem:[%s5633_s29 + $0x88] sm:$0xf] }
 0x1e4   : > { %v1466_v62 = vadd.f32 %v1429_v48, %v1077_v41  ;;  %v3877_v41 = vrot.slane %v6584_v10, 5  ;;  %v2607_v48 = vunpack.c.l.b16 %v2536_v6  ;;  %v2608_v40 = vunpack.c.l.b16 %v2539_v0  ;;  %v4907_v6 = vld [vmem:[%s5633_s29 + $0x78] sm:$0xe]  ;;  %v5370_v0 = vld [vmem:[%s5633_s29 + $0x7c] sm:$0xf] }
 0x1e5   : > { %v3358_v39 = vor.u32 %v3357_v52, %v6607_v43  ;;  %v3349_v56 = vrot.slane %v3348_v50, 4  ;;  %v3363_v30 = vrot.slane %v3361_v53, 5  ;;  %v5149_v8 = vrot.slane %v5133_v24, 9 }
 0x1e6   : > { %v3879_v59 = vrot.slane %v3877_v41, 4  ;;  %v3366_v11 = vshrl.u32 %v5087_v16, 16  ;;  %v2631_v58 = vpack.c.b16 %v2608_v40, %v2607_v48  ;;  %v3369_v52 = vshll.u32 %v5087_v16, 16 }
 0x1e7   : > { %v2373_v7 = vpop.f32.mrf.mxu0  ;;  %v3375_v5 = vshll.u32 %v6621_v28, 16  ;;  %v2542_v50 = vrot.slane %v5370_v0, 5  ;;  %v3354_v19 = vsel %vm5645_vm3, %v3349_v56, %v6607_v43  ;;  %v4923_v43 = vrot.slane %v4907_v6, 9 }
 0x1e8   : > { %v1719_v45 = vpop.f32.mrf.mxu3  ;;  %5051 = vmatmul.msk.bf16.gmra.mxu2 %vm722_vm4, %v5218_v35  ;;  %v1081_v38 = vpop.f32.mrf.mxu1  ;;  %v3881_v24 = vsel %vm5819_vm7, %v3879_v59, %v3880_v27  ;;  %v3371_v48 = vrot.slane %v3369_v52, 5 }
 0x1e9   : > { %v1756_v9 = vadd.f32 %v1719_v45, %v1466_v62  ;;  %v3359_v62 = vrot.slane %v3358_v39, 4  ;;  %v3379_v45 = vshrl.u32 %v6621_v28, 16  ;;  %v6643_v40 = vrot.slane %v3375_v5, 5 }
 0x1ea   : > { %v2544_v56 = vrot.slane %v2542_v50, 4 }
 0x1eb   : > { %v1432_v23 = vpop.f32.mrf.mxu2  ;;  %v6624_v10 = vadd.f32 %v2373_v7, %v1756_v9  ;;  %v3364_v7 = vsel %vm5645_vm3, %v3359_v62, %v3363_v30  ;;  %v1082_v9 = vadd.f32 %v1081_v38, %v6081_v32  ;;  %v3381_v16 = vrot.slane %v3379_v45, 4  ;;  %v5371_v32 = vld [vmem:[%s5633_s29 + $0x80] sm:$0x1] }
 0x1ec   : > { %v1467_v35 = vadd.f32 %v1432_v23, %v1080_v20  ;;  %v3878_v20 = vsel %vm5819_vm7, %v5149_v8, %v3877_v41  ;;  %v2545_v38 = vrot.slane %v5371_v32, 5  ;;  %v3551_v41 = vunpack.c.l.b16 %v3354_v19  ;;  %v5089_v8 = vld [vmem:[%s5633_s29 + $0x8c] sm:$0x1] }
 0x1ed   : > { %5116 = vmatmul.msk.bf16.gmra.mxu3 %vm722_vm4, %v3574_v4  ;;  %v3552_v30 = vunpack.c.l.b16 %v3364_v7  ;;  %v3949_v27 = vunpack.c.l.b16 %v3878_v20  ;;  %v2543_v45 = vsel %vm5819_vm7, %v4923_v43, %v2542_v50  ;;  %v3884_v19 = vrot.slane %v6621_v28, 5  ;;  %v5134_v7 = vld [vmem:[%s5633_s29 + $0x84] sm:$0xe] }
 0x1ef   : > { %v2376_v12 = vpop.f32.mrf.mxu0  ;;  %v3575_v0 = vpack.c.b16 %v3552_v30, %v3551_v41 }
 0x1f0   : > { %v1722_v61 = vpop.f32.mrf.mxu3  ;;  %v2699_v4 = vpop.f32.mrf.mxu1 }
 0x1f1   : > { %v1757_v39 = vadd.f32 %v1722_v61, %v1467_v35  ;;  %v2779_v53 = vadd.f32 %v2699_v4, %v6098_v46  ;;  %v3368_v46 = vrot.slane %v3366_v11, 4  ;;  %v3950_v11 = vunpack.c.l.b16 %v3881_v24 }
 0x1f2   : > { %5165 = vmatmul.msk.bf16.gmra.mxu0 %vm722_vm4, %v3972_v22  ;;  %v5219_v22 = vld [vmem:[%s5633_s29 + $0x78] sm:$0xff]  ;;  %v3382_v61 = vor.u32 %v3381_v16, %v6643_v40  ;;  %v3385_v4 = vshll.u32 %v5089_v8, 16 }
 0x1f3   : > { %v1434_v23 = vpop.f32.mrf.mxu2  ;;  %4939 = vmatmul.msk.bf16.gmra.mxu1 %vm722_vm4, %v2631_v58  ;;  %v6647_v62 = vadd.f32 %v2376_v12, %v1757_v39  ;;  %v3372_v58 = vor.u32 %v3371_v48, %v3368_v46  ;;  %v2546_v12 = vsel %vm5819_vm7, %v2544_v56, %v2545_v38  ;;  %v3973_v20 = vpack.c.b16 %v3950_v11, %v3949_v27  ;;  %v6661_v48 = vld [vmem:[%s5633_s29 + $0x94] sm:$0xf] }
 0x1f4   : > { %v1468_v35 = vadd.f32 %v1434_v23, %v1082_v9  ;;  %v5090_v9 = vld [vmem:[%s5633_s29 + $0x90] sm:$0xf]  ;;  %v2609_v46 = vunpack.c.l.b16 %v2543_v45  ;;  %v2610_v23 = vunpack.c.l.b16 %v2546_v12  ;;  %v3387_v16 = vrot.slane %v3385_v4, 5  ;;  %v4908_v12 = vld [vmem:[%s5633_s29 + $0x84] sm:$0xe] }
 0x1f5   : > { %v3373_v43 = vrot.slane %v3372_v58, 4  ;;  %v3887_v56 = vrot.slane %v5089_v8, 5  ;;  %v3390_v28 = vshrl.u32 %v5090_v9, 16  ;;  %v3393_v32 = vshll.u32 %v5090_v9, 16 }
 0x1f6   : > { %v3399_v38 = vshll.u32 %v6661_v48, 16  ;;  %v3403_v41 = vshrl.u32 %v6661_v48, 16  ;;  %v2632_v11 = vpack.c.b16 %v2610_v23, %v2609_v46 }
 0x1f7   : > { %v2378_v59 = vpop.f32.mrf.mxu0  ;;  %v3378_v45 = vsel %vm5645_vm3, %v3373_v43, %v6643_v40  ;;  %v3395_v40 = vrot.slane %v3393_v32, 5 }
 0x1f8   : > { %v1724_v52 = vpop.f32.mrf.mxu3  ;;  %5052 = vmatmul.msk.bf16.gmra.mxu2 %vm722_vm4, %v5219_v22  ;;  %v2701_v5 = vpop.f32.mrf.mxu1  ;;  %v3383_v22 = vrot.slane %v3382_v61, 4  ;;  %v3405_v9 = vrot.slane %v3403_v41, 4 }
 0x1f9   : > { %v1758_v6 = vadd.f32 %v1724_v52, %v1468_v35  ;;  %v2780_v39 = vadd.f32 %v2701_v5, %v6111_v42  ;;  %v5150_v35 = vrot.slane %v5134_v7, 9  ;;  %v3886_v42 = vrot.slane %v3884_v19, 4 }
 0x1fa   : > { %v3388_v8 = vsel %vm5645_vm3, %v3383_v22, %v3387_v16  ;;  %v6681_v7 = vrot.slane %v3399_v38, 5  ;;  %v5220_v22 = vld [vmem:[%s5633_s29 + $0x84] sm:$0xff]  ;;  %v3553_v16 = vunpack.c.l.b16 %v3378_v45 }
 0x1fb   : > { %v2989_v24 = vpop.f32.mrf.mxu2  ;;  %v6666_v30 = vadd.f32 %v2378_v59, %v1758_v6  ;;  %v3885_v59 = vsel %vm5819_vm7, %v5150_v35, %v3884_v19  ;;  %v3888_v6 = vsel %vm5819_vm7, %v3886_v42, %v3887_v56  ;;  %v3554_v35 = vunpack.c.l.b16 %v3388_v8  ;;  %v5135_v8 = vld [vmem:[%s5633_s29 + $0x90] sm:$0xe] }
 0x1fc   : > { %v3069_v50 = vadd.f32 %v2989_v24, %v2779_v53  ;;  %v5372_v53 = vld [vmem:[%s5633_s29 + $0x88] sm:$0xf]  ;;  %v3951_v42 = vunpack.c.l.b16 %v3885_v59  ;;  %v3952_v56 = vunpack.c.l.b16 %v3888_v6 }
 0x1fd   : > { %5117 = vmatmul.msk.bf16.gmra.mxu3 %vm722_vm4, %v3575_v0  ;;  %7190 = vst [vmem:[#allocation12_spill] sm:$0xff] %v6666_v30  ;;  %v2549_v58 = vrot.slane %v5372_v53, 5  ;;  %v3392_v0 = vrot.slane %v3390_v28, 4 }
 0x1ff   : > { %v4041_v27 = vpop.f32.mrf.mxu0  ;;  %v2551_v23 = vrot.slane %v2549_v58, 4  ;;  %v3396_v41 = vor.u32 %v3395_v40, %v3392_v0 }
 0x200   : > { %v3643_v52 = vpop.f32.mrf.mxu3  ;;  %v2704_v5 = vpop.f32.mrf.mxu1 }
 0x201   : > { %v3723_v61 = vadd.f32 %v3643_v52, %v3069_v50  ;;  %v2781_v4 = vadd.f32 %v2704_v5, %v6124_v15  ;;  %v4924_v15 = vrot.slane %v4908_v12, 9  ;;  %v5373_v50 = vld [vmem:[%s5633_s29 + $0x8c] sm:$0x1]  ;;  %v3576_v5 = vpack.c.b16 %v3554_v35, %v3553_v16 }
 0x202   : > { %5166 = vmatmul.msk.bf16.gmra.mxu0 %vm722_vm4, %v3973_v20  ;;  %v2552_v19 = vrot.slane %v5373_v50, 5  ;;  %v5092_v20 = vld [vmem:[%s5633_s29 + $0x98] sm:$0x1]  ;;  %v3974_v12 = vpack.c.b16 %v3952_v56, %v3951_v42 }
 0x203   : > { %v6683_v24 = vadd.f32 %v4041_v27, %v3723_v61  ;;  %v2991_v46 = vpop.f32.mrf.mxu2  ;;  %4940 = vmatmul.msk.bf16.gmra.mxu1 %vm722_vm4, %v2632_v11  ;;  %v2550_v32 = vsel %vm5819_vm7, %v4924_v15, %v2549_v58  ;;  %v3406_v27 = vor.u32 %v3405_v9, %v6681_v7  ;;  %v3409_v53 = vshll.u32 %v5092_v20, 16  ;;  %v5093_v15 = vld [vmem:[%s5633_s29 + $0x9c] sm:$0xf] }
 0x204   : > { %v3070_v43 = vadd.f32 %v2991_v46, %v2780_v39  ;;  %v2553_v38 = vsel %vm5819_vm7, %v2551_v23, %v2552_v19  ;;  %v3891_v58 = vrot.slane %v6661_v48, 5  ;;  %v2611_v61 = vunpack.c.l.b16 %v2550_v32 }
 0x205   : > { %v2612_v59 = vunpack.c.l.b16 %v2553_v38  ;;  %v4291_v6 = vmul.f32 %v6683_v24, %v6683_v24  ;;  %v3397_v9 = vrot.slane %v3396_v41, 4  ;;  %v3407_v46 = vrot.slane %v3406_v27, 4 }
 0x206   : > { %v3411_v50 = vrot.slane %v3409_v53, 5  ;;  %v3894_v19 = vrot.slane %v5092_v20, 5  ;;  %v4220_v48 = vsel %vm4219_vm8, %v6683_v24, 0.0  ;;  %v3893_v35 = vrot.slane %v3891_v58, 4 }
 0x207   : > { %v4043_v28 = vpop.f32.mrf.mxu0  ;;  %v3414_v56 = vshrl.u32 %v5093_v15, 16  ;;  %v3417_v20 = vshll.u32 %v5093_v15, 16 }
 0x208   : > { %v3645_v11 = vpop.f32.mrf.mxu3  ;;  %5053 = vmatmul.msk.bf16.gmra.mxu2 %vm722_vm4, %v5220_v22  ;;  %v2706_v39 = vpop.f32.mrf.mxu1 }
 0x209   : > { %v3724_v52 = vadd.f32 %v3645_v11, %v3070_v43  ;;  %v2782_v45 = vadd.f32 %v2706_v39, %v6137_v13  ;;  %v5151_v13 = vrot.slane %v5135_v8, 9  ;;  %v6704_v43 = vld [vmem:[%s5633_s29 + $0xa0] sm:$0xf] }
 0x20a   : > { %v3423_v41 = vshll.u32 %v6704_v43, 16  ;;  %v3427_v27 = vshrl.u32 %v6704_v43, 16 }
 0x20b   : > { %v6700_v0 = vadd.f32 %v4043_v28, %v3724_v52  ;;  %v2994_v40 = vpop.f32.mrf.mxu2  ;;  %v4323_v28 = vsel %vm4219_vm8, %v4291_v6, 0.0  ;;  %v5374_v52 = vld [vmem:[%s5633_s29 + $0x94] sm:$0xf]  ;;  %v4909_v6 = vld [vmem:[%s5633_s29 + $0x90] sm:$0xe]  ;;  %v3892_v15 = vsel %vm5819_vm7, %v5151_v13, %v3891_v58 }
 0x20c   : > { %v3071_v23 = vadd.f32 %v2994_v40, %v2781_v4  ;;  %v2633_v4 = vpack.c.b16 %v2612_v59, %v2611_v61  ;;  %v3402_v59 = vsel %vm5645_vm3, %v3397_v9, %v6681_v7  ;;  %v3412_v40 = vsel %vm5645_vm3, %v3407_v46, %v3411_v50  ;;  %v6738_v58 = vld [vmem:[%s5633_s29 + $0xa4] sm:$0x1] }
 0x20d   : > { %v4221_v22 = vsel %vm4219_vm8, %v6700_v0, 0.0  ;;  %v4292_v16 = vmul.f32 %v6700_v0, %v6700_v0  ;;  %5118 = vmatmul.msk.bf16.gmra.mxu3 %vm722_vm4, %v3576_v5  ;;  %v2556_v5 = vrot.slane %v5374_v52, 5  ;;  %v3419_v7 = vrot.slane %v3417_v20, 5 }
 0x20e   : > { %v4222_v42 = vadd.f32 %v4221_v22, %v4220_v48  ;;  %v3416_v48 = vrot.slane %v3414_v56, 4  ;;  %v6733_v9 = vrot.slane %v3423_v41, 5  ;;  %v4925_v46 = vrot.slane %v4909_v6, 9 }
 0x20f   : > { %v4324_v32 = vsel %vm4219_vm8, %v4292_v16, 0.0  ;;  %v4046_v38 = vpop.f32.mrf.mxu0  ;;  %v2558_v50 = vrot.slane %v2556_v5, 4  ;;  %v3953_v20 = vunpack.c.l.b16 %v3892_v15 }
 0x210   : > { %v4325_v11 = vadd.f32 %v4324_v32, %v4323_v28  ;;  %v3648_v39 = vpop.f32.mrf.mxu3  ;;  %v2709_v53 = vpop.f32.mrf.mxu1  ;;  %v5221_v28 = vld [vmem:[%s5633_s29 + $0x90] sm:$0xff]  ;;  %v5375_v32 = vld [vmem:[%s5633_s29 + $0x98] sm:$0x1] }
 0x211   : > { %v3725_v8 = vadd.f32 %v3648_v39, %v3071_v23  ;;  %v2783_v61 = vadd.f32 %v2709_v53, %v6150_v57  ;;  %v3895_v23 = vsel %vm5819_vm7, %v3893_v35, %v3894_v19  ;;  %v2559_v39 = vrot.slane %v5375_v32, 5 }
 0x212   : > { %5167 = vmatmul.msk.bf16.gmra.mxu0 %vm722_vm4, %v3974_v12  ;;  %v3429_v12 = vrot.slane %v3427_v27, 4  ;;  %v3555_v35 = vunpack.c.l.b16 %v3402_v59  ;;  %v3954_v41 = vunpack.c.l.b16 %v3895_v23  ;;  %v3420_v27 = vor.u32 %v3419_v7, %v3416_v48 }
 0x213   : > { %v6730_v57 = vadd.f32 %v4046_v38, %v3725_v8  ;;  %v2996_v22 = vpop.f32.mrf.mxu2  ;;  %4941 = vmatmul.msk.bf16.gmra.mxu1 %vm722_vm4, %v2633_v4  ;;  %v3556_v4 = vunpack.c.l.b16 %v3412_v40  ;;  %v3433_v53 = vshll.u32 %v6738_v58, 16  ;;  %v2557_v59 = vsel %vm5819_vm7, %v4925_v46, %v2556_v5 }
 0x214   : > { %v3072_v16 = vadd.f32 %v2996_v22, %v2782_v45  ;;  %v3430_v40 = vor.u32 %v3429_v12, %v6733_v9  ;;  %v5096_v22 = vld [vmem:[%s5633_s29 + $0xa8] sm:$0xf]  ;;  %v3975_v7 = vpack.c.b16 %v3954_v41, %v3953_v20  ;;  %v3421_v46 = vrot.slane %v3420_v27, 4 }
 0x215   : > { %v4223_v13 = vsel %vm4219_vm8, %v6730_v57, 0.0  ;;  %v4293_v19 = vmul.f32 %v6730_v57, %v6730_v57  ;;  %v3577_v23 = vpack.c.b16 %v3556_v4, %v3555_v35  ;;  %v3438_v35 = vshrl.u32 %v5096_v22, 16 }
 0x216   : > { %v4224_v56 = vadd.f32 %v4223_v13, %v4222_v42  ;;  %v2560_v42 = vsel %vm5819_vm7, %v2558_v50, %v2559_v39  ;;  %v3435_v50 = vrot.slane %v3433_v53, 5  ;;  %v5136_v39 = vld [vmem:[%s5633_s29 + $0x9c] sm:$0xe]  ;;  %v3441_v20 = vshll.u32 %v5096_v22, 16 }
 0x217   : > { %v4326_v45 = vsel %vm4219_vm8, %v4293_v19, 0.0  ;;  %v4048_v38 = vpop.f32.mrf.mxu0  ;;  %v2614_v13 = vunpack.c.l.b16 %v2560_v42  ;;  %v6757_v19 = vld [vmem:[%s5633_s29 + $0xac] sm:$0xf] }
 0x218   : > { %v4327_v52 = vadd.f32 %v4326_v45, %v4325_v11  ;;  %v3650_v8 = vpop.f32.mrf.mxu3  ;;  %5054 = vmatmul.msk.bf16.gmra.mxu2 %vm722_vm4, %v5221_v28  ;;  %v2711_v6 = vpop.f32.mrf.mxu1  ;;  %v2613_v28 = vunpack.c.l.b16 %v2557_v59  ;;  %v3431_v45 = vrot.slane %v3430_v40, 4  ;;  %v5376_v40 = vld [vmem:[%s5633_s29 + $0xa0] sm:$0xf] }
 0x219   : > { %v3726_v15 = vadd.f32 %v3650_v8, %v3072_v16  ;;  %v2784_v48 = vadd.f32 %v2711_v6, %v6163_v54  ;;  %v3898_v16 = vrot.slane %v6704_v43, 5  ;;  %v5152_v8 = vrot.slane %v5136_v39, 9 }
 0x21a   : > { %v2634_v53 = vpack.c.b16 %v2614_v13, %v2613_v28  ;;  %v3426_v43 = vsel %vm5645_vm3, %v3421_v46, %v6733_v9  ;;  %v3901_v28 = vrot.slane %v6738_v58, 5  ;;  %v3440_v13 = vrot.slane %v3438_v35, 4  ;;  %v5222_v58 = vld [vmem:[%s5633_s29 + $0x9c] sm:$0xff] }
 0x21b   : > { %v6754_v11 = vadd.f32 %v4048_v38, %v3726_v15  ;;  %v2999_v32 = vpop.f32.mrf.mxu2  ;;  %v3451_v38 = vshrl.u32 %v6757_v19, 16  ;;  %v2563_v15 = vrot.slane %v5376_v40, 5  ;;  %v3443_v39 = vrot.slane %v3441_v20, 5 }
 0x21c   : > { %v3073_v5 = vadd.f32 %v2999_v32, %v2783_v61  ;;  %v3447_v61 = vshll.u32 %v6757_v19, 16  ;;  %v3900_v32 = vrot.slane %v3898_v16, 4 }
 0x21d   : > { %v4225_v12 = vsel %vm4219_vm8, %v6754_v11, 0.0  ;;  %v4294_v54 = vmul.f32 %v6754_v11, %v6754_v11  ;;  %5119 = vmatmul.msk.bf16.gmra.mxu3 %vm722_vm4, %v3577_v23  ;;  %v3453_v46 = vrot.slane %v3451_v38, 4 }
 0x21e   : > { %v4226_v4 = vadd.f32 %v4225_v12, %v4224_v56  ;;  %v3436_v56 = vsel %vm5645_vm3, %v3431_v45, %v3435_v50  ;;  %v6779_v9 = vrot.slane %v3447_v61, 5  ;;  %v6785_v12 = vld [vmem:[%s5633_s29 + $0xb0] sm:$0x1]  ;;  %v3899_v61 = vsel %vm5819_vm7, %v5152_v8, %v3898_v16 }
 0x21f   : > { %v4328_v41 = vsel %vm4219_vm8, %v4294_v54, 0.0  ;;  %v4051_v27 = vpop.f32.mrf.mxu0  ;;  %v3902_v38 = vsel %vm5819_vm7, %v3900_v32, %v3901_v28  ;;  %v3955_v32 = vunpack.c.l.b16 %v3899_v61 }
 0x220   : > { %v4329_v6 = vadd.f32 %v4328_v41, %v4327_v52  ;;  %v3653_v59 = vpop.f32.mrf.mxu3  ;;  %v2714_v42 = vpop.f32.mrf.mxu1  ;;  %v4910_v52 = vld [vmem:[%s5633_s29 + $0x9c] sm:$0xe]  ;;  %v3956_v28 = vunpack.c.l.b16 %v3902_v38 }
 0x221   : > { %v3727_v23 = vadd.f32 %v3653_v59, %v3073_v5  ;;  %v2785_v22 = vadd.f32 %v2714_v42, %v6176_v33  ;;  %v3557_v5 = vunpack.c.l.b16 %v3426_v43  ;;  %v3558_v33 = vunpack.c.l.b16 %v3436_v56  ;;  %v5377_v42 = vld [vmem:[%s5633_s29 + $0xa4] sm:$0x1] }
 0x222   : > { %5168 = vmatmul.msk.bf16.gmra.mxu0 %vm722_vm4, %v3975_v7  ;;  %v4926_v41 = vrot.slane %v4910_v52, 9  ;;  %v2565_v59 = vrot.slane %v2563_v15, 4  ;;  %v2566_v7 = vrot.slane %v5377_v42, 5  ;;  %v3457_v43 = vshll.u32 %v6785_v12, 16 }
 0x223   : > { %v6781_v45 = vadd.f32 %v4051_v27, %v3727_v23  ;;  %v3001_v50 = vpop.f32.mrf.mxu2  ;;  %4942 = vmatmul.msk.bf16.gmra.mxu1 %vm722_vm4, %v2634_v53  ;;  %v3444_v53 = vor.u32 %v3443_v39, %v3440_v13 }
 0x224   : > { %v3074_v54 = vadd.f32 %v3001_v50, %v2784_v48  ;;  %v3454_v48 = vor.u32 %v3453_v46, %v6779_v9  ;;  %v3578_v50 = vpack.c.b16 %v3558_v33, %v3557_v5  ;;  %v2564_v16 = vsel %vm5819_vm7, %v4926_v41, %v2563_v15 }
 0x225   : > { %v4227_v35 = vsel %vm4219_vm8, %v6781_v45, 0.0  ;;  %v4295_v20 = vmul.f32 %v6781_v45, %v6781_v45  ;;  %v3445_v39 = vrot.slane %v3444_v53, 4  ;;  %v3459_v46 = vrot.slane %v3457_v43, 5  ;;  %v6822_v53 = vld [vmem:[%s5633_s29 + $0xb8] sm:$0xf] }
 0x226   : > { %v4228_v27 = vadd.f32 %v4227_v35, %v4226_v4  ;;  %v2567_v4 = vsel %vm5819_vm7, %v2565_v59, %v2566_v7  ;;  %v2615_v33 = vunpack.c.l.b16 %v2564_v16  ;;  %v3905_v15 = vrot.slane %v6757_v19, 5  ;;  %v5099_v7 = vld [vmem:[%s5633_s29 + $0xb4] sm:$0xf] }
 0x227   : > { %v4330_v56 = vsel %vm4219_vm8, %v4295_v20, 0.0  ;;  %v4053_v40 = vpop.f32.mrf.mxu0  ;;  %v5137_v20 = vld [vmem:[%s5633_s29 + $0xa8] sm:$0xe]  ;;  %v3976_v59 = vpack.c.b16 %v3956_v28, %v3955_v32  ;;  %v3450_v38 = vsel %vm5645_vm3, %v3445_v39, %v6779_v9  ;;  %v3462_v9 = vshrl.u32 %v5099_v7, 16 }
 0x228   : > { %v4331_v23 = vadd.f32 %v4330_v56, %v4329_v6  ;;  %v3655_v52 = vpop.f32.mrf.mxu3  ;;  %5055 = vmatmul.msk.bf16.gmra.mxu2 %vm722_vm4, %v5222_v58  ;;  %v2716_v42 = vpop.f32.mrf.mxu1  ;;  %v3455_v6 = vrot.slane %v3454_v48, 4  ;;  %v2616_v58 = vunpack.c.l.b16 %v2567_v4  ;;  %v3908_v4 = vrot.slane %v6785_v12, 5 }
 0x229   : > { %v3728_v8 = vadd.f32 %v3655_v52, %v3074_v54  ;;  %v2786_v13 = vadd.f32 %v2716_v42, %v6189_v31  ;;  %v5378_v52 = vld [vmem:[%s5633_s29 + $0xac] sm:$0xf]  ;;  %v3465_v32 = vshll.u32 %v5099_v7, 16 }
 0x22a   : > { %v3460_v19 = vsel %vm5645_vm3, %v3455_v6, %v3459_v46  ;;  %v2635_v56 = vpack.c.b16 %v2616_v58, %v2615_v33  ;;  %v3471_v6 = vshll.u32 %v6822_v53, 16  ;;  %v3475_v46 = vshrl.u32 %v6822_v53, 16  ;;  %v5223_v7 = vld [vmem:[%s5633_s29 + $0xa8] sm:$0xff] }
 0x22b   : > { %v6806_v35 = vadd.f32 %v4053_v40, %v3728_v8  ;;  %v3004_v5 = vpop.f32.mrf.mxu2  ;;  %v3907_v40 = vrot.slane %v3905_v15, 4  ;;  %v4911_v8 = vld [vmem:[%s5633_s29 + $0xa8] sm:$0xe] }
 0x22c   : > { %v3075_v41 = vadd.f32 %v3004_v5, %v2785_v22  ;;  %v5153_v22 = vrot.slane %v5137_v20, 9  ;;  %v3559_v5 = vunpack.c.l.b16 %v3450_v38  ;;  %v4927_v20 = vrot.slane %v4911_v8, 9 }
 0x22d   : > { %v4229_v54 = vsel %vm4219_vm8, %v6806_v35, 0.0  ;;  %v4296_v31 = vmul.f32 %v6806_v35, %v6806_v35  ;;  %5120 = vmatmul.msk.bf16.gmra.mxu3 %vm722_vm4, %v3578_v50  ;;  %v2570_v50 = vrot.slane %v5378_v52, 5  ;;  %v3464_v38 = vrot.slane %v3462_v9, 4  ;;  %v6848_v52 = vld [vmem:[%s5633_s29 + $0xbc] sm:$0x1] }
 0x22e   : > { %v4230_v61 = vadd.f32 %v4229_v54, %v4228_v27  ;;  %v3906_v33 = vsel %vm5819_vm7, %v5153_v22, %v3905_v15 }
 0x22f   : > { %v4332_v48 = vsel %vm4219_vm8, %v4296_v31, 0.0  ;;  %v4056_v43 = vpop.f32.mrf.mxu0 }
 0x230   : > { %v4333_v42 = vadd.f32 %v4332_v48, %v4331_v23  ;;  %v3658_v16 = vpop.f32.mrf.mxu3  ;;  %v2719_v27 = vpop.f32.mrf.mxu1  ;;  %v3560_v23 = vunpack.c.l.b16 %v3460_v19  ;;  %v3467_v19 = vrot.slane %v3465_v32, 5  ;;  %v6845_v48 = vrot.slane %v3471_v6, 5 }
 0x231   : > { %v3729_v28 = vadd.f32 %v3658_v16, %v3075_v41  ;;  %v2787_v39 = vadd.f32 %v2719_v27, %v6202_v1  ;;  %v2572_v41 = vrot.slane %v2570_v50, 4  ;;  %v5379_v1 = vld [vmem:[%s5633_s29 + $0xb0] sm:$0x1]  ;;  %v3957_v32 = vunpack.c.l.b16 %v3906_v33 }
 0x232   : > { %5169 = vmatmul.msk.bf16.gmra.mxu0 %vm722_vm4, %v3976_v59  ;;  %v2573_v54 = vrot.slane %v5379_v1, 5  ;;  %v3909_v59 = vsel %vm5819_vm7, %v3907_v40, %v3908_v4  ;;  %v3579_v27 = vpack.c.b16 %v3560_v23, %v3559_v5  ;;  %v2571_v40 = vsel %vm5819_vm7, %v4927_v20, %v2570_v50  ;;  %v5102_v1 = vld [vmem:[%s5633_s29 + $0xc0] sm:$0xf] }
 0x233   : > { %v6834_v12 = vadd.f32 %v4056_v43, %v3729_v28  ;;  %v3006_v58 = vpop.f32.mrf.mxu2  ;;  %4943 = vmatmul.msk.bf16.gmra.mxu1 %vm722_vm4, %v2635_v56  ;;  %v3477_v43 = vrot.slane %v3475_v46, 4  ;;  %v3468_v6 = vor.u32 %v3467_v19, %v3464_v38  ;;  %v3481_v50 = vshll.u32 %v6848_v52, 16 }
 0x234   : > { %v3076_v31 = vadd.f32 %v3006_v58, %v2786_v13  ;;  %v2574_v4 = vsel %vm5819_vm7, %v2572_v41, %v2573_v54  ;;  %v2617_v23 = vunpack.c.l.b16 %v2571_v40 }
 0x235   : > { %v4231_v15 = vsel %vm4219_vm8, %v6834_v12, 0.0  ;;  %v4297_v22 = vmul.f32 %v6834_v12, %v6834_v12  ;;  %v3478_v5 = vor.u32 %v3477_v43, %v6845_v48  ;;  %v2618_v20 = vunpack.c.l.b16 %v2574_v4  ;;  %v5138_v43 = vld [vmem:[%s5633_s29 + $0xb4] sm:$0xe] }
 0x236   : > { %v4232_v56 = vadd.f32 %v4231_v15, %v4230_v61  ;;  %v3958_v61 = vunpack.c.l.b16 %v3909_v59  ;;  %v6863_v59 = vld [vmem:[%s5633_s29 + $0xc4] sm:$0xf]  ;;  %v3483_v19 = vrot.slane %v3481_v50, 5  ;;  %v3489_v4 = vshll.u32 %v5102_v1, 16 }
 0x237   : > { %v4334_v13 = vsel %vm4219_vm8, %v4297_v22, 0.0  ;;  %v4058_v16 = vpop.f32.mrf.mxu0  ;;  %v3479_v38 = vrot.slane %v3478_v5, 4  ;;  %v2636_v22 = vpack.c.b16 %v2618_v20, %v2617_v23  ;;  %v7191_v5 = vld [vmem:[#allocation9_spill] sm:$0xff]  ;;  %v5154_v23 = vrot.slane %v5138_v43, 9 }
 0x238   : > { %v4335_v8 = vadd.f32 %v4334_v13, %v4333_v42  ;;  %v3660_v9 = vpop.f32.mrf.mxu3  ;;  %5056 = vmatmul.msk.bf16.gmra.mxu2 %vm722_vm4, %v5223_v7  ;;  %v2721_v28 = vpop.f32.mrf.mxu1  ;;  %v3977_v54 = vpack.c.b16 %v3958_v61, %v3957_v32  ;;  %v3469_v7 = vrot.slane %v3468_v6, 4  ;;  %v3912_v13 = vrot.slane %v6822_v53, 5  ;;  %v5380_v6 = vld [vmem:[%s5633_s29 + $0xb8] sm:$0xf]  ;;  %v4912_v20 = vld [vmem:[%s5633_s29 + $0xb4] sm:$0xe] }
 0x239   : > { %v3730_v46 = vadd.f32 %v3660_v9, %v3076_v31  ;;  %v2788_v58 = vadd.f32 %v2721_v28, %v6216_v25  ;;  %v3495_v9 = vshll.u32 %v6863_v59, 16  ;;  %v3499_v32 = vshrl.u32 %v6863_v59, 16 }
 0x23a   : > { %v3474_v53 = vsel %vm5645_vm3, %v3469_v7, %v6845_v48 }
 0x23b   : > { %v6859_v41 = vadd.f32 %v4058_v16, %v3730_v46  ;;  %v3009_v42 = vpop.f32.mrf.mxu2  ;;  %v2577_v46 = vrot.slane %v5380_v6, 5  ;;  %v6888_v48 = vrot.slane %v3495_v9, 5  ;;  %v3501_v7 = vrot.slane %v3499_v32, 4  ;;  %v5381_v6 = vld [vmem:[%s5633_s29 + $0xbc] sm:$0x1] }
 0x23c   : > { %v3077_v33 = vadd.f32 %v3009_v42, %v2787_v39  ;;  %v3486_v39 = vshrl.u32 %v5102_v1, 16  ;;  %v3914_v42 = vrot.slane %v3912_v13, 4  ;;  %v3915_v1 = vrot.slane %v6848_v52, 5 }
 0x23d   : > { %v4233_v31 = vsel %vm4219_vm8, %v6859_v41, 0.0  ;;  %v4298_v25 = vmul.f32 %v6859_v41, %v6859_v41  ;;  %5121 = vmatmul.msk.bf16.gmra.mxu3 %vm722_vm4, %v3579_v27  ;;  %v3913_v9 = vsel %vm5819_vm7, %v5154_v23, %v3912_v13 }
 0x23e   : > { %v4234_v15 = vadd.f32 %v4233_v31, %v4232_v56 }
 0x23f   : > { %v4336_v16 = vsel %vm4219_vm8, %v4298_v25, 0.0  ;;  %v4061_v40 = vpop.f32.mrf.mxu0 }
 0x240   : > { %v4337_v61 = vadd.f32 %v4336_v16, %v4335_v8  ;;  %v3663_v27 = vpop.f32.mrf.mxu3  ;;  %v2724_v28 = vpop.f32.mrf.mxu1  ;;  %v3484_v8 = vsel %vm5645_vm3, %v3479_v38, %v3483_v19  ;;  %v3491_v16 = vrot.slane %v3489_v4, 5  ;;  %v2580_v38 = vrot.slane %v5381_v6, 5  ;;  %v6893_v19 = vld [vmem:[%s5633_s29 + $0xc8] sm:$0x1] }
 0x241   : > { %v3731_v56 = vadd.f32 %v3663_v27, %v3077_v33  ;;  %v2789_v50 = vadd.f32 %v2724_v28, %v7191_v5  ;;  %v3488_v33 = vrot.slane %v3486_v39, 4  ;;  %v5224_v27 = vld [vmem:[%s5633_s29 + $0xb4] sm:$0xff]  ;;  %v2579_v28 = vrot.slane %v2577_v46, 4 }
 0x242   : > { %5170 = vmatmul.msk.bf16.gmra.mxu0 %vm722_vm4, %v3977_v54  ;;  %v4928_v54 = vrot.slane %v4912_v20, 9  ;;  %v3505_v20 = vshll.u32 %v6893_v19, 16 }
 0x243   : > { %v6885_v31 = vadd.f32 %v4061_v40, %v3731_v56  ;;  %v3011_v25 = vpop.f32.mrf.mxu2  ;;  %4944 = vmatmul.msk.bf16.gmra.mxu1 %vm722_vm4, %v2636_v22  ;;  %v3561_v40 = vunpack.c.l.b16 %v3474_v53  ;;  %v3562_v22 = vunpack.c.l.b16 %v3484_v8  ;;  %v3916_v56 = vsel %vm5819_vm7, %v3914_v42, %v3915_v1 }
 0x244   : > { %v3078_v43 = vadd.f32 %v3011_v25, %v2788_v58  ;;  %v3492_v5 = vor.u32 %v3491_v16, %v3488_v33  ;;  %v2581_v13 = vsel %vm5819_vm7, %v2579_v28, %v2580_v38  ;;  %v3502_v53 = vor.u32 %v3501_v7, %v6888_v48  ;;  %v5139_v28 = vld [vmem:[%s5633_s29 + $0xc0] sm:$0xe] }
 0x245   : > { %v4235_v52 = vsel %vm4219_vm8, %v6885_v31, 0.0  ;;  %v4299_v39 = vmul.f32 %v6885_v31, %v6885_v31  ;;  %v3580_v8 = vpack.c.b16 %v3562_v22, %v3561_v40  ;;  %v3959_v1 = vunpack.c.l.b16 %v3913_v9  ;;  %v5105_v40 = vld [vmem:[%s5633_s29 + $0xcc] sm:$0xf] }
 0x246   : > { %v4236_v4 = vadd.f32 %v4235_v52, %v4234_v15  ;;  %v2578_v15 = vsel %vm5819_vm7, %v4928_v54, %v2577_v46  ;;  %v3960_v33 = vunpack.c.l.b16 %v3916_v56  ;;  %v2620_v52 = vunpack.c.l.b16 %v2581_v13  ;;  %v6927_v56 = vld [vmem:[%s5633_s29 + $0xd0] sm:$0xf]  ;;  %v5382_v13 = vld [vmem:[%s5633_s29 + $0xc4] sm:$0xf] }
 0x247   : > { %v4338_v58 = vsel %vm4219_vm8, %v4299_v39, 0.0  ;;  %v4063_v32 = vpop.f32.mrf.mxu0  ;;  %v3493_v39 = vrot.slane %v3492_v5, 4  ;;  %v3503_v54 = vrot.slane %v3502_v53, 4  ;;  %v3919_v7 = vrot.slane %v6863_v59, 5 }
 0x248   : > { %v4339_v25 = vadd.f32 %v4338_v58, %v4337_v61  ;;  %v3665_v6 = vpop.f32.mrf.mxu3  ;;  %5057 = vmatmul.msk.bf16.gmra.mxu2 %vm722_vm4, %v5224_v27  ;;  %v2726_v30 = vpop.f32.mrf.mxu1  ;;  %v2619_v27 = vunpack.c.l.b16 %v2578_v15  ;;  %v3507_v58 = vrot.slane %v3505_v20, 5  ;;  %v3978_v38 = vpack.c.b16 %v3960_v33, %v3959_v1  ;;  %v4913_v33 = vld [vmem:[%s5633_s29 + $0xc0] sm:$0xe] }
 0x249   : > { %v3732_v23 = vadd.f32 %v3665_v6, %v3078_v43  ;;  %v2790_v42 = vadd.f32 %v2726_v30, %v6263_v47  ;;  %v3498_v59 = vsel %vm5645_vm3, %v3493_v39, %v6888_v48  ;;  %v3921_v15 = vrot.slane %v3919_v7, 4 }
 0x24a   : > { %v2637_v9 = vpack.c.b16 %v2620_v52, %v2619_v27  ;;  %v2584_v53 = vrot.slane %v5382_v13, 5  ;;  %v3922_v1 = vrot.slane %v6893_v19, 5  ;;  %v3510_v48 = vshrl.u32 %v5105_v40, 16 }
 0x24b   : > { %v6912_v61 = vadd.f32 %v4063_v32, %v3732_v23  ;;  %v3014_v16 = vpop.f32.mrf.mxu2  ;;  %v5155_v32 = vrot.slane %v5139_v28, 9  ;;  %v3523_v27 = vshrl.u32 %v6927_v56, 16  ;;  %v4929_v28 = vrot.slane %v4913_v33, 9 }
 0x24c   : > { %v3079_v46 = vadd.f32 %v3014_v16, %v2789_v50  ;;  %v3519_v16 = vshll.u32 %v6927_v56, 16 }
 0x24d   : > { %v4237_v43 = vsel %vm4219_vm8, %v6912_v61, 0.0  ;;  %v4300_v47 = vmul.f32 %v6912_v61, %v6912_v61  ;;  %5122 = vmatmul.msk.bf16.gmra.mxu3 %vm722_vm4, %v3580_v8 }
 0x24e   : > { %v4238_v30 = vadd.f32 %v4237_v43, %v4236_v4  ;;  %v3508_v4 = vsel %vm5645_vm3, %v3503_v54, %v3507_v58  ;;  %v5225_v58 = vld [vmem:[%s5633_s29 + $0xc0] sm:$0xff]  ;;  %v2586_v43 = vrot.slane %v2584_v53, 4 }
 0x24f   : > { %v4340_v50 = vsel %vm4219_vm8, %v4300_v47, 0.0  ;;  %v4066_v22 = vpop.f32.mrf.mxu0  ;;  %v3564_v54 = vunpack.c.l.b16 %v3508_v4  ;;  %v5383_v47 = vld [vmem:[%s5633_s29 + $0xc8] sm:$0x1]  ;;  %v5107_v4 = vld [vmem:[%s5633_s29 + $0xd4] sm:$0x1] }
 0x250   : > { %v4341_v5 = vadd.f32 %v4340_v50, %v4339_v25  ;;  %v3668_v20 = vpop.f32.mrf.mxu3  ;;  %v2729_v6 = vpop.f32.mrf.mxu1  ;;  %v3513_v25 = vshll.u32 %v5105_v40, 16 }
 0x251   : > { %v3733_v23 = vadd.f32 %v3668_v20, %v3079_v46  ;;  %v2791_v8 = vadd.f32 %v2729_v6, %v6274_v51  ;;  %v3563_v46 = vunpack.c.l.b16 %v3498_v59  ;;  %v3920_v51 = vsel %vm5819_vm7, %v5155_v32, %v3919_v7 }
 0x252   : > { %5171 = vmatmul.msk.bf16.gmra.mxu0 %vm722_vm4, %v3978_v38  ;;  %v2587_v38 = vrot.slane %v5383_v47, 5  ;;  %v3515_v20 = vrot.slane %v3513_v25, 5  ;;  %v3521_v7 = vrot.slane %v3519_v16, 5  ;;  %v2585_v47 = vsel %vm5819_vm7, %v4929_v28, %v2584_v53  ;;  %v7192_v25 = vld [vmem:[#allocation10_spill] sm:$0xff] }
 0x253   : > { %v6938_v52 = vadd.f32 %v4066_v22, %v3733_v23  ;;  %v3016_v39 = vpop.f32.mrf.mxu2  ;;  %4945 = vmatmul.msk.bf16.gmra.mxu1 %vm722_vm4, %v2637_v9  ;;  %v3923_v22 = vsel %vm5819_vm7, %v3921_v15, %v3922_v1  ;;  %v3512_v9 = vrot.slane %v3510_v48, 4  ;;  %v3581_v33 = vpack.c.b16 %v3564_v54, %v3563_v46 }
 0x254   : > { %v3080_v19 = vadd.f32 %v3016_v39, %v2790_v42  ;;  %v3525_v42 = vrot.slane %v3523_v27, 4  ;;  %v2588_v15 = vsel %vm5819_vm7, %v2586_v43, %v2587_v38  ;;  %v3961_v1 = vunpack.c.l.b16 %v3920_v51 }
 0x255   : > { %v4239_v40 = vsel %vm4219_vm8, %v6938_v52, 0.0  ;;  %v4301_v50 = vmul.f32 %v6938_v52, %v6938_v52  ;;  %v3962_v48 = vunpack.c.l.b16 %v3923_v22  ;;  %v3516_v27 = vor.u32 %v3515_v20, %v3512_v9 }
 0x256   : > { %v4240_v59 = vadd.f32 %v4239_v40, %v4238_v30  ;;  %v3526_v40 = vor.u32 %v3525_v42, %v3521_v7  ;;  %v2622_v46 = vunpack.c.l.b16 %v2588_v15 }
 0x257   : > { %v4342_v32 = vsel %vm4219_vm8, %v4301_v50, 0.0  ;;  %v4068_v6 = vpop.f32.mrf.mxu0  ;;  %v3529_v50 = vshll.u32 %v5107_v4, 16  ;;  %v3979_v51 = vpack.c.b16 %v3962_v48, %v3961_v1  ;;  %v3517_v43 = vrot.slane %v3516_v27, 4 }
 0x258   : > { %v4343_v13 = vadd.f32 %v4342_v32, %v4341_v5  ;;  %v3670_v23 = vpop.f32.mrf.mxu3  ;;  %5058 = vmatmul.msk.bf16.gmra.mxu2 %vm722_vm4, %v5225_v58  ;;  %v2731_v39 = vpop.f32.mrf.mxu1  ;;  %v2621_v58 = vunpack.c.l.b16 %v2585_v47  ;;  %v3527_v38 = vrot.slane %v3526_v40, 4  ;;  %v5140_v47 = vld [vmem:[%s5633_s29 + $0xcc] sm:$0xe] }
 0x259   : > { %v3734_v30 = vadd.f32 %v3670_v23, %v3080_v19  ;;  %v2792_v16 = vadd.f32 %v2731_v39, %v7192_v25  ;;  %v3531_v22 = vrot.slane %v3529_v50, 5  ;;  %v3929_v25 = vrot.slane %v5107_v4, 5  ;;  %v5226_v40 = vld [vmem:[%s5633_s29 + $0xcc] sm:$0xff] }
 0x25a   : > { %v2638_v42 = vpack.c.b16 %v2622_v46, %v2621_v58 }
 0x25b   : > { %v6959_v5 = vadd.f32 %v4068_v6, %v3734_v30  ;;  %v3019_v32 = vpop.f32.mrf.mxu2 }
 0x25c   : > { %v3081_v54 = vadd.f32 %v3019_v32, %v2791_v8  ;;  %v3926_v8 = vrot.slane %v6927_v56, 5  ;;  %v5156_v56 = vrot.slane %v5140_v47, 9 }
 0x25d   : > { %v4241_v53 = vsel %vm4219_vm8, %v6959_v5, 0.0  ;;  %v4302_v19 = vmul.f32 %v6959_v5, %v6959_v5  ;;  %5123 = vmatmul.msk.bf16.gmra.mxu3 %vm722_vm4, %v3581_v33  ;;  %v3532_v33 = vsel %vm5645_vm3, %v3527_v38, %v3531_v22 }
 0x25e   : > { %v4242_v28 = vadd.f32 %v4241_v53, %v4240_v59  ;;  %v3522_v59 = vsel %vm5645_vm3, %v3517_v43, %v3521_v7  ;;  %v3566_v32 = vunpack.c.l.b16 %v3532_v33 }
 0x25f   : > { %v4344_v9 = vsel %vm4219_vm8, %v4302_v19, 0.0  ;;  %v4071_v20 = vpop.f32.mrf.mxu0  ;;  %v3565_v7 = vunpack.c.l.b16 %v3522_v59 }
 0x260   : > { %v4345_v6 = vadd.f32 %v4344_v9, %v4343_v13  ;;  %v3673_v23 = vpop.f32.mrf.mxu3  ;;  %v2734_v39 = vpop.f32.mrf.mxu1  ;;  %v3928_v13 = vrot.slane %v3926_v8, 4 }
 0x261   : > { %v3735_v15 = vadd.f32 %v3673_v23, %v3081_v54  ;;  %v2793_v30 = vadd.f32 %v2734_v39, %v6310_v29  ;;  %v3927_v54 = vsel %vm5819_vm7, %v5156_v56, %v3926_v8  ;;  %v3582_v43 = vpack.c.b16 %v3566_v32, %v3565_v7 }
 0x262   : > { %5172 = vmatmul.msk.bf16.gmra.mxu0 %vm722_vm4, %v3979_v51  ;;  %v3930_v4 = vsel %vm5819_vm7, %v3928_v13, %v3929_v25  ;;  %v3963_v22 = vunpack.c.l.b16 %v3927_v54 }
 0x263   : > { %v6975_v1 = vadd.f32 %v4071_v20, %v3735_v15  ;;  %v3021_v48 = vpop.f32.mrf.mxu2  ;;  %4946 = vmatmul.msk.bf16.gmra.mxu1 %vm722_vm4, %v2638_v42 }
 0x264   : > { %v3082_v27 = vadd.f32 %v3021_v48, %v2792_v16 }
 0x265   : > { %v4243_v29 = vsel %vm4219_vm8, %v6975_v1, 0.0  ;;  %v4303_v50 = vmul.f32 %v6975_v1, %v6975_v1 }
 0x266   : > { %v4244_v36 = vadd.f32 %v4243_v29, %v4242_v28  ;;  %v3964_v28 = vunpack.c.l.b16 %v3930_v4 }
 0x267   : > { %v4346_v58 = vsel %vm4219_vm8, %v4303_v50, 0.0  ;;  %v4073_v46 = vpop.f32.mrf.mxu0 }
 0x268   : > { %v4347_v16 = vadd.f32 %v4346_v58, %v4345_v6  ;;  %v3675_v53 = vpop.f32.mrf.mxu3  ;;  %5059 = vmatmul.msk.bf16.gmra.mxu2 %vm722_vm4, %v5226_v40  ;;  %v2736_v19 = vpop.f32.mrf.mxu1  ;;  %v3980_v23 = vpack.c.b16 %v3964_v28, %v3963_v22 }
 0x269   : > { %v3736_v51 = vadd.f32 %v3675_v53, %v3082_v27  ;;  %v2794_v38 = vadd.f32 %v2736_v19, %v6334_v37 }
 0x26b   : > { %v6990_v9 = vadd.f32 %v4073_v46, %v3736_v51  ;;  %v3024_v20 = vpop.f32.mrf.mxu2 }
 0x26c   : > { %v3083_v42 = vadd.f32 %v3024_v20, %v2793_v30 }
 0x26d   : > { %v4245_v8 = vsel %vm4219_vm8, %v6990_v9, 0.0  ;;  %v4304_v18 = vmul.f32 %v6990_v9, %v6990_v9  ;;  %5124 = vmatmul.msk.bf16.gmra.mxu3 %vm722_vm4, %v3582_v43 }
 0x26e   : > { %v4246_v6 = vadd.f32 %v4245_v8, %v4244_v36 }
 0x26f   : > { %v4348_v39 = vsel %vm4219_vm8, %v4304_v18, 0.0  ;;  %v4076_v47 = vpop.f32.mrf.mxu0 }
 0x270   : > { %v4349_v37 = vadd.f32 %v4348_v39, %v4347_v16  ;;  %v3678_v15 = vpop.f32.mrf.mxu3  ;;  %v2739_v59 = vpop.f32.mrf.mxu1 }
 0x271   : > { %v3737_v33 = vadd.f32 %v3678_v15, %v3083_v42  ;;  %v2795_v46 = vadd.f32 %v2739_v59, %v6353_v34 }
 0x272   : > { %5173 = vmatmul.msk.bf16.gmra.mxu0 %vm722_vm4, %v3980_v23 }
 0x273   : > { %v6999_v30 = vadd.f32 %v4076_v47, %v3737_v33  ;;  %v3026_v48 = vpop.f32.mrf.mxu2 }
 0x274   : > { %v3084_v56 = vadd.f32 %v3026_v48, %v2794_v38 }
 0x275   : > { %v4247_v13 = vsel %vm4219_vm8, %v6999_v30, 0.0  ;;  %v4305_v25 = vmul.f32 %v6999_v30, %v6999_v30 }
 0x276   : > { %v4248_v27 = vadd.f32 %v4247_v13, %v4246_v6 }
 0x277   : > { %v4350_v40 = vsel %vm4219_vm8, %v4305_v25, 0.0  ;;  %v4078_v29 = vpop.f32.mrf.mxu0 }
 0x278   : > { %v4351_v50 = vadd.f32 %v4350_v40, %v4349_v37  ;;  %v3680_v7 = vpop.f32.mrf.mxu3  ;;  %v2741_v32 = vpop.f32.mrf.mxu1 }
 0x279   : > { %v3738_v36 = vadd.f32 %v3680_v7, %v3084_v56  ;;  %v2796_v8 = vadd.f32 %v2741_v32, %v6377_v3 }
 0x27b   : > { %v7006_v58 = vadd.f32 %v4078_v29, %v3738_v36  ;;  %v3029_v54 = vpop.f32.mrf.mxu2 }
 0x27c   : > { %v3085_v53 = vadd.f32 %v3029_v54, %v2795_v46 }
 0x27d   : > { %v4249_v4 = vsel %vm4219_vm8, %v7006_v58, 0.0  ;;  %v4306_v16 = vmul.f32 %v7006_v58, %v7006_v58 }
 0x27e   : > { %v4250_v19 = vadd.f32 %v4249_v4, %v4248_v27 }
 0x27f   : > { %v4352_v51 = vsel %vm4219_vm8, %v4306_v16, 0.0  ;;  %v4081_v43 = vpop.f32.mrf.mxu0 }
 0x280   : > { %v4353_v38 = vadd.f32 %v4352_v51, %v4351_v50  ;;  %v3683_v22 = vpop.f32.mrf.mxu3  ;;  %v2744_v28 = vpop.f32.mrf.mxu1 }
 0x281   : > { %v3739_v20 = vadd.f32 %v3683_v22, %v3085_v53  ;;  %v2797_v25 = vadd.f32 %v2744_v28, %v6396_v2 }
 0x283   : > { %v4137_v42 = vadd.f32 %v4081_v43, %v3739_v20  ;;  %v3031_v34 = vpop.f32.mrf.mxu2 }
 0x284   : > { %v3086_v23 = vadd.f32 %v3031_v34, %v2796_v8 }
 0x285   : > { %v4251_v18 = vsel %vm4219_vm8, %v4137_v42, 0.0  ;;  %v4307_v6 = vmul.f32 %v4137_v42, %v4137_v42  ;;  %v5297_v39 = vpack.i.bf16 %v4137_v42, %v6683_v24 }
 0x286   : > { %v4252_v47 = vadd.f32 %v4251_v18, %v4250_v19 }
 0x287   : > { %v4354_v37 = vsel %vm4219_vm8, %v4307_v6, 0.0  ;;  %v4083_v15 = vpop.f32.mrf.mxu0  ;;  %5298 = vxpose.xlu0.b32.start [1/16] (narrow) %v5297_v39, 8 }
 0x288   : > { %v4355_v59 = vadd.f32 %v4354_v37, %v4353_v38  ;;  %v3685_v33 = vpop.f32.mrf.mxu3  ;;  %v2746_v48 = vpop.f32.mrf.mxu1 }
 0x289   : > { %v3740_v56 = vadd.f32 %v3685_v33, %v3086_v23  ;;  %v2798_v53 = vadd.f32 %v2746_v48, %v6420_v26 }
 0x28b   : > { %v4138_v13 = vadd.f32 %v4083_v15, %v3740_v56  ;;  %v3034_v3 = vpop.f32.mrf.mxu2 }
 0x28c   : > { %v3087_v29 = vadd.f32 %v3034_v3, %v2797_v25 }
 0x28d   : > { %v4253_v27 = vsel %vm4219_vm8, %v4138_v13, 0.0  ;;  %v4308_v40 = vmul.f32 %v4138_v13, %v4138_v13  ;;  %v5299_v50 = vpack.i.bf16 %v4138_v13, %v6700_v0 }
 0x28e   : > { %v4254_v24 = vadd.f32 %v4253_v27, %v4252_v47 }
 0x28f   : > { %v4356_v7 = vsel %vm4219_vm8, %v4308_v40, 0.0  ;;  %v4086_v32 = vpop.f32.mrf.mxu0  ;;  %5300 = vxpose.xlu0.b32.cont [2/16] (narrow) %v5299_v50, 8 }
 0x290   : > { %v4357_v36 = vadd.f32 %v4356_v7, %v4355_v59  ;;  %v3688_v46 = vpop.f32.mrf.mxu3  ;;  %v2749_v54 = vpop.f32.mrf.mxu1 }
 0x291   : > { %v3741_v4 = vadd.f32 %v3688_v46, %v3087_v29  ;;  %v2799_v6 = vadd.f32 %v2749_v54, %v6439_v60 }
 0x293   : > { %v4139_v16 = vadd.f32 %v4086_v32, %v3741_v4  ;;  %v3036_v2 = vpop.f32.mrf.mxu2 }
 0x294   : > { %v3088_v43 = vadd.f32 %v3036_v2, %v2798_v53 }
 0x295   : > { %v4255_v19 = vsel %vm4219_vm8, %v4139_v16, 0.0  ;;  %v4309_v51 = vmul.f32 %v4139_v16, %v4139_v16  ;;  %v5301_v38 = vpack.i.bf16 %v4139_v16, %v6730_v57 }
 0x296   : > { %v4256_v0 = vadd.f32 %v4255_v19, %v4254_v24 }
 0x297   : > { %v4358_v22 = vsel %vm4219_vm8, %v4309_v51, 0.0  ;;  %v4088_v28 = vpop.f32.mrf.mxu0  ;;  %5302 = vxpose.xlu0.b32.cont [3/16] (narrow) %v5301_v38, 8 }
 0x298   : > { %v4359_v20 = vadd.f32 %v4358_v22, %v4357_v36  ;;  %v3690_v42 = vpop.f32.mrf.mxu3  ;;  %v2751_v8 = vpop.f32.mrf.mxu1 }
 0x299   : > { %v3742_v34 = vadd.f32 %v3690_v42, %v3088_v43  ;;  %v2800_v3 = vadd.f32 %v2751_v8, %v6463_v14 }
 0x29b   : > { %v4140_v18 = vadd.f32 %v4088_v28, %v3742_v34  ;;  %v3039_v26 = vpop.f32.mrf.mxu2 }
 0x29c   : > { %v3089_v47 = vadd.f32 %v3039_v26, %v2799_v6 }
 0x29d   : > { %v4257_v23 = vsel %vm4219_vm8, %v4140_v18, 0.0  ;;  %v4310_v39 = vmul.f32 %v4140_v18, %v4140_v18  ;;  %v5303_v37 = vpack.i.bf16 %v4140_v18, %v6754_v11 }
 0x29e   : > { %v4258_v57 = vadd.f32 %v4257_v23, %v4256_v0 }
 0x29f   : > { %v4360_v15 = vsel %vm4219_vm8, %v4310_v39, 0.0  ;;  %v4091_v59 = vpop.f32.mrf.mxu0  ;;  %5304 = vxpose.xlu0.b32.cont [4/16] (narrow) %v5303_v37, 8 }
 0x2a0   : > { %v4361_v33 = vadd.f32 %v4360_v15, %v4359_v20  ;;  %v3693_v48 = vpop.f32.mrf.mxu3  ;;  %v2754_v56 = vpop.f32.mrf.mxu1 }
 0x2a1   : > { %v3743_v13 = vadd.f32 %v3693_v48, %v3089_v47  ;;  %v2801_v16 = vadd.f32 %v2754_v56, %v6482_v21 }
 0x2a3   : > { %v4141_v25 = vadd.f32 %v4091_v59, %v3743_v13  ;;  %v3041_v60 = vpop.f32.mrf.mxu2 }
 0x2a4   : > { %v3090_v29 = vadd.f32 %v3041_v60, %v2800_v3 }
 0x2a5   : > { %v4259_v27 = vsel %vm4219_vm8, %v4141_v25, 0.0  ;;  %v4311_v40 = vmul.f32 %v4141_v25, %v4141_v25  ;;  %v5305_v50 = vpack.i.bf16 %v4141_v25, %v6781_v45 }
 0x2a6   : > { %v4260_v11 = vadd.f32 %v4259_v27, %v4258_v57 }
 0x2a7   : > { %v4362_v24 = vsel %vm4219_vm8, %v4311_v40, 0.0  ;;  %v4093_v7 = vpop.f32.mrf.mxu0  ;;  %5306 = vxpose.xlu0.b32.cont [5/16] (narrow) %v5305_v50, 8 }
 0x2a8   : > { %v4363_v32 = vadd.f32 %v4362_v24, %v4361_v33  ;;  %v3695_v36 = vpop.f32.mrf.mxu3  ;;  %v2756_v46 = vpop.f32.mrf.mxu1  ;;  %v7193_v24 = vld [vmem:[#allocation11_spill] sm:$0xff] }
 0x2a9   : > { %v3744_v54 = vadd.f32 %v3695_v36, %v3090_v29  ;;  %v2802_v8 = vadd.f32 %v2756_v46, %v6506_v49 }
 0x2ab   : > { %v4142_v4 = vadd.f32 %v4093_v7, %v3744_v54  ;;  %v3044_v14 = vpop.f32.mrf.mxu2 }
 0x2ac   : > { %v3091_v19 = vadd.f32 %v3044_v14, %v2801_v16 }
 0x2ad   : > { %v4261_v53 = vsel %vm4219_vm8, %v4142_v4, 0.0  ;;  %v4312_v2 = vmul.f32 %v4142_v4, %v4142_v4  ;;  %v5307_v51 = vpack.i.bf16 %v4142_v4, %v6806_v35 }
 0x2ae   : > { %v4262_v45 = vadd.f32 %v4261_v53, %v4260_v11 }
 0x2af   : > { %v4364_v43 = vsel %vm4219_vm8, %v4312_v2, 0.0  ;;  %v4096_v38 = vpop.f32.mrf.mxu0  ;;  %5308 = vxpose.xlu0.b32.cont [6/16] (narrow) %v5307_v51, 8 }
 0x2b0   : > { %v4365_v0 = vadd.f32 %v4364_v43, %v4363_v32  ;;  %v3698_v22 = vpop.f32.mrf.mxu3  ;;  %v2759_v28 = vpop.f32.mrf.mxu1 }
 0x2b1   : > { %v3745_v20 = vadd.f32 %v3698_v22, %v3091_v19  ;;  %v2803_v33 = vadd.f32 %v2759_v28, %v6525_v17 }
 0x2b3   : > { %v4143_v42 = vadd.f32 %v4096_v38, %v3745_v20  ;;  %v3046_v21 = vpop.f32.mrf.mxu2 }
 0x2b4   : > { %v3092_v6 = vadd.f32 %v3046_v21, %v2802_v8 }
 0x2b5   : > { %v4263_v34 = vsel %vm4219_vm8, %v4143_v42, 0.0  ;;  %v4313_v18 = vmul.f32 %v4143_v42, %v4143_v42  ;;  %v5309_v26 = vpack.i.bf16 %v4143_v42, %v6834_v12 }
 0x2b6   : > { %v4264_v35 = vadd.f32 %v4263_v34, %v4262_v45 }
 0x2b7   : > { %v4366_v23 = vsel %vm4219_vm8, %v4313_v18, 0.0  ;;  %v4098_v39 = vpop.f32.mrf.mxu0  ;;  %5310 = vxpose.xlu0.b32.cont [7/16] (narrow) %v5309_v26, 8 }
 0x2b8   : > { %v4367_v47 = vadd.f32 %v4366_v23, %v4365_v0  ;;  %v3700_v37 = vpop.f32.mrf.mxu3  ;;  %v2761_v57 = vpop.f32.mrf.mxu1 }
 0x2b9   : > { %v3746_v15 = vadd.f32 %v3700_v37, %v3092_v6  ;;  %v2804_v7 = vadd.f32 %v2761_v57, %v7193_v24 }
 0x2bb   : > { %v4144_v59 = vadd.f32 %v4098_v39, %v3746_v15  ;;  %v3049_v49 = vpop.f32.mrf.mxu2 }
 0x2bc   : > { %v3093_v13 = vadd.f32 %v3049_v49, %v2803_v33 }
 0x2bd   : > { %v4265_v48 = vsel %vm4219_vm8, %v4144_v59, 0.0  ;;  %v4314_v56 = vmul.f32 %v4144_v59, %v4144_v59  ;;  %v5311_v25 = vpack.i.bf16 %v4144_v59, %v6859_v41 }
 0x2be   : > { %v4266_v12 = vadd.f32 %v4265_v48, %v4264_v35 }
 0x2bf   : > { %v4368_v3 = vsel %vm4219_vm8, %v4314_v56, 0.0  ;;  %v4101_v60 = vpop.f32.mrf.mxu0  ;;  %5312 = vxpose.xlu0.b32.cont [8/16] (narrow) %v5311_v25, 8 }
 0x2c0   : > { %v4369_v27 = vadd.f32 %v4368_v3, %v4367_v47  ;;  %v3703_v40 = vpop.f32.mrf.mxu3  ;;  %v2764_v29 = vpop.f32.mrf.mxu1 }
 0x2c1   : > { %v3747_v50 = vadd.f32 %v3703_v40, %v3093_v13  ;;  %v2805_v45 = vadd.f32 %v2764_v29, %v6566_v44 }
 0x2c3   : > { %v4145_v11 = vadd.f32 %v4101_v60, %v3747_v50  ;;  %v3051_v17 = vpop.f32.mrf.mxu2 }
 0x2c4   : > { %v3094_v46 = vadd.f32 %v3051_v17, %v2804_v7 }
 0x2c5   : > { %v4267_v32 = vsel %vm4219_vm8, %v4145_v11, 0.0  ;;  %v4315_v36 = vmul.f32 %v4145_v11, %v4145_v11  ;;  %v5313_v54 = vpack.i.bf16 %v4145_v11, %v6885_v31 }
 0x2c6   : > { %v4268_v41 = vadd.f32 %v4267_v32, %v4266_v12 }
 0x2c7   : > { %v4370_v4 = vsel %vm4219_vm8, %v4315_v36, 0.0  ;;  %v4103_v16 = vpop.f32.mrf.mxu0  ;;  %5314 = vxpose.xlu0.b32.cont [9/16] (narrow) %v5313_v54, 8 }
 0x2c8   : > { %v4371_v14 = vadd.f32 %v4370_v4, %v4369_v27  ;;  %v3705_v53 = vpop.f32.mrf.mxu3  ;;  %v2766_v2 = vpop.f32.mrf.mxu1 }
 0x2c9   : > { %v3748_v19 = vadd.f32 %v3705_v53, %v3094_v46  ;;  %v2806_v26 = vadd.f32 %v2766_v2, %v6586_v55 }
 0x2cb   : > { %v4146_v51 = vadd.f32 %v4103_v16, %v3748_v19  ;;  %v3054_v43 = vpop.f32.mrf.mxu2 }
 0x2cc   : > { %v3095_v22 = vadd.f32 %v3054_v43, %v2805_v45 }
 0x2cd   : > { %v4269_v38 = vsel %vm4219_vm8, %v4146_v51, 0.0  ;;  %v4316_v0 = vmul.f32 %v4146_v51, %v4146_v51  ;;  %v5315_v28 = vpack.i.bf16 %v4146_v51, %v6912_v61 }
 0x2ce   : > { %v4270_v31 = vadd.f32 %v4269_v38, %v4268_v41 }
 0x2cf   : > { %v4372_v20 = vsel %vm4219_vm8, %v4316_v0, 0.0  ;;  %v4106_v42 = vpop.f32.mrf.mxu0  ;;  %5316 = vxpose.xlu0.b32.cont [10/16] (narrow) %v5315_v28, 8 }
 0x2d0   : > { %v4373_v8 = vadd.f32 %v4372_v20, %v4371_v14  ;;  %v3708_v21 = vpop.f32.mrf.mxu3  ;;  %v2769_v18 = vpop.f32.mrf.mxu1 }
 0x2d1   : > { %v3749_v34 = vadd.f32 %v3708_v21, %v3095_v22  ;;  %v2807_v48 = vadd.f32 %v2769_v18, %v6605_v63 }
 0x2d3   : > { %v4147_v6 = vadd.f32 %v4106_v42, %v3749_v34  ;;  %v3056_v44 = vpop.f32.mrf.mxu2 }
 0x2d4   : > { %v3096_v39 = vadd.f32 %v3056_v44, %v2806_v26 }
 0x2d5   : > { %v4271_v35 = vsel %vm4219_vm8, %v4147_v6, 0.0  ;;  %v4317_v23 = vmul.f32 %v4147_v6, %v4147_v6  ;;  %v5317_v47 = vpack.i.bf16 %v4147_v6, %v6938_v52 }
 0x2d6   : > { %v4272_v61 = vadd.f32 %v4271_v35, %v4270_v31 }
 0x2d7   : > { %v4374_v37 = vsel %vm4219_vm8, %v4317_v23, 0.0  ;;  %v4108_v57 = vpop.f32.mrf.mxu0  ;;  %5318 = vxpose.xlu0.b32.cont [11/16] (narrow) %v5317_v47, 8 }
 0x2d8   : > { %v4375_v15 = vadd.f32 %v4374_v37, %v4373_v8  ;;  %v3710_v59 = vpop.f32.mrf.mxu3  ;;  %v2771_v55 = vpop.f32.mrf.mxu1  ;;  %v7194_v8 = vld [vmem:[#allocation12_spill] sm:$0xff] }
 0x2d9   : > { %v3750_v33 = vadd.f32 %v3710_v59, %v3096_v39  ;;  %v2808_v24 = vadd.f32 %v2771_v55, %v6624_v10 }
 0x2db   : > { %v4148_v49 = vadd.f32 %v4108_v57, %v3750_v33  ;;  %v3059_v56 = vpop.f32.mrf.mxu2 }
 0x2dc   : > { %v3097_v12 = vadd.f32 %v3059_v56, %v2807_v48 }
 0x2dd   : > { %v4273_v13 = vsel %vm4219_vm8, %v4148_v49, 0.0  ;;  %v4318_v25 = vmul.f32 %v4148_v49, %v4148_v49  ;;  %v5319_v3 = vpack.i.bf16 %v4148_v49, %v6959_v5 }
 0x2de   : > { %v4274_v52 = vadd.f32 %v4273_v13, %v4272_v61 }
 0x2df   : > { %v4376_v60 = vsel %vm4219_vm8, %v4318_v25, 0.0  ;;  %v4111_v27 = vpop.f32.mrf.mxu0  ;;  %5320 = vxpose.xlu0.b32.cont [12/16] (narrow) %v5319_v3, 8 }
 0x2e0   : > { %v4377_v40 = vadd.f32 %v4376_v60, %v4375_v15  ;;  %v3713_v29 = vpop.f32.mrf.mxu3  ;;  %v2774_v46 = vpop.f32.mrf.mxu1 }
 0x2e1   : > { %v3751_v50 = vadd.f32 %v3713_v29, %v3097_v12  ;;  %v2809_v2 = vadd.f32 %v2774_v46, %v6647_v62 }
 0x2e3   : > { %v4149_v11 = vadd.f32 %v4111_v27, %v3751_v50  ;;  %v3061_v63 = vpop.f32.mrf.mxu2 }
 0x2e4   : > { %v3098_v32 = vadd.f32 %v3061_v63, %v2808_v24 }
 0x2e5   : > { %v4275_v7 = vsel %vm4219_vm8, %v4149_v11, 0.0  ;;  %v4319_v17 = vmul.f32 %v4149_v11, %v4149_v11  ;;  %v5321_v36 = vpack.i.bf16 %v4149_v11, %v6975_v1 }
 0x2e6   : > { %v4276_v5 = vadd.f32 %v4275_v7, %v4274_v52 }
 0x2e7   : > { %v4378_v54 = vsel %vm4219_vm8, %v4319_v17, 0.0  ;;  %v4113_v41 = vpop.f32.mrf.mxu0  ;;  %5322 = vxpose.xlu0.b32.cont [13/16] (narrow) %v5321_v36, 8 }
 0x2e8   : > { %v4379_v4 = vadd.f32 %v4378_v54, %v4377_v40  ;;  %v3715_v16 = vpop.f32.mrf.mxu3  ;;  %v2776_v0 = vpop.f32.mrf.mxu1 }
 0x2e9   : > { %v3752_v14 = vadd.f32 %v3715_v16, %v3098_v32  ;;  %v2810_v21 = vadd.f32 %v2776_v0, %v7194_v8 }
 0x2eb   : > { %v4150_v53 = vadd.f32 %v4113_v41, %v3752_v14  ;;  %v3064_v10 = vpop.f32.mrf.mxu2 }
 0x2ec   : > { %v3099_v45 = vadd.f32 %v3064_v10, %v2809_v2 }
 0x2ed   : > { %v4277_v19 = vsel %vm4219_vm8, %v4150_v53, 0.0  ;;  %v4320_v51 = vmul.f32 %v4150_v53, %v4150_v53  ;;  %v5323_v43 = vpack.i.bf16 %v4150_v53, %v6990_v9 }
 0x2ee   : > { %v4278_v1 = vadd.f32 %v4277_v19, %v4276_v5 }
 0x2ef   : > { %v4380_v38 = vsel %vm4219_vm8, %v4320_v51, 0.0  ;;  %5324 = vxpose.xlu0.b32.cont [14/16] (narrow) %v5323_v43, 8  ;;  %v4116_v28 = vpop.f32.mrf.mxu0 }
 0x2f0   : > { %v4381_v22 = vadd.f32 %v4380_v38, %v4379_v4  ;;  %v3718_v31 = vpop.f32.mrf.mxu3 }
 0x2f1   : > { %v3753_v20 = vadd.f32 %v3718_v31, %v3099_v45 }
 0x2f3   : > { %v4151_v42 = vadd.f32 %v4116_v28, %v3753_v20  ;;  %v3066_v62 = vpop.f32.mrf.mxu2 }
 0x2f4   : > { %v3100_v6 = vadd.f32 %v3066_v62, %v2810_v21 }
 0x2f5   : > { %v4279_v34 = vsel %vm4219_vm8, %v4151_v42, 0.0  ;;  %v4321_v18 = vmul.f32 %v4151_v42, %v4151_v42  ;;  %v5325_v26 = vpack.i.bf16 %v4151_v42, %v6999_v30 }
 0x2f6   : > { %v4280_v9 = vadd.f32 %v4279_v34, %v4278_v1 }
 0x2f7   : > { %v4382_v44 = vsel %vm4219_vm8, %v4321_v18, 0.0  ;;  %5326 = vxpose.xlu0.b32.cont [15/16] (narrow) %v5325_v26, 8  ;;  %v4118_v47 = vpop.f32.mrf.mxu0 }
 0x2f8   : > { %v4383_v35 = vadd.f32 %v4382_v44, %v4381_v22  ;;  %v3720_v23 = vpop.f32.mrf.mxu3 }
 0x2f9   : > { %v3754_v39 = vadd.f32 %v3720_v23, %v3100_v6 }
 0x2fb   : > { %v4152_v61 = vadd.f32 %v4118_v47, %v3754_v39 }
 0x2fd   : > { %v4281_v37 = vsel %vm4219_vm8, %v4152_v61, 0.0  ;;  %v4322_v57 = vmul.f32 %v4152_v61, %v4152_v61  ;;  %v5327_v15 = vpack.i.bf16 %v4152_v61, %v7006_v58 }
 0x2fe   : > { %v4282_v59 = vadd.f32 %v4281_v37, %v4280_v9 }
 0x2ff   : > { %v4384_v30 = vsel %vm4219_vm8, %v4322_v57, 0.0  ;;  %5328 = vxpose.xlu0.b32.end [16/16] (narrow) %v5327_v15, 8 }
 0x300   : > { %v4283_v33 = vrot.slane %v4282_v59, 4  ;;  %v4385_v49 = vadd.f32 %v4384_v30, %v4383_v35 }
 0x302   : > { %v4284_v48 = vadd.f32 %v4283_v33, %v4282_v59  ;;  %v4386_v56 = vrot.slane %v4385_v49, 4 }
 0x304   : > { %v4387_v55 = vadd.f32 %v4386_v56, %v4385_v49  ;;  %v4285_v13 = vrot.slane %v4284_v48, 2 }
 0x306   : > { %v4388_v58 = vrot.slane %v4387_v55, 2  ;;  %v4286_v25 = vadd.f32 %v4285_v13, %v4284_v48 }
 0x308   : > { %v4287_v12 = vrot.slane %v4286_v25, 1  ;;  %v4389_v3 = vadd.f32 %v4388_v58, %v4387_v55 }
 0x30a   : > { %v4288_v52 = vadd.f32 %v4287_v12, %v4286_v25  ;;  %v4390_v60 = vrot.slane %v4389_v3, 1 }
 0x30c   : > { %4290 = vst.msk [vmem:[%s218_s6] sm:$0x1] %vm4289_vm9, %v4288_v52  ;;  %v4391_v27 = vadd.f32 %v4390_v60, %v4389_v3 }
 0x30d   : > { %5411 = shalt.err (!%p5408_p5)
}
 0x30e   : > { %5233 = dma.vmem_to_hbm [thread:$0]  (%p5591_p4), %s4432_s7, 16, %s4434_s8, %s4399_s11   ;;  %4392 = vst.msk [vmem:[%s224_s9] sm:$0x1] %vm4289_vm9, %v4391_v27 }
 0x30f   : > { %s5426_s26 = sshra.s32 %s4448_s10, 4  ;;  %s5432_s14 = scalar_lea.hbm %s7179_s4, 2  ;;  %s5427_s26 = int_to_ptr.hbm [resolvable:$true] %s5426_s26 }
 0x310   : > { %s5428_s6 = scalar_lea.hbm %s5427_s26, 1  ;;  %p5433_p10 = scmp.lt.s32.totalorder %s5427_s26, %s7179_s4 }
 0x311   : > { %p5429_p6 = scmp.ne.s32.totalorder %s5427_s26, %s5428_s6  ;;  %p5434_p11 = scmp.lt.s32.totalorder %s5432_s14, %s5428_s6 }
 0x313   : > { %p5430_p7 = pnand %p5429_p6, %p5591_p4  ;;  %p5435_p12 = por %p5434_p11, %p5433_p10 }
 0x315   : > { %p5431_p9 = pneg %p5430_p7 }
 0x317   : > { %p5436_p13 = pnand %p5435_p12, %p5431_p9 }
 0x319   : > { %5439 = shalt.err (!%p5436_p13)
}
 0x31a   : > { %5234 = dma.vmem_to_hbm [thread:$0]  (%p5591_p4), %s4446_s21, 16, %s4448_s10, %s4399_s11  }
 0x31b   : > { %s4588_s7 = sshll.u32 %s7078_s12, 3  ;;  %s5227_s8 = sshll.u32 %s5514_s18, 3 }
 0x31c   : > { %s4415_s5 = scalar_lea.hbm %s7177_s2, %s5227_s8  ;;  %s212_s26 = scalar_lea.vmem [#allocation2], %s4588_s7 }
 0x31d   : > { %s4417_s6 = sshll.u32 %s212_s26, 4  ;;  %s4419_s22 = sshll.u32 %s4415_s5, 4  ;;  %s4418_s6 = int_to_ptr.vmem [resolvable:$true] %s4417_s6  ;;  %s4420_s22 = int_to_ptr.hbm [resolvable:$true] %s4419_s22 }
 0x31e   : > { %s4394_s13 = scalar_lea.sflag [#allocation3], %s7078_s12  ;;  %s5454_s14 = sshra.s32 %s4420_s22, 4  ;;  %s5455_s14 = int_to_ptr.hbm [resolvable:$true] %s5454_s14 }
 0x31f   : > { %s5456_s21 = scalar_lea.hbm %s5455_s14, 8  ;;  %s5460_s11 = scalar_lea.hbm %s7177_s2, 16 }
 0x320   : > { %p5457_p0 = scmp.ne.s32.totalorder %s5455_s14, %s5456_s21  ;;  %p5461_p3 = scmp.lt.s32.totalorder %s5455_s14, %s7177_s2 }
 0x321   : > { %p5462_p5 = scmp.lt.s32.totalorder %s5460_s11, %s5456_s21 }
 0x322   : > { %p5458_p1 = pnand %p5457_p0, %p5591_p4 }
 0x323   : > { %p5463_p6 = por %p5462_p5, %p5461_p3 }
 0x324   : > { %p5459_p2 = pneg %p5458_p1 }
 0x326   : > { %p5464_p7 = pnand %p5463_p6, %p5459_p2 }
 0x32b   : > { %v5329_v40 = vpop.trf.xlu0 }
 0x32c   : > { %v5333_v29 = vunpack.i.h.bf16 %v5329_v40  ;;  %v5330_v50 = vunpack.i.l.bf16 %v5329_v40 }
 0x32e   : > { %v4217_v11 = vpack.c.bf16 %v5333_v29, %v5330_v50 }
 0x330   : > { %4218 = vst [vmem:[%s212_s26] sm:$0xff] %v4217_v11 }
 0x331   : > { %5467 = shalt.err (!%p5464_p7)
}
 0x332   : > { %5232 = dma.vmem_to_hbm [thread:$0]  (%p5591_p4), %s4418_s6, 128, %s4420_s22, %s4394_s13  }
 0x333 PF: > { %p5248_p9 = scmp.ge.s32.totalorder %s5522_s20, 2  ;;  %s4459_s12 = sand.u32 1, %s5502_s15  }
 0x334   : > { %s4460_s7 = scalar_lea.sflag [#allocation3], %s4459_s12 }
 0x335   : > { %p5239_p10 = pnand %p5248_p9, %p5600_p8 }
 0x337   : > { %p5240_p11 = pneg %p5239_p10 }
 0x339   : > { %5493 = dma.done.wait (%p5240_p11), %s4460_s7, 128  }
 0x33a   : > { %5495 = vsyncadd (%p5240_p11), %s4460_s7, 4294967168  ;;  %s7195_s8 = sadd.s32 4294967294, %s5522_s20  }
 0x33b   : > { %s4469_s9 = sand.u32 1, %s7195_s8  }
 0x33c   : > { %s4470_s30 = scalar_lea.sflag [#allocation5], %s4469_s9 }
 0x33d   : > { %5497 = dma.done.wait (%p5240_p11), %s4470_s30, 32  }
 0x33e   : > { %5499 = vsyncadd (%p5240_p11), %s4470_s30, 4294967264  ;;  %s21_s20 = sadd.s32 1, %s5522_s20   ;;  %s7196_s15 = smov %s5506_s16 }
 0x33f   : > { %p18_p4 = scmp.ge.s32.totalorder %s21_s20, 4   ;;  %s7197_s16 = smov %s5510_s17 }
 0x340   : > { %s7198_s17 = smov %s5606_s28  ;;  %s7199_s18 = smov %s5518_s19 }
 0x341   : > { %s7200_s19 = smov %s7202_s23  ;;  %20 = sbr.rel (!%p18_p4) target bundleno = 6 (0x6), region = 106 }
 0x346   :  { %4484 = vsyncpa [#allocation3], 1 }
 0x347   :  { %4486 = vsyncpa [#allocation3 + $0x1], 1 }
 0x348   :  { %4487 = vsyncpa [#allocation5], 1 }
 0x349   :  { %4489 = vsyncpa [#allocation5 + $0x1], 1 }

</bundles_post_ra>
